<compile_context>
chip_gen: v7x
topology: tpu7x:2x2x1
jax: 0.10.0
libtpu: 0.0.40
codegen_flags: <defaults>
</compile_context>

<pallas_src>
import functools

import jax
import jax.numpy as jnp
from jax import lax
from jax.experimental import pallas as pl
from jax.experimental.pallas import tpu as pltpu

BN_EPS = 1e-5


@functools.lru_cache(maxsize=1)
def _vmem_limit_bytes():
    cap = 128 * 1024 * 1024
    try:
        cap = int(getattr(pltpu.get_tpu_info(), "vmem_capacity_bytes", cap))
    except Exception:
        pass
    # ~3/4 of physical VMEM: 96 MiB on v5e/v6e (128 MiB), 48 MiB on v7x (64 MiB).
    return int(min(cap * 3 // 4, 96 * 1024 * 1024))


# ---------------------------------------------------------------------------
# Shared conv + BN-partial-stats body.
#   z: (H, W, C) f32 conv input for this image (already residual-added).
#   Writes: y_ref (1,H,W,C) bf16 conv output, sum/ssq (1,1,C) centered partials.
#   zp_ref: (H+2, W+2, C) f32 VMEM scratch for the zero halo (re-zeroed every
#   grid step so it is safe under megacore "parallel" sharding).
# ---------------------------------------------------------------------------
def _conv_and_stats(z, wd_ref, bdw_ref, wpw_ref, bpw_ref, c_ref,
                    y_ref, sum_ref, ssq_ref, zp_ref):
    Hp, Wp, C = zp_ref.shape
    H, W = Hp - 2, Wp - 2

    # Zero halo + interior store (fused replacement for the old XLA jnp.pad).
    zp_ref[...] = jnp.zeros((Hp, Wp, C), jnp.float32)
    zp_ref[1:H + 1, 1:W + 1, :] = z

    # Depthwise 3x3: 9 shifted VPU multiply-adds in f32 (per-channel weights
    # broadcast along lanes; v5e has no bf16 VPU).
    acc = jnp.zeros((H, W, C), jnp.float32)
    for kh in range(3):
        for kw in range(3):
            acc = acc + zp_ref[kh:kh + H, kw:kw + W, :] * wd_ref[kh, kw, :, :]
    acc = acc + bdw_ref[...]                              # depthwise bias (1,C)

    # Pointwise 1x1 conv as an MXU matmul (bf16 operands, f32 accumulate).
    # W (and hence H*W) being a multiple of 8 keeps the reshape a free re-view.
    lhs = acc.reshape(H * W, C).astype(jnp.bfloat16)
    y = jnp.dot(lhs, wpw_ref[...], preferred_element_type=jnp.float32)
    y = y + bpw_ref[...]                                  # pointwise bias (1,C)

    # bf16 stash of the conv output (BN re-normalizes it next step/kernel).
    y_ref[...] = y.reshape(1, H, W, C).astype(jnp.bfloat16)

    # Centered BN sufficient statistics from the f32 values (the per-channel
    # centering constant c ~= bias path of the conv avoids E[y^2]-E[y]^2
    # cancellation when the mean dominates the variance).
    yc = y - c_ref[...]
    sum_ref[...] = jnp.sum(yc, axis=0, keepdims=True).reshape(1, 1, C)
    ssq_ref[...] = jnp.sum(yc * yc, axis=0, keepdims=True).reshape(1, 1, C)


# ---------------------------------------------------------------------------
# Kernel A0 (first application): conv(x) + stats.
# ---------------------------------------------------------------------------
def _conv_first_kernel(x_ref, wd_ref, bdw_ref, wpw_ref, bpw_ref, c_ref,
                       y_ref, sum_ref, ssq_ref, zp_ref):
    _, H, W, C = x_ref.shape
    z = x_ref[...].reshape(H, W, C)
    _conv_and_stats(z, wd_ref, bdw_ref, wpw_ref, bpw_ref, c_ref,
                    y_ref, sum_ref, ssq_ref, zp_ref)


# ---------------------------------------------------------------------------
# Kernel A (recurrent application): BN-apply + ReLU of the previous conv output
# + residual add of x fused as a prologue, then conv + stats.
# ---------------------------------------------------------------------------
def _conv_mid_kernel(yprev_ref, scale_ref, shift_ref, x_ref,
                     wd_ref, bdw_ref, wpw_ref, bpw_ref, c_ref,
                     y_ref, sum_ref, ssq_ref, zp_ref):
    _, H, W, C = x_ref.shape
    yp = yprev_ref[...].astype(jnp.float32).reshape(H, W, C)
    x1 = jnp.maximum(yp * scale_ref[...] + shift_ref[...], 0.0)   # relu(bn(y_prev))
    z = x_ref[...].reshape(H, W, C) + x1                          # residual add
    _conv_and_stats(z, wd_ref, bdw_ref, wpw_ref, bpw_ref, c_ref,
                    y_ref, sum_ref, ssq_ref, zp_ref)


# ---------------------------------------------------------------------------
# Kernel B (final step only): apply global BN affine + ReLU.
# ---------------------------------------------------------------------------
def _bn_relu_kernel(y_ref, scale_ref, shift_ref, o_ref):
    y = y_ref[...].astype(jnp.float32)
    o_ref[...] = jnp.maximum(y * scale_ref[...] + shift_ref[...], 0.0)


# ---------------------------------------------------------------------------
# pallas_call builders.
# ---------------------------------------------------------------------------
def _conv_first_call(x, wd, bdw, wpw, bpw, cstat):
    N, H, W, C = x.shape
    elems = N * H * W * C
    flops = elems * (18 + 2 * C + 8)
    bytes_accessed = (4 * x.size + 2 * elems + 8 * N * C
                      + 4 * (wd.size + bdw.size + bpw.size + cstat.size)
                      + 2 * wpw.size)
    return pl.pallas_call(
        _conv_first_kernel,
        grid=(N,),
        in_specs=[
            pl.BlockSpec((1, H, W, C), lambda b: (b, 0, 0, 0)),
            pl.BlockSpec((3, 3, 1, C), lambda b: (0, 0, 0, 0)),
            pl.BlockSpec((1, C), lambda b: (0, 0)),
            pl.BlockSpec((C, C), lambda b: (0, 0)),
            pl.BlockSpec((1, C), lambda b: (0, 0)),
            pl.BlockSpec((1, C), lambda b: (0, 0)),
        ],
        out_specs=(
            pl.BlockSpec((1, H, W, C), lambda b: (b, 0, 0, 0)),
            pl.BlockSpec((1, 1, C), lambda b: (b, 0, 0)),
            pl.BlockSpec((1, 1, C), lambda b: (b, 0, 0)),
        ),
        out_shape=(
            jax.ShapeDtypeStruct((N, H, W, C), jnp.bfloat16),
            jax.ShapeDtypeStruct((N, 1, C), jnp.float32),
            jax.ShapeDtypeStruct((N, 1, C), jnp.float32),
        ),
        scratch_shapes=[pltpu.VMEM((H + 2, W + 2, C), jnp.float32)],
        compiler_params=pltpu.CompilerParams(
            dimension_semantics=("parallel",),
            vmem_limit_bytes=_vmem_limit_bytes()),
        cost_estimate=pl.CostEstimate(flops=flops, transcendentals=0,
                                      bytes_accessed=bytes_accessed),
    )(x, wd, bdw, wpw, bpw, cstat)


def _conv_mid_call(yprev, scale, shift, x, wd, bdw, wpw, bpw, cstat):
    N, H, W, C = x.shape
    elems = N * H * W * C
    flops = elems * (18 + 2 * C + 12)
    bytes_accessed = (4 * x.size + 2 * yprev.size + 2 * elems + 8 * N * C
                      + 4 * (wd.size + bdw.size + bpw.size + cstat.size
                             + scale.size + shift.size)
                      + 2 * wpw.size)
    return pl.pallas_call(
        _conv_mid_kernel,
        grid=(N,),
        in_specs=[
            pl.BlockSpec((1, H, W, C), lambda b: (b, 0, 0, 0)),
            pl.BlockSpec((1, C), lambda b: (0, 0)),
            pl.BlockSpec((1, C), lambda b: (0, 0)),
            pl.BlockSpec((1, H, W, C), lambda b: (b, 0, 0, 0)),
            pl.BlockSpec((3, 3, 1, C), lambda b: (0, 0, 0, 0)),
            pl.BlockSpec((1, C), lambda b: (0, 0)),
            pl.BlockSpec((C, C), lambda b: (0, 0)),
            pl.BlockSpec((1, C), lambda b: (0, 0)),
            pl.BlockSpec((1, C), lambda b: (0, 0)),
        ],
        out_specs=(
            pl.BlockSpec((1, H, W, C), lambda b: (b, 0, 0, 0)),
            pl.BlockSpec((1, 1, C), lambda b: (b, 0, 0)),
            pl.BlockSpec((1, 1, C), lambda b: (b, 0, 0)),
        ),
        out_shape=(
            jax.ShapeDtypeStruct((N, H, W, C), jnp.bfloat16),
            jax.ShapeDtypeStruct((N, 1, C), jnp.float32),
            jax.ShapeDtypeStruct((N, 1, C), jnp.float32),
        ),
        scratch_shapes=[pltpu.VMEM((H + 2, W + 2, C), jnp.float32)],
        compiler_params=pltpu.CompilerParams(
            dimension_semantics=("parallel",),
            vmem_limit_bytes=_vmem_limit_bytes()),
        cost_estimate=pl.CostEstimate(flops=flops, transcendentals=0,
                                      bytes_accessed=bytes_accessed),
    )(yprev, scale, shift, x, wd, bdw, wpw, bpw, cstat)


def _bn_relu_call(y, scale, shift):
    N, H, W, C = y.shape
    elems = N * H * W * C
    return pl.pallas_call(
        _bn_relu_kernel,
        grid=(N,),
        in_specs=[
            pl.BlockSpec((1, H, W, C), lambda b: (b, 0, 0, 0)),
            pl.BlockSpec((1, C), lambda b: (0, 0)),
            pl.BlockSpec((1, C), lambda b: (0, 0)),
        ],
        out_specs=pl.BlockSpec((1, H, W, C), lambda b: (b, 0, 0, 0)),
        out_shape=jax.ShapeDtypeStruct((N, H, W, C), jnp.float32),
        compiler_params=pltpu.CompilerParams(
            dimension_semantics=("parallel",),
            vmem_limit_bytes=_vmem_limit_bytes()),
        cost_estimate=pl.CostEstimate(flops=3 * elems, transcendentals=0,
                                      bytes_accessed=2 * y.size + 4 * elems + 8 * C),
    )(y, scale, shift)


# ---------------------------------------------------------------------------
# Full Recurrent_block forward.
# ---------------------------------------------------------------------------
@functools.partial(jax.jit, static_argnames=("t",))
def recurrent_block_forward(x_nchw, w_dw, b_dw, w_pw, b_pw, gamma, beta, t=2):
    # TODO(synk): BatchNorm2d running_mean/running_var buffer updates (a
    # training-time module-state side effect) are not materialized; the returned
    # tensor does not depend on them in training mode.
    N, C, H, W = x_nchw.shape
    M = N * H * W

    # Parameters at their real channel count (no HBM channel padding).
    wd = jnp.transpose(w_dw[:, 0, :, :], (1, 2, 0)).astype(jnp.float32)      # (3,3,C)
    wd = wd.reshape(3, 3, 1, C)
    bdw = b_dw.astype(jnp.float32).reshape(1, C)
    wpw_f32 = jnp.transpose(w_pw[:, :, 0, 0]).astype(jnp.float32)            # (Cin,Cout)
    wpw = wpw_f32.astype(jnp.bfloat16)
    bpw = b_pw.astype(jnp.float32).reshape(1, C)
    gma = gamma.astype(jnp.float32)
    bta = beta.astype(jnp.float32)
    # Per-channel centering constant for the variance accumulation (bias path).
    cstat = bpw + jnp.matmul(bdw, wpw_f32)                                   # (1,C)

    # NCHW -> NHWC once (one-time layout glue; C is the innermost/full dim).
    x_nhwc = jnp.transpose(x_nchw, (0, 2, 3, 1)).astype(jnp.float32)

    def bn_params(psum, pssq):
        s = jnp.sum(psum, axis=(0, 1)) / M       # E[y - c]   (C,)
        ss = jnp.sum(pssq, axis=(0, 1)) / M      # E[(y-c)^2] (C,)
        mean = cstat.reshape(C) + s
        var = jnp.maximum(ss - s * s, 0.0)       # biased variance (training BN)
        rstd = lax.rsqrt(var + BN_EPS)
        scale = (gma * rstd).reshape(1, C)
        shift = (bta - mean * gma * rstd).reshape(1, C)
        return scale, shift

    # Application 0: conv(x).
    y, ps, pq = _conv_first_call(x_nhwc, wd, bdw, wpw, bpw, cstat)
    scale, shift = bn_params(ps, pq)
    # Applications 1..t: conv(x + relu(bn(y_prev))), fully fused in-kernel.
    for _ in range(t):
        y, ps, pq = _conv_mid_call(y, scale, shift, x_nhwc,
                                   wd, bdw, wpw, bpw, cstat)
        scale, shift = bn_params(ps, pq)
    # Final BN apply + ReLU.
    out_nhwc = _bn_relu_call(y, scale, shift)
    return jnp.transpose(out_nhwc, (0, 3, 1, 2))


# ---------------------------------------------------------------------------
# Independent pure-JAX reference (NCHW throughout).  It mirrors the two bf16
# quantization points of the kernel (bf16 MXU operands for the pointwise conv
# and the bf16 HBM stash of the conv output, which BN immediately
# re-normalizes); everything else is plain f32 PyTorch semantics.
# ---------------------------------------------------------------------------
def recurrent_block_reference(x, w_dw, b_dw, w_pw, b_pw, gamma, beta, t=2):
    x = x.astype(jnp.float32)
    N, C, H, W = x.shape

    def conv(z):
        zp = jnp.pad(z, ((0, 0), (0, 0), (1, 1), (1, 1)))
        dw = jnp.zeros_like(z)
        for kh in range(3):
            for kw in range(3):
                dw = dw + zp[:, :, kh:kh + H, kw:kw + W] \
                     * w_dw[:, 0, kh, kw].reshape(1, C, 1, 1)
        dw = dw + b_dw.reshape(1, C, 1, 1)
        lhs = dw.astype(jnp.bfloat16).astype(jnp.float32)
        wmat = w_pw[:, :, 0, 0].astype(jnp.bfloat16).astype(jnp.float32)   # (Cout,Cin)
        y = jnp.einsum('nchw,oc->nohw', lhs, wmat, precision=lax.Precision.HIGHEST)
        return y + b_pw.reshape(1, C, 1, 1)

    def bn_relu(y):
        mean = jnp.mean(y, axis=(0, 2, 3), keepdims=True)
        var = jnp.mean((y - mean) ** 2, axis=(0, 2, 3), keepdims=True)
        yq = y.astype(jnp.bfloat16).astype(jnp.float32)        # bf16 stash mirror
        out = (yq - mean) * lax.rsqrt(var + BN_EPS) * gamma.reshape(1, C, 1, 1) \
              + beta.reshape(1, C, 1, 1)
        return jnp.maximum(out, 0.0)

    y = conv(x)
    for _ in range(t):
        y = conv(x + bn_relu(y))
    return bn_relu(y)


if __name__ == "__main__":
    key = jax.random.PRNGKey(0)
    kx, k1, k2, k3, k4, k5, k6 = jax.random.split(key, 7)

    N, C, H, W = 2, 4, 16, 16          # out_filters = 4, t = 2, seprable=True
    x = jax.random.normal(kx, (N, C, H, W), jnp.float32)
    # separable conv = depthwise 3x3 (groups=C, bias) + pointwise 1x1 (bias)
    w_dw = jax.random.normal(k1, (C, 1, 3, 3), jnp.float32) * 0.3
    b_dw = jax.random.normal(k2, (C,), jnp.float32) * 0.1
    w_pw = jax.random.normal(k3, (C, C, 1, 1), jnp.float32) * 0.3
    b_pw = jax.random.normal(k4, (C,), jnp.float32) * 0.1
    gamma = 1.0 + 0.1 * jax.random.normal(k5, (C,), jnp.float32)
    beta = 0.1 * jax.random.normal(k6, (C,), jnp.float32)

    out = jax.block_until_ready(
        recurrent_block_forward(x, w_dw, b_dw, w_pw, b_pw, gamma, beta, t=2))
    ref = jax.block_until_ready(
        recurrent_block_reference(x, w_dw, b_dw, w_pw, b_pw, gamma, beta, t=2))

    assert out.shape == (N, C, H, W), out.shape
    err_max = float(jnp.max(jnp.abs(out - ref)))
    err_mean = float(jnp.mean(jnp.abs(out - ref)))
    assert err_max < 1e-2, err_max
    assert err_mean < 1e-3, err_mean
    print("KERNEL_OK")
</pallas_src>

<mosaic_0001>
module attributes {stable_mosaic.version = 11 : i64} {
  func.func @_conv_first_kernel(%arg0: i32, %arg1: memref<1x16x16x4xf32, #tpu.memory_space<vmem>>, %arg2: memref<3x3x1x4xf32, #tpu.memory_space<vmem>>, %arg3: memref<1x4xf32, #tpu.memory_space<vmem>>, %arg4: memref<4x4xbf16, #tpu.memory_space<vmem>>, %arg5: memref<1x4xf32, #tpu.memory_space<vmem>>, %arg6: memref<1x4xf32, #tpu.memory_space<vmem>>, %arg7: memref<1x16x16x4xbf16, #tpu.memory_space<vmem>>, %arg8: memref<1x1x4xf32, #tpu.memory_space<vmem>>, %arg9: memref<1x1x4xf32, #tpu.memory_space<vmem>>, %arg10: memref<18x18x4xf32, #tpu.memory_space<vmem>>) attributes {dimension_semantics = [#tpu.dimension_semantics<parallel>], iteration_bounds = array<i64: 2>, scalar_prefetch = 0 : i64, scratch_operands = 1 : i64, tpu.core_type = #tpu.core_type<tc>, window_params = [{transform_indices = @transform_0, window_bounds = array<i64: 1, 16, 16, 4>}, {pipeline_mode = #tpu.pipeline_mode<synchronous>, transform_indices = @transform_1, window_bounds = array<i64: 3, 3, 1, 4>}, {pipeline_mode = #tpu.pipeline_mode<synchronous>, transform_indices = @transform_2, window_bounds = array<i64: 1, 4>}, {pipeline_mode = #tpu.pipeline_mode<synchronous>, transform_indices = @transform_3, window_bounds = array<i64: 4, 4>}, {pipeline_mode = #tpu.pipeline_mode<synchronous>, transform_indices = @transform_4, window_bounds = array<i64: 1, 4>}, {pipeline_mode = #tpu.pipeline_mode<synchronous>, transform_indices = @transform_5, window_bounds = array<i64: 1, 4>}, {transform_indices = @transform_6, window_bounds = array<i64: 1, 16, 16, 4>}, {transform_indices = @transform_7, window_bounds = array<i64: 1, 1, 4>}, {transform_indices = @transform_8, window_bounds = array<i64: 1, 1, 4>}]} {
    %c0 = arith.constant 0 : index
    %c0_0 = arith.constant 0 : index
    %c0_1 = arith.constant 0 : index
    %c0_2 = arith.constant 0 : index
    %0 = vector.load %arg1[%c0, %c0_0, %c0_1, %c0_2] : memref<1x16x16x4xf32, #tpu.memory_space<vmem>>, vector<1x16x16x4xf32>
    %1 = vector.shape_cast %0 : vector<1x16x16x4xf32> to vector<16x16x4xf32>
    %cst = arith.constant 0.000000e+00 : f32
    %2 = vector.broadcast %cst : f32 to vector<18x18x4xf32>
    %c0_3 = arith.constant 0 : index
    %c0_4 = arith.constant 0 : index
    %c0_5 = arith.constant 0 : index
    %3 = vector.load %arg10[%c0_3, %c0_4, %c0_5] : memref<18x18x4xf32, #tpu.memory_space<vmem>>, vector<18x18x4xf32>
    tpu.vector_store %arg10[%c0_3, %c0_4, %c0_5], %2 {strides = array<i32>} : memref<18x18x4xf32, #tpu.memory_space<vmem>>, vector<18x18x4xf32>,
    %c1 = arith.constant 1 : index
    %c1_6 = arith.constant 1 : index
    %c0_7 = arith.constant 0 : index
    %4 = vector.load %arg10[%c1, %c1_6, %c0_7] : memref<18x18x4xf32, #tpu.memory_space<vmem>>, vector<16x16x4xf32>
    tpu.vector_store %arg10[%c1, %c1_6, %c0_7], %1 {strides = array<i32>} : memref<18x18x4xf32, #tpu.memory_space<vmem>>, vector<16x16x4xf32>,
    %cst_8 = arith.constant 0.000000e+00 : f32
    %5 = vector.broadcast %cst_8 : f32 to vector<16x16x4xf32>
    %c0_9 = arith.constant 0 : index
    %c0_10 = arith.constant 0 : index
    %c0_11 = arith.constant 0 : index
    %6 = vector.load %arg10[%c0_9, %c0_10, %c0_11] : memref<18x18x4xf32, #tpu.memory_space<vmem>>, vector<16x16x4xf32>
    %c0_12 = arith.constant 0 : index
    %c0_13 = arith.constant 0 : index
    %c0_14 = arith.constant 0 : index
    %c0_15 = arith.constant 0 : index
    %7 = vector.load %arg2[%c0_12, %c0_13, %c0_14, %c0_15] : memref<3x3x1x4xf32, #tpu.memory_space<vmem>>, vector<1x1x1x4xf32>
    %8 = vector.shape_cast %7 : vector<1x1x1x4xf32> to vector<1x4xf32>
    %9 = vector.shape_cast %8 : vector<1x4xf32> to vector<1x1x4xf32>
    %10 = vector.broadcast %9 : vector<1x1x4xf32> to vector<16x16x4xf32>
    %11 = arith.mulf %6, %10 : vector<16x16x4xf32>
    %12 = arith.addf %5, %11 : vector<16x16x4xf32>
    %c0_16 = arith.constant 0 : index
    %c1_17 = arith.constant 1 : index
    %c0_18 = arith.constant 0 : index
    %13 = vector.load %arg10[%c0_16, %c1_17, %c0_18] : memref<18x18x4xf32, #tpu.memory_space<vmem>>, vector<16x16x4xf32>
    %c0_19 = arith.constant 0 : index
    %c1_20 = arith.constant 1 : index
    %c0_21 = arith.constant 0 : index
    %c0_22 = arith.constant 0 : index
    %14 = vector.load %arg2[%c0_19, %c1_20, %c0_21, %c0_22] : memref<3x3x1x4xf32, #tpu.memory_space<vmem>>, vector<1x1x1x4xf32>
    %15 = vector.shape_cast %14 : vector<1x1x1x4xf32> to vector<1x4xf32>
    %16 = vector.shape_cast %15 : vector<1x4xf32> to vector<1x1x4xf32>
    %17 = vector.broadcast %16 : vector<1x1x4xf32> to vector<16x16x4xf32>
    %18 = arith.mulf %13, %17 : vector<16x16x4xf32>
    %19 = arith.addf %12, %18 : vector<16x16x4xf32>
    %c0_23 = arith.constant 0 : index
    %c2 = arith.constant 2 : index
    %c0_24 = arith.constant 0 : index
    %20 = vector.load %arg10[%c0_23, %c2, %c0_24] : memref<18x18x4xf32, #tpu.memory_space<vmem>>, vector<16x16x4xf32>
    %c0_25 = arith.constant 0 : index
    %c2_26 = arith.constant 2 : index
    %c0_27 = arith.constant 0 : index
    %c0_28 = arith.constant 0 : index
    %21 = vector.load %arg2[%c0_25, %c2_26, %c0_27, %c0_28] : memref<3x3x1x4xf32, #tpu.memory_space<vmem>>, vector<1x1x1x4xf32>
    %22 = vector.shape_cast %21 : vector<1x1x1x4xf32> to vector<1x4xf32>
    %23 = vector.shape_cast %22 : vector<1x4xf32> to vector<1x1x4xf32>
    %24 = vector.broadcast %23 : vector<1x1x4xf32> to vector<16x16x4xf32>
    %25 = arith.mulf %20, %24 : vector<16x16x4xf32>
    %26 = arith.addf %19, %25 : vector<16x16x4xf32>
    %c1_29 = arith.constant 1 : index
    %c0_30 = arith.constant 0 : index
    %c0_31 = arith.constant 0 : index
    %27 = vector.load %arg10[%c1_29, %c0_30, %c0_31] : memref<18x18x4xf32, #tpu.memory_space<vmem>>, vector<16x16x4xf32>
    %c1_32 = arith.constant 1 : index
    %c0_33 = arith.constant 0 : index
    %c0_34 = arith.constant 0 : index
    %c0_35 = arith.constant 0 : index
    %28 = vector.load %arg2[%c1_32, %c0_33, %c0_34, %c0_35] : memref<3x3x1x4xf32, #tpu.memory_space<vmem>>, vector<1x1x1x4xf32>
    %29 = vector.shape_cast %28 : vector<1x1x1x4xf32> to vector<1x4xf32>
    %30 = vector.shape_cast %29 : vector<1x4xf32> to vector<1x1x4xf32>
    %31 = vector.broadcast %30 : vector<1x1x4xf32> to vector<16x16x4xf32>
    %32 = arith.mulf %27, %31 : vector<16x16x4xf32>
    %33 = arith.addf %26, %32 : vector<16x16x4xf32>
    %c1_36 = arith.constant 1 : index
    %c1_37 = arith.constant 1 : index
    %c0_38 = arith.constant 0 : index
    %34 = vector.load %arg10[%c1_36, %c1_37, %c0_38] : memref<18x18x4xf32, #tpu.memory_space<vmem>>, vector<16x16x4xf32>
    %c1_39 = arith.constant 1 : index
    %c1_40 = arith.constant 1 : index
    %c0_41 = arith.constant 0 : index
    %c0_42 = arith.constant 0 : index
    %35 = vector.load %arg2[%c1_39, %c1_40, %c0_41, %c0_42] : memref<3x3x1x4xf32, #tpu.memory_space<vmem>>, vector<1x1x1x4xf32>
    %36 = vector.shape_cast %35 : vector<1x1x1x4xf32> to vector<1x4xf32>
    %37 = vector.shape_cast %36 : vector<1x4xf32> to vector<1x1x4xf32>
    %38 = vector.broadcast %37 : vector<1x1x4xf32> to vector<16x16x4xf32>
    %39 = arith.mulf %34, %38 : vector<16x16x4xf32>
    %40 = arith.addf %33, %39 : vector<16x16x4xf32>
    %c1_43 = arith.constant 1 : index
    %c2_44 = arith.constant 2 : index
    %c0_45 = arith.constant 0 : index
    %41 = vector.load %arg10[%c1_43, %c2_44, %c0_45] : memref<18x18x4xf32, #tpu.memory_space<vmem>>, vector<16x16x4xf32>
    %c1_46 = arith.constant 1 : index
    %c2_47 = arith.constant 2 : index
    %c0_48 = arith.constant 0 : index
    %c0_49 = arith.constant 0 : index
    %42 = vector.load %arg2[%c1_46, %c2_47, %c0_48, %c0_49] : memref<3x3x1x4xf32, #tpu.memory_space<vmem>>, vector<1x1x1x4xf32>
    %43 = vector.shape_cast %42 : vector<1x1x1x4xf32> to vector<1x4xf32>
    %44 = vector.shape_cast %43 : vector<1x4xf32> to vector<1x1x4xf32>
    %45 = vector.broadcast %44 : vector<1x1x4xf32> to vector<16x16x4xf32>
    %46 = arith.mulf %41, %45 : vector<16x16x4xf32>
    %47 = arith.addf %40, %46 : vector<16x16x4xf32>
    %c2_50 = arith.constant 2 : index
    %c0_51 = arith.constant 0 : index
    %c0_52 = arith.constant 0 : index
    %48 = vector.load %arg10[%c2_50, %c0_51, %c0_52] : memref<18x18x4xf32, #tpu.memory_space<vmem>>, vector<16x16x4xf32>
    %c2_53 = arith.constant 2 : index
    %c0_54 = arith.constant 0 : index
    %c0_55 = arith.constant 0 : index
    %c0_56 = arith.constant 0 : index
    %49 = vector.load %arg2[%c2_53, %c0_54, %c0_55, %c0_56] : memref<3x3x1x4xf32, #tpu.memory_space<vmem>>, vector<1x1x1x4xf32>
    %50 = vector.shape_cast %49 : vector<1x1x1x4xf32> to vector<1x4xf32>
    %51 = vector.shape_cast %50 : vector<1x4xf32> to vector<1x1x4xf32>
    %52 = vector.broadcast %51 : vector<1x1x4xf32> to vector<16x16x4xf32>
    %53 = arith.mulf %48, %52 : vector<16x16x4xf32>
    %54 = arith.addf %47, %53 : vector<16x16x4xf32>
    %c2_57 = arith.constant 2 : index
    %c1_58 = arith.constant 1 : index
    %c0_59 = arith.constant 0 : index
    %55 = vector.load %arg10[%c2_57, %c1_58, %c0_59] : memref<18x18x4xf32, #tpu.memory_space<vmem>>, vector<16x16x4xf32>
    %c2_60 = arith.constant 2 : index
    %c1_61 = arith.constant 1 : index
    %c0_62 = arith.constant 0 : index
    %c0_63 = arith.constant 0 : index
    %56 = vector.load %arg2[%c2_60, %c1_61, %c0_62, %c0_63] : memref<3x3x1x4xf32, #tpu.memory_space<vmem>>, vector<1x1x1x4xf32>
    %57 = vector.shape_cast %56 : vector<1x1x1x4xf32> to vector<1x4xf32>
    %58 = vector.shape_cast %57 : vector<1x4xf32> to vector<1x1x4xf32>
    %59 = vector.broadcast %58 : vector<1x1x4xf32> to vector<16x16x4xf32>
    %60 = arith.mulf %55, %59 : vector<16x16x4xf32>
    %61 = arith.addf %54, %60 : vector<16x16x4xf32>
    %c2_64 = arith.constant 2 : index
    %c2_65 = arith.constant 2 : index
    %c0_66 = arith.constant 0 : index
    %62 = vector.load %arg10[%c2_64, %c2_65, %c0_66] : memref<18x18x4xf32, #tpu.memory_space<vmem>>, vector<16x16x4xf32>
    %c2_67 = arith.constant 2 : index
    %c2_68 = arith.constant 2 : index
    %c0_69 = arith.constant 0 : index
    %c0_70 = arith.constant 0 : index
    %63 = vector.load %arg2[%c2_67, %c2_68, %c0_69, %c0_70] : memref<3x3x1x4xf32, #tpu.memory_space<vmem>>, vector<1x1x1x4xf32>
    %64 = vector.shape_cast %63 : vector<1x1x1x4xf32> to vector<1x4xf32>
    %65 = vector.shape_cast %64 : vector<1x4xf32> to vector<1x1x4xf32>
    %66 = vector.broadcast %65 : vector<1x1x4xf32> to vector<16x16x4xf32>
    %67 = arith.mulf %62, %66 : vector<16x16x4xf32>
    %68 = arith.addf %61, %67 : vector<16x16x4xf32>
    %c0_71 = arith.constant 0 : index
    %c0_72 = arith.constant 0 : index
    %69 = vector.load %arg3[%c0_71, %c0_72] : memref<1x4xf32, #tpu.memory_space<vmem>>, vector<1x4xf32>
    %70 = vector.shape_cast %69 : vector<1x4xf32> to vector<1x1x4xf32>
    %71 = vector.broadcast %70 : vector<1x1x4xf32> to vector<16x16x4xf32>
    %72 = arith.addf %68, %71 : vector<16x16x4xf32>
    %73 = vector.shape_cast %72 : vector<16x16x4xf32> to vector<256x4xf32>
    %74 = arith.truncf %73 : vector<256x4xf32> to vector<256x4xbf16>
    %c0_73 = arith.constant 0 : index
    %c0_74 = arith.constant 0 : index
    %75 = vector.load %arg4[%c0_73, %c0_74] : memref<4x4xbf16, #tpu.memory_space<vmem>>, vector<4x4xbf16>
    %cst_75 = arith.constant dense<0.000000e+00> : vector<256x4xf32>
    %76 = tpu.matmul %74, %75, %cst_75 {dimension_numbers = #tpu.dot_dimension_numbers<[1], [0], [0], [1], [0, 0, 1, 1], [], []>} : vector<256x4xbf16>, vector<4x4xbf16>, vector<256x4xf32> -> vector<256x4xf32>
    %c0_76 = arith.constant 0 : index
    %c0_77 = arith.constant 0 : index
    %77 = vector.load %arg5[%c0_76, %c0_77] : memref<1x4xf32, #tpu.memory_space<vmem>>, vector<1x4xf32>
    %78 = vector.broadcast %77 : vector<1x4xf32> to vector<256x4xf32>
    %79 = arith.addf %76, %78 : vector<256x4xf32>
    %80 = vector.shape_cast %79 : vector<256x4xf32> to vector<1x16x16x4xf32>
    %81 = arith.truncf %80 : vector<1x16x16x4xf32> to vector<1x16x16x4xbf16>
    %c0_78 = arith.constant 0 : index
    %c0_79 = arith.constant 0 : index
    %c0_80 = arith.constant 0 : index
    %c0_81 = arith.constant 0 : index
    %82 = vector.load %arg7[%c0_78, %c0_79, %c0_80, %c0_81] : memref<1x16x16x4xbf16, #tpu.memory_space<vmem>>, vector<1x16x16x4xbf16>
    tpu.vector_store %arg7[%c0_78, %c0_79, %c0_80, %c0_81], %81 {strides = array<i32>} : memref<1x16x16x4xbf16, #tpu.memory_space<vmem>>, vector<1x16x16x4xbf16>,
    %c0_82 = arith.constant 0 : index
    %c0_83 = arith.constant 0 : index
    %83 = vector.load %arg6[%c0_82, %c0_83] : memref<1x4xf32, #tpu.memory_space<vmem>>, vector<1x4xf32>
    %84 = vector.broadcast %83 : vector<1x4xf32> to vector<256x4xf32>
    %85 = arith.subf %79, %84 : vector<256x4xf32>
    %cst_84 = arith.constant dense<0.000000e+00> : vector<4xf32>
    %86 = vector.multi_reduction <add>, %85, %cst_84 [0] : vector<256x4xf32> to vector<4xf32>
    %87 = vector.shape_cast %86 : vector<4xf32> to vector<1x4xf32>
    %88 = vector.shape_cast %87 : vector<1x4xf32> to vector<1x1x4xf32>
    %c0_85 = arith.constant 0 : index
    %c0_86 = arith.constant 0 : index
    %c0_87 = arith.constant 0 : index
    %89 = vector.load %arg8[%c0_85, %c0_86, %c0_87] : memref<1x1x4xf32, #tpu.memory_space<vmem>>, vector<1x1x4xf32>
    tpu.vector_store %arg8[%c0_85, %c0_86, %c0_87], %88 {strides = array<i32>} : memref<1x1x4xf32, #tpu.memory_space<vmem>>, vector<1x1x4xf32>,
    %90 = arith.mulf %85, %85 : vector<256x4xf32>
    %cst_88 = arith.constant dense<0.000000e+00> : vector<4xf32>
    %91 = vector.multi_reduction <add>, %90, %cst_88 [0] : vector<256x4xf32> to vector<4xf32>
    %92 = vector.shape_cast %91 : vector<4xf32> to vector<1x4xf32>
    %93 = vector.shape_cast %92 : vector<1x4xf32> to vector<1x1x4xf32>
    %c0_89 = arith.constant 0 : index
    %c0_90 = arith.constant 0 : index
    %c0_91 = arith.constant 0 : index
    %94 = vector.load %arg9[%c0_89, %c0_90, %c0_91] : memref<1x1x4xf32, #tpu.memory_space<vmem>>, vector<1x1x4xf32>
    tpu.vector_store %arg9[%c0_89, %c0_90, %c0_91], %93 {strides = array<i32>} : memref<1x1x4xf32, #tpu.memory_space<vmem>>, vector<1x1x4xf32>,
    return
  }
  func.func @transform_0(%arg0: i32) -> (i32, i32, i32, i32) {
    %c0_i32 = arith.constant 0 : i32
    %c0_i32_0 = arith.constant 0 : i32
    %c0_i32_1 = arith.constant 0 : i32
    %c0_i32_2 = arith.constant 0 : i32
    return %arg0, %c0_i32, %c0_i32_0, %c0_i32_1 : i32, i32, i32, i32
  }
  func.func @transform_1(%arg0: i32) -> (i32, i32, i32, i32) {
    %c0_i32 = arith.constant 0 : i32
    %c0_i32_0 = arith.constant 0 : i32
    %c0_i32_1 = arith.constant 0 : i32
    %c0_i32_2 = arith.constant 0 : i32
    %c0_i32_3 = arith.constant 0 : i32
    return %c0_i32, %c0_i32_0, %c0_i32_1, %c0_i32_2 : i32, i32, i32, i32
  }
  func.func @transform_2(%arg0: i32) -> (i32, i32) {
    %c0_i32 = arith.constant 0 : i32
    %c0_i32_0 = arith.constant 0 : i32
    %c0_i32_1 = arith.constant 0 : i32
    return %c0_i32, %c0_i32_0 : i32, i32
  }
  func.func @transform_3(%arg0: i32) -> (i32, i32) {
    %c0_i32 = arith.constant 0 : i32
    %c0_i32_0 = arith.constant 0 : i32
    %c0_i32_1 = arith.constant 0 : i32
    return %c0_i32, %c0_i32_0 : i32, i32
  }
  func.func @transform_4(%arg0: i32) -> (i32, i32) {
    %c0_i32 = arith.constant 0 : i32
    %c0_i32_0 = arith.constant 0 : i32
    %c0_i32_1 = arith.constant 0 : i32
    return %c0_i32, %c0_i32_0 : i32, i32
  }
  func.func @transform_5(%arg0: i32) -> (i32, i32) {
    %c0_i32 = arith.constant 0 : i32
    %c0_i32_0 = arith.constant 0 : i32
    %c0_i32_1 = arith.constant 0 : i32
    return %c0_i32, %c0_i32_0 : i32, i32
  }
  func.func @transform_6(%arg0: i32) -> (i32, i32, i32, i32) {
    %c0_i32 = arith.constant 0 : i32
    %c0_i32_0 = arith.constant 0 : i32
    %c0_i32_1 = arith.constant 0 : i32
    %c0_i32_2 = arith.constant 0 : i32
    return %arg0, %c0_i32, %c0_i32_0, %c0_i32_1 : i32, i32, i32, i32
  }
  func.func @transform_7(%arg0: i32) -> (i32, i32, i32) {
    %c0_i32 = arith.constant 0 : i32
    %c0_i32_0 = arith.constant 0 : i32
    %c0_i32_1 = arith.constant 0 : i32
    return %arg0, %c0_i32, %c0_i32_0 : i32, i32, i32
  }
  func.func @transform_8(%arg0: i32) -> (i32, i32, i32) {
    %c0_i32 = arith.constant 0 : i32
    %c0_i32_0 = arith.constant 0 : i32
    %c0_i32_1 = arith.constant 0 : i32
    return %arg0, %c0_i32, %c0_i32_0 : i32, i32, i32
  }
}

module attributes {stable_mosaic.version = 11 : i64} {
  func.func @_bn_relu_kernel(%arg0: i32, %arg1: memref<1x16x16x4xbf16, #tpu.memory_space<vmem>>, %arg2: memref<1x4xf32, #tpu.memory_space<vmem>>, %arg3: memref<1x4xf32, #tpu.memory_space<vmem>>, %arg4: memref<1x16x16x4xf32, #tpu.memory_space<vmem>>) attributes {dimension_semantics = [#tpu.dimension_semantics<parallel>], iteration_bounds = array<i64: 2>, scalar_prefetch = 0 : i64, scratch_operands = 0 : i64, tpu.core_type = #tpu.core_type<tc>, window_params = [{transform_indices = @transform_0, window_bounds = array<i64: 1, 16, 16, 4>}, {pipeline_mode = #tpu.pipeline_mode<synchronous>, transform_indices = @transform_1, window_bounds = array<i64: 1, 4>}, {pipeline_mode = #tpu.pipeline_mode<synchronous>, transform_indices = @transform_2, window_bounds = array<i64: 1, 4>}, {transform_indices = @transform_3, window_bounds = array<i64: 1, 16, 16, 4>}]} {
    %c0 = arith.constant 0 : index
    %c0_0 = arith.constant 0 : index
    %c0_1 = arith.constant 0 : index
    %c0_2 = arith.constant 0 : index
    %0 = vector.load %arg1[%c0, %c0_0, %c0_1, %c0_2] : memref<1x16x16x4xbf16, #tpu.memory_space<vmem>>, vector<1x16x16x4xbf16>
    %1 = arith.extf %0 : vector<1x16x16x4xbf16> to vector<1x16x16x4xf32>
    %c0_3 = arith.constant 0 : index
    %c0_4 = arith.constant 0 : index
    %2 = vector.load %arg2[%c0_3, %c0_4] : memref<1x4xf32, #tpu.memory_space<vmem>>, vector<1x4xf32>
    %3 = vector.shape_cast %2 : vector<1x4xf32> to vector<1x1x1x4xf32>
    %4 = vector.broadcast %3 : vector<1x1x1x4xf32> to vector<1x16x16x4xf32>
    %5 = arith.mulf %1, %4 : vector<1x16x16x4xf32>
    %c0_5 = arith.constant 0 : index
    %c0_6 = arith.constant 0 : index
    %6 = vector.load %arg3[%c0_5, %c0_6] : memref<1x4xf32, #tpu.memory_space<vmem>>, vector<1x4xf32>
    %7 = vector.shape_cast %6 : vector<1x4xf32> to vector<1x1x1x4xf32>
    %8 = vector.broadcast %7 : vector<1x1x1x4xf32> to vector<1x16x16x4xf32>
    %9 = arith.addf %5, %8 : vector<1x16x16x4xf32>
    %cst = arith.constant 0.000000e+00 : f32
    %10 = vector.broadcast %cst : f32 to vector<1x16x16x4xf32>
    %11 = arith.maximumf %9, %10 : vector<1x16x16x4xf32>
    %c0_7 = arith.constant 0 : index
    %c0_8 = arith.constant 0 : index
    %c0_9 = arith.constant 0 : index
    %c0_10 = arith.constant 0 : index
    %12 = vector.load %arg4[%c0_7, %c0_8, %c0_9, %c0_10] : memref<1x16x16x4xf32, #tpu.memory_space<vmem>>, vector<1x16x16x4xf32>
    tpu.vector_store %arg4[%c0_7, %c0_8, %c0_9, %c0_10], %11 {strides = array<i32>} : memref<1x16x16x4xf32, #tpu.memory_space<vmem>>, vector<1x16x16x4xf32>,
    return
  }
  func.func @transform_0(%arg0: i32) -> (i32, i32, i32, i32) {
    %c0_i32 = arith.constant 0 : i32
    %c0_i32_0 = arith.constant 0 : i32
    %c0_i32_1 = arith.constant 0 : i32
    %c0_i32_2 = arith.constant 0 : i32
    return %arg0, %c0_i32, %c0_i32_0, %c0_i32_1 : i32, i32, i32, i32
  }
  func.func @transform_1(%arg0: i32) -> (i32, i32) {
    %c0_i32 = arith.constant 0 : i32
    %c0_i32_0 = arith.constant 0 : i32
    %c0_i32_1 = arith.constant 0 : i32
    return %c0_i32, %c0_i32_0 : i32, i32
  }
  func.func @transform_2(%arg0: i32) -> (i32, i32) {
    %c0_i32 = arith.constant 0 : i32
    %c0_i32_0 = arith.constant 0 : i32
    %c0_i32_1 = arith.constant 0 : i32
    return %c0_i32, %c0_i32_0 : i32, i32
  }
  func.func @transform_3(%arg0: i32) -> (i32, i32, i32, i32) {
    %c0_i32 = arith.constant 0 : i32
    %c0_i32_0 = arith.constant 0 : i32
    %c0_i32_1 = arith.constant 0 : i32
    %c0_i32_2 = arith.constant 0 : i32
    return %arg0, %c0_i32, %c0_i32_0, %c0_i32_1 : i32, i32, i32, i32
  }
}

module attributes {stable_mosaic.version = 11 : i64} {
  func.func @_conv_mid_kernel(%arg0: i32, %arg1: memref<1x16x16x4xbf16, #tpu.memory_space<vmem>>, %arg2: memref<1x4xf32, #tpu.memory_space<vmem>>, %arg3: memref<1x4xf32, #tpu.memory_space<vmem>>, %arg4: memref<1x16x16x4xf32, #tpu.memory_space<vmem>>, %arg5: memref<3x3x1x4xf32, #tpu.memory_space<vmem>>, %arg6: memref<1x4xf32, #tpu.memory_space<vmem>>, %arg7: memref<4x4xbf16, #tpu.memory_space<vmem>>, %arg8: memref<1x4xf32, #tpu.memory_space<vmem>>, %arg9: memref<1x4xf32, #tpu.memory_space<vmem>>, %arg10: memref<1x16x16x4xbf16, #tpu.memory_space<vmem>>, %arg11: memref<1x1x4xf32, #tpu.memory_space<vmem>>, %arg12: memref<1x1x4xf32, #tpu.memory_space<vmem>>, %arg13: memref<18x18x4xf32, #tpu.memory_space<vmem>>) attributes {dimension_semantics = [#tpu.dimension_semantics<parallel>], iteration_bounds = array<i64: 2>, scalar_prefetch = 0 : i64, scratch_operands = 1 : i64, tpu.core_type = #tpu.core_type<tc>, window_params = [{transform_indices = @transform_0, window_bounds = array<i64: 1, 16, 16, 4>}, {pipeline_mode = #tpu.pipeline_mode<synchronous>, transform_indices = @transform_1, window_bounds = array<i64: 1, 4>}, {pipeline_mode = #tpu.pipeline_mode<synchronous>, transform_indices = @transform_2, window_bounds = array<i64: 1, 4>}, {transform_indices = @transform_3, window_bounds = array<i64: 1, 16, 16, 4>}, {pipeline_mode = #tpu.pipeline_mode<synchronous>, transform_indices = @transform_4, window_bounds = array<i64: 3, 3, 1, 4>}, {pipeline_mode = #tpu.pipeline_mode<synchronous>, transform_indices = @transform_5, window_bounds = array<i64: 1, 4>}, {pipeline_mode = #tpu.pipeline_mode<synchronous>, transform_indices = @transform_6, window_bounds = array<i64: 4, 4>}, {pipeline_mode = #tpu.pipeline_mode<synchronous>, transform_indices = @transform_7, window_bounds = array<i64: 1, 4>}, {pipeline_mode = #tpu.pipeline_mode<synchronous>, transform_indices = @transform_8, window_bounds = array<i64: 1, 4>}, {transform_indices = @transform_9, window_bounds = array<i64: 1, 16, 16, 4>}, {transform_indices = @transform_10, window_bounds = array<i64: 1, 1, 4>}, {transform_indices = @transform_11, window_bounds = array<i64: 1, 1, 4>}]} {
    %c0 = arith.constant 0 : index
    %c0_0 = arith.constant 0 : index
    %c0_1 = arith.constant 0 : index
    %c0_2 = arith.constant 0 : index
    %0 = vector.load %arg1[%c0, %c0_0, %c0_1, %c0_2] : memref<1x16x16x4xbf16, #tpu.memory_space<vmem>>, vector<1x16x16x4xbf16>
    %1 = arith.extf %0 : vector<1x16x16x4xbf16> to vector<1x16x16x4xf32>
    %2 = vector.shape_cast %1 : vector<1x16x16x4xf32> to vector<16x16x4xf32>
    %c0_3 = arith.constant 0 : index
    %c0_4 = arith.constant 0 : index
    %3 = vector.load %arg2[%c0_3, %c0_4] : memref<1x4xf32, #tpu.memory_space<vmem>>, vector<1x4xf32>
    %4 = vector.shape_cast %3 : vector<1x4xf32> to vector<1x1x4xf32>
    %5 = vector.broadcast %4 : vector<1x1x4xf32> to vector<16x16x4xf32>
    %6 = arith.mulf %2, %5 : vector<16x16x4xf32>
    %c0_5 = arith.constant 0 : index
    %c0_6 = arith.constant 0 : index
    %7 = vector.load %arg3[%c0_5, %c0_6] : memref<1x4xf32, #tpu.memory_space<vmem>>, vector<1x4xf32>
    %8 = vector.shape_cast %7 : vector<1x4xf32> to vector<1x1x4xf32>
    %9 = vector.broadcast %8 : vector<1x1x4xf32> to vector<16x16x4xf32>
    %10 = arith.addf %6, %9 : vector<16x16x4xf32>
    %cst = arith.constant 0.000000e+00 : f32
    %11 = vector.broadcast %cst : f32 to vector<16x16x4xf32>
    %12 = arith.maximumf %10, %11 : vector<16x16x4xf32>
    %c0_7 = arith.constant 0 : index
    %c0_8 = arith.constant 0 : index
    %c0_9 = arith.constant 0 : index
    %c0_10 = arith.constant 0 : index
    %13 = vector.load %arg4[%c0_7, %c0_8, %c0_9, %c0_10] : memref<1x16x16x4xf32, #tpu.memory_space<vmem>>, vector<1x16x16x4xf32>
    %14 = vector.shape_cast %13 : vector<1x16x16x4xf32> to vector<16x16x4xf32>
    %15 = arith.addf %14, %12 : vector<16x16x4xf32>
    %cst_11 = arith.constant 0.000000e+00 : f32
    %16 = vector.broadcast %cst_11 : f32 to vector<18x18x4xf32>
    %c0_12 = arith.constant 0 : index
    %c0_13 = arith.constant 0 : index
    %c0_14 = arith.constant 0 : index
    %17 = vector.load %arg13[%c0_12, %c0_13, %c0_14] : memref<18x18x4xf32, #tpu.memory_space<vmem>>, vector<18x18x4xf32>
    tpu.vector_store %arg13[%c0_12, %c0_13, %c0_14], %16 {strides = array<i32>} : memref<18x18x4xf32, #tpu.memory_space<vmem>>, vector<18x18x4xf32>,
    %c1 = arith.constant 1 : index
    %c1_15 = arith.constant 1 : index
    %c0_16 = arith.constant 0 : index
    %18 = vector.load %arg13[%c1, %c1_15, %c0_16] : memref<18x18x4xf32, #tpu.memory_space<vmem>>, vector<16x16x4xf32>
    tpu.vector_store %arg13[%c1, %c1_15, %c0_16], %15 {strides = array<i32>} : memref<18x18x4xf32, #tpu.memory_space<vmem>>, vector<16x16x4xf32>,
    %cst_17 = arith.constant 0.000000e+00 : f32
    %19 = vector.broadcast %cst_17 : f32 to vector<16x16x4xf32>
    %c0_18 = arith.constant 0 : index
    %c0_19 = arith.constant 0 : index
    %c0_20 = arith.constant 0 : index
    %20 = vector.load %arg13[%c0_18, %c0_19, %c0_20] : memref<18x18x4xf32, #tpu.memory_space<vmem>>, vector<16x16x4xf32>
    %c0_21 = arith.constant 0 : index
    %c0_22 = arith.constant 0 : index
    %c0_23 = arith.constant 0 : index
    %c0_24 = arith.constant 0 : index
    %21 = vector.load %arg5[%c0_21, %c0_22, %c0_23, %c0_24] : memref<3x3x1x4xf32, #tpu.memory_space<vmem>>, vector<1x1x1x4xf32>
    %22 = vector.shape_cast %21 : vector<1x1x1x4xf32> to vector<1x4xf32>
    %23 = vector.shape_cast %22 : vector<1x4xf32> to vector<1x1x4xf32>
    %24 = vector.broadcast %23 : vector<1x1x4xf32> to vector<16x16x4xf32>
    %25 = arith.mulf %20, %24 : vector<16x16x4xf32>
    %26 = arith.addf %19, %25 : vector<16x16x4xf32>
    %c0_25 = arith.constant 0 : index
    %c1_26 = arith.constant 1 : index
    %c0_27 = arith.constant 0 : index
    %27 = vector.load %arg13[%c0_25, %c1_26, %c0_27] : memref<18x18x4xf32, #tpu.memory_space<vmem>>, vector<16x16x4xf32>
    %c0_28 = arith.constant 0 : index
    %c1_29 = arith.constant 1 : index
    %c0_30 = arith.constant 0 : index
    %c0_31 = arith.constant 0 : index
    %28 = vector.load %arg5[%c0_28, %c1_29, %c0_30, %c0_31] : memref<3x3x1x4xf32, #tpu.memory_space<vmem>>, vector<1x1x1x4xf32>
    %29 = vector.shape_cast %28 : vector<1x1x1x4xf32> to vector<1x4xf32>
    %30 = vector.shape_cast %29 : vector<1x4xf32> to vector<1x1x4xf32>
    %31 = vector.broadcast %30 : vector<1x1x4xf32> to vector<16x16x4xf32>
    %32 = arith.mulf %27, %31 : vector<16x16x4xf32>
    %33 = arith.addf %26, %32 : vector<16x16x4xf32>
    %c0_32 = arith.constant 0 : index
    %c2 = arith.constant 2 : index
    %c0_33 = arith.constant 0 : index
    %34 = vector.load %arg13[%c0_32, %c2, %c0_33] : memref<18x18x4xf32, #tpu.memory_space<vmem>>, vector<16x16x4xf32>
    %c0_34 = arith.constant 0 : index
    %c2_35 = arith.constant 2 : index
    %c0_36 = arith.constant 0 : index
    %c0_37 = arith.constant 0 : index
    %35 = vector.load %arg5[%c0_34, %c2_35, %c0_36, %c0_37] : memref<3x3x1x4xf32, #tpu.memory_space<vmem>>, vector<1x1x1x4xf32>
    %36 = vector.shape_cast %35 : vector<1x1x1x4xf32> to vector<1x4xf32>
    %37 = vector.shape_cast %36 : vector<1x4xf32> to vector<1x1x4xf32>
    %38 = vector.broadcast %37 : vector<1x1x4xf32> to vector<16x16x4xf32>
    %39 = arith.mulf %34, %38 : vector<16x16x4xf32>
    %40 = arith.addf %33, %39 : vector<16x16x4xf32>
    %c1_38 = arith.constant 1 : index
    %c0_39 = arith.constant 0 : index
    %c0_40 = arith.constant 0 : index
    %41 = vector.load %arg13[%c1_38, %c0_39, %c0_40] : memref<18x18x4xf32, #tpu.memory_space<vmem>>, vector<16x16x4xf32>
    %c1_41 = arith.constant 1 : index
    %c0_42 = arith.constant 0 : index
    %c0_43 = arith.constant 0 : index
    %c0_44 = arith.constant 0 : index
    %42 = vector.load %arg5[%c1_41, %c0_42, %c0_43, %c0_44] : memref<3x3x1x4xf32, #tpu.memory_space<vmem>>, vector<1x1x1x4xf32>
    %43 = vector.shape_cast %42 : vector<1x1x1x4xf32> to vector<1x4xf32>
    %44 = vector.shape_cast %43 : vector<1x4xf32> to vector<1x1x4xf32>
    %45 = vector.broadcast %44 : vector<1x1x4xf32> to vector<16x16x4xf32>
    %46 = arith.mulf %41, %45 : vector<16x16x4xf32>
    %47 = arith.addf %40, %46 : vector<16x16x4xf32>
    %c1_45 = arith.constant 1 : index
    %c1_46 = arith.constant 1 : index
    %c0_47 = arith.constant 0 : index
    %48 = vector.load %arg13[%c1_45, %c1_46, %c0_47] : memref<18x18x4xf32, #tpu.memory_space<vmem>>, vector<16x16x4xf32>
    %c1_48 = arith.constant 1 : index
    %c1_49 = arith.constant 1 : index
    %c0_50 = arith.constant 0 : index
    %c0_51 = arith.constant 0 : index
    %49 = vector.load %arg5[%c1_48, %c1_49, %c0_50, %c0_51] : memref<3x3x1x4xf32, #tpu.memory_space<vmem>>, vector<1x1x1x4xf32>
    %50 = vector.shape_cast %49 : vector<1x1x1x4xf32> to vector<1x4xf32>
    %51 = vector.shape_cast %50 : vector<1x4xf32> to vector<1x1x4xf32>
    %52 = vector.broadcast %51 : vector<1x1x4xf32> to vector<16x16x4xf32>
    %53 = arith.mulf %48, %52 : vector<16x16x4xf32>
    %54 = arith.addf %47, %53 : vector<16x16x4xf32>
    %c1_52 = arith.constant 1 : index
    %c2_53 = arith.constant 2 : index
    %c0_54 = arith.constant 0 : index
    %55 = vector.load %arg13[%c1_52, %c2_53, %c0_54] : memref<18x18x4xf32, #tpu.memory_space<vmem>>, vector<16x16x4xf32>
    %c1_55 = arith.constant 1 : index
    %c2_56 = arith.constant 2 : index
    %c0_57 = arith.constant 0 : index
    %c0_58 = arith.constant 0 : index
    %56 = vector.load %arg5[%c1_55, %c2_56, %c0_57, %c0_58] : memref<3x3x1x4xf32, #tpu.memory_space<vmem>>, vector<1x1x1x4xf32>
    %57 = vector.shape_cast %56 : vector<1x1x1x4xf32> to vector<1x4xf32>
    %58 = vector.shape_cast %57 : vector<1x4xf32> to vector<1x1x4xf32>
    %59 = vector.broadcast %58 : vector<1x1x4xf32> to vector<16x16x4xf32>
    %60 = arith.mulf %55, %59 : vector<16x16x4xf32>
    %61 = arith.addf %54, %60 : vector<16x16x4xf32>
    %c2_59 = arith.constant 2 : index
    %c0_60 = arith.constant 0 : index
    %c0_61 = arith.constant 0 : index
    %62 = vector.load %arg13[%c2_59, %c0_60, %c0_61] : memref<18x18x4xf32, #tpu.memory_space<vmem>>, vector<16x16x4xf32>
    %c2_62 = arith.constant 2 : index
    %c0_63 = arith.constant 0 : index
    %c0_64 = arith.constant 0 : index
    %c0_65 = arith.constant 0 : index
    %63 = vector.load %arg5[%c2_62, %c0_63, %c0_64, %c0_65] : memref<3x3x1x4xf32, #tpu.memory_space<vmem>>, vector<1x1x1x4xf32>
    %64 = vector.shape_cast %63 : vector<1x1x1x4xf32> to vector<1x4xf32>
    %65 = vector.shape_cast %64 : vector<1x4xf32> to vector<1x1x4xf32>
    %66 = vector.broadcast %65 : vector<1x1x4xf32> to vector<16x16x4xf32>
    %67 = arith.mulf %62, %66 : vector<16x16x4xf32>
    %68 = arith.addf %61, %67 : vector<16x16x4xf32>
    %c2_66 = arith.constant 2 : index
    %c1_67 = arith.constant 1 : index
    %c0_68 = arith.constant 0 : index
    %69 = vector.load %arg13[%c2_66, %c1_67, %c0_68] : memref<18x18x4xf32, #tpu.memory_space<vmem>>, vector<16x16x4xf32>
    %c2_69 = arith.constant 2 : index
    %c1_70 = arith.constant 1 : index
    %c0_71 = arith.constant 0 : index
    %c0_72 = arith.constant 0 : index
    %70 = vector.load %arg5[%c2_69, %c1_70, %c0_71, %c0_72] : memref<3x3x1x4xf32, #tpu.memory_space<vmem>>, vector<1x1x1x4xf32>
    %71 = vector.shape_cast %70 : vector<1x1x1x4xf32> to vector<1x4xf32>
    %72 = vector.shape_cast %71 : vector<1x4xf32> to vector<1x1x4xf32>
    %73 = vector.broadcast %72 : vector<1x1x4xf32> to vector<16x16x4xf32>
    %74 = arith.mulf %69, %73 : vector<16x16x4xf32>
    %75 = arith.addf %68, %74 : vector<16x16x4xf32>
    %c2_73 = arith.constant 2 : index
    %c2_74 = arith.constant 2 : index
    %c0_75 = arith.constant 0 : index
    %76 = vector.load %arg13[%c2_73, %c2_74, %c0_75] : memref<18x18x4xf32, #tpu.memory_space<vmem>>, vector<16x16x4xf32>
    %c2_76 = arith.constant 2 : index
    %c2_77 = arith.constant 2 : index
    %c0_78 = arith.constant 0 : index
    %c0_79 = arith.constant 0 : index
    %77 = vector.load %arg5[%c2_76, %c2_77, %c0_78, %c0_79] : memref<3x3x1x4xf32, #tpu.memory_space<vmem>>, vector<1x1x1x4xf32>
    %78 = vector.shape_cast %77 : vector<1x1x1x4xf32> to vector<1x4xf32>
    %79 = vector.shape_cast %78 : vector<1x4xf32> to vector<1x1x4xf32>
    %80 = vector.broadcast %79 : vector<1x1x4xf32> to vector<16x16x4xf32>
    %81 = arith.mulf %76, %80 : vector<16x16x4xf32>
    %82 = arith.addf %75, %81 : vector<16x16x4xf32>
    %c0_80 = arith.constant 0 : index
    %c0_81 = arith.constant 0 : index
    %83 = vector.load %arg6[%c0_80, %c0_81] : memref<1x4xf32, #tpu.memory_space<vmem>>, vector<1x4xf32>
    %84 = vector.shape_cast %83 : vector<1x4xf32> to vector<1x1x4xf32>
    %85 = vector.broadcast %84 : vector<1x1x4xf32> to vector<16x16x4xf32>
    %86 = arith.addf %82, %85 : vector<16x16x4xf32>
    %87 = vector.shape_cast %86 : vector<16x16x4xf32> to vector<256x4xf32>
    %88 = arith.truncf %87 : vector<256x4xf32> to vector<256x4xbf16>
    %c0_82 = arith.constant 0 : index
    %c0_83 = arith.constant 0 : index
    %89 = vector.load %arg7[%c0_82, %c0_83] : memref<4x4xbf16, #tpu.memory_space<vmem>>, vector<4x4xbf16>
    %cst_84 = arith.constant dense<0.000000e+00> : vector<256x4xf32>
    %90 = tpu.matmul %88, %89, %cst_84 {dimension_numbers = #tpu.dot_dimension_numbers<[1], [0], [0], [1], [0, 0, 1, 1], [], []>} : vector<256x4xbf16>, vector<4x4xbf16>, vector<256x4xf32> -> vector<256x4xf32>
    %c0_85 = arith.constant 0 : index
    %c0_86 = arith.constant 0 : index
    %91 = vector.load %arg8[%c0_85, %c0_86] : memref<1x4xf32, #tpu.memory_space<vmem>>, vector<1x4xf32>
    %92 = vector.broadcast %91 : vector<1x4xf32> to vector<256x4xf32>
    %93 = arith.addf %90, %92 : vector<256x4xf32>
    %94 = vector.shape_cast %93 : vector<256x4xf32> to vector<1x16x16x4xf32>
    %95 = arith.truncf %94 : vector<1x16x16x4xf32> to vector<1x16x16x4xbf16>
    %c0_87 = arith.constant 0 : index
    %c0_88 = arith.constant 0 : index
    %c0_89 = arith.constant 0 : index
    %c0_90 = arith.constant 0 : index
    %96 = vector.load %arg10[%c0_87, %c0_88, %c0_89, %c0_90] : memref<1x16x16x4xbf16, #tpu.memory_space<vmem>>, vector<1x16x16x4xbf16>
    tpu.vector_store %arg10[%c0_87, %c0_88, %c0_89, %c0_90], %95 {strides = array<i32>} : memref<1x16x16x4xbf16, #tpu.memory_space<vmem>>, vector<1x16x16x4xbf16>,
    %c0_91 = arith.constant 0 : index
    %c0_92 = arith.constant 0 : index
    %97 = vector.load %arg9[%c0_91, %c0_92] : memref<1x4xf32, #tpu.memory_space<vmem>>, vector<1x4xf32>
    %98 = vector.broadcast %97 : vector<1x4xf32> to vector<256x4xf32>
    %99 = arith.subf %93, %98 : vector<256x4xf32>
    %cst_93 = arith.constant dense<0.000000e+00> : vector<4xf32>
    %100 = vector.multi_reduction <add>, %99, %cst_93 [0] : vector<256x4xf32> to vector<4xf32>
    %101 = vector.shape_cast %100 : vector<4xf32> to vector<1x4xf32>
    %102 = vector.shape_cast %101 : vector<1x4xf32> to vector<1x1x4xf32>
    %c0_94 = arith.constant 0 : index
    %c0_95 = arith.constant 0 : index
    %c0_96 = arith.constant 0 : index
    %103 = vector.load %arg11[%c0_94, %c0_95, %c0_96] : memref<1x1x4xf32, #tpu.memory_space<vmem>>, vector<1x1x4xf32>
    tpu.vector_store %arg11[%c0_94, %c0_95, %c0_96], %102 {strides = array<i32>} : memref<1x1x4xf32, #tpu.memory_space<vmem>>, vector<1x1x4xf32>,
    %104 = arith.mulf %99, %99 : vector<256x4xf32>
    %cst_97 = arith.constant dense<0.000000e+00> : vector<4xf32>
    %105 = vector.multi_reduction <add>, %104, %cst_97 [0] : vector<256x4xf32> to vector<4xf32>
    %106 = vector.shape_cast %105 : vector<4xf32> to vector<1x4xf32>
    %107 = vector.shape_cast %106 : vector<1x4xf32> to vector<1x1x4xf32>
    %c0_98 = arith.constant 0 : index
    %c0_99 = arith.constant 0 : index
    %c0_100 = arith.constant 0 : index
    %108 = vector.load %arg12[%c0_98, %c0_99, %c0_100] : memref<1x1x4xf32, #tpu.memory_space<vmem>>, vector<1x1x4xf32>
    tpu.vector_store %arg12[%c0_98, %c0_99, %c0_100], %107 {strides = array<i32>} : memref<1x1x4xf32, #tpu.memory_space<vmem>>, vector<1x1x4xf32>,
    return
  }
  func.func @transform_0(%arg0: i32) -> (i32, i32, i32, i32) {
    %c0_i32 = arith.constant 0 : i32
    %c0_i32_0 = arith.constant 0 : i32
    %c0_i32_1 = arith.constant 0 : i32
    %c0_i32_2 = arith.constant 0 : i32
    return %arg0, %c0_i32, %c0_i32_0, %c0_i32_1 : i32, i32, i32, i32
  }
  func.func @transform_1(%arg0: i32) -> (i32, i32) {
    %c0_i32 = arith.constant 0 : i32
    %c0_i32_0 = arith.constant 0 : i32
    %c0_i32_1 = arith.constant 0 : i32
    return %c0_i32, %c0_i32_0 : i32, i32
  }
  func.func @transform_2(%arg0: i32) -> (i32, i32) {
    %c0_i32 = arith.constant 0 : i32
    %c0_i32_0 = arith.constant 0 : i32
    %c0_i32_1 = arith.constant 0 : i32
    return %c0_i32, %c0_i32_0 : i32, i32
  }
  func.func @transform_3(%arg0: i32) -> (i32, i32, i32, i32) {
    %c0_i32 = arith.constant 0 : i32
    %c0_i32_0 = arith.constant 0 : i32
    %c0_i32_1 = arith.constant 0 : i32
    %c0_i32_2 = arith.constant 0 : i32
    return %arg0, %c0_i32, %c0_i32_0, %c0_i32_1 : i32, i32, i32, i32
  }
  func.func @transform_4(%arg0: i32) -> (i32, i32, i32, i32) {
    %c0_i32 = arith.constant 0 : i32
    %c0_i32_0 = arith.constant 0 : i32
    %c0_i32_1 = arith.constant 0 : i32
    %c0_i32_2 = arith.constant 0 : i32
    %c0_i32_3 = arith.constant 0 : i32
    return %c0_i32, %c0_i32_0, %c0_i32_1, %c0_i32_2 : i32, i32, i32, i32
  }
  func.func @transform_5(%arg0: i32) -> (i32, i32) {
    %c0_i32 = arith.constant 0 : i32
    %c0_i32_0 = arith.constant 0 : i32
    %c0_i32_1 = arith.constant 0 : i32
    return %c0_i32, %c0_i32_0 : i32, i32
  }
  func.func @transform_6(%arg0: i32) -> (i32, i32) {
    %c0_i32 = arith.constant 0 : i32
    %c0_i32_0 = arith.constant 0 : i32
    %c0_i32_1 = arith.constant 0 : i32
    return %c0_i32, %c0_i32_0 : i32, i32
  }
  func.func @transform_7(%arg0: i32) -> (i32, i32) {
    %c0_i32 = arith.constant 0 : i32
    %c0_i32_0 = arith.constant 0 : i32
    %c0_i32_1 = arith.constant 0 : i32
    return %c0_i32, %c0_i32_0 : i32, i32
  }
  func.func @transform_8(%arg0: i32) -> (i32, i32) {
    %c0_i32 = arith.constant 0 : i32
    %c0_i32_0 = arith.constant 0 : i32
    %c0_i32_1 = arith.constant 0 : i32
    return %c0_i32, %c0_i32_0 : i32, i32
  }
  func.func @transform_9(%arg0: i32) -> (i32, i32, i32, i32) {
    %c0_i32 = arith.constant 0 : i32
    %c0_i32_0 = arith.constant 0 : i32
    %c0_i32_1 = arith.constant 0 : i32
    %c0_i32_2 = arith.constant 0 : i32
    return %arg0, %c0_i32, %c0_i32_0, %c0_i32_1 : i32, i32, i32, i32
  }
  func.func @transform_10(%arg0: i32) -> (i32, i32, i32) {
    %c0_i32 = arith.constant 0 : i32
    %c0_i32_0 = arith.constant 0 : i32
    %c0_i32_1 = arith.constant 0 : i32
    return %arg0, %c0_i32, %c0_i32_0 : i32, i32, i32
  }
  func.func @transform_11(%arg0: i32) -> (i32, i32, i32) {
    %c0_i32 = arith.constant 0 : i32
    %c0_i32_0 = arith.constant 0 : i32
    %c0_i32_1 = arith.constant 0 : i32
    return %arg0, %c0_i32, %c0_i32_0 : i32, i32, i32
  }
}

</mosaic_0001>

<bundles_post_ra>
// kernel: recurrent_block_forward.7
= control target key start
LH: loop header
LB: loop body
LE: loop exit
PB: predicated region body
PF: predicated region fallthrough
CT: control target
= control target key end

     0   :  { %8 = vsyncpa [#allocation3], 0  ;;  %s1271_s0 = inlined_call_operand.hbm [shape: bf16[2,16,16,4], index: 0, kind: input, shape index: {}]   ;;  %s1272_s1 = inlined_call_operand.hbm [shape: f32[1,4], index: 1, kind: input, shape index: {}]   ;;  %s1273_s2 = inlined_call_operand.hbm [shape: f32[1,4], index: 2, kind: input, shape index: {}]   ;;  %s1274_s3 = inlined_call_operand.hbm [shape: f32[2,16,16,4], index: 3, kind: output, shape index: {}]  }
   0x1   :  { %10 = vsyncpa [#allocation3 + $0x1], 0 }
   0x2   :  { %11 = vsyncpa [#allocation6], 0 }
   0x3   :  { %12 = vsyncpa [#allocation4], 0 }
   0x4   :  { %14 = vsyncpa [#allocation4 + $0x1], 0  ;;  %s885_s12 = smov 0   ;;  %s887_s13 = smov 0  }
   0x5   :  { %s889_s14 = smov 0   ;;  %s891_s15 = smov 0  }
   0x6 LB: > { %s906_s16 = sadd.s32 4294967295, %s855_s15   ;;  %s527_s17 = sadd.s32 4294967294, %s855_s15   ;;  %s855_s15 = sphi %s891_s15, %s1299_s15   ;;  %s851_s14 = sphi %s889_s14, %s1298_s14   ;;  %s847_s13 = sphi %s887_s13, %s1297_s13   ;;  %s843_s12 = sphi %s885_s12, %s1296_s12  }
   0x7   : > { %s910_s18 = sadd.s32 1, %s855_s15   ;;  %s27_s19 = sadd.s32 1, %s851_s14 }
   0x8   : > { %s24_s20 = ssub.s32 %s855_s15, %s910_s18  ;;  %p34_p0 = scmp.ne.s32.totalorder %s851_s14, %s847_s13 }
   0x9   : > { %p25_p1 = scmp.eq.s32.totalorder %s24_s20, 0  ;;  %p35_p2 = scmp.eq.s32.totalorder %s855_s15, 0 }
   0xa   : > { %p40_p3 = scmp.ne.s32.totalorder %s847_s13, %s843_s12  ;;  %p1275_p4 = scmp.eq.s32.totalorder %s906_s16, 0 }
   0xb   : > { %s922_s21 = scalar_select %p25_p1, %s851_s14, %s27_s19  }
   0xc   : > { %p924_p5 = por %p35_p2, %p34_p0  ;;  %p930_p6 = por %p1275_p4, %p40_p3 }
   0xd   : > { %p106_p7 = scmp.eq.s32.totalorder %s906_s16, 1  ;;  %p112_p8 = scmp.eq.s32.totalorder %s527_s17, 1 }
   0xe   : > { %s1281_s23 = scalar_select %p930_p6, 1, 0 }
   0xf   : > { %p528_p9 = scmp.ge.s32.totalorder %s855_s15, 1  ;;  %p119_p10 = scmp.lt.s32.totalorder %s855_s15, 3 }
  0x10   : > { %p937_p11 = por %p106_p7, %p34_p0  ;;  %p941_p12 = por %p112_p8, %p40_p3 }
  0x11   : > { %p945_p13 = pnand %p528_p9, %p119_p10  ;;  %s857_s27 = smov [#allocation5]  }
  0x12   : > { %s1282_s24 = scalar_select %p937_p11, 1, 0 }
  0x13   : > { %s1283_s25 = scalar_select %p941_p12, 1, 0 }
  0x14   : > { %s1284_s26 = scalar_select %p945_p13, 1, 0 }
  0x15   : > { %p640_p2 = pneg %p945_p13  ;;  %s132_s28 = sshll.u32 %s857_s27, 4  ;;  %s133_s28 = int_to_ptr.vmem [resolvable:$true] %s132_s28 }
  0x16   : > { %p657_p4 = scmp.lt.s32.totalorder %s855_s15, 2  ;;  %p1285_p0 = scmp.eq.s32.totalorder %s906_s16, 0 }
  0x17   : > { %s858_s4 = smov [#allocation7]   ;;  %s699_s8 = scalar_lea.hbm %s1272_s1, 16 }
  0x18   : > { %p955_p7 = pnand %p640_p2, %p1285_p0  ;;  %p961_p3 = pnand %p657_p4, %p924_p5 }
  0x19   : > { %s143_s5 = sshll.u32 %s858_s4, 4  ;;  %p700_p8 = scmp.ne.s32.totalorder %s1272_s1, %s699_s8  ;;  %s965_s5 = int_to_ptr.vmem [resolvable:$true] %s143_s5 }
  0x1a   : > { %s1287_s30 = scalar_select %p961_p3, 1, 0 }
  0x1b   : > { %p701_p9 = pneg %p955_p7  ;;  %p706_p10 = scmp.lt.u32.totalorder %s699_s8, %s1272_s1 }
  0x1d   : > { %p702_p4 = pnand %p701_p9, %p700_p8 }
  0x1f   : > { %p703_p5 = pneg %p702_p4 }
  0x21   : > { %p708_p2 = pnand %p706_p10, %p703_p5 }
  0x23   : > { %711 = shalt.err (!%p708_p2)
}
  0x24   : > { %s712_s19 = scalar_lea.vmem %s133_s28, 16  ;;  %s719_s20 = scalar_lea.vmem %s133_s28, 32 }
  0x25   : > { %p713_p0 = scmp.ne.s32.totalorder %s133_s28, %s712_s19  ;;  %p720_p11 = scmp.lt.s32.totalorder %s133_s28, %s133_s28 }
  0x26   : > { %p721_p6 = scmp.lt.s32.totalorder %s719_s20, %s712_s19 }
  0x27   : > { %p715_p1 = pnand %p713_p0, %p701_p9 }
  0x28   : > { %p722_p13 = por %p721_p6, %p720_p11 }
  0x29   : > { %p716_p12 = pneg %p715_p1 }
  0x2b   : > { %p723_p3 = pnand %p722_p13, %p716_p12 }
  0x2d   : > { %726 = shalt.err (!%p723_p3)
}
  0x2e   : > { %643 = dma.hbm_to_vmem [thread:$0]  (!%p955_p7), %s1272_s1, 16, %s133_s28, [#allocation6]  }
  0x2f   : > { %s154_s4 = sand.u32 1, %s851_s14   ;;  %s727_s8 = scalar_lea.hbm %s1273_s2, 16 }
  0x30   : > { %p728_p1 = scmp.ne.s32.totalorder %s1273_s2, %s727_s8  ;;  %p734_p12 = scmp.lt.u32.totalorder %s727_s8, %s1273_s2 }
  0x32   : > { %p730_p6 = pnand %p728_p1, %p701_p9 }
  0x34   : > { %p731_p11 = pneg %p730_p6 }
  0x36   : > { %p736_p13 = pnand %p734_p12, %p731_p11 }
  0x38   : > { %739 = shalt.err (!%p736_p13)
}
  0x39   : > { %s740_s28 = scalar_lea.vmem %s965_s5, 16  ;;  %s747_s19 = scalar_lea.vmem %s965_s5, 32 }
  0x3a   : > { %p741_p3 = scmp.ne.s32.totalorder %s965_s5, %s740_s28  ;;  %p748_p5 = scmp.lt.s32.totalorder %s965_s5, %s965_s5 }
  0x3b   : > { %p749_p10 = scmp.lt.s32.totalorder %s747_s19, %s740_s28 }
  0x3c   : > { %p743_p8 = pnand %p741_p3, %p701_p9 }
  0x3d   : > { %p750_p2 = por %p749_p10, %p748_p5 }
  0x3e   : > { %p744_p4 = pneg %p743_p8 }
  0x40   : > { %p751_p0 = pnand %p750_p2, %p744_p4 }
  0x42   : > { %754 = shalt.err (!%p751_p0)
}
  0x43   : > { %646 = dma.hbm_to_vmem [thread:$0]  (!%p955_p7), %s1273_s2, 16, %s965_s5, [#allocation6]  }
  0x44   : > { %s532_s27 = sshll.u32 %s154_s4, 7  ;;  %s547_s6 = sshll.u32 %s855_s15, 11 }
  0x45   : > { %s1020_s9 = scalar_lea.hbm %s1271_s0, %s547_s6  ;;  %s158_s29 = scalar_lea.vmem [#allocation2], %s532_s27 }
  0x46   : > { %s165_s10 = sshll.u32 %s158_s29, 4  ;;  %s1024_s11 = scalar_lea.sflag [#allocation3], %s154_s4  ;;  %s1022_s10 = int_to_ptr.vmem [resolvable:$true] %s165_s10 }
  0x47   : > { %s755_s17 = scalar_lea.hbm %s1020_s9, 2048  ;;  %p1288_p7 = scmp.ne.s32.totalorder %s1287_s30, 0 }
  0x48   : > { %p756_p9 = scmp.ne.s32.totalorder %s1020_s9, %s755_s17  ;;  %s760_s19 = scalar_lea.hbm %s1271_s0, 4096 }
  0x49   : > { %p757_p1 = pneg %p1288_p7  ;;  %p761_p12 = scmp.lt.u32.totalorder %s1020_s9, %s1271_s0 }
  0x4a   : > { %p762_p13 = scmp.lt.u32.totalorder %s760_s19, %s755_s17  ;;  %p764_p8 = scmp.lt.u32.totalorder %s755_s17, %s1020_s9 }
  0x4b   : > { %p758_p6 = pnand %p757_p1, %p756_p9 }
  0x4c   : > { %p763_p3 = por %p762_p13, %p761_p12 }
  0x4d   : > { %p759_p11 = pneg %p758_p6 }
  0x4e   : > { %p765_p4 = por %p764_p8, %p763_p3 }
  0x50   : > { %p766_p5 = pnand %p765_p4, %p759_p11 }
  0x52   : > { %769 = shalt.err (!%p766_p5)
}
  0x53   : > { %s770_s4 = scalar_lea.vmem %s1022_s10, 2048  ;;  %s859_s27 = smov [#allocation2]  }
  0x54   : > { %p771_p10 = scmp.ne.s32.totalorder %s1022_s10, %s770_s4  ;;  %s775_s6 = sshll.u32 %s859_s27, 4  ;;  %s776_s6 = int_to_ptr.vmem [resolvable:$false] %s775_s6 }
  0x55   : > { %s777_s7 = scalar_lea.vmem %s776_s6, 4096  ;;  %p778_p9 = scmp.lt.s32.totalorder %s1022_s10, %s776_s6 }
  0x56   : > { %p773_p2 = pnand %p771_p10, %p757_p1  ;;  %p779_p6 = scmp.lt.s32.totalorder %s777_s7, %s770_s4 }
  0x58   : > { %p774_p0 = pneg %p773_p2  ;;  %p780_p12 = por %p779_p6, %p778_p9 }
  0x5a   : > { %p781_p13 = pnand %p780_p12, %p774_p0 }
  0x5c   : > { %784 = shalt.err (!%p781_p13)
}
  0x5d   : > { %s860_s8 = smov 64   ;;  %s861_s29 = smov 4  }
  0x5e   : > { %650 = dma.hbm_to_vmem [thread:$0]  (!%p1288_p7), %s1020_s9, 2048, %s1022_s10, %s1024_s11, %s860_s8, %s860_s8, %s861_s29  }
  0x5f   : > { %p1289_p1 = scmp.ne.s32.totalorder %s1284_s26, 0 }
  0x60   : > { %s1055_s17 = sand.u32 (!%p1289_p1), 1, %s847_s13   ;;  %p1290_p11 = scmp.ne.s32.totalorder (!%p1289_p1), %s1281_s23, 0 }
  0x61   : > { %177 = sbr.rel (%p1289_p1) target bundleno = 158 (0x9e), region = 32  ;;  %s536_s5 = sshll.u32 (!%p1289_p1), %s1055_s17, 7 }
  0x62   : > { %s180_s28 = scalar_lea.sflag (!%p1289_p1), [#allocation3], %s1055_s17  ;;  %s1059_s19 = scalar_lea.vmem (!%p1289_p1), [#allocation2], %s536_s5 }
  0x68   : > { %830 = dma.done.wait (%p1290_p11), %s180_s28, 2048  }
  0x69   : > { %832 = vsyncadd (%p1290_p11), %s180_s28, 4294965248  ;;  %p1291_p7 = scmp.eq.s32.totalorder %s906_s16, 0 }
  0x6b   : > { %834 = dma.done.wait (%p1291_p7), [#allocation6], 32   ;;  %p1292_p3 = pmov %p1291_p7 }
  0x6c   : > { %v550_v0 = vld [vmem:[%s1059_s19] sm:$0xff]   ;;  %vm388_vm0 = vcmask 31744   ;;  %v613_v4 = vld [vmem:[%s1059_s19 + $0x8] sm:$0xff]   ;;  %v614_v5 = vld [vmem:[%s1059_s19 + $0x10] sm:$0xff]   ;;  %s539_s23 = sshll.u32 %s1055_s17, 8  ;;  %s548_s30 = sshll.u32 %s906_s16, 12 }
  0x6d   : > { %836 = vsyncadd (%p1292_p3), [#allocation6], 4294967264  ;;  %v1070_v1 = vld [vmem:[#allocation5] ss:$0 sm:$0xff]  ;;  %v551_v2 = vunpack.c.l.bf16 %v550_v0  ;;  %v552_v3 = vunpack.c.h.bf16 %v550_v0  ;;  %v615_v6 = vld [vmem:[%s1059_s19 + $0x18] sm:$0xff]   ;;  %v555_v8 = vunpack.c.l.bf16 %v613_v4  ;;  %v556_v9 = vunpack.c.h.bf16 %v613_v4  ;;  %s1098_s26 = scalar_lea.vmem [#allocation8], %s539_s23  ;;  %s1209_s11 = scalar_lea.hbm %s1274_s3, %s548_s30 }
  0x6e   : > { %v1075_v7 = vld [vmem:[#allocation7] ss:$0 sm:$0xff]  ;;  %v559_v10 = vunpack.c.l.bf16 %v614_v5  ;;  %v560_v11 = vunpack.c.h.bf16 %v614_v5  ;;  %v563_v14 = vunpack.c.l.bf16 %v615_v6  ;;  %v564_v15 = vunpack.c.h.bf16 %v615_v6  ;;  %v617_v33 = vld [vmem:[%s1059_s19 + $0x28] sm:$0xff]   ;;  %v618_v34 = vld [vmem:[%s1059_s19 + $0x30] sm:$0xff]   ;;  %s435_s9 = sshll.u32 %s1098_s26, 4  ;;  %s422_s20 = scalar_lea.sflag [#allocation4], %s1055_s17  ;;  %s1211_s9 = int_to_ptr.vmem [resolvable:$true] %s435_s9 }
  0x6f   : > { %v285_v12 = vmul.f32 %v551_v2, %v1070_v1  ;;  %v286_v13 = vmul.f32 %v552_v3, %v1070_v1  ;;  %v287_v16 = vmul.f32 %v555_v8, %v1070_v1  ;;  %v288_v17 = vmul.f32 %v556_v9, %v1070_v1  ;;  %v616_v28 = vld [vmem:[%s1059_s19 + $0x20] sm:$0xff]   ;;  %v619_v39 = vld [vmem:[%s1059_s19 + $0x38] sm:$0xff]   ;;  %v621_v6 = vld [vmem:[%s1059_s19 + $0x48] sm:$0xff]   ;;  %s785_s22 = scalar_lea.vmem %s1211_s9, 4096  ;;  %p1293_p4 = scmp.ne.s32.totalorder %s1282_s24, 0 }
  0x70   : > { %v289_v18 = vmul.f32 %v559_v10, %v1070_v1  ;;  %v290_v19 = vmul.f32 %v560_v11, %v1070_v1  ;;  %v291_v22 = vmul.f32 %v563_v14, %v1070_v1  ;;  %v292_v23 = vmul.f32 %v564_v15, %v1070_v1  ;;  %v620_v0 = vld [vmem:[%s1059_s19 + $0x40] sm:$0xff]   ;;  %v622_v8 = vld [vmem:[%s1059_s19 + $0x50] sm:$0xff]   ;;  %p786_p8 = scmp.ne.s32.totalorder %s1211_s9, %s785_s22  ;;  %s862_s4 = smov [#allocation8]  }
  0x71   : > { %v324_v20 = vadd.f32 %v1075_v7, %v285_v12  ;;  %v325_v21 = vadd.f32 %v1075_v7, %v286_v13  ;;  %v326_v24 = vadd.f32 %v1075_v7, %v287_v16  ;;  %v327_v25 = vadd.f32 %v1075_v7, %v288_v17  ;;  %v623_v13 = vld [vmem:[%s1059_s19 + $0x58] sm:$0xff]   ;;  %s789_s27 = sshll.u32 %s862_s4, 4  ;;  %s790_s27 = int_to_ptr.vmem [resolvable:$false] %s789_s27 }
  0x72   : > { %v328_v26 = vadd.f32 %v1075_v7, %v289_v18  ;;  %v329_v27 = vadd.f32 %v1075_v7, %v290_v19  ;;  %v330_v31 = vadd.f32 %v1075_v7, %v291_v22  ;;  %v331_v32 = vadd.f32 %v1075_v7, %v292_v23  ;;  %p787_p5 = pnand %p786_p8, %p1293_p4  ;;  %s791_s6 = scalar_lea.vmem %s790_s27, 8192 }
  0x73   : > { %v356_v29 = vmax.f32 %v324_v20, 0.0  ;;  %v357_v30 = vmax.f32 %v325_v21, 0.0  ;;  %v358_v35 = vmax.f32 %v326_v24, 0.0  ;;  %v359_v36 = vmax.f32 %v327_v25, 0.0  ;;  %p792_p2 = scmp.lt.s32.totalorder %s1211_s9, %s790_s27  ;;  %p793_p0 = scmp.lt.s32.totalorder %s791_s6, %s785_s22 }
  0x74   : > { %v360_v37 = vmax.f32 %v328_v26, 0.0  ;;  %v361_v38 = vmax.f32 %v329_v27, 0.0  ;;  %v362_v40 = vmax.f32 %v330_v31, 0.0  ;;  %v363_v41 = vmax.f32 %v331_v32, 0.0  ;;  %p788_p10 = pneg %p787_p5 }
  0x75   : > { %389 = vst.msk [vmem:[%s1098_s26] sm:$0xff] %vm388_vm0, %v356_v29  ;;  %390 = vst.msk [vmem:[%s1098_s26 + $0x8] sm:$0xff] %vm388_vm0, %v357_v30  ;;  %v567_v42 = vunpack.c.l.bf16 %v616_v28  ;;  %v568_v43 = vunpack.c.h.bf16 %v616_v28  ;;  %v571_v44 = vunpack.c.l.bf16 %v617_v33  ;;  %v572_v45 = vunpack.c.h.bf16 %v617_v33  ;;  %p794_p9 = por %p793_p0, %p792_p2 }
  0x76   : > { %391 = vst.msk [vmem:[%s1098_s26 + $0x10] sm:$0xff] %vm388_vm0, %v358_v35  ;;  %392 = vst.msk [vmem:[%s1098_s26 + $0x18] sm:$0xff] %vm388_vm0, %v359_v36  ;;  %v575_v46 = vunpack.c.l.bf16 %v618_v34  ;;  %v576_v47 = vunpack.c.h.bf16 %v618_v34  ;;  %v579_v50 = vunpack.c.l.bf16 %v619_v39  ;;  %v580_v51 = vunpack.c.h.bf16 %v619_v39 }
  0x77   : > { %393 = vst.msk [vmem:[%s1098_s26 + $0x20] sm:$0xff] %vm388_vm0, %v360_v37  ;;  %394 = vst.msk [vmem:[%s1098_s26 + $0x28] sm:$0xff] %vm388_vm0, %v361_v38  ;;  %v293_v48 = vmul.f32 %v567_v42, %v1070_v1  ;;  %v294_v49 = vmul.f32 %v568_v43, %v1070_v1  ;;  %v295_v52 = vmul.f32 %v571_v44, %v1070_v1  ;;  %v583_v16 = vunpack.c.l.bf16 %v620_v0  ;;  %v624_v38 = vld [vmem:[%s1059_s19 + $0x60] sm:$0xff]   ;;  %v625_v43 = vld [vmem:[%s1059_s19 + $0x68] sm:$0xff]   ;;  %p795_p6 = pnand %p794_p9, %p788_p10 }
  0x78   : > { %395 = vst.msk [vmem:[%s1098_s26 + $0x30] sm:$0xff] %vm388_vm0, %v362_v40  ;;  %396 = vst.msk [vmem:[%s1098_s26 + $0x38] sm:$0xff] %vm388_vm0, %v363_v41  ;;  %v296_v53 = vmul.f32 %v572_v45, %v1070_v1  ;;  %v297_v54 = vmul.f32 %v575_v46, %v1070_v1  ;;  %v298_v55 = vmul.f32 %v576_v47, %v1070_v1  ;;  %v584_v17 = vunpack.c.h.bf16 %v620_v0  ;;  %v626_v44 = vld [vmem:[%s1059_s19 + $0x70] sm:$0xff]  }
  0x79   : > { %v332_v56 = vadd.f32 %v1075_v7, %v293_v48  ;;  %v333_v57 = vadd.f32 %v1075_v7, %v294_v49  ;;  %v299_v58 = vmul.f32 %v579_v50, %v1070_v1  ;;  %v300_v59 = vmul.f32 %v580_v51, %v1070_v1  ;;  %v627_v49 = vld [vmem:[%s1059_s19 + $0x78] sm:$0xff]  }
  0x7a   : > { %v334_v60 = vadd.f32 %v1075_v7, %v295_v52  ;;  %v335_v61 = vadd.f32 %v1075_v7, %v296_v53  ;;  %v336_v62 = vadd.f32 %v1075_v7, %v297_v54  ;;  %v337_v63 = vadd.f32 %v1075_v7, %v298_v55 }
  0x7b   : > { %v364_v2 = vmax.f32 %v332_v56, 0.0  ;;  %v365_v3 = vmax.f32 %v333_v57, 0.0  ;;  %v338_v4 = vadd.f32 %v1075_v7, %v299_v58  ;;  %v339_v5 = vadd.f32 %v1075_v7, %v300_v59 }
  0x7c   : > { %v366_v9 = vmax.f32 %v334_v60, 0.0  ;;  %v367_v10 = vmax.f32 %v335_v61, 0.0  ;;  %v368_v11 = vmax.f32 %v336_v62, 0.0  ;;  %v369_v12 = vmax.f32 %v337_v63, 0.0 }
  0x7d   : > { %397 = vst.msk [vmem:[%s1098_s26 + $0x40] sm:$0xff] %vm388_vm0, %v364_v2  ;;  %398 = vst.msk [vmem:[%s1098_s26 + $0x48] sm:$0xff] %vm388_vm0, %v365_v3  ;;  %v370_v14 = vmax.f32 %v338_v4, 0.0  ;;  %v371_v15 = vmax.f32 %v339_v5, 0.0  ;;  %v587_v18 = vunpack.c.l.bf16 %v621_v6  ;;  %v588_v19 = vunpack.c.h.bf16 %v621_v6 }
  0x7e   : > { %399 = vst.msk [vmem:[%s1098_s26 + $0x50] sm:$0xff] %vm388_vm0, %v366_v9  ;;  %400 = vst.msk [vmem:[%s1098_s26 + $0x58] sm:$0xff] %vm388_vm0, %v367_v10  ;;  %v591_v20 = vunpack.c.l.bf16 %v622_v8  ;;  %v592_v21 = vunpack.c.h.bf16 %v622_v8  ;;  %v301_v22 = vmul.f32 %v583_v16, %v1070_v1  ;;  %v302_v23 = vmul.f32 %v584_v17, %v1070_v1 }
  0x7f   : > { %401 = vst.msk [vmem:[%s1098_s26 + $0x60] sm:$0xff] %vm388_vm0, %v368_v11  ;;  %402 = vst.msk [vmem:[%s1098_s26 + $0x68] sm:$0xff] %vm388_vm0, %v369_v12  ;;  %v595_v24 = vunpack.c.l.bf16 %v623_v13  ;;  %v596_v25 = vunpack.c.h.bf16 %v623_v13  ;;  %v303_v26 = vmul.f32 %v587_v18, %v1070_v1  ;;  %v304_v27 = vmul.f32 %v588_v19, %v1070_v1 }
  0x80   : > { %403 = vst.msk [vmem:[%s1098_s26 + $0x70] sm:$0xff] %vm388_vm0, %v370_v14  ;;  %404 = vst.msk [vmem:[%s1098_s26 + $0x78] sm:$0xff] %vm388_vm0, %v371_v15  ;;  %v305_v28 = vmul.f32 %v591_v20, %v1070_v1  ;;  %v306_v29 = vmul.f32 %v592_v21, %v1070_v1  ;;  %v340_v30 = vadd.f32 %v1075_v7, %v301_v22  ;;  %v599_v52 = vunpack.c.l.bf16 %v624_v38 }
  0x81   : > { %v341_v31 = vadd.f32 %v1075_v7, %v302_v23  ;;  %v307_v32 = vmul.f32 %v595_v24, %v1070_v1  ;;  %v308_v33 = vmul.f32 %v596_v25, %v1070_v1  ;;  %v342_v34 = vadd.f32 %v1075_v7, %v303_v26 }
  0x82   : > { %v343_v35 = vadd.f32 %v1075_v7, %v304_v27  ;;  %v344_v36 = vadd.f32 %v1075_v7, %v305_v28  ;;  %v345_v37 = vadd.f32 %v1075_v7, %v306_v29  ;;  %v372_v39 = vmax.f32 %v340_v30, 0.0 }
  0x83   : > { %v373_v40 = vmax.f32 %v341_v31, 0.0  ;;  %v346_v41 = vadd.f32 %v1075_v7, %v307_v32  ;;  %v347_v42 = vadd.f32 %v1075_v7, %v308_v33  ;;  %v374_v45 = vmax.f32 %v342_v34, 0.0 }
  0x84   : > { %v375_v46 = vmax.f32 %v343_v35, 0.0  ;;  %v376_v47 = vmax.f32 %v344_v36, 0.0  ;;  %v377_v48 = vmax.f32 %v345_v37, 0.0  ;;  %405 = vst.msk [vmem:[%s1098_s26 + $0x80] sm:$0xff] %vm388_vm0, %v372_v39  ;;  %v600_v53 = vunpack.c.h.bf16 %v624_v38 }
  0x85   : > { %406 = vst.msk [vmem:[%s1098_s26 + $0x88] sm:$0xff] %vm388_vm0, %v373_v40  ;;  %v378_v50 = vmax.f32 %v346_v41, 0.0  ;;  %v379_v51 = vmax.f32 %v347_v42, 0.0  ;;  %407 = vst.msk [vmem:[%s1098_s26 + $0x90] sm:$0xff] %vm388_vm0, %v374_v45  ;;  %v603_v54 = vunpack.c.l.bf16 %v625_v43  ;;  %v604_v55 = vunpack.c.h.bf16 %v625_v43 }
  0x86   : > { %408 = vst.msk [vmem:[%s1098_s26 + $0x98] sm:$0xff] %vm388_vm0, %v375_v46  ;;  %409 = vst.msk [vmem:[%s1098_s26 + $0xa0] sm:$0xff] %vm388_vm0, %v376_v47  ;;  %v607_v56 = vunpack.c.l.bf16 %v626_v44  ;;  %v608_v57 = vunpack.c.h.bf16 %v626_v44  ;;  %v309_v58 = vmul.f32 %v599_v52, %v1070_v1  ;;  %v310_v59 = vmul.f32 %v600_v53, %v1070_v1 }
  0x87   : > { %410 = vst.msk [vmem:[%s1098_s26 + $0xa8] sm:$0xff] %vm388_vm0, %v377_v48  ;;  %411 = vst.msk [vmem:[%s1098_s26 + $0xb0] sm:$0xff] %vm388_vm0, %v378_v50  ;;  %v611_v60 = vunpack.c.l.bf16 %v627_v49  ;;  %v612_v61 = vunpack.c.h.bf16 %v627_v49  ;;  %v311_v62 = vmul.f32 %v603_v54, %v1070_v1  ;;  %v312_v63 = vmul.f32 %v604_v55, %v1070_v1 }
  0x88   : > { %412 = vst.msk [vmem:[%s1098_s26 + $0xb8] sm:$0xff] %vm388_vm0, %v379_v51  ;;  %v313_v0 = vmul.f32 %v607_v56, %v1070_v1  ;;  %v314_v2 = vmul.f32 %v608_v57, %v1070_v1  ;;  %v348_v3 = vadd.f32 %v1075_v7, %v309_v58  ;;  %v349_v4 = vadd.f32 %v1075_v7, %v310_v59 }
  0x89   : > { %v315_v5 = vmul.f32 %v611_v60, %v1070_v1  ;;  %v316_v6 = vmul.f32 %v612_v61, %v1070_v1  ;;  %v350_v8 = vadd.f32 %v1075_v7, %v311_v62  ;;  %v351_v9 = vadd.f32 %v1075_v7, %v312_v63 }
  0x8a   : > { %v352_v10 = vadd.f32 %v1075_v7, %v313_v0  ;;  %v353_v11 = vadd.f32 %v1075_v7, %v314_v2  ;;  %v380_v12 = vmax.f32 %v348_v3, 0.0  ;;  %v381_v13 = vmax.f32 %v349_v4, 0.0 }
  0x8b   : > { %v354_v1 = vadd.f32 %v1075_v7, %v315_v5  ;;  %v355_v14 = vadd.f32 %v1075_v7, %v316_v6  ;;  %v382_v15 = vmax.f32 %v350_v8, 0.0  ;;  %v383_v16 = vmax.f32 %v351_v9, 0.0 }
  0x8c   : > { %v384_v17 = vmax.f32 %v352_v10, 0.0  ;;  %v385_v18 = vmax.f32 %v353_v11, 0.0  ;;  %413 = vst.msk [vmem:[%s1098_s26 + $0xc0] sm:$0xff] %vm388_vm0, %v380_v12  ;;  %414 = vst.msk [vmem:[%s1098_s26 + $0xc8] sm:$0xff] %vm388_vm0, %v381_v13 }
  0x8d   : > { %v386_v7 = vmax.f32 %v354_v1, 0.0  ;;  %v387_v19 = vmax.f32 %v355_v14, 0.0  ;;  %415 = vst.msk [vmem:[%s1098_s26 + $0xd0] sm:$0xff] %vm388_vm0, %v382_v15  ;;  %416 = vst.msk [vmem:[%s1098_s26 + $0xd8] sm:$0xff] %vm388_vm0, %v383_v16 }
  0x8e   : > { %417 = vst.msk [vmem:[%s1098_s26 + $0xe0] sm:$0xff] %vm388_vm0, %v384_v17  ;;  %418 = vst.msk [vmem:[%s1098_s26 + $0xe8] sm:$0xff] %vm388_vm0, %v385_v18 }
  0x8f   : > { %419 = vst.msk [vmem:[%s1098_s26 + $0xf0] sm:$0xff] %vm388_vm0, %v386_v7  ;;  %420 = vst.msk [vmem:[%s1098_s26 + $0xf8] sm:$0xff] %vm388_vm0, %v387_v19 }
  0x90   : > { %798 = shalt.err (!%p795_p6)
}
  0x91   : > { %s799_s7 = scalar_lea.hbm %s1209_s11, 4096  ;;  %s803_s5 = scalar_lea.hbm %s1274_s3, 8192 }
  0x92   : > { %p800_p12 = scmp.ne.s32.totalorder %s1209_s11, %s799_s7  ;;  %p804_p11 = scmp.lt.u32.totalorder %s1209_s11, %s1274_s3 }
  0x93   : > { %p805_p7 = scmp.lt.u32.totalorder %s803_s5, %s799_s7  ;;  %p807_p8 = scmp.lt.u32.totalorder %s799_s7, %s1209_s11 }
  0x94   : > { %p801_p13 = pnand %p800_p12, %p1293_p4 }
  0x95   : > { %p806_p3 = por %p805_p7, %p804_p11 }
  0x96   : > { %p802_p1 = pneg %p801_p13 }
  0x97   : > { %p808_p5 = por %p807_p8, %p806_p3 }
  0x99   : > { %p809_p10 = pnand %p808_p5, %p802_p1 }
  0x9b   : > { %812 = shalt.err (!%p809_p10)
}
  0x9c   : > { %s863_s23 = smov 128   ;;  %s864_s26 = smov 8  }
  0x9d   : > { %638 = dma.vmem_to_hbm [thread:$0]  (%p1293_p4), %s1211_s9, 4096, %s1209_s11, %s422_s20, %s863_s23, %s863_s23, %s864_s26  }
  0x9e PF: > { %s450_s30 = sand.u32 1, %s843_s12   ;;  %p1294_p2 = scmp.ne.s32.totalorder %s1283_s25, 0 }
  0x9f   : > { %p1295_p0 = scmp.ge.s32.totalorder %s855_s15, 2  ;;  %s451_s16 = scalar_lea.sflag [#allocation4], %s450_s30 }
  0xa1   : > { %p652_p9 = pnand %p1295_p0, %p1294_p2 }
  0xa3   : > { %838 = dma.done.wait (!%p652_p9), %s451_s16, 4096  }
  0xa4   : > { %840 = vsyncadd (!%p652_p9), %s451_s16, 4294963200  ;;  %p17_p6 = scmp.ge.s32.totalorder %s910_s18, 4   ;;  %s1296_s12 = smov %s847_s13 }
  0xa5   : > { %s1297_s13 = smov %s851_s14  ;;  %s1298_s14 = smov %s922_s21 }
  0xa6   : > { %s1299_s15 = smov %s910_s18  ;;  %19 = sbr.rel (!%p17_p6) target bundleno = 6 (0x6), region = 85 }
  0xad   :  { %456 = vsyncpa [#allocation3], 1 }
  0xae   :  { %458 = vsyncpa [#allocation3 + $0x1], 1 }
  0xaf   :  { %459 = vsyncpa [#allocation6], 1 }
  0xb0   :  { %460 = vsyncpa [#allocation4], 1 }
  0xb1   :  { %462 = vsyncpa [#allocation4 + $0x1], 1 }

// kernel: recurrent_block_forward.4
= control target key start
LH: loop header
LB: loop body
LE: loop exit
PB: predicated region body
PF: predicated region fallthrough
CT: control target
= control target key end

     0   :  { %s4378_s0 = inlined_call_operand.hbm [shape: f32[2,16,16,4], index: 0, kind: input, shape index: {}]   ;;  %s4379_s1 = inlined_call_operand.hbm [shape: f32[3,3,1,4], index: 1, kind: input, shape index: {}]   ;;  %s4380_s2 = inlined_call_operand.hbm [shape: f32[1,4], index: 2, kind: input, shape index: {}]   ;;  %s4381_s3 = inlined_call_operand.hbm [shape: bf16[4,4], index: 3, kind: input, shape index: {}]   ;;  %s4382_s4 = inlined_call_operand.hbm [shape: f32[1,4], index: 4, kind: input, shape index: {}]   ;;  %s4383_s5 = inlined_call_operand.hbm [shape: f32[1,4], index: 5, kind: input, shape index: {}]   ;;  %s4384_s6 = inlined_call_operand.hbm [shape: bf16[2,16,16,4], index: 6, kind: output, shape index: {0}]   ;;  %s4385_s7 = inlined_call_operand.hbm [shape: f32[2,1,4], index: 7, kind: output, shape index: {1}]   ;;  %s4386_s8 = inlined_call_operand.hbm [shape: f32[2,1,4], index: 8, kind: output, shape index: {2}]  }
   0x1   :  { %4392 = sst [smem:[#allocation24_spill]] %s4378_s0 }
   0x2   :  { %14 = vsyncpa [#allocation4], 0 }
   0x3   :  { %16 = vsyncpa [#allocation4 + $0x1], 0 }
   0x4   :  { %17 = vsyncpa [#allocation7], 0 }
   0x5   :  { %18 = vsyncpa [#allocation10], 0 }
   0x6   :  { %19 = vsyncpa [#allocation13], 0 }
   0x7   :  { %20 = vsyncpa [#allocation5], 0 }
   0x8   :  { %22 = vsyncpa [#allocation5 + $0x1], 0 }
   0x9   :  { %23 = vsyncpa [#allocation16], 0 }
   0xa   :  { %25 = vsyncpa [#allocation16 + $0x1], 0  ;;  %s3004_s27 = smov 0   ;;  %s3006_s28 = smov 0  }
   0xb   :  { %s3008_s29 = smov 0   ;;  %s3010_s30 = smov 0  }
   0xc LB: > { %s2943_s9 = smov [#allocation6]   ;;  %s3025_s11 = sadd.s32 4294967295, %s2941_s30   ;;  %s2941_s30 = sphi %s3010_s30, %s4417_s30   ;;  %s2937_s29 = sphi %s3008_s29, %s4416_s29   ;;  %s2933_s28 = sphi %s3006_s28, %s4415_s28   ;;  %s2929_s27 = sphi %s3004_s27, %s4414_s27  }
   0xd   : > { %s257_s10 = sshll.u32 %s2943_s9, 4  ;;  %p2335_p0 = scmp.ge.s32.totalorder %s2941_s30, 1  ;;  %s3030_s10 = int_to_ptr.vmem [resolvable:$true] %s257_s10 }
   0xe   : > { %p4387_p1 = scmp.eq.s32.totalorder %s3025_s11, 0  ;;  %p245_p2 = scmp.lt.s32.totalorder %s2941_s30, 3 }
   0xf   : > { %s2944_s13 = smov [#allocation9]   ;;  %s2945_s16 = smov [#allocation8]  }
  0x10   : > { %p3032_p3 = pnand %p2335_p0, %p245_p2  ;;  %s282_s14 = sshll.u32 %s2944_s13, 4  ;;  %s3045_s14 = int_to_ptr.vmem [resolvable:$true] %s282_s14 }
  0x11   : > { %s271_s17 = sshll.u32 %s2945_s16, 4  ;;  %s2633_s20 = scalar_lea.hbm %s4379_s1, 144  ;;  %s3047_s17 = int_to_ptr.vmem [resolvable:$true] %s271_s17 }
  0x12   : > { %s4393_s12 = scalar_select %p3032_p3, 1, 0 }
  0x13   : > { %p2537_p5 = pneg %p3032_p3  ;;  %p2634_p7 = scmp.ne.s32.totalorder %s4379_s1, %s2633_s20 }
  0x14   : > { %p2640_p11 = scmp.lt.u32.totalorder %s2633_s20, %s4379_s1 }
  0x15   : > { %p3041_p6 = pnand %p2537_p5, %p4387_p1 }
  0x17   : > { %p3057_p8 = pneg %p3041_p6 }
  0x19   : > { %p2636_p9 = pnand %p3057_p8, %p2634_p7 }
  0x1b   : > { %p2637_p10 = pneg %p2636_p9 }
  0x1d   : > { %p2642_p12 = pnand %p2640_p11, %p2637_p10 }
  0x1f   : > { %2645 = shalt.err (!%p2642_p12)
}
  0x20   : > { %s2646_s26 = scalar_lea.vmem %s3030_s10, 144  ;;  %s2653_s9 = scalar_lea.vmem %s3030_s10, 160 }
  0x21   : > { %p2647_p13 = scmp.ne.s32.totalorder %s3030_s10, %s2646_s26  ;;  %p2654_p5 = scmp.lt.s32.totalorder %s3030_s10, %s3030_s10 }
  0x22   : > { %p2655_p7 = scmp.lt.s32.totalorder %s2653_s9, %s2646_s26 }
  0x23   : > { %p2649_p0 = pnand %p2647_p13, %p3057_p8 }
  0x24   : > { %p2656_p9 = por %p2655_p7, %p2654_p5 }
  0x25   : > { %p2650_p2 = pneg %p2649_p0 }
  0x27   : > { %p2657_p4 = pnand %p2656_p9, %p2650_p2 }
  0x29   : > { %2660 = shalt.err (!%p2657_p4)
}
  0x2a   : > { %s2946_s13 = smov 16   ;;  %s2947_s16 = smov 1  }
  0x2b   : > { %2540 = dma.hbm_to_vmem [thread:$0]  (!%p3041_p6), %s4379_s1, 144, %s3030_s10, [#allocation7], %s2946_s13, %s2946_s13, %s2947_s16  }
  0x2c   : > { %s2661_s22 = scalar_lea.hbm %s4381_s3, 32 }
  0x2d   : > { %p2662_p10 = scmp.ne.s32.totalorder %s4381_s3, %s2661_s22  ;;  %p2668_p12 = scmp.lt.u32.totalorder %s2661_s22, %s4381_s3 }
  0x2f   : > { %p2664_p4 = pnand %p2662_p10, %p3057_p8 }
  0x31   : > { %p2665_p11 = pneg %p2664_p4 }
  0x33   : > { %p2670_p13 = pnand %p2668_p12, %p2665_p11 }
  0x35   : > { %2673 = shalt.err (!%p2670_p13)
}
  0x36   : > { %s2674_s10 = scalar_lea.vmem %s3045_s14, 32  ;;  %p2682_p7 = scmp.lt.s32.totalorder %s3045_s14, %s3045_s14 }
  0x37   : > { %p2675_p0 = scmp.ne.s32.totalorder %s3045_s14, %s2674_s10  ;;  %p2683_p9 = scmp.lt.s32.totalorder %s2674_s10, %s2674_s10 }
  0x39   : > { %p2677_p2 = pnand %p2675_p0, %p3057_p8  ;;  %p2684_p10 = por %p2683_p9, %p2682_p7 }
  0x3b   : > { %p2678_p5 = pneg %p2677_p2 }
  0x3d   : > { %p2685_p4 = pnand %p2684_p10, %p2678_p5 }
  0x3f   : > { %2688 = shalt.err (!%p2685_p4)
}
  0x40   : > { %2546 = dma.hbm_to_vmem [thread:$0]  (!%p3041_p6), %s4381_s3, 32, %s3045_s14, [#allocation10]  }
  0x41   : > { %s2689_s20 = scalar_lea.hbm %s4380_s2, 16 }
  0x42   : > { %p2690_p11 = scmp.ne.s32.totalorder %s4380_s2, %s2689_s20  ;;  %p2696_p0 = scmp.lt.u32.totalorder %s2689_s20, %s4380_s2 }
  0x44   : > { %p2692_p12 = pnand %p2690_p11, %p3057_p8 }
  0x46   : > { %p2693_p13 = pneg %p2692_p12 }
  0x48   : > { %p2698_p2 = pnand %p2696_p0, %p2693_p13 }
  0x4a   : > { %2701 = shalt.err (!%p2698_p2)
}
  0x4b   : > { %s2702_s14 = scalar_lea.vmem %s3047_s17, 16  ;;  %s2709_s26 = scalar_lea.vmem %s3047_s17, 32 }
  0x4c   : > { %p2703_p5 = scmp.ne.s32.totalorder %s3047_s17, %s2702_s14  ;;  %p2710_p10 = scmp.lt.s32.totalorder %s3047_s17, %s3047_s17 }
  0x4d   : > { %p2711_p4 = scmp.lt.s32.totalorder %s2709_s26, %s2702_s14 }
  0x4e   : > { %p2705_p7 = pnand %p2703_p5, %p3057_p8 }
  0x4f   : > { %p2712_p11 = por %p2711_p4, %p2710_p10 }
  0x50   : > { %p2706_p9 = pneg %p2705_p7 }
  0x52   : > { %p2713_p12 = pnand %p2712_p11, %p2706_p9 }
  0x54   : > { %2716 = shalt.err (!%p2713_p12)
}
  0x55   : > { %2543 = dma.hbm_to_vmem [thread:$0]  (!%p3041_p6), %s4380_s2, 16, %s3047_s17, [#allocation7]  }
  0x56   : > { %s2948_s13 = smov [#allocation11]   ;;  %s2949_s18 = smov [#allocation12]  }
  0x57   : > { %s293_s16 = sshll.u32 %s2948_s13, 4  ;;  %s304_s19 = sshll.u32 %s2949_s18, 4  ;;  %s294_s16 = int_to_ptr.vmem [resolvable:$true] %s293_s16  ;;  %s305_s19 = int_to_ptr.vmem [resolvable:$true] %s304_s19 }
  0x58   : > { %s2717_s22 = scalar_lea.hbm %s4382_s4, 16 }
  0x59   : > { %p2718_p13 = scmp.ne.s32.totalorder %s4382_s4, %s2717_s22  ;;  %p2724_p5 = scmp.lt.u32.totalorder %s2717_s22, %s4382_s4 }
  0x5b   : > { %p2720_p0 = pnand %p2718_p13, %p3057_p8 }
  0x5d   : > { %p2721_p2 = pneg %p2720_p0 }
  0x5f   : > { %p2726_p7 = pnand %p2724_p5, %p2721_p2 }
  0x61   : > { %2729 = shalt.err (!%p2726_p7)
}
  0x62   : > { %s2730_s17 = scalar_lea.vmem %s294_s16, 16  ;;  %s2737_s9 = scalar_lea.vmem %s294_s16, 32 }
  0x63   : > { %p2731_p9 = scmp.ne.s32.totalorder %s294_s16, %s2730_s17  ;;  %p2738_p11 = scmp.lt.s32.totalorder %s294_s16, %s294_s16 }
  0x64   : > { %p2739_p12 = scmp.lt.s32.totalorder %s2737_s9, %s2730_s17 }
  0x65   : > { %p2733_p10 = pnand %p2731_p9, %p3057_p8 }
  0x66   : > { %p2740_p1 = por %p2739_p12, %p2738_p11 }
  0x67   : > { %p2734_p4 = pneg %p2733_p10 }
  0x69   : > { %p2741_p3 = pnand %p2740_p1, %p2734_p4 }
  0x6b   : > { %2744 = shalt.err (!%p2741_p3)
}
  0x6c   : > { %2549 = dma.hbm_to_vmem [thread:$0]  (!%p3041_p6), %s4382_s4, 16, %s294_s16, [#allocation10]  }
  0x6d   : > { %s2745_s21 = scalar_lea.hbm %s4383_s5, 16 }
  0x6e   : > { %p2746_p13 = scmp.ne.s32.totalorder %s4383_s5, %s2745_s21  ;;  %p2752_p3 = scmp.lt.u32.totalorder %s2745_s21, %s4383_s5 }
  0x70   : > { %p2748_p0 = pnand %p2746_p13, %p3057_p8 }
  0x72   : > { %p2749_p1 = pneg %p2748_p0 }
  0x74   : > { %p2754_p2 = pnand %p2752_p3, %p2749_p1 }
  0x76   : > { %2757 = shalt.err (!%p2754_p2)
}
  0x77   : > { %s2758_s26 = scalar_lea.vmem %s305_s19, 16  ;;  %s2765_s16 = scalar_lea.vmem %s305_s19, 32 }
  0x78   : > { %p2759_p5 = scmp.ne.s32.totalorder %s305_s19, %s2758_s26  ;;  %p2766_p10 = scmp.lt.s32.totalorder %s305_s19, %s305_s19 }
  0x79   : > { %p2767_p4 = scmp.lt.s32.totalorder %s2765_s16, %s2758_s26 }
  0x7a   : > { %p2761_p7 = pnand %p2759_p5, %p3057_p8 }
  0x7b   : > { %p2768_p11 = por %p2767_p4, %p2766_p10 }
  0x7c   : > { %p2762_p9 = pneg %p2761_p7 }
  0x7e   : > { %p2769_p12 = pnand %p2768_p11, %p2762_p9 }
  0x80   : > { %2772 = shalt.err (!%p2769_p12)
}
  0x81   : > { %2552 = dma.hbm_to_vmem [thread:$0]  (!%p3041_p6), %s4383_s5, 16, %s305_s19, [#allocation13]  }
  0x82   : > { %s4389_s15 = sadd.s32 4294967294, %s2941_s30   ;;  %s3164_s23 = sadd.s32 1, %s2941_s30  }
  0x83   : > { %s38_s10 = sadd.s32 1, %s2937_s29  ;;  %s35_s13 = ssub.s32 %s2941_s30, %s3164_s23 }
  0x84   : > { %p45_p8 = scmp.ne.s32.totalorder %s2937_s29, %s2933_s28  ;;  %p36_p13 = scmp.eq.s32.totalorder %s35_s13, 0 }
  0x85   : > { %p46_p0 = scmp.eq.s32.totalorder %s2941_s30, 0  ;;  %p51_p1 = scmp.ne.s32.totalorder %s2933_s28, %s2929_s27 }
  0x86   : > { %p180_p3 = scmp.eq.s32.totalorder %s3025_s11, 1  ;;  %p4396_p5 = scmp.eq.s32.totalorder %s3025_s11, 0 }
  0x87   : > { %s3176_s18 = scalar_select %p36_p13, %s2937_s29, %s38_s10  }
  0x88   : > { %p47_p2 = por %p46_p0, %p45_p8  ;;  %p3180_p7 = por %p4396_p5, %p51_p1 }
  0x89   : > { %p3184_p6 = por %p180_p3, %p45_p8  ;;  %p186_p9 = scmp.eq.s32.totalorder %s4389_s15, 1 }
  0x8a   : > { %p2572_p10 = scmp.lt.s32.totalorder %s2941_s30, 2  ;;  %s315_s21 = sand.u32 1, %s2937_s29  }
  0x8b   : > { %s4398_s19 = scalar_select %p3184_p6, 1, 0 }
  0x8c   : > { %p3192_p4 = por %p186_p9, %p51_p1  ;;  %s2342_s24 = sshll.u32 %s315_s21, 8 }
  0x8d   : > { %s2420_s25 = sshll.u32 %s2941_s30, 12  ;;  %s4400_s0 = sld [smem:[#allocation24_spill]] }
  0x8e   : > { %s4399_s22 = scalar_select %p3192_p4, 1, 0 }
  0x8f   : > { %s319_s17 = scalar_lea.vmem [#allocation3], %s2342_s24  ;;  %p3202_p11 = pnand %p2572_p10, %p47_p2 }
  0x90   : > { %s326_s9 = sshll.u32 %s319_s17, 4  ;;  %s3208_s13 = scalar_lea.sflag [#allocation4], %s315_s21  ;;  %s3206_s9 = int_to_ptr.vmem [resolvable:$true] %s326_s9 }
  0x91   : > { %p2775_p8 = pneg %p3202_p11 }
  0x93   : > { %s3200_s16 = scalar_lea.hbm %s4400_s0, %s2420_s25  ;;  %s2778_s14 = scalar_lea.hbm %s4400_s0, 8192 }
  0x94   : > { %s2773_s15 = scalar_lea.hbm %s3200_s16, 4096  ;;  %p2779_p1 = scmp.lt.u32.totalorder %s3200_s16, %s4400_s0 }
  0x95   : > { %p2774_p12 = scmp.ne.s32.totalorder %s3200_s16, %s2773_s15  ;;  %p2780_p3 = scmp.lt.u32.totalorder %s2778_s14, %s2773_s15 }
  0x96   : > { %p2782_p5 = scmp.lt.u32.totalorder %s2773_s15, %s3200_s16 }
  0x97   : > { %p2776_p13 = pnand %p2775_p8, %p2774_p12  ;;  %p2781_p2 = por %p2780_p3, %p2779_p1 }
  0x99   : > { %p2777_p0 = pneg %p2776_p13  ;;  %p2783_p9 = por %p2782_p5, %p2781_p2 }
  0x9b   : > { %p2784_p10 = pnand %p2783_p9, %p2777_p0 }
  0x9d   : > { %2787 = shalt.err (!%p2784_p10)
}
  0x9e   : > { %s2788_s21 = scalar_lea.vmem %s3206_s9, 4096  ;;  %s2950_s24 = smov [#allocation3]  }
  0x9f   : > { %p2789_p12 = scmp.ne.s32.totalorder %s3206_s9, %s2788_s21  ;;  %s2793_s25 = sshll.u32 %s2950_s24, 4  ;;  %s2794_s25 = int_to_ptr.vmem [resolvable:$false] %s2793_s25 }
  0xa0   : > { %s2795_s26 = scalar_lea.vmem %s2794_s25, 8192  ;;  %p2796_p6 = scmp.lt.s32.totalorder %s3206_s9, %s2794_s25 }
  0xa1   : > { %p2791_p13 = pnand %p2789_p12, %p2775_p8  ;;  %p2797_p1 = scmp.lt.s32.totalorder %s2795_s26, %s2788_s21 }
  0xa3   : > { %p2792_p4 = pneg %p2791_p13  ;;  %p2798_p3 = por %p2797_p1, %p2796_p6 }
  0xa5   : > { %p2799_p2 = pnand %p2798_p3, %p2792_p4 }
  0xa7   : > { %2802 = shalt.err (!%p2799_p2)
}
  0xa8   : > { %s2951_s15 = smov 128   ;;  %s2952_s14 = smov 8  }
  0xa9   : > { %2556 = dma.hbm_to_vmem [thread:$0]  (!%p3202_p11), %s3200_s16, 4096, %s3206_s9, %s3208_s13, %s2951_s15, %s2951_s15, %s2952_s14  }
  0xaa   : > { %p4402_p8 = scmp.ne.s32.totalorder %s4393_s12, 0 }
  0xab   : > { %s3239_s17 = sand.u32 (!%p4402_p8), 1, %s2933_s28  }
  0xac   : > { %338 = sbr.rel (%p4402_p8) target bundleno = 669 (0x29d), region = 44  ;;  %s2346_s21 = sshll.u32 (!%p4402_p8), %s3239_s17, 8 }
  0xad   : > { %s341_s24 = scalar_lea.sflag (!%p4402_p8), [#allocation4], %s3239_s17  ;;  %s3243_s25 = scalar_lea.vmem (!%p4402_p8), [#allocation3], %s2346_s21 }
  0xb3   : > { %2904 = dma.done.wait (%p3180_p7), %s341_s24, 4096  }
  0xb4   : > { %2906 = vsyncadd (%p3180_p7), %s341_s24, 4294963200  ;;  %p4403_p6 = scmp.eq.s32.totalorder %s3025_s11, 0 }
  0xb6   : > { %2908 = dma.done.wait (%p4403_p6), [#allocation7], 160   ;;  %p4404_p4 = pmov %p4403_p6 }
  0xb8   : > { %2910 = vsyncadd (%p4404_p4), [#allocation7], 4294967136  ;;  %p4405_p11 = pmov %p4404_p4 }
  0xb9   : > { %p4406_p0 = pmov %p4404_p4 }
  0xba   : > { %2912 = dma.done.wait (%p4405_p11), [#allocation10], 48  }
  0xbb   : > { %2914 = vsyncadd (%p4406_p0), [#allocation10], 4294967248  ;;  %p4407_p5 = pmov %p4406_p0 }
  0xbc   : > { %p4408_p9 = pmov %p4406_p0 }
  0xbd   : > { %2916 = dma.done.wait (%p4407_p5), [#allocation13], 16  }
  0xbe   : > { %2918 = vsyncadd (%p4408_p9), [#allocation13], 4294967280  ;;  %vm438_vm0 = vcmask 31744   ;;  %vm441_vm1 = vcmask 25600   ;;  %v2953_v0 = vmov 0.0   ;;  %vm1574_vm2 = vcmask 1041408  }
  0xbf   : > { %439 = vst.msk [vmem:[#allocation2] sm:$0xff] %vm438_vm0, %v2953_v0  ;;  %440 = vst.msk [vmem:[#allocation2 + $0x8] sm:$0xff] %vm438_vm0, %v2953_v0  ;;  %v1518_v1 = vld [vmem:[#allocation9] sm:$0x3]  ;;  %v406_v2 = vld [vmem:[%s3243_s25] sm:$0xff]  ;;  %s2352_s12 = sshll.u32 %s3239_s17, 7 }
  0xc0   : > { %442 = vst.msk [vmem:[#allocation2 + $0x10] sm:$0x3] %vm441_vm1, %v2953_v0  ;;  %445 = vst.msk [vmem:[#allocation2 + $0x28] sm:$0x3] %vm441_vm1, %v2953_v0  ;;  %v407_v3 = vld [vmem:[%s3243_s25 + $0x8] sm:$0xff]  ;;  %2507 = vmatprep.subr.msk.bf16.mxu0 %vm1574_vm2, %v1518_v1  ;;  %v1576_v4 = vsel %vm1574_vm2, %v1518_v1, 0  ;;  %2508 = vmatprep.subr.msk.bf16.mxu1 %vm1574_vm2, %v1518_v1 }
  0xc1   : > { %443 = vst.msk [vmem:[#allocation2 + $0x18] sm:$0xff] %vm438_vm0, %v2953_v0  ;;  %444 = vst.msk [vmem:[#allocation2 + $0x20] sm:$0xff] %vm438_vm0, %v2953_v0  ;;  %v408_v5 = vld [vmem:[%s3243_s25 + $0x10] sm:$0xff]  ;;  %v409_v6 = vld [vmem:[%s3243_s25 + $0x18] sm:$0xff]  ;;  %2472 = vmatpush3.bf16.msra.mxu0 %v1576_v4  ;;  %2506 = vmatpush3.bf16.msra.mxu1 %v1576_v4  ;;  %vm1867_vm3 = vcmask 27648   ;;  %s4067_s20 = scalar_lea.vmem [#allocation14], %s2352_s12 }
  0xc2   : > { %446 = vst.msk [vmem:[#allocation2 + $0x30] sm:$0xff] %vm438_vm0, %v2953_v0  ;;  %447 = vst.msk [vmem:[#allocation2 + $0x38] sm:$0xff] %vm438_vm0, %v2953_v0  ;;  %v3323_v9 = vld [vmem:[#allocation6] ss:$0 sm:$0xff]  ;;  %v3327_v14 = vld [vmem:[#allocation6 + $0x1] ss:$0 sm:$0xff] }
  0xc3   : > { %448 = vst.msk [vmem:[#allocation2 + $0x40] sm:$0x3] %vm441_vm1, %v2953_v0  ;;  %451 = vst.msk [vmem:[#allocation2 + $0x58] sm:$0x3] %vm441_vm1, %v2953_v0  ;;  %v3331_v19 = vld [vmem:[#allocation6 + $0x2] ss:$0 sm:$0xff] }
  0xc4   : > { %449 = vst.msk [vmem:[#allocation2 + $0x48] sm:$0xff] %vm438_vm0, %v2953_v0  ;;  %450 = vst.msk [vmem:[#allocation2 + $0x50] sm:$0xff] %vm438_vm0, %v2953_v0  ;;  %v3335_v22 = vld [vmem:[#allocation6 + $0x3] ss:$0 sm:$0xff]  ;;  %v3337_v25 = vld [vmem:[#allocation6 + $0x4] ss:$0 sm:$0xff] }
  0xc5   : > { %452 = vst.msk [vmem:[#allocation2 + $0x60] sm:$0xff] %vm438_vm0, %v2953_v0  ;;  %453 = vst.msk [vmem:[#allocation2 + $0x68] sm:$0xff] %vm438_vm0, %v2953_v0  ;;  %v3339_v26 = vld [vmem:[#allocation6 + $0x5] ss:$0 sm:$0xff]  ;;  %v3341_v27 = vld [vmem:[#allocation6 + $0x6] ss:$0 sm:$0xff] }
  0xc6   : > { %454 = vst.msk [vmem:[#allocation2 + $0x70] sm:$0x3] %vm441_vm1, %v2953_v0  ;;  %457 = vst.msk [vmem:[#allocation2 + $0x88] sm:$0x3] %vm441_vm1, %v2953_v0  ;;  %v527_v7 = vld [vmem:[#allocation2] sm:$0xff]  ;;  %v528_v8 = vld [vmem:[#allocation2 + $0x8] sm:$0xff] }
  0xc7   : > { %455 = vst.msk [vmem:[#allocation2 + $0x78] sm:$0xff] %vm438_vm0, %v2953_v0  ;;  %456 = vst.msk [vmem:[#allocation2 + $0x80] sm:$0xff] %vm438_vm0, %v2953_v0  ;;  %v630_v10 = vld [vmem:[#allocation2 + $0x1] sm:$0xff]  ;;  %v566_v11 = vmul.f32 %v3323_v9, %v527_v7  ;;  %v567_v12 = vmul.f32 %v3323_v9, %v528_v8  ;;  %v631_v13 = vld [vmem:[#allocation2 + $0x9] sm:$0xff]  ;;  %s2453_s16 = sshll.u32 %s3025_s11, 11  ;;  %s2134_s9 = sshll.u32 %s4067_s20, 4  ;;  %s4247_s9 = int_to_ptr.vmem [resolvable:$true] %s2134_s9 }
  0xc8   : > { %458 = vst.msk [vmem:[#allocation2 + $0x90] sm:$0xff] %vm438_vm0, %v2953_v0  ;;  %459 = vst.msk [vmem:[#allocation2 + $0x98] sm:$0xff] %vm438_vm0, %v2953_v0  ;;  %v734_v15 = vld [vmem:[#allocation2 + $0x2] sm:$0xff]  ;;  %v670_v16 = vmul.f32 %v3327_v14, %v630_v10  ;;  %v671_v17 = vmul.f32 %v3327_v14, %v631_v13  ;;  %v735_v18 = vld [vmem:[#allocation2 + $0xa] sm:$0xff]  ;;  %s4245_s26 = scalar_lea.hbm %s4384_s6, %s2453_s16  ;;  %s2113_s15 = scalar_lea.sflag [#allocation5], %s3239_s17 }
  0xc9   : > { %460 = vst.msk [vmem:[#allocation2 + $0xa0] sm:$0x3] %vm441_vm1, %v2953_v0  ;;  %463 = vst.msk [vmem:[#allocation2 + $0xb8] sm:$0x3] %vm441_vm1, %v2953_v0  ;;  %v774_v20 = vmul.f32 %v3331_v19, %v734_v15  ;;  %v775_v21 = vmul.f32 %v3331_v19, %v735_v18  ;;  %v3343_v28 = vld [vmem:[#allocation6 + $0x7] ss:$0 sm:$0xff] }
  0xca   : > { %461 = vst.msk [vmem:[#allocation2 + $0xa8] sm:$0xff] %vm438_vm0, %v2953_v0  ;;  %462 = vst.msk [vmem:[#allocation2 + $0xb0] sm:$0xff] %vm438_vm0, %v2953_v0  ;;  %v702_v23 = vadd.f32 %v670_v16, %v566_v11  ;;  %v703_v24 = vadd.f32 %v671_v17, %v567_v12  ;;  %v3345_v29 = vld [vmem:[#allocation6 + $0x8] ss:$0 sm:$0xff]  ;;  %v410_v30 = vld [vmem:[%s3243_s25 + $0x20] sm:$0xff]  ;;  %s2803_s14 = scalar_lea.vmem %s4247_s9, 2048 }
  0xcb   : > { %464 = vst.msk [vmem:[#allocation2 + $0xc0] sm:$0xff] %vm438_vm0, %v2953_v0  ;;  %465 = vst.msk [vmem:[#allocation2 + $0xc8] sm:$0xff] %vm438_vm0, %v2953_v0  ;;  %v411_v31 = vld [vmem:[%s3243_s25 + $0x28] sm:$0xff]  ;;  %v412_v32 = vld [vmem:[%s3243_s25 + $0x30] sm:$0xff]  ;;  %p2804_p7 = scmp.ne.s32.totalorder %s4247_s9, %s2803_s14  ;;  %p4409_p10 = scmp.ne.s32.totalorder %s4398_s19, 0 }
  0xcc   : > { %466 = vst.msk [vmem:[#allocation2 + $0xd0] sm:$0x3] %vm441_vm1, %v2953_v0  ;;  %469 = vst.msk [vmem:[#allocation2 + $0xe8] sm:$0x3] %vm441_vm1, %v2953_v0  ;;  %v806_v33 = vadd.f32 %v774_v20, %v702_v23  ;;  %v807_v34 = vadd.f32 %v775_v21, %v703_v24  ;;  %v413_v63 = vld [vmem:[%s3243_s25 + $0x38] sm:$0xff]  ;;  %v415_v1 = vld [vmem:[%s3243_s25 + $0x48] sm:$0xff] }
  0xcd   : > { %467 = vst.msk [vmem:[#allocation2 + $0xd8] sm:$0xff] %vm438_vm0, %v2953_v0  ;;  %468 = vst.msk [vmem:[#allocation2 + $0xe0] sm:$0xff] %vm438_vm0, %v2953_v0  ;;  %v417_v7 = vld [vmem:[%s3243_s25 + $0x58] sm:$0xff]  ;;  %v418_v8 = vld [vmem:[%s3243_s25 + $0x60] sm:$0xff]  ;;  %p2805_p12 = pnand %p2804_p7, %p4409_p10  ;;  %s2954_s21 = smov [#allocation14]  }
  0xce   : > { %470 = vst.msk [vmem:[#allocation2 + $0xf0] sm:$0xff] %vm438_vm0, %v2953_v0  ;;  %471 = vst.msk [vmem:[#allocation2 + $0xf8] sm:$0xff] %vm438_vm0, %v2953_v0  ;;  %v419_v15 = vld [vmem:[%s3243_s25 + $0x68] sm:$0xff]  ;;  %v420_v16 = vld [vmem:[%s3243_s25 + $0x70] sm:$0xff]  ;;  %s2807_s24 = sshll.u32 %s2954_s21, 4  ;;  %s2808_s24 = int_to_ptr.vmem [resolvable:$false] %s2807_s24 }
  0xcf   : > { %472 = vst.msk [vmem:[#allocation2 + $0x100] sm:$0x3] %vm441_vm1, %v2953_v0  ;;  %475 = vst.msk [vmem:[#allocation2 + $0x118] sm:$0x3] %vm441_vm1, %v2953_v0  ;;  %v421_v17 = vld [vmem:[%s3243_s25 + $0x78] sm:$0xff]  ;;  %p2806_p13 = pneg %p2805_p12  ;;  %p2810_p1 = scmp.lt.s32.totalorder %s4247_s9, %s2808_s24 }
  0xd0   : > { %473 = vst.msk [vmem:[#allocation2 + $0x108] sm:$0xff] %vm438_vm0, %v2953_v0  ;;  %474 = vst.msk [vmem:[#allocation2 + $0x110] sm:$0xff] %vm438_vm0, %v2953_v0 }
  0xd1   : > { %476 = vst.msk [vmem:[#allocation2 + $0x120] sm:$0xff] %vm438_vm0, %v2953_v0  ;;  %477 = vst.msk [vmem:[#allocation2 + $0x128] sm:$0xff] %vm438_vm0, %v2953_v0 }
  0xd2   : > { %478 = vst.msk [vmem:[#allocation2 + $0x130] sm:$0x3] %vm441_vm1, %v2953_v0  ;;  %481 = vst.msk [vmem:[#allocation2 + $0x148] sm:$0x3] %vm441_vm1, %v2953_v0 }
  0xd3   : > { %479 = vst.msk [vmem:[#allocation2 + $0x138] sm:$0xff] %vm438_vm0, %v2953_v0  ;;  %480 = vst.msk [vmem:[#allocation2 + $0x140] sm:$0xff] %vm438_vm0, %v2953_v0 }
  0xd4   : > { %482 = vst.msk [vmem:[#allocation2 + $0x150] sm:$0xff] %vm438_vm0, %v2953_v0  ;;  %483 = vst.msk [vmem:[#allocation2 + $0x158] sm:$0xff] %vm438_vm0, %v2953_v0 }
  0xd5   : > { %484 = vst.msk [vmem:[#allocation2 + $0x160] sm:$0x3] %vm441_vm1, %v2953_v0  ;;  %487 = vst.msk [vmem:[#allocation2 + $0x178] sm:$0x3] %vm441_vm1, %v2953_v0 }
  0xd6   : > { %485 = vst.msk [vmem:[#allocation2 + $0x168] sm:$0xff] %vm438_vm0, %v2953_v0  ;;  %486 = vst.msk [vmem:[#allocation2 + $0x170] sm:$0xff] %vm438_vm0, %v2953_v0 }
  0xd7   : > { %488 = vst.msk [vmem:[#allocation2 + $0x180] sm:$0xff] %vm438_vm0, %v2953_v0  ;;  %489 = vst.msk [vmem:[#allocation2 + $0x188] sm:$0xff] %vm438_vm0, %v2953_v0 }
  0xd8   : > { %490 = vst.msk [vmem:[#allocation2 + $0x190] sm:$0x3] %vm441_vm1, %v2953_v0  ;;  %493 = vst.msk [vmem:[#allocation2 + $0x1a8] sm:$0x3] %vm441_vm1, %v2953_v0 }
  0xd9   : > { %491 = vst.msk [vmem:[#allocation2 + $0x198] sm:$0xff] %vm438_vm0, %v2953_v0  ;;  %492 = vst.msk [vmem:[#allocation2 + $0x1a0] sm:$0xff] %vm438_vm0, %v2953_v0  ;;  %v414_v0 = vld [vmem:[%s3243_s25 + $0x40] sm:$0xff] }
  0xda   : > { %495 = vst.msk [vmem:[#allocation2 + $0x19] sm:$0xff] %vm438_vm0, %v406_v2  ;;  %496 = vst.msk [vmem:[#allocation2 + $0x21] sm:$0xff] %vm438_vm0, %v407_v3 }
  0xdb   : > { %497 = vst.msk [vmem:[#allocation2 + $0x31] sm:$0xff] %vm438_vm0, %v408_v5  ;;  %498 = vst.msk [vmem:[#allocation2 + $0x39] sm:$0xff] %vm438_vm0, %v409_v6  ;;  %v416_v6 = vld [vmem:[%s3243_s25 + $0x50] sm:$0xff] }
  0xdc   : > { %499 = vst.msk [vmem:[#allocation2 + $0x49] sm:$0xff] %vm438_vm0, %v410_v30  ;;  %500 = vst.msk [vmem:[#allocation2 + $0x51] sm:$0xff] %vm438_vm0, %v411_v31 }
  0xdd   : > { %501 = vst.msk [vmem:[#allocation2 + $0x61] sm:$0xff] %vm438_vm0, %v412_v32  ;;  %502 = vst.msk [vmem:[#allocation2 + $0x69] sm:$0xff] %vm438_vm0, %v413_v63 }
  0xde   : > { %503 = vst.msk [vmem:[#allocation2 + $0x79] sm:$0xff] %vm438_vm0, %v414_v0  ;;  %504 = vst.msk [vmem:[#allocation2 + $0x81] sm:$0xff] %vm438_vm0, %v415_v1  ;;  %v426_v1 = vld [vmem:[%s3243_s25 + $0xa0] sm:$0xff] }
  0xdf   : > { %505 = vst.msk [vmem:[#allocation2 + $0x91] sm:$0xff] %vm438_vm0, %v416_v6  ;;  %506 = vst.msk [vmem:[#allocation2 + $0x99] sm:$0xff] %vm438_vm0, %v417_v7 }
  0xe0   : > { %507 = vst.msk [vmem:[#allocation2 + $0xa9] sm:$0xff] %vm438_vm0, %v418_v8  ;;  %508 = vst.msk [vmem:[#allocation2 + $0xb1] sm:$0xff] %vm438_vm0, %v419_v15 }
  0xe1   : > { %v838_v35 = vld [vmem:[#allocation2 + $0x18] sm:$0xff]  ;;  %v839_v36 = vld [vmem:[#allocation2 + $0x20] sm:$0xff]  ;;  %509 = vst.msk [vmem:[#allocation2 + $0xc1] sm:$0xff] %vm438_vm0, %v420_v16  ;;  %510 = vst.msk [vmem:[#allocation2 + $0xc9] sm:$0xff] %vm438_vm0, %v421_v17 }
  0xe2   : > { %v942_v37 = vld [vmem:[#allocation2 + $0x19] sm:$0xff]  ;;  %v878_v38 = vmul.f32 %v3335_v22, %v838_v35  ;;  %v879_v39 = vmul.f32 %v3335_v22, %v839_v36  ;;  %v943_v40 = vld [vmem:[#allocation2 + $0x21] sm:$0xff]  ;;  %v568_v44 = vmul.f32 %v3323_v9, %v838_v35  ;;  %v3360_v48 = vld [vmem:[#allocation2 + $0x30] sm:$0xff]  ;;  %v569_v51 = vmul.f32 %v3323_v9, %v839_v36  ;;  %515 = vst.msk [vmem:[#allocation2 + $0x109] sm:$0xff] %vm438_vm0, %v426_v1 }
  0xe3   : > { %v982_v41 = vmul.f32 %v3337_v25, %v942_v37  ;;  %v1046_v42 = vld [vmem:[#allocation2 + $0x1a] sm:$0xff]  ;;  %v1047_v43 = vld [vmem:[#allocation2 + $0x22] sm:$0xff]  ;;  %v983_v45 = vmul.f32 %v3337_v25, %v943_v40  ;;  %v3364_v50 = vld [vmem:[#allocation2 + $0x31] sm:$0xff]  ;;  %v1191_v54 = vmul.f32 %v3341_v27, %v3360_v48  ;;  %v672_v4 = vmul.f32 %v3327_v14, %v942_v37 }
  0xe4   : > { %v1086_v46 = vmul.f32 %v3339_v26, %v1046_v42  ;;  %v1087_v47 = vmul.f32 %v3339_v26, %v1047_v43  ;;  %v3362_v49 = vld [vmem:[#allocation2 + $0x38] sm:$0xff]  ;;  %v910_v52 = vadd.f32 %v878_v38, %v806_v33  ;;  %v911_v53 = vadd.f32 %v879_v39, %v807_v34  ;;  %v3412_v24 = vld [vmem:[#allocation2 + $0x48] sm:$0xff]  ;;  %v3425_v34 = vld [vmem:[#allocation2 + $0x50] sm:$0xff] }
  0xe5   : > { %v1192_v55 = vmul.f32 %v3341_v27, %v3362_v49  ;;  %v3371_v56 = vld [vmem:[#allocation2 + $0x39] sm:$0xff]  ;;  %v1295_v59 = vmul.f32 %v3343_v28, %v3364_v50  ;;  %v673_v5 = vmul.f32 %v3327_v14, %v943_v40  ;;  %v776_v10 = vmul.f32 %v3331_v19, %v1046_v42  ;;  %v3427_v35 = vld [vmem:[#allocation2 + $0x49] sm:$0xff]  ;;  %v3429_v36 = vld [vmem:[#allocation2 + $0x51] sm:$0xff] }
  0xe6   : > { %v3373_v57 = vld [vmem:[#allocation2 + $0x32] sm:$0xff]  ;;  %v3375_v58 = vld [vmem:[#allocation2 + $0x3a] sm:$0xff]  ;;  %v1296_v60 = vmul.f32 %v3343_v28, %v3371_v56  ;;  %v1014_v2 = vadd.f32 %v982_v41, %v910_v52  ;;  %v1015_v3 = vadd.f32 %v983_v45, %v911_v53  ;;  %v777_v11 = vmul.f32 %v3331_v19, %v1047_v43  ;;  %v3431_v41 = vld [vmem:[#allocation2 + $0x4a] sm:$0xff] }
  0xe7   : > { %v3383_v61 = vmul.f32 %v3345_v29, %v3373_v57  ;;  %v3387_v62 = vmul.f32 %v3345_v29, %v3375_v58  ;;  %v880_v12 = vmul.f32 %v3335_v22, %v3360_v48  ;;  %v881_v13 = vmul.f32 %v3335_v22, %v3362_v49  ;;  %v3433_v42 = vld [vmem:[#allocation2 + $0x52] sm:$0xff]  ;;  %v424_v52 = vld [vmem:[%s3243_s25 + $0x90] sm:$0xff]  ;;  %v425_v53 = vld [vmem:[%s3243_s25 + $0x98] sm:$0xff] }
  0xe8   : > { %v1118_v18 = vadd.f32 %v1086_v46, %v1014_v2  ;;  %v1119_v20 = vadd.f32 %v1087_v47, %v1015_v3  ;;  %v704_v21 = vadd.f32 %v672_v4, %v568_v44  ;;  %v705_v23 = vadd.f32 %v673_v5, %v569_v51  ;;  %v422_v43 = vld [vmem:[%s3243_s25 + $0x80] sm:$0xff]  ;;  %v423_v51 = vld [vmem:[%s3243_s25 + $0x88] sm:$0xff]  ;;  %513 = vst.msk [vmem:[#allocation2 + $0xf1] sm:$0xff] %vm438_vm0, %v424_v52  ;;  %v428_v3 = vld [vmem:[%s3243_s25 + $0xb0] sm:$0xff] }
  0xe9   : > { %v984_v30 = vmul.f32 %v3337_v25, %v3364_v50  ;;  %v985_v31 = vmul.f32 %v3337_v25, %v3371_v56  ;;  %v1088_v32 = vmul.f32 %v3339_v26, %v3373_v57  ;;  %v1089_v33 = vmul.f32 %v3339_v26, %v3375_v58  ;;  %511 = vst.msk [vmem:[#allocation2 + $0xd9] sm:$0xff] %vm438_vm0, %v422_v43  ;;  %v427_v2 = vld [vmem:[%s3243_s25 + $0xa8] sm:$0xff] }
  0xea   : > { %v1223_v37 = vadd.f32 %v1191_v54, %v1118_v18  ;;  %v1224_v38 = vadd.f32 %v1192_v55, %v1119_v20  ;;  %v808_v39 = vadd.f32 %v776_v10, %v704_v21  ;;  %v809_v40 = vadd.f32 %v777_v11, %v705_v23  ;;  %512 = vst.msk [vmem:[#allocation2 + $0xe1] sm:$0xff] %vm438_vm0, %v423_v51  ;;  %v3454_v4 = vld [vmem:[#allocation8] ss:$0 sm:$0xff] }
  0xeb   : > { %v1193_v44 = vmul.f32 %v3341_v27, %v3412_v24  ;;  %v1194_v45 = vmul.f32 %v3341_v27, %v3425_v34  ;;  %v1297_v46 = vmul.f32 %v3343_v28, %v3427_v35  ;;  %v1298_v47 = vmul.f32 %v3343_v28, %v3429_v36  ;;  %514 = vst.msk [vmem:[#allocation2 + $0xf9] sm:$0xff] %vm438_vm0, %v425_v53  ;;  %v3502_v53 = vld [vmem:[#allocation2 + $0x69] sm:$0xff] }
  0xec   : > { %v1327_v54 = vadd.f32 %v1295_v59, %v1223_v37  ;;  %v1328_v55 = vadd.f32 %v1296_v60, %v1224_v38  ;;  %v912_v63 = vadd.f32 %v880_v12, %v808_v39  ;;  %v913_v0 = vadd.f32 %v881_v13, %v809_v40  ;;  %516 = vst.msk [vmem:[#allocation2 + $0x111] sm:$0xff] %vm438_vm0, %v427_v2  ;;  %v3494_v40 = vld [vmem:[#allocation2 + $0x68] sm:$0xff] }
  0xed   : > { %v1401_v5 = vmul.f32 %v3345_v29, %v3431_v41  ;;  %v1402_v59 = vmul.f32 %v3345_v29, %v3433_v42  ;;  %v570_v60 = vmul.f32 %v3323_v9, %v3360_v48  ;;  %v571_v6 = vmul.f32 %v3323_v9, %v3362_v49  ;;  %517 = vst.msk [vmem:[#allocation2 + $0x121] sm:$0xff] %vm438_vm0, %v428_v3 }
  0xee   : > { %v1431_v7 = vadd.f32 %v3383_v61, %v1327_v54  ;;  %v1432_v8 = vadd.f32 %v3387_v62, %v1328_v55  ;;  %v1016_v10 = vadd.f32 %v984_v30, %v912_v63  ;;  %v1017_v11 = vadd.f32 %v985_v31, %v913_v0  ;;  %v3510_v0 = vld [vmem:[#allocation2 + $0x6a] sm:$0xff] }
  0xef   : > { %v674_v12 = vmul.f32 %v3327_v14, %v3364_v50  ;;  %v675_v48 = vmul.f32 %v3327_v14, %v3371_v56  ;;  %v778_v49 = vmul.f32 %v3331_v19, %v3373_v57  ;;  %v779_v13 = vmul.f32 %v3331_v19, %v3375_v58 }
  0xf0   : > { %v1470_v15 = vadd.f32 %v3454_v4, %v1431_v7  ;;  %v1471_v61 = vadd.f32 %v3454_v4, %v1432_v8  ;;  %v1120_v16 = vadd.f32 %v1088_v32, %v1016_v10  ;;  %v1121_v62 = vadd.f32 %v1089_v33, %v1017_v11  ;;  %v3489_v33 = vld [vmem:[#allocation2 + $0x60] sm:$0xff] }
  0xf1   : > { %v706_v17 = vadd.f32 %v674_v12, %v570_v60  ;;  %v707_v18 = vadd.f32 %v675_v48, %v571_v6  ;;  %v882_v50 = vmul.f32 %v3335_v22, %v3412_v24  ;;  %v883_v56 = vmul.f32 %v3335_v22, %v3425_v34 }
  0xf2   : > { %v1502_v20 = vpack.c.bf16 %v1471_v61, %v1470_v15  ;;  %v1225_v21 = vadd.f32 %v1193_v44, %v1120_v16  ;;  %v1226_v57 = vadd.f32 %v1194_v45, %v1121_v62  ;;  %v986_v58 = vmul.f32 %v3337_v25, %v3427_v35  ;;  %v3498_v44 = vld [vmem:[#allocation2 + $0x61] sm:$0xff]  ;;  %v3534_v62 = vld [vmem:[#allocation2 + $0x78] sm:$0xff] }
  0xf3   : > { %v810_v23 = vadd.f32 %v778_v49, %v706_v17  ;;  %v811_v30 = vadd.f32 %v779_v13, %v707_v18  ;;  %v987_v31 = vmul.f32 %v3337_v25, %v3429_v36  ;;  %v1090_v32 = vmul.f32 %v3339_v26, %v3431_v41 }
  0xf4   : > { %2473 = vmatprep.mubr.msk.bf16.mxu0 %vm438_vm0, %v1502_v20  ;;  %v1329_v37 = vadd.f32 %v1297_v46, %v1225_v21  ;;  %v1330_v38 = vadd.f32 %v1298_v47, %v1226_v57  ;;  %v1091_v39 = vmul.f32 %v3339_v26, %v3433_v42  ;;  %v1195_v43 = vmul.f32 %v3341_v27, %v3489_v33  ;;  %v3506_v47 = vld [vmem:[#allocation2 + $0x62] sm:$0xff] }
  0xf5   : > { %v914_v45 = vadd.f32 %v882_v50, %v810_v23  ;;  %v915_v51 = vadd.f32 %v883_v56, %v811_v30  ;;  %v1196_v52 = vmul.f32 %v3341_v27, %v3494_v40  ;;  %v1299_v46 = vmul.f32 %v3343_v28, %v3498_v44  ;;  %v3545_v50 = vld [vmem:[#allocation2 + $0x79] sm:$0xff]  ;;  %v3547_v56 = vld [vmem:[#allocation2 + $0x81] sm:$0xff] }
  0xf6   : > { %v1433_v54 = vadd.f32 %v1401_v5, %v1329_v37  ;;  %v1434_v55 = vadd.f32 %v1402_v59, %v1330_v38  ;;  %v1300_v63 = vmul.f32 %v3343_v28, %v3502_v53  ;;  %v1403_v1 = vmul.f32 %v3345_v29, %v3506_v47  ;;  %v429_v20 = vld [vmem:[%s3243_s25 + $0xb8] sm:$0xff]  ;;  %v3552_v30 = vld [vmem:[#allocation2 + $0x7a] sm:$0xff] }
  0xf7   : > { %v1018_v2 = vadd.f32 %v986_v58, %v914_v45  ;;  %v1019_v3 = vadd.f32 %v987_v31, %v915_v51  ;;  %v1404_v60 = vmul.f32 %v3345_v29, %v3510_v0  ;;  %v572_v6 = vmul.f32 %v3323_v9, %v3412_v24  ;;  %v3554_v31 = vld [vmem:[#allocation2 + $0x82] sm:$0xff]  ;;  %518 = vst.msk [vmem:[#allocation2 + $0x129] sm:$0xff] %vm438_vm0, %v429_v20  ;;  %v431_v37 = vld [vmem:[%s3243_s25 + $0xc8] sm:$0xff] }
  0xf8   : > { %v1472_v7 = vadd.f32 %v3454_v4, %v1433_v54  ;;  %v1473_v5 = vadd.f32 %v3454_v4, %v1434_v55  ;;  %v573_v59 = vmul.f32 %v3323_v9, %v3425_v34  ;;  %v676_v8 = vmul.f32 %v3327_v14, %v3427_v35  ;;  %520 = vst.msk [vmem:[#allocation2 + $0x141] sm:$0xff] %vm438_vm0, %v431_v37  ;;  %v432_v51 = vld [vmem:[%s3243_s25 + $0xd0] sm:$0xff] }
  0xf9   : > { %v1122_v10 = vadd.f32 %v1090_v32, %v1018_v2  ;;  %v1123_v11 = vadd.f32 %v1091_v39, %v1019_v3  ;;  %v677_v12 = vmul.f32 %v3327_v14, %v3429_v36  ;;  %v780_v48 = vmul.f32 %v3331_v19, %v3431_v41  ;;  %v3536_v36 = vld [vmem:[#allocation2 + $0x80] sm:$0xff]  ;;  %v430_v32 = vld [vmem:[%s3243_s25 + $0xc0] sm:$0xff]  ;;  %521 = vst.msk [vmem:[#allocation2 + $0x151] sm:$0xff] %vm438_vm0, %v432_v51  ;;  %v435_v3 = vld [vmem:[%s3243_s25 + $0xe8] sm:$0xff] }
  0xfa   : > { %v1503_v49 = vpack.c.bf16 %v1473_v5, %v1472_v7  ;;  %v708_v24 = vadd.f32 %v676_v8, %v572_v6  ;;  %v781_v13 = vmul.f32 %v3331_v19, %v3433_v42  ;;  %v884_v34 = vmul.f32 %v3335_v22, %v3489_v33  ;;  %519 = vst.msk [vmem:[#allocation2 + $0x139] sm:$0xff] %vm438_vm0, %v430_v32  ;;  %v436_v6 = vld [vmem:[%s3243_s25 + $0xf0] sm:$0xff]  ;;  %v437_v7 = vld [vmem:[%s3243_s25 + $0xf8] sm:$0xff] }
  0xfb   : > { %v1227_v15 = vadd.f32 %v1195_v43, %v1122_v10  ;;  %v1228_v61 = vadd.f32 %v1196_v52, %v1123_v11  ;;  %v709_v35 = vadd.f32 %v677_v12, %v573_v59  ;;  %v885_v16 = vmul.f32 %v3335_v22, %v3494_v40  ;;  %v433_v52 = vld [vmem:[%s3243_s25 + $0xd8] sm:$0xff]  ;;  %524 = vst.msk [vmem:[#allocation2 + $0x171] sm:$0xff] %vm438_vm0, %v435_v3 }
  0xfc   : > { %2474 = vmatmul.mubr.msk.bf16.vlgmr.msra.gmra.mrb[0].mxu0 %vm438_vm0, %v1503_v49  ;;  %v812_v41 = vadd.f32 %v780_v48, %v708_v24  ;;  %v988_v42 = vmul.f32 %v3337_v25, %v3498_v44  ;;  %v989_v17 = vmul.f32 %v3337_v25, %v3502_v53  ;;  %v1092_v18 = vmul.f32 %v3339_v26, %v3506_v47 }
  0xfd   : > { %v1331_v21 = vadd.f32 %v1299_v46, %v1227_v15  ;;  %v1332_v57 = vadd.f32 %v1300_v63, %v1228_v61  ;;  %v813_v58 = vadd.f32 %v781_v13, %v709_v35  ;;  %v1093_v23 = vmul.f32 %v3339_v26, %v3510_v0  ;;  %v434_v46 = vld [vmem:[%s3243_s25 + $0xe0] sm:$0xff]  ;;  %522 = vst.msk [vmem:[#allocation2 + $0x159] sm:$0xff] %vm438_vm0, %v433_v52  ;;  %s2809_s25 = scalar_lea.vmem %s2808_s24, 4096 }
  0xfe   : > { %v916_v38 = vadd.f32 %v884_v34, %v812_v41  ;;  %v1197_v39 = vmul.f32 %v3341_v27, %v3534_v62  ;;  %v1198_v43 = vmul.f32 %v3341_v27, %v3536_v36  ;;  %v1301_v45 = vmul.f32 %v3343_v28, %v3545_v50  ;;  %523 = vst.msk [vmem:[#allocation2 + $0x169] sm:$0xff] %vm438_vm0, %v434_v46  ;;  %v1367_v46 = vld [vmem:[#allocation2 + $0x92] sm:$0xff]  ;;  %p2811_p3 = scmp.lt.s32.totalorder %s2809_s25, %s2803_s14 }
  0xff   : > { %v1435_v54 = vadd.f32 %v1403_v1, %v1331_v21  ;;  %v1436_v55 = vadd.f32 %v1404_v60, %v1332_v57  ;;  %v917_v63 = vadd.f32 %v885_v16, %v813_v58  ;;  %v1302_v2 = vmul.f32 %v3343_v28, %v3547_v56  ;;  %525 = vst.msk [vmem:[#allocation2 + $0x181] sm:$0xff] %vm438_vm0, %v436_v6  ;;  %v3612_v21 = vld [vmem:[#allocation2 + $0x90] sm:$0xff]  ;;  %v3614_v57 = vld [vmem:[#allocation2 + $0x98] sm:$0xff] }
 0x100   : > { %v1020_v5 = vadd.f32 %v988_v42, %v916_v38  ;;  %v1405_v59 = vmul.f32 %v3345_v29, %v3552_v30  ;;  %v1406_v1 = vmul.f32 %v3345_v29, %v3554_v31  ;;  %v574_v60 = vmul.f32 %v3323_v9, %v3489_v33  ;;  %526 = vst.msk [vmem:[#allocation2 + $0x189] sm:$0xff] %vm438_vm0, %v437_v7  ;;  %v3616_v58 = vld [vmem:[#allocation2 + $0x91] sm:$0xff]  ;;  %v1264_v38 = vld [vmem:[#allocation2 + $0x99] sm:$0xff]  ;;  %p2812_p2 = por %p2811_p3, %p2810_p1 }
 0x101   : > { %v1474_v8 = vadd.f32 %v3454_v4, %v1435_v54  ;;  %v1475_v10 = vadd.f32 %v3454_v4, %v1436_v55  ;;  %v1021_v11 = vadd.f32 %v989_v17, %v917_v63  ;;  %v575_v12 = vmul.f32 %v3323_v9, %v3494_v40  ;;  %v1368_v54 = vld [vmem:[#allocation2 + $0x9a] sm:$0xff] }
 0x102   : > { %v1124_v48 = vadd.f32 %v1092_v18, %v1020_v5  ;;  %v678_v49 = vmul.f32 %v3327_v14, %v3498_v44  ;;  %v679_v33 = vmul.f32 %v3327_v14, %v3502_v53  ;;  %v782_v24 = vmul.f32 %v3331_v19, %v3506_v47  ;;  %p2813_p8 = pnand %p2812_p2, %p2806_p13 }
 0x103   : > { %v1504_v13 = vpack.c.bf16 %v1475_v10, %v1474_v8  ;;  %v1125_v34 = vadd.f32 %v1093_v23, %v1021_v11  ;;  %v783_v15 = vmul.f32 %v3331_v19, %v3510_v0  ;;  %v886_v61 = vmul.f32 %v3335_v22, %v3534_v62 }
 0x104   : > { %v1229_v35 = vadd.f32 %v1197_v39, %v1124_v48  ;;  %v710_v40 = vadd.f32 %v678_v49, %v574_v60  ;;  %v711_v16 = vadd.f32 %v679_v33, %v575_v12  ;;  %v887_v44 = vmul.f32 %v3335_v22, %v3536_v36 }
 0x105   : > { %2477 = vmatprep.mubr.msk.bf16.mxu0 %vm438_vm0, %v1504_v13  ;;  %v1230_v53 = vadd.f32 %v1198_v43, %v1125_v34  ;;  %v990_v47 = vmul.f32 %v3337_v25, %v3545_v50  ;;  %v991_v41 = vmul.f32 %v3337_v25, %v3547_v56  ;;  %v1094_v0 = vmul.f32 %v3339_v26, %v3552_v30 }
 0x106   : > { %v1333_v42 = vadd.f32 %v1301_v45, %v1229_v35  ;;  %v814_v17 = vadd.f32 %v782_v24, %v710_v40  ;;  %v815_v18 = vadd.f32 %v783_v15, %v711_v16  ;;  %v1095_v20 = vmul.f32 %v3339_v26, %v3554_v31  ;;  %v3651_v35 = vld [vmem:[#allocation2 + $0xa8] sm:$0xff]  ;;  %v3653_v40 = vld [vmem:[#allocation2 + $0xb0] sm:$0xff] }
 0x107   : > { %v1334_v23 = vadd.f32 %v1302_v2, %v1230_v53  ;;  %v1199_v32 = vmul.f32 %v3341_v27, %v3612_v21  ;;  %v1200_v37 = vmul.f32 %v3341_v27, %v3614_v57  ;;  %v1303_v39 = vmul.f32 %v3343_v28, %v3616_v58 }
 0x108   : > { %v1437_v43 = vadd.f32 %v1405_v59, %v1333_v42  ;;  %v918_v45 = vadd.f32 %v886_v61, %v814_v17  ;;  %v919_v51 = vadd.f32 %v887_v44, %v815_v18  ;;  %v1304_v52 = vmul.f32 %v3343_v28, %v1264_v38 }
 0x109   : > { %v1438_v55 = vadd.f32 %v1406_v1, %v1334_v23  ;;  %v1407_v63 = vmul.f32 %v3345_v29, %v1367_v46  ;;  %v1408_v2 = vmul.f32 %v3345_v29, %v1368_v54  ;;  %v576_v3 = vmul.f32 %v3323_v9, %v3534_v62  ;;  %v1369_v23 = vld [vmem:[#allocation2 + $0xaa] sm:$0xff] }
 0x10a   : > { %v1476_v6 = vadd.f32 %v3454_v4, %v1437_v43  ;;  %v1022_v7 = vadd.f32 %v990_v47, %v918_v45  ;;  %v1023_v5 = vadd.f32 %v991_v41, %v919_v51  ;;  %v577_v59 = vmul.f32 %v3323_v9, %v3536_v36  ;;  %v1265_v41 = vld [vmem:[#allocation2 + $0xa9] sm:$0xff] }
 0x10b   : > { %v1477_v60 = vadd.f32 %v3454_v4, %v1438_v55  ;;  %v680_v8 = vmul.f32 %v3327_v14, %v3545_v50  ;;  %v681_v1 = vmul.f32 %v3327_v14, %v3547_v56  ;;  %v784_v10 = vmul.f32 %v3331_v19, %v3552_v30 }
 0x10c   : > { %v1126_v11 = vadd.f32 %v1094_v0, %v1022_v7  ;;  %v1127_v62 = vadd.f32 %v1095_v20, %v1023_v5  ;;  %v785_v12 = vmul.f32 %v3331_v19, %v3554_v31  ;;  %v888_v48 = vmul.f32 %v3335_v22, %v3612_v21  ;;  %v3659_v0 = vld [vmem:[#allocation2 + $0xb1] sm:$0xff] }
 0x10d   : > { %v1505_v36 = vpack.c.bf16 %v1477_v60, %v1476_v6  ;;  %v712_v49 = vadd.f32 %v680_v8, %v576_v3  ;;  %v713_v33 = vadd.f32 %v681_v1, %v577_v59  ;;  %v889_v50 = vmul.f32 %v3335_v22, %v3614_v57 }
 0x10e   : > { %v1231_v24 = vadd.f32 %v1199_v32, %v1126_v11  ;;  %v1232_v13 = vadd.f32 %v1200_v37, %v1127_v62  ;;  %v992_v56 = vmul.f32 %v3337_v25, %v3616_v58  ;;  %v993_v30 = vmul.f32 %v3337_v25, %v1264_v38  ;;  %v1370_v32 = vld [vmem:[#allocation2 + $0xb2] sm:$0xff] }
 0x10f   : > { %2478 = vmatmul.mubr.msk.bf16.gmra.mrb[4].mxu0 %vm438_vm0, %v1505_v36  ;;  %v816_v34 = vadd.f32 %v784_v10, %v712_v49  ;;  %v817_v31 = vadd.f32 %v785_v12, %v713_v33  ;;  %v1096_v15 = vmul.f32 %v3339_v26, %v1367_v46  ;;  %v1097_v61 = vmul.f32 %v3339_v26, %v1368_v54  ;;  %v3686_v36 = vld [vmem:[#allocation2 + $0xc0] sm:$0xff] }
 0x110   : > { %v1335_v16 = vadd.f32 %v1303_v39, %v1231_v24  ;;  %v1336_v44 = vadd.f32 %v1304_v52, %v1232_v13  ;;  %v1201_v53 = vmul.f32 %v3341_v27, %v3651_v35  ;;  %v1202_v47 = vmul.f32 %v3341_v27, %v3653_v40  ;;  %v3689_v24 = vld [vmem:[#allocation2 + $0xc8] sm:$0xff] }
 0x111   : > { %v920_v42 = vadd.f32 %v888_v48, %v816_v34  ;;  %v921_v17 = vadd.f32 %v889_v50, %v817_v31  ;;  %v1305_v18 = vmul.f32 %v3343_v28, %v1265_v41  ;;  %v1306_v20 = vmul.f32 %v3343_v28, %v3659_v0 }
 0x112   : > { %v1439_v37 = vadd.f32 %v1407_v63, %v1335_v16  ;;  %v1440_v39 = vadd.f32 %v1408_v2, %v1336_v44  ;;  %v1409_v43 = vmul.f32 %v3345_v29, %v1369_v23  ;;  %v1410_v45 = vmul.f32 %v3345_v29, %v1370_v32  ;;  %v1371_v16 = vld [vmem:[#allocation2 + $0xc2] sm:$0xff] }
 0x113   : > { %v1024_v51 = vadd.f32 %v992_v56, %v920_v42  ;;  %v1025_v52 = vadd.f32 %v993_v30, %v921_v17  ;;  %v578_v55 = vmul.f32 %v3323_v9, %v3612_v21  ;;  %v579_v3 = vmul.f32 %v3323_v9, %v3614_v57  ;;  %v3693_v56 = vld [vmem:[#allocation2 + $0xc1] sm:$0xff]  ;;  %v1372_v42 = vld [vmem:[#allocation2 + $0xca] sm:$0xff] }
 0x114   : > { %v1478_v6 = vadd.f32 %v3454_v4, %v1439_v37  ;;  %v1479_v7 = vadd.f32 %v3454_v4, %v1440_v39  ;;  %v682_v63 = vmul.f32 %v3327_v14, %v3616_v58  ;;  %v683_v2 = vmul.f32 %v3327_v14, %v1264_v38 }
 0x115   : > { %v1128_v5 = vadd.f32 %v1096_v15, %v1024_v51  ;;  %v1129_v59 = vadd.f32 %v1097_v61, %v1025_v52  ;;  %v786_v60 = vmul.f32 %v3331_v19, %v1367_v46  ;;  %v787_v8 = vmul.f32 %v3331_v19, %v1368_v54  ;;  %v1268_v15 = vld [vmem:[#allocation2 + $0xc9] sm:$0xff] }
 0x116   : > { %v1506_v1 = vpack.c.bf16 %v1479_v7, %v1478_v6  ;;  %v714_v21 = vadd.f32 %v682_v63, %v578_v55  ;;  %v715_v10 = vadd.f32 %v683_v2, %v579_v3  ;;  %v890_v57 = vmul.f32 %v3335_v22, %v3651_v35 }
 0x117   : > { %v1233_v11 = vadd.f32 %v1201_v53, %v1128_v5  ;;  %v1234_v62 = vadd.f32 %v1202_v47, %v1129_v59  ;;  %v891_v12 = vmul.f32 %v3335_v22, %v3653_v40  ;;  %v994_v58 = vmul.f32 %v3337_v25, %v1265_v41 }
 0x118   : > { %2481 = vmatprep.mubr.msk.bf16.mxu0 %vm438_vm0, %v1506_v1  ;;  %v818_v38 = vadd.f32 %v786_v60, %v714_v21  ;;  %v819_v48 = vadd.f32 %v787_v8, %v715_v10  ;;  %v995_v46 = vmul.f32 %v3337_v25, %v3659_v0  ;;  %v1098_v54 = vmul.f32 %v3339_v26, %v1369_v23 }
 0x119   : > { %v1337_v49 = vadd.f32 %v1305_v18, %v1233_v11  ;;  %v1338_v33 = vadd.f32 %v1306_v20, %v1234_v62  ;;  %v1099_v50 = vmul.f32 %v3339_v26, %v1370_v32  ;;  %v1203_v13 = vmul.f32 %v3341_v27, %v3686_v36  ;;  %v1165_v11 = vld [vmem:[#allocation2 + $0xd8] sm:$0xff]  ;;  %v3723_v62 = vld [vmem:[#allocation2 + $0xe0] sm:$0xff] }
 0x11a   : > { %v922_v30 = vadd.f32 %v890_v57, %v818_v38  ;;  %v923_v34 = vadd.f32 %v891_v12, %v819_v48  ;;  %v1204_v31 = vmul.f32 %v3341_v27, %v3689_v24  ;;  %v1307_v61 = vmul.f32 %v3343_v28, %v3693_v56  ;;  %v3725_v12 = vld [vmem:[#allocation2 + $0xd9] sm:$0xff] }
 0x11b   : > { %v1441_v44 = vadd.f32 %v1409_v43, %v1337_v49  ;;  %v1442_v53 = vadd.f32 %v1410_v45, %v1338_v33  ;;  %v1308_v47 = vmul.f32 %v3343_v28, %v1268_v15  ;;  %v1411_v17 = vmul.f32 %v3345_v29, %v1371_v16 }
 0x11c   : > { %v1026_v18 = vadd.f32 %v994_v58, %v922_v30  ;;  %v1027_v20 = vadd.f32 %v995_v46, %v923_v34  ;;  %v1412_v37 = vmul.f32 %v3345_v29, %v1372_v42  ;;  %v580_v39 = vmul.f32 %v3323_v9, %v3651_v35  ;;  %v1270_v46 = vld [vmem:[#allocation2 + $0xe1] sm:$0xff] }
 0x11d   : > { %v1480_v51 = vadd.f32 %v3454_v4, %v1441_v44  ;;  %v1481_v52 = vadd.f32 %v3454_v4, %v1442_v53  ;;  %v581_v43 = vmul.f32 %v3323_v9, %v3653_v40  ;;  %v684_v45 = vmul.f32 %v3327_v14, %v1265_v41  ;;  %v1373_v30 = vld [vmem:[#allocation2 + $0xda] sm:$0xff]  ;;  %v1374_v34 = vld [vmem:[#allocation2 + $0xe2] sm:$0xff] }
 0x11e   : > { %v1130_v55 = vadd.f32 %v1098_v54, %v1026_v18  ;;  %v1131_v3 = vadd.f32 %v1099_v50, %v1027_v20  ;;  %v685_v6 = vmul.f32 %v3327_v14, %v3659_v0  ;;  %v788_v7 = vmul.f32 %v3331_v19, %v1369_v23 }
 0x11f   : > { %v1507_v63 = vpack.c.bf16 %v1481_v52, %v1480_v51  ;;  %v716_v2 = vadd.f32 %v684_v45, %v580_v39  ;;  %v789_v35 = vmul.f32 %v3331_v19, %v1370_v32  ;;  %v892_v5 = vmul.f32 %v3335_v22, %v3686_v36 }
 0x120   : > { %v1235_v59 = vadd.f32 %v1203_v13, %v1130_v55  ;;  %v1236_v60 = vadd.f32 %v1204_v31, %v1131_v3  ;;  %v717_v8 = vadd.f32 %v685_v6, %v581_v43  ;;  %v893_v40 = vmul.f32 %v3335_v22, %v3689_v24 }
 0x121   : > { %2482 = vmatmul.mubr.msk.bf16.gmra.mrb[8].mxu0 %vm438_vm0, %v1507_v63  ;;  %v820_v41 = vadd.f32 %v788_v7, %v716_v2  ;;  %v996_v0 = vmul.f32 %v3337_v25, %v3693_v56  ;;  %v997_v23 = vmul.f32 %v3337_v25, %v1268_v15  ;;  %v1100_v1 = vmul.f32 %v3339_v26, %v1371_v16 }
 0x122   : > { %v1339_v32 = vadd.f32 %v1307_v61, %v1235_v59  ;;  %v1340_v21 = vadd.f32 %v1308_v47, %v1236_v60  ;;  %v821_v10 = vadd.f32 %v789_v35, %v717_v8  ;;  %v1101_v57 = vmul.f32 %v3339_v26, %v1372_v42  ;;  %v3755_v59 = vld [vmem:[#allocation2 + $0xf0] sm:$0xff]  ;;  %v3757_v60 = vld [vmem:[#allocation2 + $0xf8] sm:$0xff] }
 0x123   : > { %v924_v58 = vadd.f32 %v892_v5, %v820_v41  ;;  %v1205_v38 = vmul.f32 %v3341_v27, %v1165_v11  ;;  %v1206_v48 = vmul.f32 %v3341_v27, %v3723_v62  ;;  %v1309_v54 = vmul.f32 %v3343_v28, %v3725_v12  ;;  %v3759_v8 = vld [vmem:[#allocation2 + $0xf1] sm:$0xff] }
 0x124   : > { %v1443_v49 = vadd.f32 %v1411_v17, %v1339_v32  ;;  %v1444_v33 = vadd.f32 %v1412_v37, %v1340_v21  ;;  %v925_v50 = vadd.f32 %v893_v40, %v821_v10  ;;  %v1310_v13 = vmul.f32 %v3343_v28, %v1270_v46 }
 0x125   : > { %v1028_v31 = vadd.f32 %v996_v0, %v924_v58  ;;  %v1413_v61 = vmul.f32 %v3345_v29, %v1373_v30  ;;  %v1414_v44 = vmul.f32 %v3345_v29, %v1374_v34  ;;  %v582_v53 = vmul.f32 %v3323_v9, %v3686_v36  ;;  %v1375_v58 = vld [vmem:[#allocation2 + $0xf2] sm:$0xff] }
 0x126   : > { %v1482_v47 = vadd.f32 %v3454_v4, %v1443_v49  ;;  %v1483_v18 = vadd.f32 %v3454_v4, %v1444_v33  ;;  %v1029_v20 = vadd.f32 %v997_v23, %v925_v50  ;;  %v583_v17 = vmul.f32 %v3323_v9, %v3689_v24  ;;  %v1272_v23 = vld [vmem:[#allocation2 + $0xf9] sm:$0xff] }
 0x127   : > { %v1132_v37 = vadd.f32 %v1100_v1, %v1028_v31  ;;  %v686_v39 = vmul.f32 %v3327_v14, %v3693_v56  ;;  %v687_v51 = vmul.f32 %v3327_v14, %v1268_v15  ;;  %v790_v52 = vmul.f32 %v3331_v19, %v1371_v16 }
 0x128   : > { %v1508_v43 = vpack.c.bf16 %v1483_v18, %v1482_v47  ;;  %v1133_v45 = vadd.f32 %v1101_v57, %v1029_v20  ;;  %v791_v36 = vmul.f32 %v3331_v19, %v1372_v42  ;;  %v894_v55 = vmul.f32 %v3335_v22, %v1165_v11 }
 0x129   : > { %v1237_v3 = vadd.f32 %v1205_v38, %v1132_v37  ;;  %v718_v6 = vadd.f32 %v686_v39, %v582_v53  ;;  %v719_v7 = vadd.f32 %v687_v51, %v583_v17  ;;  %v895_v24 = vmul.f32 %v3335_v22, %v3723_v62  ;;  %v1376_v38 = vld [vmem:[#allocation2 + $0xfa] sm:$0xff] }
 0x12a   : > { %2485 = vmatprep.mubr.msk.bf16.mxu0 %vm438_vm0, %v1508_v43  ;;  %v1238_v63 = vadd.f32 %v1206_v48, %v1133_v45  ;;  %v998_v56 = vmul.f32 %v3337_v25, %v3725_v12  ;;  %v999_v15 = vmul.f32 %v3337_v25, %v1270_v46  ;;  %v1102_v16 = vmul.f32 %v3339_v26, %v1373_v30 }
 0x12b   : > { %v1341_v2 = vadd.f32 %v1309_v54, %v1237_v3  ;;  %v822_v42 = vadd.f32 %v790_v52, %v718_v6  ;;  %v823_v35 = vadd.f32 %v791_v36, %v719_v7  ;;  %v1103_v5 = vmul.f32 %v3339_v26, %v1374_v34  ;;  %v3790_v3 = vld [vmem:[#allocation2 + $0x108] sm:$0xff]  ;;  %v3792_v6 = vld [vmem:[#allocation2 + $0x110] sm:$0xff] }
 0x12c   : > { %v1342_v40 = vadd.f32 %v1310_v13, %v1238_v63  ;;  %v1207_v41 = vmul.f32 %v3341_v27, %v3755_v59  ;;  %v1208_v0 = vmul.f32 %v3341_v27, %v3757_v60  ;;  %v1311_v1 = vmul.f32 %v3343_v28, %v3759_v8 }
 0x12d   : > { %v1445_v32 = vadd.f32 %v1413_v61, %v1341_v2  ;;  %v926_v21 = vadd.f32 %v894_v55, %v822_v42  ;;  %v927_v10 = vadd.f32 %v895_v24, %v823_v35  ;;  %v1312_v57 = vmul.f32 %v3343_v28, %v1272_v23 }
 0x12e   : > { %v1446_v48 = vadd.f32 %v1414_v44, %v1342_v40  ;;  %v1415_v54 = vmul.f32 %v3345_v29, %v1375_v58  ;;  %v1416_v49 = vmul.f32 %v3345_v29, %v1376_v38  ;;  %v584_v33 = vmul.f32 %v3323_v9, %v1165_v11  ;;  %v3806_v40 = vld [vmem:[#allocation2 + $0x10a] sm:$0xff] }
 0x12f   : > { %v1484_v50 = vadd.f32 %v3454_v4, %v1445_v32  ;;  %v1030_v13 = vadd.f32 %v998_v56, %v926_v21  ;;  %v1031_v31 = vadd.f32 %v999_v15, %v927_v10  ;;  %v585_v61 = vmul.f32 %v3323_v9, %v3723_v62  ;;  %v3798_v15 = vld [vmem:[#allocation2 + $0x109] sm:$0xff] }
 0x130   : > { %v1485_v53 = vadd.f32 %v3454_v4, %v1446_v48  ;;  %v688_v47 = vmul.f32 %v3327_v14, %v3725_v12  ;;  %v689_v44 = vmul.f32 %v3327_v14, %v1270_v46  ;;  %v792_v18 = vmul.f32 %v3331_v19, %v1373_v30 }
 0x131   : > { %v1134_v20 = vadd.f32 %v1102_v16, %v1030_v13  ;;  %v1135_v17 = vadd.f32 %v1103_v5, %v1031_v31  ;;  %v793_v11 = vmul.f32 %v3331_v19, %v1374_v34  ;;  %v896_v37 = vmul.f32 %v3335_v22, %v3755_v59  ;;  %v3800_v16 = vld [vmem:[#allocation2 + $0x111] sm:$0xff] }
 0x132   : > { %v1509_v39 = vpack.c.bf16 %v1485_v53, %v1484_v50  ;;  %v720_v51 = vadd.f32 %v688_v47, %v584_v33  ;;  %v721_v52 = vadd.f32 %v689_v44, %v585_v61  ;;  %v897_v62 = vmul.f32 %v3335_v22, %v3757_v60 }
 0x133   : > { %v1239_v43 = vadd.f32 %v1207_v41, %v1134_v20  ;;  %v1240_v45 = vadd.f32 %v1208_v0, %v1135_v17  ;;  %v1000_v12 = vmul.f32 %v3337_v25, %v3759_v8  ;;  %v1001_v46 = vmul.f32 %v3337_v25, %v1272_v23  ;;  %v3808_v41 = vld [vmem:[#allocation2 + $0x112] sm:$0xff] }
 0x134   : > { %2486 = vmatmul.mubr.msk.bf16.gmra.mrb[12].mxu0 %vm438_vm0, %v1509_v39  ;;  %v824_v30 = vadd.f32 %v792_v18, %v720_v51  ;;  %v825_v34 = vadd.f32 %v793_v11, %v721_v52  ;;  %v1104_v36 = vmul.f32 %v3339_v26, %v1375_v58  ;;  %v1105_v55 = vmul.f32 %v3339_v26, %v1376_v38  ;;  %v3840_v11 = vld [vmem:[#allocation2 + $0x128] sm:$0xff] }
 0x135   : > { %v1343_v7 = vadd.f32 %v1311_v1, %v1239_v43  ;;  %v1344_v24 = vadd.f32 %v1312_v57, %v1240_v45  ;;  %v1209_v63 = vmul.f32 %v3341_v27, %v3790_v3  ;;  %v1210_v56 = vmul.f32 %v3341_v27, %v3792_v6  ;;  %v3844_v39 = vld [vmem:[#allocation2 + $0x121] sm:$0xff]  ;;  %v3850_v43 = vld [vmem:[#allocation2 + $0x129] sm:$0xff]  ;;  %v3852_v45 = vld [vmem:[#allocation6 + $0x7] ss:$0 sm:$0xff] }
 0x136   : > { %v928_v2 = vadd.f32 %v896_v37, %v824_v30  ;;  %v929_v42 = vadd.f32 %v897_v62, %v825_v34  ;;  %v1313_v35 = vmul.f32 %v3343_v28, %v3798_v15  ;;  %v1314_v5 = vmul.f32 %v3343_v28, %v3800_v16  ;;  %v3860_v34 = vld [vmem:[#allocation2 + $0x12a] sm:$0xff] }
 0x137   : > { %v1447_v0 = vadd.f32 %v1415_v54, %v1343_v7  ;;  %v1448_v1 = vadd.f32 %v1416_v49, %v1344_v24  ;;  %v1417_v32 = vmul.f32 %v3345_v29, %v3806_v40  ;;  %v1418_v21 = vmul.f32 %v3345_v29, %v3808_v41 }
 0x138   : > { %v1032_v10 = vadd.f32 %v1000_v12, %v928_v2  ;;  %v1033_v57 = vadd.f32 %v1001_v46, %v929_v42  ;;  %v586_v48 = vmul.f32 %v3323_v9, %v3755_v59  ;;  %v587_v28 = vmul.f32 %v3323_v9, %v3757_v60  ;;  %v3856_v12 = vld [vmem:[#allocation2 + $0x122] sm:$0xff] }
 0x139   : > { %v1486_v33 = vadd.f32 %v3454_v4, %v1447_v0  ;;  %v1487_v50 = vadd.f32 %v3454_v4, %v1448_v1  ;;  %v690_v54 = vmul.f32 %v3327_v14, %v3759_v8  ;;  %v691_v49 = vmul.f32 %v3327_v14, %v1272_v23  ;;  %v3876_v0 = vld [vmem:[#allocation6 + $0x1] ss:$0 sm:$0xff] }
 0x13a   : > { %v1136_v13 = vadd.f32 %v1104_v36, %v1032_v10  ;;  %v1137_v31 = vadd.f32 %v1105_v55, %v1033_v57  ;;  %v794_v29 = vmul.f32 %v3331_v19, %v1375_v58  ;;  %v795_v61 = vmul.f32 %v3331_v19, %v1376_v38  ;;  %v3836_v38 = vld [vmem:[#allocation2 + $0x120] sm:$0xff]  ;;  %v3862_v36 = vld [vmem:[#allocation6 + $0x8] ss:$0 sm:$0xff]  ;;  %v3882_v57 = vld [vmem:[#allocation6 + $0x2] ss:$0 sm:$0xff] }
 0x13b   : > { %v1510_v53 = vpack.c.bf16 %v1487_v50, %v1486_v33  ;;  %v722_v59 = vadd.f32 %v690_v54, %v586_v48  ;;  %v723_v47 = vadd.f32 %v691_v49, %v587_v28  ;;  %v898_v9 = vmul.f32 %v3335_v22, %v3790_v3  ;;  %v3888_v33 = vld [vmem:[#allocation6 + $0x3] ss:$0 sm:$0xff] }
 0x13c   : > { %v1241_v60 = vadd.f32 %v1209_v63, %v1136_v13  ;;  %v1242_v44 = vadd.f32 %v1210_v56, %v1137_v31  ;;  %v899_v18 = vmul.f32 %v3335_v22, %v3792_v6  ;;  %v1002_v14 = vmul.f32 %v3337_v25, %v3798_v15  ;;  %v3868_v56 = vld [vmem:[#allocation6] ss:$0 sm:$0xff] }
 0x13d   : > { %2489 = vmatprep.mubr.msk.bf16.mxu1 %vm438_vm0, %v1510_v53  ;;  %v826_v8 = vadd.f32 %v794_v29, %v722_v59  ;;  %v827_v23 = vadd.f32 %v795_v61, %v723_v47  ;;  %v1003_v19 = vmul.f32 %v3337_v25, %v3800_v16  ;;  %v1106_v58 = vmul.f32 %v3339_v26, %v3806_v40  ;;  %v3846_v25 = vld [vmem:[#allocation6 + $0x6] ss:$0 sm:$0xff]  ;;  %v3901_v29 = vld [vmem:[#allocation6 + $0x5] ss:$0 sm:$0xff] }
 0x13e   : > { %v1345_v20 = vadd.f32 %v1313_v35, %v1241_v60  ;;  %v1346_v17 = vadd.f32 %v1314_v5, %v1242_v44  ;;  %v1107_v22 = vmul.f32 %v3339_v26, %v3808_v41  ;;  %v1211_v37 = vmul.f32 %v3341_v27, %v3836_v38  ;;  %v1173_v60 = vld [vmem:[#allocation2 + $0x138] sm:$0xff]  ;;  %v3907_v44 = vld [vmem:[#allocation2 + $0x140] sm:$0xff] }
 0x13f   : > { %v930_v51 = vadd.f32 %v898_v9, %v826_v8  ;;  %v931_v52 = vadd.f32 %v899_v18, %v827_v23  ;;  %v1212_v62 = vmul.f32 %v3846_v25, %v3840_v11  ;;  %v1315_v26 = vmul.f32 %v3852_v45, %v3844_v39  ;;  %v3909_v18 = vld [vmem:[#allocation2 + $0x139] sm:$0xff] }
 0x140   : > { %v1449_v46 = vadd.f32 %v1417_v32, %v1345_v20  ;;  %v1450_v27 = vadd.f32 %v1418_v21, %v1346_v17  ;;  %v1316_v30 = vmul.f32 %v3852_v45, %v3850_v43  ;;  %v1419_v55 = vmul.f32 %v3862_v36, %v3856_v12 }
 0x141   : > { %v1034_v7 = vadd.f32 %v1002_v14, %v930_v51  ;;  %v1035_v24 = vadd.f32 %v1003_v19, %v931_v52  ;;  %v1420_v63 = vmul.f32 %v3862_v36, %v3860_v34  ;;  %v588_v2 = vmul.f32 %v3868_v56, %v3790_v3  ;;  %v1278_v19 = vld [vmem:[#allocation2 + $0x141] sm:$0xff] }
 0x142   : > { %v1488_v42 = vadd.f32 %v3454_v4, %v1449_v46  ;;  %v1489_v35 = vadd.f32 %v3454_v4, %v1450_v27  ;;  %v589_v5 = vmul.f32 %v3868_v56, %v3792_v6  ;;  %v692_v1 = vmul.f32 %v3876_v0, %v3798_v15  ;;  %v1381_v51 = vld [vmem:[#allocation2 + $0x13a] sm:$0xff]  ;;  %v1382_v52 = vld [vmem:[#allocation2 + $0x142] sm:$0xff] }
 0x143   : > { %v1138_v32 = vadd.f32 %v1106_v58, %v1034_v7  ;;  %v1139_v21 = vadd.f32 %v1107_v22, %v1035_v24  ;;  %v693_v10 = vmul.f32 %v3876_v0, %v3800_v16  ;;  %v796_v3 = vmul.f32 %v3882_v57, %v3806_v40  ;;  %v3895_v40 = vld [vmem:[#allocation6 + $0x4] ss:$0 sm:$0xff] }
 0x144   : > { %v1511_v48 = vpack.c.bf16 %v1489_v35, %v1488_v42  ;;  %v724_v28 = vadd.f32 %v692_v1, %v588_v2  ;;  %v797_v6 = vmul.f32 %v3882_v57, %v3808_v41  ;;  %v900_v15 = vmul.f32 %v3888_v33, %v3836_v38 }
 0x145   : > { %v1243_v50 = vadd.f32 %v1211_v37, %v1138_v32  ;;  %v1244_v54 = vadd.f32 %v1212_v62, %v1139_v21  ;;  %v725_v49 = vadd.f32 %v693_v10, %v589_v5  ;;  %v901_v16 = vmul.f32 %v3888_v33, %v3840_v11 }
 0x146   : > { %2490 = vmatmul.mubr.msk.bf16.vlgmr.msra.gmra.mrb[0].mxu1 %vm438_vm0, %v1511_v48  ;;  %v828_v13 = vadd.f32 %v796_v3, %v724_v28  ;;  %v1004_v31 = vmul.f32 %v3895_v40, %v3844_v39  ;;  %v1005_v41 = vmul.f32 %v3895_v40, %v3850_v43  ;;  %v1108_v61 = vmul.f32 %v3901_v29, %v3856_v12 }
 0x147   : > { %v1347_v53 = vadd.f32 %v1315_v26, %v1243_v50  ;;  %v1348_v59 = vadd.f32 %v1316_v30, %v1244_v54  ;;  %v829_v47 = vadd.f32 %v797_v6, %v725_v49  ;;  %v1109_v9 = vmul.f32 %v3901_v29, %v3860_v34  ;;  %v3942_v50 = vld [vmem:[#allocation2 + $0x150] sm:$0xff]  ;;  %v3944_v54 = vld [vmem:[#allocation2 + $0x158] sm:$0xff] }
 0x148   : > { %v932_v14 = vadd.f32 %v900_v15, %v828_v13  ;;  %v1213_v8 = vmul.f32 %v3846_v25, %v1173_v60  ;;  %v1214_v23 = vmul.f32 %v3846_v25, %v3907_v44  ;;  %v1317_v58 = vmul.f32 %v3852_v45, %v3909_v18  ;;  %v3946_v49 = vld [vmem:[#allocation2 + $0x151] sm:$0xff] }
 0x149   : > { %v1451_v20 = vadd.f32 %v1419_v55, %v1347_v53  ;;  %v1452_v17 = vadd.f32 %v1420_v63, %v1348_v59  ;;  %v933_v22 = vadd.f32 %v901_v16, %v829_v47  ;;  %v1318_v37 = vmul.f32 %v3852_v45, %v1278_v19 }
 0x14a   : > { %v1036_v62 = vadd.f32 %v1004_v31, %v932_v14  ;;  %v1421_v26 = vmul.f32 %v3862_v36, %v1381_v51  ;;  %v1422_v46 = vmul.f32 %v3862_v36, %v1382_v52  ;;  %v590_v27 = vmul.f32 %v3868_v56, %v3836_v38  ;;  %v1383_v14 = vld [vmem:[#allocation2 + $0x152] sm:$0xff] }
 0x14b   : > { %v1490_v30 = vadd.f32 %v3454_v4, %v1451_v20  ;;  %v1491_v7 = vadd.f32 %v3454_v4, %v1452_v17  ;;  %v1037_v24 = vadd.f32 %v1005_v41, %v933_v22  ;;  %v591_v55 = vmul.f32 %v3868_v56, %v3840_v11  ;;  %v3952_v41 = vld [vmem:[#allocation2 + $0x159] sm:$0xff] }
 0x14c   : > { %v1140_v63 = vadd.f32 %v1108_v61, %v1036_v62  ;;  %v694_v2 = vmul.f32 %v3876_v0, %v3844_v39  ;;  %v695_v42 = vmul.f32 %v3876_v0, %v3850_v43  ;;  %v798_v35 = vmul.f32 %v3882_v57, %v3856_v12 }
 0x14d   : > { %v1512_v5 = vpack.c.bf16 %v1491_v7, %v1490_v30  ;;  %v1141_v38 = vadd.f32 %v1109_v9, %v1037_v24  ;;  %v799_v1 = vmul.f32 %v3882_v57, %v3860_v34  ;;  %v902_v32 = vmul.f32 %v3888_v33, %v1173_v60 }
 0x14e   : > { %v1245_v21 = vadd.f32 %v1213_v8, %v1140_v63  ;;  %v726_v10 = vadd.f32 %v694_v2, %v590_v27  ;;  %v727_v11 = vadd.f32 %v695_v42, %v591_v55  ;;  %v903_v3 = vmul.f32 %v3888_v33, %v3907_v44  ;;  %v1384_v8 = vld [vmem:[#allocation2 + $0x15a] sm:$0xff] }
 0x14f   : > { %2493 = vmatprep.mubr.msk.bf16.mxu1 %vm438_vm0, %v1512_v5  ;;  %v1246_v39 = vadd.f32 %v1214_v23, %v1141_v38  ;;  %v1006_v43 = vmul.f32 %v3895_v40, %v3909_v18  ;;  %v1007_v12 = vmul.f32 %v3895_v40, %v1278_v19  ;;  %v1110_v48 = vmul.f32 %v3901_v29, %v1381_v51  ;;  %v3964_v27 = vld [vmem:[#allocation8] ss:$0 sm:$0xff] }
 0x150   : > { %v1349_v28 = vadd.f32 %v1317_v58, %v1245_v21  ;;  %v830_v34 = vadd.f32 %v798_v35, %v726_v10  ;;  %v831_v6 = vadd.f32 %v799_v1, %v727_v11  ;;  %v1111_v15 = vmul.f32 %v3901_v29, %v1382_v52  ;;  %v3983_v21 = vld [vmem:[#allocation2 + $0x168] sm:$0xff]  ;;  %v3985_v10 = vld [vmem:[#allocation2 + $0x170] sm:$0xff] }
 0x151   : > { %v1350_v16 = vadd.f32 %v1318_v37, %v1246_v39  ;;  %v1215_v13 = vmul.f32 %v3846_v25, %v3942_v50  ;;  %v1216_v31 = vmul.f32 %v3846_v25, %v3944_v54  ;;  %v1319_v61 = vmul.f32 %v3852_v45, %v3946_v49 }
 0x152   : > { %v1453_v53 = vadd.f32 %v1421_v26, %v1349_v28  ;;  %v934_v59 = vadd.f32 %v902_v32, %v830_v34  ;;  %v935_v47 = vadd.f32 %v903_v3, %v831_v6  ;;  %v1320_v9 = vmul.f32 %v3852_v45, %v3952_v41 }
 0x153   : > { %v1454_v23 = vadd.f32 %v1422_v46, %v1350_v16  ;;  %v1423_v58 = vmul.f32 %v3862_v36, %v1383_v14  ;;  %v1424_v20 = vmul.f32 %v3862_v36, %v1384_v8  ;;  %v592_v17 = vmul.f32 %v3868_v56, %v1173_v60  ;;  %v1385_v16 = vld [vmem:[#allocation2 + $0x16a] sm:$0xff] }
 0x154   : > { %v1492_v22 = vadd.f32 %v3454_v4, %v1453_v53  ;;  %v1038_v37 = vadd.f32 %v1006_v43, %v934_v59  ;;  %v1039_v62 = vadd.f32 %v1007_v12, %v935_v47  ;;  %v593_v26 = vmul.f32 %v3868_v56, %v3907_v44  ;;  %v1281_v12 = vld [vmem:[#allocation2 + $0x169] sm:$0xff] }
 0x155   : > { %v1493_v30 = vadd.f32 %v3964_v27, %v1454_v23  ;;  %v696_v46 = vmul.f32 %v3876_v0, %v3909_v18  ;;  %v697_v7 = vmul.f32 %v3876_v0, %v1278_v19  ;;  %v800_v24 = vmul.f32 %v3882_v57, %v1381_v51 }
 0x156   : > { %v1142_v55 = vadd.f32 %v1110_v48, %v1038_v37  ;;  %v1143_v60 = vadd.f32 %v1111_v15, %v1039_v62  ;;  %v801_v4 = vmul.f32 %v3882_v57, %v1382_v52  ;;  %v904_v63 = vmul.f32 %v3888_v33, %v3942_v50  ;;  %v3991_v48 = vld [vmem:[#allocation2 + $0x171] sm:$0xff] }
 0x157   : > { %v1513_v2 = vpack.c.bf16 %v1493_v30, %v1492_v22  ;;  %v728_v44 = vadd.f32 %v696_v46, %v592_v17  ;;  %v729_v42 = vadd.f32 %v697_v7, %v593_v26  ;;  %v905_v35 = vmul.f32 %v3888_v33, %v3944_v54 }
 0x158   : > { %v1247_v5 = vadd.f32 %v1215_v13, %v1142_v55  ;;  %v1248_v38 = vadd.f32 %v1216_v31, %v1143_v60  ;;  %v1008_v18 = vmul.f32 %v3895_v40, %v3946_v49  ;;  %v1009_v19 = vmul.f32 %v3895_v40, %v3952_v41  ;;  %v1386_v13 = vld [vmem:[#allocation2 + $0x172] sm:$0xff] }
 0x159   : > { %2494 = vmatmul.mubr.msk.bf16.gmra.mrb[4].mxu1 %vm438_vm0, %v1513_v2  ;;  %v832_v51 = vadd.f32 %v800_v24, %v728_v44  ;;  %v833_v52 = vadd.f32 %v801_v4, %v729_v42  ;;  %v1112_v1 = vmul.f32 %v3901_v29, %v1383_v14  ;;  %v1113_v32 = vmul.f32 %v3901_v29, %v1384_v8  ;;  %v1179_v2 = vld [vmem:[#allocation2 + $0x180] sm:$0xff] }
 0x15a   : > { %v1351_v11 = vadd.f32 %v1319_v61, %v1247_v5  ;;  %v1352_v3 = vadd.f32 %v1320_v9, %v1248_v38  ;;  %v1217_v39 = vmul.f32 %v3846_v25, %v3983_v21  ;;  %v1218_v43 = vmul.f32 %v3846_v25, %v3985_v10  ;;  %v1180_v5 = vld [vmem:[#allocation2 + $0x188] sm:$0xff] }
 0x15b   : > { %v936_v28 = vadd.f32 %v904_v63, %v832_v51  ;;  %v937_v34 = vadd.f32 %v905_v35, %v833_v52  ;;  %v1321_v6 = vmul.f32 %v3852_v45, %v1281_v12  ;;  %v1322_v15 = vmul.f32 %v3852_v45, %v3991_v48 }
 0x15c   : > { %v1455_v31 = vadd.f32 %v1423_v58, %v1351_v11  ;;  %v1456_v61 = vadd.f32 %v1424_v20, %v1352_v3  ;;  %v1425_v53 = vmul.f32 %v3862_v36, %v1385_v16  ;;  %v1426_v59 = vmul.f32 %v3862_v36, %v1386_v13  ;;  %v1387_v11 = vld [vmem:[#allocation2 + $0x182] sm:$0xff] }
 0x15d   : > { %v1040_v47 = vadd.f32 %v1008_v18, %v936_v28  ;;  %v1041_v9 = vadd.f32 %v1009_v19, %v937_v34  ;;  %v594_v23 = vmul.f32 %v3868_v56, %v3942_v50  ;;  %v595_v17 = vmul.f32 %v3868_v56, %v3944_v54  ;;  %v1283_v18 = vld [vmem:[#allocation2 + $0x181] sm:$0xff]  ;;  %v1388_v28 = vld [vmem:[#allocation2 + $0x18a] sm:$0xff] }
 0x15e   : > { %v1494_v22 = vadd.f32 %v3964_v27, %v1455_v31  ;;  %v1495_v37 = vadd.f32 %v3964_v27, %v1456_v61  ;;  %v698_v58 = vmul.f32 %v3876_v0, %v3946_v49  ;;  %v699_v20 = vmul.f32 %v3876_v0, %v3952_v41 }
 0x15f   : > { %v1144_v62 = vadd.f32 %v1112_v1, %v1040_v47  ;;  %v1145_v26 = vadd.f32 %v1113_v32, %v1041_v9  ;;  %v802_v30 = vmul.f32 %v3882_v57, %v1383_v14  ;;  %v803_v46 = vmul.f32 %v3882_v57, %v1384_v8  ;;  %v1284_v1 = vld [vmem:[#allocation2 + $0x189] sm:$0xff] }
 0x160   : > { %v1514_v50 = vpack.c.bf16 %v1495_v37, %v1494_v22  ;;  %v730_v7 = vadd.f32 %v698_v58, %v594_v23  ;;  %v731_v24 = vadd.f32 %v699_v20, %v595_v17  ;;  %v906_v54 = vmul.f32 %v3888_v33, %v3983_v21 }
 0x161   : > { %v1249_v55 = vadd.f32 %v1217_v39, %v1144_v62  ;;  %v1250_v60 = vadd.f32 %v1218_v43, %v1145_v26  ;;  %v907_v49 = vmul.f32 %v3888_v33, %v3985_v10  ;;  %v1010_v4 = vmul.f32 %v3895_v40, %v1281_v12 }
 0x162   : > { %2497 = vmatprep.mubr.msk.bf16.mxu1 %vm438_vm0, %v1514_v50  ;;  %v834_v41 = vadd.f32 %v802_v30, %v730_v7  ;;  %v835_v63 = vadd.f32 %v803_v46, %v731_v24  ;;  %v1011_v14 = vmul.f32 %v3895_v40, %v3991_v48  ;;  %v1114_v8 = vmul.f32 %v3901_v29, %v1385_v16  ;;  %v1181_v7 = vld [vmem:[#allocation2 + $0x198] sm:$0xff] }
 0x163   : > { %v1353_v44 = vadd.f32 %v1321_v6, %v1249_v55  ;;  %v1354_v42 = vadd.f32 %v1322_v15, %v1250_v60  ;;  %v1115_v35 = vmul.f32 %v3901_v29, %v1386_v13  ;;  %v1219_v38 = vmul.f32 %v3846_v25, %v1179_v2 }
 0x164   : > { %v938_v19 = vadd.f32 %v906_v54, %v834_v41  ;;  %v939_v51 = vadd.f32 %v907_v49, %v835_v63  ;;  %v1220_v52 = vmul.f32 %v3846_v25, %v1180_v5  ;;  %v1323_v32 = vmul.f32 %v3852_v45, %v1283_v18  ;;  %v1285_v49 = vld [vmem:[#allocation2 + $0x199] sm:$0xff]  ;;  %v1286_v63 = vld [vmem:[#allocation2 + $0x1a1] sm:$0xff] }
 0x165   : > { %v1457_v3 = vadd.f32 %v1425_v53, %v1353_v44  ;;  %v1458_v39 = vadd.f32 %v1426_v59, %v1354_v42  ;;  %v1324_v43 = vmul.f32 %v3852_v45, %v1284_v1  ;;  %v1427_v34 = vmul.f32 %v3862_v36, %v1387_v11  ;;  %v1389_v44 = vld [vmem:[#allocation2 + $0x19a] sm:$0xff] }
 0x166   : > { %v1042_v6 = vadd.f32 %v1010_v4, %v938_v19  ;;  %v1043_v15 = vadd.f32 %v1011_v14, %v939_v51  ;;  %v1428_v31 = vmul.f32 %v3862_v36, %v1388_v28  ;;  %v596_v61 = vmul.f32 %v3868_v56, %v3983_v21 }
 0x167   : > { %v1496_v47 = vadd.f32 %v3964_v27, %v1457_v3  ;;  %v1497_v9 = vadd.f32 %v3964_v27, %v1458_v39  ;;  %v597_v53 = vmul.f32 %v3868_v56, %v3985_v10  ;;  %v700_v59 = vmul.f32 %v3876_v0, %v1281_v12 }
 0x168   : > { %v1146_v23 = vadd.f32 %v1114_v8, %v1042_v6  ;;  %v1147_v17 = vadd.f32 %v1115_v35, %v1043_v15  ;;  %v701_v22 = vmul.f32 %v3876_v0, %v3991_v48  ;;  %v804_v37 = vmul.f32 %v3882_v57, %v1385_v16  ;;  %v4060_v15 = vld [vmem:[#allocation12] ss:$0 sm:$0xff] }
 0x169   : > { %v1515_v58 = vpack.c.bf16 %v1497_v9, %v1496_v47  ;;  %v732_v20 = vadd.f32 %v700_v59, %v596_v61  ;;  %v805_v21 = vmul.f32 %v3882_v57, %v1386_v13  ;;  %v908_v62 = vmul.f32 %v3888_v33, %v1179_v2  ;;  %v1182_v13 = vld [vmem:[#allocation2 + $0x1a0] sm:$0xff] }
 0x16a   : > { %v1251_v26 = vadd.f32 %v1219_v38, %v1146_v23  ;;  %v1252_v30 = vadd.f32 %v1220_v52, %v1147_v17  ;;  %v733_v46 = vadd.f32 %v701_v22, %v597_v53  ;;  %v909_v56 = vmul.f32 %v3888_v33, %v1180_v5  ;;  %v1390_v5 = vld [vmem:[#allocation2 + $0x1a2] sm:$0xff] }
 0x16b   : > { %2498 = vmatmul.mubr.msk.bf16.gmra.mrb[8].mxu1 %vm438_vm0, %v1515_v58  ;;  %v836_v10 = vadd.f32 %v804_v37, %v732_v20  ;;  %v1012_v12 = vmul.f32 %v3895_v40, %v1283_v18  ;;  %v1013_v16 = vmul.f32 %v3895_v40, %v1284_v1  ;;  %v1116_v57 = vmul.f32 %v3901_v29, %v1387_v11 }
 0x16c   : > { %v1355_v50 = vadd.f32 %v1323_v32, %v1251_v26  ;;  %v1356_v0 = vadd.f32 %v1324_v43, %v1252_v30  ;;  %v837_v48 = vadd.f32 %v805_v21, %v733_v46  ;;  %v1117_v33 = vmul.f32 %v3901_v29, %v1388_v28 }
 0x16d   : > { %v940_v24 = vadd.f32 %v908_v62, %v836_v10  ;;  %v1221_v41 = vmul.f32 %v3846_v25, %v1181_v7  ;;  %v1222_v2 = vmul.f32 %v3846_v25, %v1182_v13  ;;  %v1325_v35 = vmul.f32 %v3852_v45, %v1285_v49 }
 0x16e   : > { %v1459_v54 = vadd.f32 %v1427_v34, %v1355_v50  ;;  %v1460_v55 = vadd.f32 %v1428_v31, %v1356_v0  ;;  %v941_v60 = vadd.f32 %v909_v56, %v837_v48  ;;  %v1326_v29 = vmul.f32 %v3852_v45, %v1286_v63  ;;  %v4056_v45 = vld [vmem:[#allocation11] ss:$0 sm:$0xff] }
 0x16f   : > { %v1044_v4 = vadd.f32 %v1012_v12, %v940_v24  ;;  %v1429_v51 = vmul.f32 %v3862_v36, %v1389_v44  ;;  %v1430_v1 = vmul.f32 %v3862_v36, %v1390_v5 }
 0x170   : > { %v1498_v14 = vadd.f32 %v3964_v27, %v1459_v54  ;;  %v1499_v8 = vadd.f32 %v3964_v27, %v1460_v55  ;;  %v1045_v40 = vadd.f32 %v1013_v16, %v941_v60 }
 0x171   : > { %v1148_v42 = vadd.f32 %v1116_v57, %v1044_v4 }
 0x172   : > { %v1516_v38 = vpack.c.bf16 %v1499_v8, %v1498_v14  ;;  %v1149_v18 = vadd.f32 %v1117_v33, %v1045_v40 }
 0x173   : > { %v1253_v19 = vadd.f32 %v1221_v41, %v1148_v42 }
 0x174   : > { %2501 = vmatprep.mubr.msk.bf16.mxu1 %vm438_vm0, %v1516_v38  ;;  %v1254_v52 = vadd.f32 %v1222_v2, %v1149_v18 }
 0x175   : > { %v1357_v32 = vadd.f32 %v1325_v35, %v1253_v19 }
 0x176   : > { %v1358_v25 = vadd.f32 %v1326_v29, %v1254_v52 }
 0x177   : > { %v1461_v11 = vadd.f32 %v1429_v51, %v1357_v32 }
 0x178   : > { %v1462_v3 = vadd.f32 %v1430_v1, %v1358_v25 }
 0x179   : > { %v1500_v39 = vadd.f32 %v3964_v27, %v1461_v11 }
 0x17a   : > { %v1501_v43 = vadd.f32 %v3964_v27, %v1462_v3 }
 0x17c   : > { %v1517_v28 = vpack.c.bf16 %v1501_v43, %v1500_v39 }
 0x17e   : > { %2502 = vmatmul.mubr.msk.bf16.gmra.mrb[12].mxu1 %vm438_vm0, %v1517_v28 }
 0x1cf   : > { %v2475_v34 = vpop.f32.mrb[0].mxu0 }
 0x1d0   : > { %v1621_v6 = vadd.f32 %v2475_v34, %v4056_v45  ;;  %v1612_v36 = vpop.f32.mrb[1].mxu0 }
 0x1d1   : > { %v1613_v31 = vadd.f32 %v4056_v45, %v1612_v36  ;;  %v2476_v61 = vpop.f32.mrb[2].mxu0 }
 0x1d2   : > { %v2423_v47 = vpack.c.bf16 %v1621_v6, %v1621_v6  ;;  %v1624_v9 = vadd.f32 %v2476_v61, %v4056_v45  ;;  %v1615_v27 = vpop.f32.mrb[3].mxu0  ;;  %v1909_v53 = vsub.f32 %v1621_v6, %v4060_v15 }
 0x1d3   : > { %v2421_v59 = vpack.c.bf16 %v1613_v31, %v1613_v31  ;;  %v1907_v23 = vsub.f32 %v1613_v31, %v4060_v15  ;;  %v1616_v17 = vadd.f32 %v4056_v45, %v1615_v27 }
 0x1d4   : > { %1870 = vst.msk [vmem:[%s4067_s20 + $0x8] sm:$0xf] %vm1867_vm3, %v2423_v47  ;;  %v2424_v22 = vpack.c.bf16 %v1624_v9, %v1624_v9  ;;  %v1910_v58 = vsub.f32 %v1624_v9, %v4060_v15  ;;  %v2012_v62 = vmul.f32 %v1909_v53, %v1909_v53  ;;  %v1942_v10 = vsel %vm438_vm0, %v1909_v53, 0.0 }
 0x1d5   : > { %1868 = vst.msk [vmem:[%s4067_s20] sm:$0xf] %vm1867_vm3, %v2421_v59  ;;  %v2010_v37 = vmul.f32 %v1907_v23, %v1907_v23  ;;  %v2422_v20 = vpack.c.bf16 %v1616_v17, %v1616_v17  ;;  %v1908_v21 = vsub.f32 %v1616_v17, %v4060_v15  ;;  %v1939_v26 = vsel %vm438_vm0, %v1907_v23, 0.0 }
 0x1d6   : > { %1871 = vst.msk [vmem:[%s4067_s20 + $0xc] sm:$0xf] %vm1867_vm3, %v2424_v22  ;;  %v2013_v50 = vmul.f32 %v1910_v58, %v1910_v58  ;;  %v2045_v7 = vsel %vm438_vm0, %v2012_v62, 0.0  ;;  %v1944_v24 = vsel %vm438_vm0, %v1910_v58, 0.0 }
 0x1d7   : > { %1869 = vst.msk [vmem:[%s4067_s20 + $0x4] sm:$0xf] %vm1867_vm3, %v2422_v20  ;;  %v1940_v30 = vsel %vm438_vm0, %v1908_v21, 0.0  ;;  %v2011_v46 = vmul.f32 %v1908_v21, %v1908_v21  ;;  %v2042_v12 = vsel %vm438_vm0, %v2010_v37, 0.0 }
 0x1d8   : > { %v1941_v56 = vadd.f32 %v1940_v30, %v1939_v26  ;;  %v2047_v54 = vsel %vm438_vm0, %v2013_v50, 0.0 }
 0x1d9   : > { %v2043_v0 = vsel %vm438_vm0, %v2011_v46, 0.0 }
 0x1da   : > { %v1943_v48 = vadd.f32 %v1942_v10, %v1941_v56  ;;  %v2044_v16 = vadd.f32 %v2043_v0, %v2042_v12 }
 0x1dc   : > { %v2046_v57 = vadd.f32 %v2045_v7, %v2044_v16  ;;  %v1945_v13 = vadd.f32 %v1944_v24, %v1943_v48 }
 0x1de   : > { %v2048_v55 = vadd.f32 %v2047_v54, %v2046_v57 }
 0x1e2   : > { %v2479_v60 = vpop.f32.mrb[4].mxu0 }
 0x1e3   : > { %v1637_v33 = vadd.f32 %v2479_v60, %v4056_v45  ;;  %v1628_v49 = vpop.f32.mrb[5].mxu0 }
 0x1e4   : > { %v1629_v4 = vadd.f32 %v4056_v45, %v1628_v49  ;;  %v2480_v41 = vpop.f32.mrb[6].mxu0 }
 0x1e5   : > { %v2427_v63 = vpack.c.bf16 %v1637_v33, %v1637_v33  ;;  %v1640_v14 = vadd.f32 %v2480_v41, %v4056_v45  ;;  %v1631_v8 = vpop.f32.mrb[7].mxu0  ;;  %v1913_v40 = vsub.f32 %v1637_v33, %v4060_v15 }
 0x1e6   : > { %v2425_v2 = vpack.c.bf16 %v1629_v4, %v1629_v4  ;;  %v1911_v44 = vsub.f32 %v1629_v4, %v4060_v15  ;;  %v1632_v42 = vadd.f32 %v4056_v45, %v1631_v8 }
 0x1e7   : > { %1874 = vst.msk [vmem:[%s4067_s20 + $0x18] sm:$0xf] %vm1867_vm3, %v2427_v63  ;;  %v2428_v35 = vpack.c.bf16 %v1640_v14, %v1640_v14  ;;  %v1914_v5 = vsub.f32 %v1640_v14, %v4060_v15  ;;  %v2016_v52 = vmul.f32 %v1913_v40, %v1913_v40  ;;  %v1950_v39 = vsel %vm438_vm0, %v1913_v40, 0.0 }
 0x1e8   : > { %1872 = vst.msk [vmem:[%s4067_s20 + $0x10] sm:$0xf] %vm1867_vm3, %v2425_v2  ;;  %v1946_v38 = vsel %vm438_vm0, %v1911_v44, 0.0  ;;  %v2014_v18 = vmul.f32 %v1911_v44, %v1911_v44  ;;  %v2426_v29 = vpack.c.bf16 %v1632_v42, %v1632_v42  ;;  %v1912_v19 = vsub.f32 %v1632_v42, %v4060_v15 }
 0x1e9   : > { %v1947_v51 = vadd.f32 %v1946_v38, %v1945_v13  ;;  %1875 = vst.msk [vmem:[%s4067_s20 + $0x1c] sm:$0xf] %vm1867_vm3, %v2428_v35  ;;  %v2017_v43 = vmul.f32 %v1914_v5, %v1914_v5  ;;  %v2053_v36 = vsel %vm438_vm0, %v2016_v52, 0.0  ;;  %v1952_v31 = vsel %vm438_vm0, %v1914_v5, 0.0 }
 0x1ea   : > { %v2049_v1 = vsel %vm438_vm0, %v2014_v18, 0.0  ;;  %1873 = vst.msk [vmem:[%s4067_s20 + $0x14] sm:$0xf] %vm1867_vm3, %v2426_v29  ;;  %v1948_v32 = vsel %vm438_vm0, %v1912_v19, 0.0  ;;  %v2015_v25 = vmul.f32 %v1912_v19, %v1912_v19 }
 0x1eb   : > { %v2050_v11 = vadd.f32 %v2049_v1, %v2048_v55  ;;  %v1949_v3 = vadd.f32 %v1948_v32, %v1947_v51  ;;  %v2055_v9 = vsel %vm438_vm0, %v2017_v43, 0.0 }
 0x1ec   : > { %v2051_v28 = vsel %vm438_vm0, %v2015_v25, 0.0 }
 0x1ed   : > { %v1951_v34 = vadd.f32 %v1950_v39, %v1949_v3  ;;  %v2052_v6 = vadd.f32 %v2051_v28, %v2050_v11 }
 0x1ef   : > { %v2054_v61 = vadd.f32 %v2053_v36, %v2052_v6  ;;  %v1953_v47 = vadd.f32 %v1952_v31, %v1951_v34 }
 0x1f1   : > { %v2056_v27 = vadd.f32 %v2055_v9, %v2054_v61 }
 0x1f4   : > { %v2483_v53 = vpop.f32.mrb[8].mxu0 }
 0x1f5   : > { %v1653_v59 = vadd.f32 %v2483_v53, %v4056_v45  ;;  %v1644_v23 = vpop.f32.mrb[9].mxu0 }
 0x1f6   : > { %v1645_v17 = vadd.f32 %v4056_v45, %v1644_v23  ;;  %v2484_v22 = vpop.f32.mrb[10].mxu0 }
 0x1f7   : > { %v2431_v37 = vpack.c.bf16 %v1653_v59, %v1653_v59  ;;  %v1656_v58 = vadd.f32 %v2484_v22, %v4056_v45  ;;  %v1647_v20 = vpop.f32.mrb[11].mxu0  ;;  %v1917_v21 = vsub.f32 %v1653_v59, %v4060_v15 }
 0x1f8   : > { %v2429_v62 = vpack.c.bf16 %v1645_v17, %v1645_v17  ;;  %v1915_v26 = vsub.f32 %v1645_v17, %v4060_v15  ;;  %v1648_v30 = vadd.f32 %v4056_v45, %v1647_v20 }
 0x1f9   : > { %1878 = vst.msk [vmem:[%s4067_s20 + $0x28] sm:$0xf] %vm1867_vm3, %v2431_v37  ;;  %v2432_v46 = vpack.c.bf16 %v1656_v58, %v1656_v58  ;;  %v1918_v56 = vsub.f32 %v1656_v58, %v4060_v15  ;;  %v2020_v16 = vmul.f32 %v1917_v21, %v1917_v21  ;;  %v1958_v55 = vsel %vm438_vm0, %v1917_v21, 0.0 }
 0x1fa   : > { %1876 = vst.msk [vmem:[%s4067_s20 + $0x20] sm:$0xf] %vm1867_vm3, %v2429_v62  ;;  %v1954_v10 = vsel %vm438_vm0, %v1915_v26, 0.0  ;;  %v2018_v12 = vmul.f32 %v1915_v26, %v1915_v26  ;;  %v2430_v50 = vpack.c.bf16 %v1648_v30, %v1648_v30  ;;  %v1916_v0 = vsub.f32 %v1648_v30, %v4060_v15 }
 0x1fb   : > { %v1955_v48 = vadd.f32 %v1954_v10, %v1953_v47  ;;  %1879 = vst.msk [vmem:[%s4067_s20 + $0x2c] sm:$0xf] %vm1867_vm3, %v2432_v46  ;;  %v2021_v60 = vmul.f32 %v1918_v56, %v1918_v56  ;;  %v2061_v41 = vsel %vm438_vm0, %v2020_v16, 0.0  ;;  %v1960_v63 = vsel %vm438_vm0, %v1918_v56, 0.0 }
 0x1fc   : > { %v2057_v7 = vsel %vm438_vm0, %v2018_v12, 0.0  ;;  %1877 = vst.msk [vmem:[%s4067_s20 + $0x24] sm:$0xf] %vm1867_vm3, %v2430_v50  ;;  %v1956_v24 = vsel %vm438_vm0, %v1916_v0, 0.0  ;;  %v2019_v57 = vmul.f32 %v1916_v0, %v1916_v0 }
 0x1fd   : > { %v2058_v13 = vadd.f32 %v2057_v7, %v2056_v27  ;;  %v1957_v54 = vadd.f32 %v1956_v24, %v1955_v48  ;;  %v2063_v40 = vsel %vm438_vm0, %v2021_v60, 0.0 }
 0x1fe   : > { %v2059_v33 = vsel %vm438_vm0, %v2019_v57, 0.0 }
 0x1ff   : > { %v1959_v49 = vadd.f32 %v1958_v55, %v1957_v54  ;;  %v2060_v4 = vadd.f32 %v2059_v33, %v2058_v13 }
 0x201   : > { %v2062_v14 = vadd.f32 %v2061_v41, %v2060_v4  ;;  %v1961_v8 = vadd.f32 %v1960_v63, %v1959_v49 }
 0x203   : > { %v2064_v2 = vadd.f32 %v2063_v40, %v2062_v14 }
 0x207   : > { %v2487_v44 = vpop.f32.mrb[12].mxu0 }
 0x208   : > { %v1669_v42 = vadd.f32 %v2487_v44, %v4056_v45  ;;  %v1660_v35 = vpop.f32.mrb[13].mxu0 }
 0x209   : > { %v1661_v5 = vadd.f32 %v4056_v45, %v1660_v35  ;;  %v2488_v38 = vpop.f32.mrb[14].mxu0 }
 0x20a   : > { %v2435_v18 = vpack.c.bf16 %v1669_v42, %v1669_v42  ;;  %v1672_v29 = vadd.f32 %v2488_v38, %v4056_v45  ;;  %v1663_v19 = vpop.f32.mrb[15].mxu0  ;;  %v1921_v51 = vsub.f32 %v1669_v42, %v4060_v15 }
 0x20b   : > { %v2433_v52 = vpack.c.bf16 %v1661_v5, %v1661_v5  ;;  %v1919_v1 = vsub.f32 %v1661_v5, %v4060_v15  ;;  %v1664_v32 = vadd.f32 %v4056_v45, %v1663_v19 }
 0x20c   : > { %1882 = vst.msk [vmem:[%s4067_s20 + $0x38] sm:$0xf] %vm1867_vm3, %v2435_v18  ;;  %v2436_v25 = vpack.c.bf16 %v1672_v29, %v1672_v29  ;;  %v1922_v11 = vsub.f32 %v1672_v29, %v4060_v15  ;;  %v2024_v6 = vmul.f32 %v1921_v51, %v1921_v51  ;;  %v1966_v27 = vsel %vm438_vm0, %v1921_v51, 0.0 }
 0x20d   : > { %1880 = vst.msk [vmem:[%s4067_s20 + $0x30] sm:$0xf] %vm1867_vm3, %v2433_v52  ;;  %v1962_v3 = vsel %vm438_vm0, %v1919_v1, 0.0  ;;  %v2022_v39 = vmul.f32 %v1919_v1, %v1919_v1  ;;  %v2434_v43 = vpack.c.bf16 %v1664_v32, %v1664_v32  ;;  %v1920_v28 = vsub.f32 %v1664_v32, %v4060_v15 }
 0x20e   : > { %v1963_v34 = vadd.f32 %v1962_v3, %v1961_v8  ;;  %1883 = vst.msk [vmem:[%s4067_s20 + $0x3c] sm:$0xf] %vm1867_vm3, %v2436_v25  ;;  %v2025_v53 = vmul.f32 %v1922_v11, %v1922_v11  ;;  %v2069_v22 = vsel %vm438_vm0, %v2024_v6, 0.0  ;;  %v1968_v37 = vsel %vm438_vm0, %v1922_v11, 0.0 }
 0x20f   : > { %v2065_v36 = vsel %vm438_vm0, %v2022_v39, 0.0  ;;  %1881 = vst.msk [vmem:[%s4067_s20 + $0x34] sm:$0xf] %vm1867_vm3, %v2434_v43  ;;  %v1964_v31 = vsel %vm438_vm0, %v1920_v28, 0.0  ;;  %v2023_v61 = vmul.f32 %v1920_v28, %v1920_v28 }
 0x210   : > { %v2066_v47 = vadd.f32 %v2065_v36, %v2064_v2  ;;  %v1965_v9 = vadd.f32 %v1964_v31, %v1963_v34  ;;  %v2071_v21 = vsel %vm438_vm0, %v2025_v53, 0.0 }
 0x211   : > { %v2067_v59 = vsel %vm438_vm0, %v2023_v61, 0.0 }
 0x212   : > { %v1967_v23 = vadd.f32 %v1966_v27, %v1965_v9  ;;  %v2068_v17 = vadd.f32 %v2067_v59, %v2066_v47 }
 0x214   : > { %v2070_v58 = vadd.f32 %v2069_v22, %v2068_v17  ;;  %v1969_v20 = vadd.f32 %v1968_v37, %v1967_v23 }
 0x216   : > { %v2072_v62 = vadd.f32 %v2071_v21, %v2070_v58 }
 0x219   : > { %v2491_v26 = vpop.f32.mrb[0].mxu1 }
 0x21a   : > { %v1685_v30 = vadd.f32 %v2491_v26, %v4056_v45  ;;  %v1676_v46 = vpop.f32.mrb[1].mxu1 }
 0x21b   : > { %v1677_v56 = vadd.f32 %v4056_v45, %v1676_v46  ;;  %v2492_v10 = vpop.f32.mrb[2].mxu1 }
 0x21c   : > { %v2439_v12 = vpack.c.bf16 %v1685_v30, %v1685_v30  ;;  %v1688_v50 = vadd.f32 %v2492_v10, %v4056_v45  ;;  %v1679_v0 = vpop.f32.mrb[3].mxu1  ;;  %v1925_v48 = vsub.f32 %v1685_v30, %v4060_v15 }
 0x21d   : > { %v2437_v16 = vpack.c.bf16 %v1677_v56, %v1677_v56  ;;  %v1923_v7 = vsub.f32 %v1677_v56, %v4060_v15  ;;  %v1680_v24 = vadd.f32 %v4056_v45, %v1679_v0 }
 0x21e   : > { %1886 = vst.msk [vmem:[%s4067_s20 + $0x48] sm:$0xf] %vm1867_vm3, %v2439_v12  ;;  %v2440_v57 = vpack.c.bf16 %v1688_v50, %v1688_v50  ;;  %v1926_v13 = vsub.f32 %v1688_v50, %v4060_v15  ;;  %v2028_v4 = vmul.f32 %v1925_v48, %v1925_v48  ;;  %v1974_v2 = vsel %vm438_vm0, %v1925_v48, 0.0 }
 0x21f   : > { %1884 = vst.msk [vmem:[%s4067_s20 + $0x40] sm:$0xf] %vm1867_vm3, %v2437_v16  ;;  %v1970_v54 = vsel %vm438_vm0, %v1923_v7, 0.0  ;;  %v2026_v55 = vmul.f32 %v1923_v7, %v1923_v7  ;;  %v2438_v60 = vpack.c.bf16 %v1680_v24, %v1680_v24  ;;  %v1924_v33 = vsub.f32 %v1680_v24, %v4060_v15 }
 0x220   : > { %v1971_v49 = vadd.f32 %v1970_v54, %v1969_v20  ;;  %1887 = vst.msk [vmem:[%s4067_s20 + $0x4c] sm:$0xf] %vm1867_vm3, %v2440_v57  ;;  %v2029_v44 = vmul.f32 %v1926_v13, %v1926_v13  ;;  %v2077_v38 = vsel %vm438_vm0, %v2028_v4, 0.0  ;;  %v1976_v18 = vsel %vm438_vm0, %v1926_v13, 0.0 }
 0x221   : > { %v2073_v41 = vsel %vm438_vm0, %v2026_v55, 0.0  ;;  %1885 = vst.msk [vmem:[%s4067_s20 + $0x44] sm:$0xf] %vm1867_vm3, %v2438_v60  ;;  %v1972_v63 = vsel %vm438_vm0, %v1924_v33, 0.0  ;;  %v2027_v14 = vmul.f32 %v1924_v33, %v1924_v33 }
 0x222   : > { %v2074_v8 = vadd.f32 %v2073_v41, %v2072_v62  ;;  %v1973_v40 = vadd.f32 %v1972_v63, %v1971_v49  ;;  %v2079_v51 = vsel %vm438_vm0, %v2029_v44, 0.0 }
 0x223   : > { %v2075_v42 = vsel %vm438_vm0, %v2027_v14, 0.0 }
 0x224   : > { %v1975_v35 = vadd.f32 %v1974_v2, %v1973_v40  ;;  %v2076_v5 = vadd.f32 %v2075_v42, %v2074_v8 }
 0x226   : > { %v2078_v29 = vadd.f32 %v2077_v38, %v2076_v5  ;;  %v1977_v19 = vadd.f32 %v1976_v18, %v1975_v35 }
 0x228   : > { %v2080_v52 = vadd.f32 %v2079_v51, %v2078_v29 }
 0x22c   : > { %v2495_v1 = vpop.f32.mrb[4].mxu1 }
 0x22d   : > { %v1701_v32 = vadd.f32 %v2495_v1, %v4056_v45  ;;  %v1692_v25 = vpop.f32.mrb[5].mxu1 }
 0x22e   : > { %v1693_v11 = vadd.f32 %v4056_v45, %v1692_v25  ;;  %v2496_v3 = vpop.f32.mrb[6].mxu1 }
 0x22f   : > { %v2443_v39 = vpack.c.bf16 %v1701_v32, %v1701_v32  ;;  %v1704_v43 = vadd.f32 %v2496_v3, %v4056_v45  ;;  %v1695_v28 = vpop.f32.mrb[7].mxu1  ;;  %v1929_v34 = vsub.f32 %v1701_v32, %v4060_v15 }
 0x230   : > { %v2441_v6 = vpack.c.bf16 %v1693_v11, %v1693_v11  ;;  %v1927_v36 = vsub.f32 %v1693_v11, %v4060_v15  ;;  %v1696_v31 = vadd.f32 %v4056_v45, %v1695_v28 }
 0x231   : > { %1890 = vst.msk [vmem:[%s4067_s20 + $0x58] sm:$0xf] %vm1867_vm3, %v2443_v39  ;;  %v2444_v61 = vpack.c.bf16 %v1704_v43, %v1704_v43  ;;  %v1930_v47 = vsub.f32 %v1704_v43, %v4060_v15  ;;  %v2032_v17 = vmul.f32 %v1929_v34, %v1929_v34  ;;  %v1982_v62 = vsel %vm438_vm0, %v1929_v34, 0.0 }
 0x232   : > { %1888 = vst.msk [vmem:[%s4067_s20 + $0x50] sm:$0xf] %vm1867_vm3, %v2441_v6  ;;  %v1978_v9 = vsel %vm438_vm0, %v1927_v36, 0.0  ;;  %v2030_v27 = vmul.f32 %v1927_v36, %v1927_v36  ;;  %v2442_v53 = vpack.c.bf16 %v1696_v31, %v1696_v31  ;;  %v1928_v59 = vsub.f32 %v1696_v31, %v4060_v15 }
 0x233   : > { %v1979_v23 = vadd.f32 %v1978_v9, %v1977_v19  ;;  %1891 = vst.msk [vmem:[%s4067_s20 + $0x5c] sm:$0xf] %vm1867_vm3, %v2444_v61  ;;  %v2033_v26 = vmul.f32 %v1930_v47, %v1930_v47  ;;  %v2085_v10 = vsel %vm438_vm0, %v2032_v17, 0.0  ;;  %v1984_v12 = vsel %vm438_vm0, %v1930_v47, 0.0 }
 0x234   : > { %v2081_v22 = vsel %vm438_vm0, %v2030_v27, 0.0  ;;  %1889 = vst.msk [vmem:[%s4067_s20 + $0x54] sm:$0xf] %vm1867_vm3, %v2442_v53  ;;  %v1980_v37 = vsel %vm438_vm0, %v1928_v59, 0.0  ;;  %v2031_v58 = vmul.f32 %v1928_v59, %v1928_v59 }
 0x235   : > { %v2082_v20 = vadd.f32 %v2081_v22, %v2080_v52  ;;  %v1981_v21 = vadd.f32 %v1980_v37, %v1979_v23  ;;  %v2087_v48 = vsel %vm438_vm0, %v2033_v26, 0.0 }
 0x236   : > { %v2083_v30 = vsel %vm438_vm0, %v2031_v58, 0.0 }
 0x237   : > { %v1983_v46 = vadd.f32 %v1982_v62, %v1981_v21  ;;  %v2084_v56 = vadd.f32 %v2083_v30, %v2082_v20 }
 0x239   : > { %v2086_v50 = vadd.f32 %v2085_v10, %v2084_v56  ;;  %v1985_v0 = vadd.f32 %v1984_v12, %v1983_v46 }
 0x23b   : > { %v2088_v16 = vadd.f32 %v2087_v48, %v2086_v50 }
 0x23e   : > { %v2499_v7 = vpop.f32.mrb[8].mxu1 }
 0x23f   : > { %v1717_v24 = vadd.f32 %v2499_v7, %v4056_v45  ;;  %v1708_v57 = vpop.f32.mrb[9].mxu1 }
 0x240   : > { %v1709_v13 = vadd.f32 %v4056_v45, %v1708_v57  ;;  %v2500_v54 = vpop.f32.mrb[10].mxu1 }
 0x241   : > { %v2447_v55 = vpack.c.bf16 %v1717_v24, %v1717_v24  ;;  %v1720_v60 = vadd.f32 %v2500_v54, %v4056_v45  ;;  %v1711_v33 = vpop.f32.mrb[11].mxu1  ;;  %v1933_v49 = vsub.f32 %v1717_v24, %v4060_v15 }
 0x242   : > { %v2445_v4 = vpack.c.bf16 %v1709_v13, %v1709_v13  ;;  %v1931_v41 = vsub.f32 %v1709_v13, %v4060_v15  ;;  %v1712_v63 = vadd.f32 %v4056_v45, %v1711_v33 }
 0x243   : > { %1894 = vst.msk [vmem:[%s4067_s20 + $0x68] sm:$0xf] %vm1867_vm3, %v2447_v55  ;;  %v2448_v14 = vpack.c.bf16 %v1720_v60, %v1720_v60  ;;  %v1934_v8 = vsub.f32 %v1720_v60, %v4060_v15  ;;  %v2036_v5 = vmul.f32 %v1933_v49, %v1933_v49  ;;  %v1990_v52 = vsel %vm438_vm0, %v1933_v49, 0.0 }
 0x244   : > { %1892 = vst.msk [vmem:[%s4067_s20 + $0x60] sm:$0xf] %vm1867_vm3, %v2445_v4  ;;  %v1986_v40 = vsel %vm438_vm0, %v1931_v41, 0.0  ;;  %v2034_v2 = vmul.f32 %v1931_v41, %v1931_v41  ;;  %v2446_v44 = vpack.c.bf16 %v1712_v63, %v1712_v63  ;;  %v1932_v42 = vsub.f32 %v1712_v63, %v4060_v15 }
 0x245   : > { %v1987_v35 = vadd.f32 %v1986_v40, %v1985_v0  ;;  %1895 = vst.msk [vmem:[%s4067_s20 + $0x6c] sm:$0xf] %vm1867_vm3, %v2448_v14  ;;  %v2037_v1 = vmul.f32 %v1934_v8, %v1934_v8  ;;  %v2093_v3 = vsel %vm438_vm0, %v2036_v5, 0.0  ;;  %v1992_v39 = vsel %vm438_vm0, %v1934_v8, 0.0 }
 0x246   : > { %v2089_v38 = vsel %vm438_vm0, %v2034_v2, 0.0  ;;  %1893 = vst.msk [vmem:[%s4067_s20 + $0x64] sm:$0xf] %vm1867_vm3, %v2446_v44  ;;  %v1988_v18 = vsel %vm438_vm0, %v1932_v42, 0.0  ;;  %v2035_v29 = vmul.f32 %v1932_v42, %v1932_v42 }
 0x247   : > { %v2090_v19 = vadd.f32 %v2089_v38, %v2088_v16  ;;  %v1989_v51 = vadd.f32 %v1988_v18, %v1987_v35  ;;  %v2095_v34 = vsel %vm438_vm0, %v2037_v1, 0.0 }
 0x248   : > { %v2091_v32 = vsel %vm438_vm0, %v2035_v29, 0.0 }
 0x249   : > { %v1991_v25 = vadd.f32 %v1990_v52, %v1989_v51  ;;  %v2092_v11 = vadd.f32 %v2091_v32, %v2090_v19 }
 0x24b   : > { %v2094_v43 = vadd.f32 %v2093_v3, %v2092_v11  ;;  %v1993_v28 = vadd.f32 %v1992_v39, %v1991_v25 }
 0x24d   : > { %v2096_v6 = vadd.f32 %v2095_v34, %v2094_v43 }
 0x251   : > { %v2503_v36 = vpop.f32.mrb[12].mxu1 }
 0x252   : > { %v1733_v31 = vadd.f32 %v2503_v36, %v4056_v45  ;;  %v1724_v61 = vpop.f32.mrb[13].mxu1 }
 0x253   : > { %v1725_v47 = vadd.f32 %v4056_v45, %v1724_v61  ;;  %v2504_v9 = vpop.f32.mrb[14].mxu1 }
 0x254   : > { %v2451_v27 = vpack.c.bf16 %v1733_v31, %v1733_v31  ;;  %v1736_v53 = vadd.f32 %v2504_v9, %v4056_v45  ;;  %v1727_v59 = vpop.f32.mrb[15].mxu1  ;;  %v1937_v23 = vsub.f32 %v1733_v31, %v4060_v15 }
 0x255   : > { %v2449_v17 = vpack.c.bf16 %v1725_v47, %v1725_v47  ;;  %v1935_v22 = vsub.f32 %v1725_v47, %v4060_v15  ;;  %v1728_v37 = vadd.f32 %v4056_v45, %v1727_v59 }
 0x256   : > { %1898 = vst.msk [vmem:[%s4067_s20 + $0x78] sm:$0xf] %vm1867_vm3, %v2451_v27  ;;  %v2452_v58 = vpack.c.bf16 %v1736_v53, %v1736_v53  ;;  %v1938_v20 = vsub.f32 %v1736_v53, %v4060_v15  ;;  %v2040_v46 = vmul.f32 %v1937_v23, %v1937_v23 }
 0x257   : > { %1896 = vst.msk [vmem:[%s4067_s20 + $0x70] sm:$0xf] %vm1867_vm3, %v2449_v17  ;;  %v1994_v21 = vsel %vm438_vm0, %v1935_v22, 0.0  ;;  %v2038_v45 = vmul.f32 %v1935_v22, %v1935_v22  ;;  %v2450_v62 = vpack.c.bf16 %v1728_v37, %v1728_v37  ;;  %v1936_v26 = vsub.f32 %v1728_v37, %v4060_v15 }
 0x258   : > { %v1995_v30 = vadd.f32 %v1994_v21, %v1993_v28  ;;  %1899 = vst.msk [vmem:[%s4067_s20 + $0x7c] sm:$0xf] %vm1867_vm3, %v2452_v58 }
 0x259   : > { %v2097_v56 = vsel %vm438_vm0, %v2038_v45, 0.0  ;;  %1897 = vst.msk [vmem:[%s4067_s20 + $0x74] sm:$0xf] %vm1867_vm3, %v2450_v62  ;;  %v1996_v10 = vsel %vm438_vm0, %v1936_v26, 0.0  ;;  %v2039_v12 = vmul.f32 %v1936_v26, %v1936_v26 }
 0x25a   : > { %v2098_v50 = vadd.f32 %v2097_v56, %v2096_v6  ;;  %v1997_v0 = vadd.f32 %v1996_v10, %v1995_v30 }
 0x25b   : > { %2816 = shalt.err (!%p2813_p8)
}
 0x25c   : > { %s2817_s12 = scalar_lea.hbm %s4245_s26, 2048  ;;  %s2821_s10 = scalar_lea.hbm %s4384_s6, 4096 }
 0x25d   : > { %p2818_p6 = scmp.ne.s32.totalorder %s4245_s26, %s2817_s12  ;;  %p2822_p0 = scmp.lt.u32.totalorder %s4245_s26, %s4384_s6 }
 0x25e   : > { %p2823_p5 = scmp.lt.u32.totalorder %s2821_s10, %s2817_s12  ;;  %p2825_p7 = scmp.lt.u32.totalorder %s2817_s12, %s4245_s26 }
 0x25f   : > { %p2819_p4 = pnand %p2818_p6, %p4409_p10 }
 0x260   : > { %p2824_p9 = por %p2823_p5, %p2822_p0 }
 0x261   : > { %p2820_p11 = pneg %p2819_p4 }
 0x262   : > { %p2826_p12 = por %p2825_p7, %p2824_p9 }
 0x264   : > { %p2827_p13 = pnand %p2826_p12, %p2820_p11 }
 0x266   : > { %2830 = shalt.err (!%p2827_p13)
}
 0x267   : > { %s2955_s14 = smov 64   ;;  %s2956_s24 = smov 4   ;;  %v1998_v15 = vsel %vm438_vm0, %v1937_v23, 0.0  ;;  %v2041_v48 = vmul.f32 %v1938_v20, %v1938_v20  ;;  %v2099_v16 = vsel %vm438_vm0, %v2039_v12, 0.0  ;;  %v2101_v57 = vsel %vm438_vm0, %v2040_v46, 0.0 }
 0x268   : > { %2531 = dma.vmem_to_hbm [thread:$0]  (%p4409_p10), %s4247_s9, 2048, %s4245_s26, %s2113_s15, %s2955_s14, %s2955_s14, %s2956_s24   ;;  %v1999_v7 = vadd.f32 %v1998_v15, %v1997_v0  ;;  %v2100_v24 = vadd.f32 %v2099_v16, %v2098_v50  ;;  %v2000_v13 = vsel %vm438_vm0, %v1938_v20, 0.0  ;;  %vm2008_vm4 = vcmask 24576  }
 0x269   : > { %v2103_v60 = vsel %vm438_vm0, %v2041_v48, 0.0  ;;  %s2117_s9 = sand.u32 1, %s3025_s11   ;;  %s2416_s26 = sshll.u32 %s3025_s11, 4 }
 0x26a   : > { %v2001_v54 = vadd.f32 %v2000_v13, %v1999_v7  ;;  %v2102_v55 = vadd.f32 %v2101_v57, %v2100_v24  ;;  %s398_s15 = scalar_lea.vmem [#allocation15], %s3239_s17  ;;  %s4391_s12 = scalar_lea.vmem [#allocation17], %s3239_s17 }
 0x26b   : > { %s2150_s25 = sshll.u32 %s398_s15, 4  ;;  %s2163_s20 = sshll.u32 %s4391_s12, 4  ;;  %s4299_s25 = int_to_ptr.vmem [resolvable:$true] %s2150_s25  ;;  %s4307_s20 = int_to_ptr.vmem [resolvable:$true] %s2163_s20 }
 0x26c   : > { %v2002_v33 = vrot.slane %v2001_v54, 4  ;;  %v2104_v49 = vadd.f32 %v2103_v60, %v2102_v55  ;;  %s4297_s13 = scalar_lea.hbm %s4385_s7, %s2416_s26  ;;  %s4305_s14 = scalar_lea.hbm %s4386_s8, %s2416_s26 }
 0x26d   : > { %s4309_s24 = scalar_lea.sflag [#allocation16], %s2117_s9  ;;  %s2831_s16 = scalar_lea.vmem %s4299_s25, 16 }
 0x26e   : > { %v2003_v4 = vadd.f32 %v2002_v33, %v2001_v54  ;;  %v2105_v41 = vrot.slane %v2104_v49, 4  ;;  %p2832_p1 = scmp.ne.s32.totalorder %s4299_s25, %s2831_s16  ;;  %s2957_s10 = smov [#allocation15]  }
 0x26f   : > { %s2835_s12 = sshll.u32 %s2957_s10, 4  ;;  %s2836_s12 = int_to_ptr.vmem [resolvable:$false] %s2835_s12 }
 0x270   : > { %v2004_v63 = vrot.slane %v2003_v4, 2  ;;  %v2106_v14 = vadd.f32 %v2105_v41, %v2104_v49  ;;  %p2833_p3 = pnand %p2832_p1, %p4409_p10  ;;  %s2837_s0 = scalar_lea.vmem %s2836_s12, 32 }
 0x271   : > { %p2838_p8 = scmp.lt.s32.totalorder %s4299_s25, %s2836_s12  ;;  %p2839_p6 = scmp.lt.s32.totalorder %s2837_s0, %s2831_s16 }
 0x272   : > { %v2005_v8 = vadd.f32 %v2004_v63, %v2003_v4  ;;  %v2107_v40 = vrot.slane %v2106_v14, 2  ;;  %p2834_p2 = pneg %p2833_p3 }
 0x273   : > { %p2840_p4 = por %p2839_p6, %p2838_p8 }
 0x274   : > { %v2006_v2 = vrot.slane %v2005_v8, 1  ;;  %v2108_v44 = vadd.f32 %v2107_v40, %v2106_v14 }
 0x275   : > { %p2841_p11 = pnand %p2840_p4, %p2834_p2 }
 0x276   : > { %v2109_v42 = vrot.slane %v2108_v44, 1  ;;  %v2007_v35 = vadd.f32 %v2006_v2, %v2005_v8 }
 0x278   : > { %2009 = vst.msk [vmem:[%s398_s15] sm:$0x1] %vm2008_vm4, %v2007_v35  ;;  %v2110_v5 = vadd.f32 %v2109_v42, %v2108_v44 }
 0x279   : > { %2844 = shalt.err (!%p2841_p11)
}
 0x27a   : > { %s2845_s9 = scalar_lea.hbm %s4297_s13, 16  ;;  %s2849_s11 = scalar_lea.hbm %s4385_s7, 32 }
 0x27b   : > { %p2846_p0 = scmp.ne.s32.totalorder %s4297_s13, %s2845_s9  ;;  %p2850_p7 = scmp.lt.u32.totalorder %s4297_s13, %s4385_s7 }
 0x27c   : > { %p2851_p12 = scmp.lt.u32.totalorder %s2849_s11, %s2845_s9  ;;  %p2853_p1 = scmp.lt.u32.totalorder %s2845_s9, %s4297_s13 }
 0x27d   : > { %p2847_p5 = pnand %p2846_p0, %p4409_p10 }
 0x27e   : > { %p2852_p13 = por %p2851_p12, %p2850_p7 }
 0x27f   : > { %p2848_p9 = pneg %p2847_p5 }
 0x280   : > { %p2854_p3 = por %p2853_p1, %p2852_p13 }
 0x282   : > { %p2855_p2 = pnand %p2854_p3, %p2848_p9 }
 0x284   : > { %2858 = shalt.err (!%p2855_p2)
}
 0x285   : > { %2532 = dma.vmem_to_hbm [thread:$0]  (%p4409_p10), %s4299_s25, 16, %s4297_s13, %s4309_s24  }
 0x286   : > { %s4410_s0 = scalar_lea.vmem [#allocation17], %s3239_s17  ;;  %s2859_s16 = scalar_lea.vmem %s4307_s20, 16 }
 0x287   : > { %2111 = vst.msk [vmem:[%s4410_s0] sm:$0x1] %vm2008_vm4, %v2110_v5  ;;  %p2860_p8 = scmp.ne.s32.totalorder %s4307_s20, %s2859_s16  ;;  %s2958_s10 = smov [#allocation17]  }
 0x288   : > { %s2863_s9 = sshll.u32 %s2958_s10, 4  ;;  %s2864_s9 = int_to_ptr.vmem [resolvable:$false] %s2863_s9 }
 0x289   : > { %p2861_p6 = pnand %p2860_p8, %p4409_p10  ;;  %s2865_s26 = scalar_lea.vmem %s2864_s9, 32 }
 0x28a   : > { %p2866_p11 = scmp.lt.s32.totalorder %s4307_s20, %s2864_s9  ;;  %p2867_p0 = scmp.lt.s32.totalorder %s2865_s26, %s2859_s16 }
 0x28b   : > { %p2862_p4 = pneg %p2861_p6 }
 0x28c   : > { %p2868_p5 = por %p2867_p0, %p2866_p11 }
 0x28e   : > { %p2869_p9 = pnand %p2868_p5, %p2862_p4 }
 0x290   : > { %2872 = shalt.err (!%p2869_p9)
}
 0x291   : > { %s2873_s17 = scalar_lea.hbm %s4305_s14, 16  ;;  %s2877_s15 = scalar_lea.hbm %s4386_s8, 32 }
 0x292   : > { %p2874_p7 = scmp.ne.s32.totalorder %s4305_s14, %s2873_s17  ;;  %p2878_p1 = scmp.lt.u32.totalorder %s4305_s14, %s4386_s8 }
 0x293   : > { %p2879_p3 = scmp.lt.u32.totalorder %s2877_s15, %s2873_s17  ;;  %p2881_p8 = scmp.lt.u32.totalorder %s2873_s17, %s4305_s14 }
 0x294   : > { %p2875_p12 = pnand %p2874_p7, %p4409_p10 }
 0x295   : > { %p2880_p2 = por %p2879_p3, %p2878_p1 }
 0x296   : > { %p2876_p13 = pneg %p2875_p12 }
 0x297   : > { %p2882_p6 = por %p2881_p8, %p2880_p2 }
 0x299   : > { %p2883_p4 = pnand %p2882_p6, %p2876_p13 }
 0x29b   : > { %2886 = shalt.err (!%p2883_p4)
}
 0x29c   : > { %2533 = dma.vmem_to_hbm [thread:$0]  (%p4409_p10), %s4307_s20, 16, %s4305_s14, %s4309_s24  }
 0x29d PF: > { %s2175_s12 = sand.u32 1, %s2929_s27   ;;  %p4411_p11 = scmp.ne.s32.totalorder %s4399_s22, 0 }
 0x29e   : > { %p4412_p0 = scmp.ge.s32.totalorder %s2941_s30, 2  ;;  %s2176_s0 = scalar_lea.sflag [#allocation5], %s2175_s12 }
 0x2a0   : > { %p2558_p5 = pnand %p4412_p0, %p4411_p11 }
 0x2a2   : > { %2920 = dma.done.wait (!%p2558_p5), %s2176_s0, 2048  }
 0x2a3   : > { %2922 = vsyncadd (!%p2558_p5), %s2176_s0, 4294965248  ;;  %s4413_s16 = sadd.s32 4294967294, %s2941_s30  }
 0x2a4   : > { %s2184_s10 = sand.u32 1, %s4413_s16  }
 0x2a5   : > { %s2185_s9 = scalar_lea.sflag [#allocation16], %s2184_s10 }
 0x2a6   : > { %2924 = dma.done.wait (!%p2558_p5), %s2185_s9, 32  }
 0x2a7   : > { %2926 = vsyncadd (!%p2558_p5), %s2185_s9, 4294967264  ;;  %p28_p10 = scmp.ge.s32.totalorder %s3164_s23, 4   ;;  %s4414_s27 = smov %s2933_s28 }
 0x2a8   : > { %s4415_s28 = smov %s2937_s29  ;;  %s4416_s29 = smov %s3176_s18 }
 0x2a9   : > { %s4417_s30 = smov %s3164_s23  ;;  %30 = sbr.rel (!%p28_p10) target bundleno = 12 (0xc), region = 151 }
 0x2b0   :  { %2197 = vsyncpa [#allocation4], 1 }
 0x2b1   :  { %2199 = vsyncpa [#allocation4 + $0x1], 1 }
 0x2b2   :  { %2200 = vsyncpa [#allocation7], 1 }
 0x2b3   :  { %2201 = vsyncpa [#allocation10], 1 }
 0x2b4   :  { %2202 = vsyncpa [#allocation13], 1 }
 0x2b5   :  { %2203 = vsyncpa [#allocation5], 1 }
 0x2b6   :  { %2205 = vsyncpa [#allocation5 + $0x1], 1 }
 0x2b7   :  { %2206 = vsyncpa [#allocation16], 1 }
 0x2b8   :  { %2208 = vsyncpa [#allocation16 + $0x1], 1 }

// kernel: recurrent_block_forward.5
= control target key start
LH: loop header
LB: loop body
LE: loop exit
PB: predicated region body
PF: predicated region fallthrough
CT: control target
= control target key end

     0   :  { %s5019_s0 = inlined_call_operand.hbm [shape: bf16[2,16,16,4], index: 0, kind: input, shape index: {}]   ;;  %s5020_s1 = inlined_call_operand.hbm [shape: f32[1,4], index: 1, kind: input, shape index: {}]   ;;  %s5021_s2 = inlined_call_operand.hbm [shape: f32[1,4], index: 2, kind: input, shape index: {}]   ;;  %s5022_s3 = inlined_call_operand.hbm [shape: f32[2,16,16,4], index: 3, kind: input, shape index: {}]   ;;  %s5023_s4 = inlined_call_operand.hbm [shape: f32[3,3,1,4], index: 4, kind: input, shape index: {}]   ;;  %s5024_s5 = inlined_call_operand.hbm [shape: f32[1,4], index: 5, kind: input, shape index: {}]   ;;  %s5025_s6 = inlined_call_operand.hbm [shape: bf16[4,4], index: 6, kind: input, shape index: {}]   ;;  %s5026_s7 = inlined_call_operand.hbm [shape: f32[1,4], index: 7, kind: input, shape index: {}]   ;;  %s5027_s8 = inlined_call_operand.hbm [shape: f32[1,4], index: 8, kind: input, shape index: {}]   ;;  %s5028_s9 = inlined_call_operand.hbm [shape: bf16[2,16,16,4], index: 9, kind: output, shape index: {0}]   ;;  %s5029_s10 = inlined_call_operand.hbm [shape: f32[2,1,4], index: 10, kind: output, shape index: {1}]   ;;  %s5030_s11 = inlined_call_operand.hbm [shape: f32[2,1,4], index: 11, kind: output, shape index: {2}]  }
   0x1   :  { %5036 = sst [smem:[#allocation30_spill]] %s5019_s0 }
   0x2   :  { %5037 = sst [smem:[#allocation31_spill]] %s5020_s1 }
   0x3   :  { %5038 = sst [smem:[#allocation32_spill]] %s5021_s2 }
   0x4   :  { %5039 = sst [smem:[#allocation33_spill]] %s5023_s4 }
   0x5   :  { %5040 = sst [smem:[#allocation34_spill]] %s5024_s5 }
   0x6   :  { %5041 = sst [smem:[#allocation35_spill]] %s5025_s6 }
   0x7   :  { %5042 = sst [smem:[#allocation36_spill]] %s5026_s7 }
   0x8   :  { %5043 = sst [smem:[#allocation37_spill]] %s5027_s8 }
   0x9   :  { %5044 = sst [smem:[#allocation38_spill]] %s5030_s11 }
   0xa   :  { %17 = vsyncpa [#allocation4], 0 }
   0xb   :  { %19 = vsyncpa [#allocation4 + $0x1], 0 }
   0xc   :  { %20 = vsyncpa [#allocation7], 0 }
   0xd   :  { %21 = vsyncpa [#allocation10], 0 }
   0xe   :  { %23 = vsyncpa [#allocation10 + $0x1], 0 }
   0xf   :  { %24 = vsyncpa [#allocation13], 0 }
  0x10   :  { %25 = vsyncpa [#allocation16], 0 }
  0x11   :  { %26 = vsyncpa [#allocation5], 0 }
  0x12   :  { %28 = vsyncpa [#allocation5 + $0x1], 0 }
  0x13   :  { %29 = vsyncpa [#allocation20], 0 }
  0x14   :  { %31 = vsyncpa [#allocation20 + $0x1], 0  ;;  %s3629_s17 = smov 0   ;;  %s3631_s18 = smov 0  }
  0x15   :  { %s3633_s19 = smov 0   ;;  %s3635_s20 = smov 0  }
  0x16 LB: > { %s3548_s21 = smov [#allocation6]   ;;  %s3650_s23 = sadd.s32 4294967295, %s3546_s20   ;;  %s3546_s20 = sphi %s3635_s20, %s5081_s20   ;;  %s3542_s19 = sphi %s3633_s19, %s5080_s19   ;;  %s3538_s18 = sphi %s3631_s18, %s5079_s18   ;;  %s3534_s17 = sphi %s3629_s17, %s5078_s17  }
  0x17   : > { %s332_s22 = sshll.u32 %s3548_s21, 4  ;;  %p2727_p0 = scmp.ge.s32.totalorder %s3546_s20, 1  ;;  %s3655_s22 = int_to_ptr.vmem [resolvable:$true] %s332_s22 }
  0x18   : > { %p5032_p1 = scmp.eq.s32.totalorder %s3650_s23, 0  ;;  %p319_p2 = scmp.lt.s32.totalorder %s3546_s20, 3 }
  0x19   : > { %s3549_s25 = smov [#allocation11]   ;;  %s3550_s28 = smov [#allocation12]  }
  0x1a   : > { %p3657_p3 = pnand %p2727_p0, %p319_p2  ;;  %s353_s26 = sshll.u32 %s3549_s25, 4  ;;  %s3664_s26 = int_to_ptr.vmem [resolvable:$true] %s353_s26 }
  0x1b   : > { %s367_s29 = sshll.u32 %s3550_s28, 4  ;;  %s5047_s1 = sld [smem:[#allocation31_spill]]  ;;  %s3672_s29 = int_to_ptr.vmem [resolvable:$true] %s367_s29 }
  0x1c   : > { %s5045_s24 = scalar_select %p3657_p3, 1, 0 }
  0x1d   : > { %p3029_p5 = pneg %p3657_p3 }
  0x1f   : > { %p3668_p6 = pnand %p3029_p5, %p5032_p1 }
  0x21   : > { %s3144_s13 = scalar_lea.hbm %s5047_s1, 16  ;;  %p3682_p8 = pneg %p3668_p6 }
  0x22   : > { %p3145_p7 = scmp.ne.s32.totalorder %s5047_s1, %s3144_s13  ;;  %p3151_p11 = scmp.lt.u32.totalorder %s3144_s13, %s5047_s1 }
  0x24   : > { %p3147_p9 = pnand %p3682_p8, %p3145_p7 }
  0x26   : > { %p3148_p10 = pneg %p3147_p9 }
  0x28   : > { %p3153_p12 = pnand %p3151_p11, %p3148_p10 }
  0x2a   : > { %3156 = shalt.err (!%p3153_p12)
}
  0x2b   : > { %s3157_s28 = scalar_lea.vmem %s3655_s22, 16  ;;  %s3164_s30 = scalar_lea.vmem %s3655_s22, 32 }
  0x2c   : > { %p3158_p13 = scmp.ne.s32.totalorder %s3655_s22, %s3157_s28  ;;  %p3165_p5 = scmp.lt.s32.totalorder %s3655_s22, %s3655_s22 }
  0x2d   : > { %p3166_p7 = scmp.lt.s32.totalorder %s3164_s30, %s3157_s28 }
  0x2e   : > { %p3160_p0 = pnand %p3158_p13, %p3682_p8 }
  0x2f   : > { %p3167_p9 = por %p3166_p7, %p3165_p5 }
  0x30   : > { %p3161_p2 = pneg %p3160_p0 }
  0x32   : > { %p3168_p4 = pnand %p3167_p9, %p3161_p2 }
  0x34   : > { %3171 = shalt.err (!%p3168_p4)
}
  0x35   : > { %3032 = dma.hbm_to_vmem [thread:$0]  (!%p3668_p6), %s5047_s1, 16, %s3655_s22, [#allocation7]  }
  0x36   : > { %s5049_s4 = sld [smem:[#allocation33_spill]] }
  0x3c   : > { %s3172_s21 = scalar_lea.hbm %s5049_s4, 144 }
  0x3d   : > { %p3173_p10 = scmp.ne.s32.totalorder %s5049_s4, %s3172_s21  ;;  %p3179_p4 = scmp.lt.u32.totalorder %s3172_s21, %s5049_s4 }
  0x3f   : > { %p3175_p11 = pnand %p3173_p10, %p3682_p8 }
  0x41   : > { %p3176_p12 = pneg %p3175_p11 }
  0x43   : > { %p3181_p13 = pnand %p3179_p4, %p3176_p12 }
  0x45   : > { %3184 = shalt.err (!%p3181_p13)
}
  0x46   : > { %s3185_s22 = scalar_lea.vmem %s3664_s26, 144  ;;  %s3192_s11 = scalar_lea.vmem %s3664_s26, 160 }
  0x47   : > { %p3186_p0 = scmp.ne.s32.totalorder %s3664_s26, %s3185_s22  ;;  %p3193_p7 = scmp.lt.s32.totalorder %s3664_s26, %s3664_s26 }
  0x48   : > { %p3194_p9 = scmp.lt.s32.totalorder %s3192_s11, %s3185_s22 }
  0x49   : > { %p3188_p2 = pnand %p3186_p0, %p3682_p8 }
  0x4a   : > { %p3195_p10 = por %p3194_p9, %p3193_p7 }
  0x4b   : > { %p3189_p5 = pneg %p3188_p2 }
  0x4d   : > { %p3196_p11 = pnand %p3195_p10, %p3189_p5 }
  0x4f   : > { %3199 = shalt.err (!%p3196_p11)
}
  0x50   : > { %s3551_s12 = smov 16   ;;  %s3552_s13 = smov 1  }
  0x51   : > { %3038 = dma.hbm_to_vmem [thread:$0]  (!%p3668_p6), %s5049_s4, 144, %s3664_s26, [#allocation10], %s3551_s12, %s3551_s12, %s3552_s13  }
  0x52   : > { %s5050_s5 = sld [smem:[#allocation34_spill]] }
  0x58   : > { %s3200_s28 = scalar_lea.hbm %s5050_s5, 16 }
  0x59   : > { %p3201_p12 = scmp.ne.s32.totalorder %s5050_s5, %s3200_s28  ;;  %p3207_p0 = scmp.lt.u32.totalorder %s3200_s28, %s5050_s5 }
  0x5b   : > { %p3203_p4 = pnand %p3201_p12, %p3682_p8 }
  0x5d   : > { %p3204_p13 = pneg %p3203_p4 }
  0x5f   : > { %p3209_p2 = pnand %p3207_p0, %p3204_p13 }
  0x61   : > { %3212 = shalt.err (!%p3209_p2)
}
  0x62   : > { %s3213_s26 = scalar_lea.vmem %s3672_s29, 16  ;;  %s3220_s1 = scalar_lea.vmem %s3672_s29, 32 }
  0x63   : > { %p3214_p5 = scmp.ne.s32.totalorder %s3672_s29, %s3213_s26  ;;  %p3221_p10 = scmp.lt.s32.totalorder %s3672_s29, %s3672_s29 }
  0x64   : > { %p3222_p11 = scmp.lt.s32.totalorder %s3220_s1, %s3213_s26 }
  0x65   : > { %p3216_p7 = pnand %p3214_p5, %p3682_p8 }
  0x66   : > { %p3223_p12 = por %p3222_p11, %p3221_p10 }
  0x67   : > { %p3217_p9 = pneg %p3216_p7 }
  0x69   : > { %p3224_p4 = pnand %p3223_p12, %p3217_p9 }
  0x6b   : > { %3227 = shalt.err (!%p3224_p4)
}
  0x6c   : > { %3041 = dma.hbm_to_vmem [thread:$0]  (!%p3668_p6), %s5050_s5, 16, %s3672_s29, [#allocation13]  }
  0x6d   : > { %s3553_s14 = smov [#allocation15]   ;;  %s3554_s21 = smov [#allocation8]  }
  0x6e   : > { %s389_s15 = sshll.u32 %s3553_s14, 4  ;;  %s343_s25 = sshll.u32 %s3554_s21, 4  ;;  %s390_s15 = int_to_ptr.vmem [resolvable:$true] %s389_s15  ;;  %s344_s25 = int_to_ptr.vmem [resolvable:$true] %s343_s25 }
  0x6f   : > { %s5051_s7 = sld [smem:[#allocation36_spill]] }
  0x75   : > { %s3228_s22 = scalar_lea.hbm %s5051_s7, 16 }
  0x76   : > { %p3229_p13 = scmp.ne.s32.totalorder %s5051_s7, %s3228_s22  ;;  %p3235_p5 = scmp.lt.u32.totalorder %s3228_s22, %s5051_s7 }
  0x78   : > { %p3231_p0 = pnand %p3229_p13, %p3682_p8 }
  0x7a   : > { %p3232_p2 = pneg %p3231_p0 }
  0x7c   : > { %p3237_p7 = pnand %p3235_p5, %p3232_p2 }
  0x7e   : > { %3240 = shalt.err (!%p3237_p7)
}
  0x7f   : > { %s3241_s29 = scalar_lea.vmem %s390_s15, 16  ;;  %s3248_s13 = scalar_lea.vmem %s390_s15, 32 }
  0x80   : > { %p3242_p9 = scmp.ne.s32.totalorder %s390_s15, %s3241_s29  ;;  %p3249_p12 = scmp.lt.s32.totalorder %s390_s15, %s390_s15 }
  0x81   : > { %p3250_p4 = scmp.lt.s32.totalorder %s3248_s13, %s3241_s29 }
  0x82   : > { %p3244_p10 = pnand %p3242_p9, %p3682_p8 }
  0x83   : > { %p3251_p1 = por %p3250_p4, %p3249_p12 }
  0x84   : > { %p3245_p11 = pneg %p3244_p10 }
  0x86   : > { %p3252_p3 = pnand %p3251_p1, %p3245_p11 }
  0x88   : > { %3255 = shalt.err (!%p3252_p3)
}
  0x89   : > { %3047 = dma.hbm_to_vmem [thread:$0]  (!%p3668_p6), %s5051_s7, 16, %s390_s15, [#allocation16]  }
  0x8a   : > { %s5052_s2 = sld [smem:[#allocation32_spill]] }
  0x90   : > { %s3256_s22 = scalar_lea.hbm %s5052_s2, 16 }
  0x91   : > { %p3257_p13 = scmp.ne.s32.totalorder %s5052_s2, %s3256_s22  ;;  %p3263_p3 = scmp.lt.u32.totalorder %s3256_s22, %s5052_s2 }
  0x93   : > { %p3259_p0 = pnand %p3257_p13, %p3682_p8 }
  0x95   : > { %p3260_p1 = pneg %p3259_p0 }
  0x97   : > { %p3265_p2 = pnand %p3263_p3, %p3260_p1 }
  0x99   : > { %3268 = shalt.err (!%p3265_p2)
}
  0x9a   : > { %s3269_s29 = scalar_lea.vmem %s344_s25, 16  ;;  %s3276_s15 = scalar_lea.vmem %s344_s25, 32 }
  0x9b   : > { %p3270_p5 = scmp.ne.s32.totalorder %s344_s25, %s3269_s29  ;;  %p3277_p10 = scmp.lt.s32.totalorder %s344_s25, %s344_s25 }
  0x9c   : > { %p3278_p11 = scmp.lt.s32.totalorder %s3276_s15, %s3269_s29 }
  0x9d   : > { %p3272_p7 = pnand %p3270_p5, %p3682_p8 }
  0x9e   : > { %p3279_p12 = por %p3278_p11, %p3277_p10 }
  0x9f   : > { %p3273_p9 = pneg %p3272_p7 }
  0xa1   : > { %p3280_p4 = pnand %p3279_p12, %p3273_p9 }
  0xa3   : > { %3283 = shalt.err (!%p3280_p4)
}
  0xa4   : > { %3035 = dma.hbm_to_vmem [thread:$0]  (!%p3668_p6), %s5052_s2, 16, %s344_s25, [#allocation7]  }
  0xa5   : > { %s3555_s21 = smov [#allocation14]   ;;  %s3556_s30 = smov [#allocation17]  }
  0xa6   : > { %s378_s28 = sshll.u32 %s3555_s21, 4  ;;  %s400_s22 = sshll.u32 %s3556_s30, 4  ;;  %s379_s28 = int_to_ptr.vmem [resolvable:$true] %s378_s28  ;;  %s401_s22 = int_to_ptr.vmem [resolvable:$true] %s400_s22 }
  0xa7   : > { %s5053_s6 = sld [smem:[#allocation35_spill]] }
  0xad   : > { %s3284_s1 = scalar_lea.hbm %s5053_s6, 32 }
  0xae   : > { %p3285_p13 = scmp.ne.s32.totalorder %s5053_s6, %s3284_s1  ;;  %p3291_p3 = scmp.lt.u32.totalorder %s3284_s1, %s5053_s6 }
  0xb0   : > { %p3287_p0 = pnand %p3285_p13, %p3682_p8 }
  0xb2   : > { %p3288_p1 = pneg %p3287_p0 }
  0xb4   : > { %p3293_p2 = pnand %p3291_p3, %p3288_p1 }
  0xb6   : > { %3296 = shalt.err (!%p3293_p2)
}
  0xb7   : > { %s3297_s25 = scalar_lea.vmem %s379_s28, 32  ;;  %p3305_p10 = scmp.lt.s32.totalorder %s379_s28, %s379_s28 }
  0xb8   : > { %p3298_p5 = scmp.ne.s32.totalorder %s379_s28, %s3297_s25  ;;  %p3306_p11 = scmp.lt.s32.totalorder %s3297_s25, %s3297_s25 }
  0xba   : > { %p3300_p7 = pnand %p3298_p5, %p3682_p8  ;;  %p3307_p12 = por %p3306_p11, %p3305_p10 }
  0xbc   : > { %p3301_p9 = pneg %p3300_p7 }
  0xbe   : > { %p3308_p4 = pnand %p3307_p12, %p3301_p9 }
  0xc0   : > { %3311 = shalt.err (!%p3308_p4)
}
  0xc1   : > { %3044 = dma.hbm_to_vmem [thread:$0]  (!%p3668_p6), %s5053_s6, 32, %s379_s28, [#allocation13]  }
  0xc2   : > { %s5054_s8 = sld [smem:[#allocation37_spill]] }
  0xc8   : > { %s3312_s26 = scalar_lea.hbm %s5054_s8, 16 }
  0xc9   : > { %p3313_p13 = scmp.ne.s32.totalorder %s5054_s8, %s3312_s26  ;;  %p3319_p3 = scmp.lt.u32.totalorder %s3312_s26, %s5054_s8 }
  0xcb   : > { %p3315_p0 = pnand %p3313_p13, %p3682_p8 }
  0xcd   : > { %p3316_p1 = pneg %p3315_p0 }
  0xcf   : > { %p3321_p2 = pnand %p3319_p3, %p3316_p1 }
  0xd1   : > { %3324 = shalt.err (!%p3321_p2)
}
  0xd2   : > { %s3325_s13 = scalar_lea.vmem %s401_s22, 16  ;;  %s3332_s28 = scalar_lea.vmem %s401_s22, 32 }
  0xd3   : > { %p3326_p5 = scmp.ne.s32.totalorder %s401_s22, %s3325_s13  ;;  %p3333_p10 = scmp.lt.s32.totalorder %s401_s22, %s401_s22 }
  0xd4   : > { %p3334_p11 = scmp.lt.s32.totalorder %s3332_s28, %s3325_s13 }
  0xd5   : > { %p3328_p7 = pnand %p3326_p5, %p3682_p8 }
  0xd6   : > { %p3335_p12 = por %p3334_p11, %p3333_p10 }
  0xd7   : > { %p3329_p9 = pneg %p3328_p7 }
  0xd9   : > { %p3336_p4 = pnand %p3335_p12, %p3329_p9 }
  0xdb   : > { %3339 = shalt.err (!%p3336_p4)
}
  0xdc   : > { %3050 = dma.hbm_to_vmem [thread:$0]  (!%p3668_p6), %s5054_s8, 16, %s401_s22, [#allocation16]  }
  0xdd   : > { %s5034_s27 = sadd.s32 4294967294, %s3546_s20   ;;  %s3826_s16 = sadd.s32 1, %s3546_s20  }
  0xde   : > { %s44_s21 = sadd.s32 1, %s3542_s19  ;;  %s41_s30 = ssub.s32 %s3546_s20, %s3826_s16 }
  0xdf   : > { %p51_p8 = scmp.ne.s32.totalorder %s3542_s19, %s3538_s18  ;;  %p42_p13 = scmp.eq.s32.totalorder %s41_s30, 0 }
  0xe0   : > { %p52_p0 = scmp.eq.s32.totalorder %s3546_s20, 0  ;;  %p57_p1 = scmp.ne.s32.totalorder %s3538_s18, %s3534_s17 }
  0xe1   : > { %p254_p3 = scmp.eq.s32.totalorder %s3650_s23, 1  ;;  %p5055_p5 = scmp.eq.s32.totalorder %s3650_s23, 0 }
  0xe2   : > { %s3838_s11 = scalar_select %p42_p13, %s3542_s19, %s44_s21  }
  0xe3   : > { %p53_p2 = por %p52_p0, %p51_p8  ;;  %p3842_p7 = por %p5055_p5, %p57_p1 }
  0xe4   : > { %p3846_p6 = por %p254_p3, %p51_p8  ;;  %p260_p9 = scmp.eq.s32.totalorder %s5034_s27, 1 }
  0xe5   : > { %p3075_p10 = scmp.lt.s32.totalorder %s3546_s20, 2  ;;  %s3854_s1 = sand.u32 1, %s3542_s19  }
  0xe6   : > { %s5057_s22 = scalar_select %p3846_p6, 1, 0 }
  0xe7   : > { %p3856_p11 = por %p260_p9, %p57_p1  ;;  %s2736_s29 = sshll.u32 %s3854_s1, 7 }
  0xe8   : > { %s2822_s15 = sshll.u32 %s3546_s20, 11  ;;  %s5059_s0 = sld [smem:[#allocation30_spill]] }
  0xe9   : > { %s5058_s12 = scalar_select %p3856_p11, 1, 0 }
  0xea   : > { %s415_s14 = scalar_lea.vmem [#allocation3], %s2736_s29  ;;  %p3867_p12 = pnand %p3075_p10, %p53_p2 }
  0xeb   : > { %s422_s21 = sshll.u32 %s415_s14, 4  ;;  %s3871_s21 = int_to_ptr.vmem [resolvable:$true] %s422_s21 }
  0xec   : > { %p3342_p8 = pneg %p3867_p12 }
  0xee   : > { %s3865_s25 = scalar_lea.hbm %s5059_s0, %s2822_s15  ;;  %s3345_s13 = scalar_lea.hbm %s5059_s0, 4096 }
  0xef   : > { %s3340_s2 = scalar_lea.hbm %s3865_s25, 2048  ;;  %p3346_p1 = scmp.lt.u32.totalorder %s3865_s25, %s5059_s0 }
  0xf0   : > { %p3341_p4 = scmp.ne.s32.totalorder %s3865_s25, %s3340_s2  ;;  %p3347_p3 = scmp.lt.u32.totalorder %s3345_s13, %s3340_s2 }
  0xf1   : > { %p3349_p5 = scmp.lt.u32.totalorder %s3340_s2, %s3865_s25 }
  0xf2   : > { %p3343_p13 = pnand %p3342_p8, %p3341_p4  ;;  %p3348_p2 = por %p3347_p3, %p3346_p1 }
  0xf4   : > { %p3344_p0 = pneg %p3343_p13  ;;  %p3350_p9 = por %p3349_p5, %p3348_p2 }
  0xf6   : > { %p3351_p10 = pnand %p3350_p9, %p3344_p0 }
  0xf8   : > { %3354 = shalt.err (!%p3351_p10)
}
  0xf9   : > { %s3355_s27 = scalar_lea.vmem %s3871_s21, 2048  ;;  %s3557_s15 = smov [#allocation3]  }
  0xfa   : > { %p3356_p4 = scmp.ne.s32.totalorder %s3871_s21, %s3355_s27  ;;  %s3360_s29 = sshll.u32 %s3557_s15, 4  ;;  %s3361_s29 = int_to_ptr.vmem [resolvable:$false] %s3360_s29 }
  0xfb   : > { %s3362_s28 = scalar_lea.vmem %s3361_s29, 4096  ;;  %p3363_p6 = scmp.lt.s32.totalorder %s3871_s21, %s3361_s29 }
  0xfc   : > { %p3358_p13 = pnand %p3356_p4, %p3342_p8  ;;  %p3364_p1 = scmp.lt.s32.totalorder %s3362_s28, %s3355_s27 }
  0xfe   : > { %p3359_p11 = pneg %p3358_p13  ;;  %p3365_p3 = por %p3364_p1, %p3363_p6 }
 0x100   : > { %p3366_p2 = pnand %p3365_p3, %p3359_p11 }
 0x102   : > { %3369 = shalt.err (!%p3366_p2)
}
 0x103   : > { %s3558_s2 = smov 64   ;;  %s3559_s13 = smov 4  }
 0x104   : > { %s5061_s14 = scalar_lea.sflag [#allocation4], %s3854_s1  ;;  %s432_s15 = sand.u32 1, %s3546_s20  }
 0x105   : > { %3054 = dma.hbm_to_vmem [thread:$0]  (!%p3867_p12), %s3865_s25, 2048, %s3871_s21, %s5061_s14, %s3558_s2, %s3558_s2, %s3559_s13  }
 0x106   : > { %s2739_s0 = sshll.u32 %s3854_s1, 8  ;;  %s2823_s29 = sshll.u32 %s3546_s20, 12 }
 0x107   : > { %s436_s27 = scalar_lea.vmem [#allocation9], %s2739_s0  ;;  %s3907_s6 = scalar_lea.hbm %s5022_s3, %s2823_s29 }
 0x108   : > { %s443_s28 = sshll.u32 %s436_s27, 4  ;;  %s3911_s7 = scalar_lea.sflag [#allocation10], %s432_s15  ;;  %s3909_s28 = int_to_ptr.vmem [resolvable:$true] %s443_s28 }
 0x109   : > { %s3370_s8 = scalar_lea.hbm %s3907_s6, 4096  ;;  %s3375_s4 = scalar_lea.hbm %s5022_s3, 8192 }
 0x10a   : > { %p3371_p6 = scmp.ne.s32.totalorder %s3907_s6, %s3370_s8  ;;  %p3376_p5 = scmp.lt.u32.totalorder %s3907_s6, %s5022_s3 }
 0x10b   : > { %p3377_p9 = scmp.lt.u32.totalorder %s3375_s4, %s3370_s8  ;;  %p3379_p4 = scmp.lt.u32.totalorder %s3370_s8, %s3907_s6 }
 0x10c   : > { %p3373_p11 = pnand %p3371_p6, %p3342_p8 }
 0x10d   : > { %p3378_p10 = por %p3377_p9, %p3376_p5 }
 0x10e   : > { %p3374_p0 = pneg %p3373_p11 }
 0x10f   : > { %p3380_p13 = por %p3379_p4, %p3378_p10 }
 0x111   : > { %p3381_p1 = pnand %p3380_p13, %p3374_p0 }
 0x113   : > { %3384 = shalt.err (!%p3381_p1)
}
 0x114   : > { %s3385_s21 = scalar_lea.vmem %s3909_s28, 4096  ;;  %s3560_s2 = smov [#allocation9]  }
 0x115   : > { %p3386_p3 = scmp.ne.s32.totalorder %s3909_s28, %s3385_s21  ;;  %s3390_s13 = sshll.u32 %s3560_s2, 4  ;;  %s3391_s13 = int_to_ptr.vmem [resolvable:$false] %s3390_s13 }
 0x116   : > { %s3392_s14 = scalar_lea.vmem %s3391_s13, 8192  ;;  %p3393_p11 = scmp.lt.s32.totalorder %s3909_s28, %s3391_s13 }
 0x117   : > { %p3388_p2 = pnand %p3386_p3, %p3342_p8  ;;  %p3394_p5 = scmp.lt.s32.totalorder %s3392_s14, %s3385_s21 }
 0x119   : > { %p3389_p6 = pneg %p3388_p2  ;;  %p3395_p9 = por %p3394_p5, %p3393_p11 }
 0x11b   : > { %p3396_p10 = pnand %p3395_p9, %p3389_p6 }
 0x11d   : > { %3399 = shalt.err (!%p3396_p10)
}
 0x11e   : > { %s3561_s8 = smov 128   ;;  %s3562_s15 = smov 8  }
 0x11f   : > { %3057 = dma.hbm_to_vmem [thread:$0]  (!%p3867_p12), %s3907_s6, 4096, %s3909_s28, %s3911_s7, %s3561_s8, %s3561_s8, %s3562_s15  }
 0x120   : > { %p5062_p8 = scmp.ne.s32.totalorder %s5045_s24, 0 }
 0x121   : > { %s3940_s29 = sand.u32 (!%p5062_p8), 1, %s3538_s18  }
 0x122   : > { %455 = sbr.rel (%p5062_p8) target bundleno = 817 (0x331), region = 56  ;;  %s2743_s27 = sshll.u32 (!%p5062_p8), %s3940_s29, 7 }
 0x123   : > { %s458_s0 = scalar_lea.sflag (!%p5062_p8), [#allocation4], %s3940_s29  ;;  %s3946_s1 = scalar_lea.vmem (!%p5062_p8), [#allocation3], %s2743_s27 }
 0x129   : > { %3501 = dma.done.wait (%p3842_p7), %s458_s0, 2048  }
 0x12a   : > { %3503 = vsyncadd (%p3842_p7), %s458_s0, 4294965248  ;;  %p5063_p12 = scmp.eq.s32.totalorder %s3650_s23, 0 }
 0x12c   : > { %3505 = dma.done.wait (%p5063_p12), [#allocation7], 32   ;;  %p5064_p0 = pmov %p5063_p12 }
 0x12d   : > { %s474_s6 = sand.u32 1, %s3650_s23   ;;  %s2746_s7 = sshll.u32 %s3940_s29, 8 }
 0x12e   : > { %3507 = vsyncadd (%p5064_p0), [#allocation7], 4294967264  ;;  %s475_s24 = scalar_lea.sflag [#allocation10], %s474_s6  ;;  %s3960_s30 = scalar_lea.vmem [#allocation9], %s2746_s7 }
 0x12f   : > { %3509 = dma.done.wait (%p3842_p7), %s475_s24, 4096  }
 0x130   : > { %3511 = vsyncadd (%p3842_p7), %s475_s24, 4294963200  ;;  %p5065_p4 = pmov %p5064_p0 }
 0x131   : > { %p5066_p13 = pmov %p5064_p0 }
 0x132   : > { %3513 = dma.done.wait (%p5065_p4), [#allocation10], 144  }
 0x133   : > { %3515 = vsyncadd (%p5066_p13), [#allocation10], 4294967152  ;;  %p5067_p1 = pmov %p5064_p0 }
 0x134   : > { %p5068_p3 = pmov %p5064_p0 }
 0x135   : > { %3517 = dma.done.wait (%p5067_p1), [#allocation13], 48  }
 0x136   : > { %3519 = vsyncadd (%p5068_p3), [#allocation13], 4294967248  ;;  %p5069_p2 = pmov %p5064_p0 }
 0x137   : > { %p5070_p6 = pmov %p5064_p0 }
 0x138   : > { %3521 = dma.done.wait (%p5069_p2), [#allocation16], 32  }
 0x139   : > { %3523 = vsyncadd (%p5070_p6), [#allocation16], 4294967264  ;;  %vm789_vm0 = vcmask 31744   ;;  %vm792_vm1 = vcmask 25600   ;;  %v3563_v0 = vmov 0.0   ;;  %vm1925_vm2 = vcmask 1041408  }
 0x13a   : > { %790 = vst.msk [vmem:[#allocation2] sm:$0xff] %vm789_vm0, %v3563_v0  ;;  %791 = vst.msk [vmem:[#allocation2 + $0x8] sm:$0xff] %vm789_vm0, %v3563_v0  ;;  %v1869_v1 = vld [vmem:[#allocation14] sm:$0x3]  ;;  %v2858_v2 = vld [vmem:[%s3946_s1] sm:$0xff]   ;;  %vm2218_vm3 = vcmask 27648  }
 0x13b   : > { %793 = vst.msk [vmem:[#allocation2 + $0x10] sm:$0x3] %vm792_vm1, %v3563_v0  ;;  %796 = vst.msk [vmem:[#allocation2 + $0x28] sm:$0x3] %vm792_vm1, %v3563_v0  ;;  %v2921_v3 = vld [vmem:[%s3946_s1 + $0x8] sm:$0xff]   ;;  %2989 = vmatprep.subr.msk.bf16.mxu0 %vm1925_vm2, %v1869_v1  ;;  %v1927_v4 = vsel %vm1925_vm2, %v1869_v1, 0  ;;  %v2859_v5 = vunpack.c.l.bf16 %v2858_v2  ;;  %v2860_v6 = vunpack.c.h.bf16 %v2858_v2  ;;  %2990 = vmatprep.subr.msk.bf16.mxu1 %vm1925_vm2, %v1869_v1 }
 0x13c   : > { %794 = vst.msk [vmem:[#allocation2 + $0x18] sm:$0xff] %vm789_vm0, %v3563_v0  ;;  %795 = vst.msk [vmem:[#allocation2 + $0x20] sm:$0xff] %vm789_vm0, %v3563_v0  ;;  %v2863_v7 = vunpack.c.l.bf16 %v2921_v3  ;;  %v4034_v8 = vld [vmem:[#allocation6] ss:$0 sm:$0xff]  ;;  %2954 = vmatpush3.bf16.msra.mxu0 %v1927_v4  ;;  %v2864_v9 = vunpack.c.h.bf16 %v2921_v3  ;;  %v4036_v10 = vld [vmem:[#allocation8] ss:$0 sm:$0xff]  ;;  %2988 = vmatpush3.bf16.msra.mxu1 %v1927_v4 }
 0x13d   : > { %797 = vst.msk [vmem:[#allocation2 + $0x30] sm:$0xff] %vm789_vm0, %v3563_v0  ;;  %798 = vst.msk [vmem:[#allocation2 + $0x38] sm:$0xff] %vm789_vm0, %v3563_v0  ;;  %v622_v11 = vmul.f32 %v2859_v5, %v4034_v8  ;;  %v623_v12 = vmul.f32 %v2860_v6, %v4034_v8  ;;  %v4041_v16 = vld [vmem:[#allocation11] ss:$0 sm:$0xff]  ;;  %v4046_v22 = vld [vmem:[#allocation11 + $0x1] ss:$0 sm:$0xff] }
 0x13e   : > { %799 = vst.msk [vmem:[#allocation2 + $0x40] sm:$0x3] %vm792_vm1, %v3563_v0  ;;  %802 = vst.msk [vmem:[#allocation2 + $0x58] sm:$0x3] %vm792_vm1, %v3563_v0  ;;  %v624_v13 = vmul.f32 %v2863_v7, %v4034_v8  ;;  %v625_v17 = vmul.f32 %v2864_v9, %v4034_v8  ;;  %v4052_v29 = vld [vmem:[#allocation11 + $0x2] ss:$0 sm:$0xff] }
 0x13f   : > { %800 = vst.msk [vmem:[#allocation2 + $0x48] sm:$0xff] %vm789_vm0, %v3563_v0  ;;  %801 = vst.msk [vmem:[#allocation2 + $0x50] sm:$0xff] %vm789_vm0, %v3563_v0  ;;  %v661_v23 = vadd.f32 %v4036_v10, %v622_v11  ;;  %v662_v24 = vadd.f32 %v4036_v10, %v623_v12  ;;  %v725_v31 = vld [vmem:[%s3960_s30] sm:$0xff]  ;;  %v726_v32 = vld [vmem:[%s3960_s30 + $0x8] sm:$0xff]  ;;  %s4707_s26 = scalar_lea.vmem [#allocation18], %s2743_s27  ;;  %s2856_s28 = sshll.u32 %s3650_s23, 11 }
 0x140   : > { %803 = vst.msk [vmem:[#allocation2 + $0x60] sm:$0xff] %vm789_vm0, %v3563_v0  ;;  %804 = vst.msk [vmem:[#allocation2 + $0x68] sm:$0xff] %vm789_vm0, %v3563_v0  ;;  %v663_v25 = vadd.f32 %v4036_v10, %v624_v13  ;;  %v664_v30 = vadd.f32 %v4036_v10, %v625_v17  ;;  %v727_v33 = vld [vmem:[%s3960_s30 + $0x10] sm:$0xff]  ;;  %v728_v40 = vld [vmem:[%s3960_s30 + $0x18] sm:$0xff]  ;;  %s2485_s4 = sshll.u32 %s4707_s26, 4  ;;  %s4885_s21 = scalar_lea.hbm %s5028_s9, %s2856_s28  ;;  %s4887_s4 = int_to_ptr.vmem [resolvable:$true] %s2485_s4 }
 0x141   : > { %805 = vst.msk [vmem:[#allocation2 + $0x70] sm:$0x3] %vm792_vm1, %v3563_v0  ;;  %808 = vst.msk [vmem:[#allocation2 + $0x88] sm:$0x3] %vm792_vm1, %v3563_v0  ;;  %v878_v14 = vld [vmem:[#allocation2] sm:$0xff]  ;;  %v879_v15 = vld [vmem:[#allocation2 + $0x8] sm:$0xff] }
 0x142   : > { %806 = vst.msk [vmem:[#allocation2 + $0x78] sm:$0xff] %vm789_vm0, %v3563_v0  ;;  %807 = vst.msk [vmem:[#allocation2 + $0x80] sm:$0xff] %vm789_vm0, %v3563_v0  ;;  %v917_v18 = vmul.f32 %v4041_v16, %v878_v14  ;;  %v918_v19 = vmul.f32 %v4041_v16, %v879_v15  ;;  %v981_v20 = vld [vmem:[#allocation2 + $0x1] sm:$0xff]  ;;  %v982_v21 = vld [vmem:[#allocation2 + $0x9] sm:$0xff]  ;;  %v693_v37 = vmax.f32 %v661_v23, 0.0  ;;  %v694_v38 = vmax.f32 %v662_v24, 0.0 }
 0x143   : > { %809 = vst.msk [vmem:[#allocation2 + $0x90] sm:$0xff] %vm789_vm0, %v3563_v0  ;;  %810 = vst.msk [vmem:[#allocation2 + $0x98] sm:$0xff] %vm789_vm0, %v3563_v0  ;;  %v1021_v26 = vmul.f32 %v4046_v22, %v981_v20  ;;  %v1085_v27 = vld [vmem:[#allocation2 + $0x2] sm:$0xff]  ;;  %v1086_v28 = vld [vmem:[#allocation2 + $0xa] sm:$0xff]  ;;  %v1022_v34 = vmul.f32 %v4046_v22, %v982_v21  ;;  %v695_v39 = vmax.f32 %v663_v25, 0.0  ;;  %v696_v43 = vmax.f32 %v664_v30, 0.0 }
 0x144   : > { %811 = vst.msk [vmem:[#allocation2 + $0xa0] sm:$0x3] %vm792_vm1, %v3563_v0  ;;  %814 = vst.msk [vmem:[#allocation2 + $0xb8] sm:$0x3] %vm792_vm1, %v3563_v0  ;;  %v1125_v35 = vmul.f32 %v4052_v29, %v1085_v27  ;;  %v1126_v36 = vmul.f32 %v4052_v29, %v1086_v28  ;;  %v2922_v42 = vld [vmem:[%s3946_s1 + $0x10] sm:$0xff]   ;;  %v757_v47 = vadd.f32 %v725_v31, %v693_v37  ;;  %v2923_v51 = vld [vmem:[%s3946_s1 + $0x18] sm:$0xff]  }
 0x145   : > { %812 = vst.msk [vmem:[#allocation2 + $0xa8] sm:$0xff] %vm789_vm0, %v3563_v0  ;;  %813 = vst.msk [vmem:[#allocation2 + $0xb0] sm:$0xff] %vm789_vm0, %v3563_v0  ;;  %v1053_v41 = vadd.f32 %v1021_v26, %v917_v18  ;;  %v1054_v44 = vadd.f32 %v1022_v34, %v918_v19  ;;  %v2867_v45 = vunpack.c.l.bf16 %v2922_v42  ;;  %v2868_v46 = vunpack.c.h.bf16 %v2922_v42  ;;  %v2924_v56 = vld [vmem:[%s3946_s1 + $0x20] sm:$0xff]   ;;  %v2925_v61 = vld [vmem:[%s3946_s1 + $0x28] sm:$0xff]   ;;  %s2464_s2 = scalar_lea.sflag [#allocation5], %s3940_s29  ;;  %s3400_s13 = scalar_lea.vmem %s4887_s4, 2048 }
 0x146   : > { %815 = vst.msk [vmem:[#allocation2 + $0xc0] sm:$0xff] %vm789_vm0, %v3563_v0  ;;  %816 = vst.msk [vmem:[#allocation2 + $0xc8] sm:$0xff] %vm789_vm0, %v3563_v0  ;;  %v758_v48 = vadd.f32 %v726_v32, %v694_v38  ;;  %v759_v49 = vadd.f32 %v727_v33, %v695_v39  ;;  %v760_v52 = vadd.f32 %v728_v40, %v696_v43  ;;  %v2871_v57 = vunpack.c.l.bf16 %v2923_v51  ;;  %v729_v2 = vld [vmem:[%s3960_s30 + $0x20] sm:$0xff]  ;;  %v730_v3 = vld [vmem:[%s3960_s30 + $0x28] sm:$0xff]  ;;  %p3401_p7 = scmp.ne.s32.totalorder %s4887_s4, %s3400_s13  ;;  %p5073_p11 = scmp.ne.s32.totalorder %s5057_s22, 0 }
 0x147   : > { %817 = vst.msk [vmem:[#allocation2 + $0xd0] sm:$0x3] %vm792_vm1, %v3563_v0  ;;  %820 = vst.msk [vmem:[#allocation2 + $0xe8] sm:$0x3] %vm792_vm1, %v3563_v0  ;;  %v4063_v50 = vadd.f32 %v1125_v35, %v1053_v41  ;;  %v4066_v53 = vadd.f32 %v1126_v36, %v1054_v44  ;;  %v626_v54 = vmul.f32 %v2867_v45, %v4034_v8  ;;  %v2872_v58 = vunpack.c.h.bf16 %v2923_v51  ;;  %v4086_v14 = vld [vmem:[#allocation11 + $0x3] ss:$0 sm:$0xff] }
 0x148   : > { %818 = vst.msk [vmem:[#allocation2 + $0xd8] sm:$0xff] %vm789_vm0, %v3563_v0  ;;  %819 = vst.msk [vmem:[#allocation2 + $0xe0] sm:$0xff] %vm789_vm0, %v3563_v0  ;;  %v627_v55 = vmul.f32 %v2868_v46, %v4034_v8  ;;  %v2875_v59 = vunpack.c.l.bf16 %v2924_v56  ;;  %v2876_v60 = vunpack.c.h.bf16 %v2924_v56  ;;  %v2880_v1 = vunpack.c.h.bf16 %v2925_v61  ;;  %v4101_v20 = vld [vmem:[%s3946_s1 + $0x30] sm:$0xff]   ;;  %v4103_v21 = vld [vmem:[#allocation11 + $0x4] ss:$0 sm:$0xff]  ;;  %p3402_p5 = pnand %p3401_p7, %p5073_p11  ;;  %s3564_s14 = smov [#allocation18]  }
 0x149   : > { %821 = vst.msk [vmem:[#allocation2 + $0xf0] sm:$0xff] %vm789_vm0, %v3563_v0  ;;  %822 = vst.msk [vmem:[#allocation2 + $0xf8] sm:$0xff] %vm789_vm0, %v3563_v0  ;;  %v665_v62 = vadd.f32 %v4036_v10, %v626_v54  ;;  %v628_v4 = vmul.f32 %v2871_v57, %v4034_v8  ;;  %v629_v5 = vmul.f32 %v2872_v58, %v4034_v8  ;;  %v4105_v23 = vld [vmem:[#allocation11 + $0x5] ss:$0 sm:$0xff]  ;;  %v4107_v24 = vld [vmem:[#allocation11 + $0x6] ss:$0 sm:$0xff] }
 0x14a   : > { %823 = vst.msk [vmem:[#allocation2 + $0x100] sm:$0x3] %vm792_vm1, %v3563_v0  ;;  %826 = vst.msk [vmem:[#allocation2 + $0x118] sm:$0x3] %vm792_vm1, %v3563_v0  ;;  %v666_v63 = vadd.f32 %v4036_v10, %v627_v55  ;;  %v630_v6 = vmul.f32 %v2875_v59, %v4034_v8  ;;  %v631_v7 = vmul.f32 %v2876_v60, %v4034_v8  ;;  %v4115_v30 = vld [vmem:[#allocation11 + $0x7] ss:$0 sm:$0xff]  ;;  %p3403_p9 = pneg %p3402_p5 }
 0x14b   : > { %824 = vst.msk [vmem:[#allocation2 + $0x108] sm:$0xff] %vm789_vm0, %v3563_v0  ;;  %825 = vst.msk [vmem:[#allocation2 + $0x110] sm:$0xff] %vm789_vm0, %v3563_v0  ;;  %v697_v9 = vmax.f32 %v665_v62, 0.0  ;;  %v633_v13 = vmul.f32 %v2880_v1, %v4034_v8  ;;  %v4089_v15 = vadd.f32 %v4036_v10, %v628_v4  ;;  %v4092_v17 = vadd.f32 %v4036_v10, %v629_v5  ;;  %v4117_v31 = vld [vmem:[#allocation11 + $0x8] ss:$0 sm:$0xff]  ;;  %s3404_s8 = sshll.u32 %s3564_s14, 4  ;;  %s3405_s8 = int_to_ptr.vmem [resolvable:$false] %s3404_s8 }
 0x14c   : > { %827 = vst.msk [vmem:[#allocation2 + $0x120] sm:$0xff] %vm789_vm0, %v3563_v0  ;;  %828 = vst.msk [vmem:[#allocation2 + $0x128] sm:$0xff] %vm789_vm0, %v3563_v0  ;;  %v698_v11 = vmax.f32 %v666_v63, 0.0  ;;  %v4095_v18 = vadd.f32 %v4036_v10, %v630_v6  ;;  %v4098_v19 = vadd.f32 %v4036_v10, %v631_v7  ;;  %s3406_s15 = scalar_lea.vmem %s3405_s8, 4096  ;;  %p3407_p10 = scmp.lt.s32.totalorder %s4887_s4, %s3405_s8 }
 0x14d   : > { %829 = vst.msk [vmem:[#allocation2 + $0x130] sm:$0x3] %vm792_vm1, %v3563_v0  ;;  %832 = vst.msk [vmem:[#allocation2 + $0x148] sm:$0x3] %vm792_vm1, %v3563_v0  ;;  %v761_v25 = vadd.f32 %v729_v2, %v697_v9  ;;  %v4113_v28 = vadd.f32 %v4036_v10, %v633_v13  ;;  %v699_v32 = vmax.f32 %v4089_v15, 0.0  ;;  %v700_v33 = vmax.f32 %v4092_v17, 0.0  ;;  %p3408_p8 = scmp.lt.s32.totalorder %s3406_s15, %s3400_s13 }
 0x14e   : > { %830 = vst.msk [vmem:[#allocation2 + $0x138] sm:$0xff] %vm789_vm0, %v3563_v0  ;;  %831 = vst.msk [vmem:[#allocation2 + $0x140] sm:$0xff] %vm789_vm0, %v3563_v0  ;;  %v762_v26 = vadd.f32 %v730_v3, %v698_v11  ;;  %v701_v34 = vmax.f32 %v4095_v18, 0.0  ;;  %v702_v35 = vmax.f32 %v4098_v19, 0.0 }
 0x14f   : > { %833 = vst.msk [vmem:[#allocation2 + $0x150] sm:$0xff] %vm789_vm0, %v3563_v0  ;;  %834 = vst.msk [vmem:[#allocation2 + $0x158] sm:$0xff] %vm789_vm0, %v3563_v0  ;;  %v704_v40 = vmax.f32 %v4113_v28, 0.0  ;;  %p3409_p12 = por %p3408_p8, %p3407_p10 }
 0x150   : > { %835 = vst.msk [vmem:[#allocation2 + $0x160] sm:$0x3] %vm792_vm1, %v3563_v0  ;;  %838 = vst.msk [vmem:[#allocation2 + $0x178] sm:$0x3] %vm792_vm1, %v3563_v0 }
 0x151   : > { %836 = vst.msk [vmem:[#allocation2 + $0x168] sm:$0xff] %vm789_vm0, %v3563_v0  ;;  %837 = vst.msk [vmem:[#allocation2 + $0x170] sm:$0xff] %vm789_vm0, %v3563_v0  ;;  %p3410_p0 = pnand %p3409_p12, %p3403_p9 }
 0x152   : > { %839 = vst.msk [vmem:[#allocation2 + $0x180] sm:$0xff] %vm789_vm0, %v3563_v0  ;;  %840 = vst.msk [vmem:[#allocation2 + $0x188] sm:$0xff] %vm789_vm0, %v3563_v0 }
 0x153   : > { %841 = vst.msk [vmem:[#allocation2 + $0x190] sm:$0x3] %vm792_vm1, %v3563_v0  ;;  %844 = vst.msk [vmem:[#allocation2 + $0x1a8] sm:$0x3] %vm792_vm1, %v3563_v0 }
 0x154   : > { %842 = vst.msk [vmem:[#allocation2 + $0x198] sm:$0xff] %vm789_vm0, %v3563_v0  ;;  %843 = vst.msk [vmem:[#allocation2 + $0x1a0] sm:$0xff] %vm789_vm0, %v3563_v0  ;;  %v2879_v0 = vunpack.c.l.bf16 %v2925_v61 }
 0x155   : > { %846 = vst.msk [vmem:[#allocation2 + $0x19] sm:$0xff] %vm789_vm0, %v757_v47  ;;  %847 = vst.msk [vmem:[#allocation2 + $0x21] sm:$0xff] %vm789_vm0, %v758_v48 }
 0x156   : > { %848 = vst.msk [vmem:[#allocation2 + $0x31] sm:$0xff] %vm789_vm0, %v759_v49  ;;  %849 = vst.msk [vmem:[#allocation2 + $0x39] sm:$0xff] %vm789_vm0, %v760_v52  ;;  %v632_v12 = vmul.f32 %v2879_v0, %v4034_v8 }
 0x157   : > { %850 = vst.msk [vmem:[#allocation2 + $0x49] sm:$0xff] %vm789_vm0, %v761_v25  ;;  %851 = vst.msk [vmem:[#allocation2 + $0x51] sm:$0xff] %vm789_vm0, %v762_v26 }
 0x158   : > { %v4110_v27 = vadd.f32 %v4036_v10, %v632_v12 }
 0x15a   : > { %v703_v39 = vmax.f32 %v4110_v27, 0.0 }
 0x15c   : > { %v1189_v36 = vld [vmem:[#allocation2 + $0x18] sm:$0xff]  ;;  %v1190_v37 = vld [vmem:[#allocation2 + $0x20] sm:$0xff] }
 0x15d   : > { %v1293_v38 = vld [vmem:[#allocation2 + $0x19] sm:$0xff]  ;;  %v1229_v43 = vmul.f32 %v4086_v14, %v1189_v36  ;;  %v1230_v44 = vmul.f32 %v4086_v14, %v1190_v37  ;;  %v1294_v45 = vld [vmem:[#allocation2 + $0x21] sm:$0xff]  ;;  %v919_v49 = vmul.f32 %v4041_v16, %v1189_v36  ;;  %v1502_v55 = vld [vmem:[#allocation2 + $0x30] sm:$0xff]  ;;  %v920_v58 = vmul.f32 %v4041_v16, %v1190_v37 }
 0x15e   : > { %v1333_v46 = vmul.f32 %v4103_v21, %v1293_v38  ;;  %v1397_v47 = vld [vmem:[#allocation2 + $0x1a] sm:$0xff]  ;;  %v1398_v48 = vld [vmem:[#allocation2 + $0x22] sm:$0xff]  ;;  %v1334_v51 = vmul.f32 %v4103_v21, %v1294_v45  ;;  %v1606_v57 = vld [vmem:[#allocation2 + $0x31] sm:$0xff]  ;;  %v1542_v61 = vmul.f32 %v4107_v24, %v1502_v55  ;;  %v1023_v6 = vmul.f32 %v4046_v22, %v1293_v38 }
 0x15f   : > { %v1437_v52 = vmul.f32 %v4105_v23, %v1397_v47  ;;  %v1438_v54 = vmul.f32 %v4105_v23, %v1398_v48  ;;  %v1503_v56 = vld [vmem:[#allocation2 + $0x38] sm:$0xff]  ;;  %v1261_v59 = vadd.f32 %v1229_v43, %v4063_v50  ;;  %v1262_v60 = vadd.f32 %v1230_v44, %v4066_v53 }
 0x160   : > { %v1543_v62 = vmul.f32 %v4107_v24, %v1503_v56  ;;  %v1607_v63 = vld [vmem:[#allocation2 + $0x39] sm:$0xff]  ;;  %v1646_v2 = vmul.f32 %v4115_v30, %v1606_v57  ;;  %v1024_v7 = vmul.f32 %v4046_v22, %v1294_v45  ;;  %v1127_v9 = vmul.f32 %v4052_v29, %v1397_v47  ;;  %v731_v47 = vld [vmem:[%s3960_s30 + $0x30] sm:$0xff] }
 0x161   : > { %v4141_v0 = vld [vmem:[#allocation2 + $0x32] sm:$0xff]  ;;  %v4143_v1 = vld [vmem:[#allocation2 + $0x3a] sm:$0xff]  ;;  %v1647_v3 = vmul.f32 %v4115_v30, %v1607_v63  ;;  %v1365_v53 = vadd.f32 %v1333_v46, %v1261_v59  ;;  %v1366_v5 = vadd.f32 %v1334_v51, %v1262_v60  ;;  %v1128_v11 = vmul.f32 %v4052_v29, %v1398_v48  ;;  %v4163_v46 = vld [vmem:[#allocation2 + $0x48] sm:$0xff] }
 0x162   : > { %v1750_v4 = vmul.f32 %v4117_v31, %v4141_v0  ;;  %v1751_v50 = vmul.f32 %v4117_v31, %v4143_v1  ;;  %v1231_v12 = vmul.f32 %v4086_v14, %v1502_v55  ;;  %v1232_v13 = vmul.f32 %v4086_v14, %v1503_v56  ;;  %v732_v48 = vld [vmem:[%s3960_s30 + $0x38] sm:$0xff] }
 0x163   : > { %v1469_v25 = vadd.f32 %v1437_v52, %v1365_v53  ;;  %v1470_v26 = vadd.f32 %v1438_v54, %v1366_v5  ;;  %v1055_v36 = vadd.f32 %v1023_v6, %v919_v49  ;;  %v1056_v37 = vadd.f32 %v1024_v7, %v920_v58  ;;  %v4167_v49 = vld [vmem:[#allocation2 + $0x50] sm:$0xff] }
 0x164   : > { %v1335_v43 = vmul.f32 %v4103_v21, %v1606_v57  ;;  %v1336_v44 = vmul.f32 %v4103_v21, %v1607_v63  ;;  %v1439_v38 = vmul.f32 %v4105_v23, %v4141_v0  ;;  %v1440_v45 = vmul.f32 %v4105_v23, %v4143_v1  ;;  %v4169_v58 = vld [vmem:[#allocation2 + $0x49] sm:$0xff]  ;;  %v4171_v60 = vld [vmem:[#allocation2 + $0x51] sm:$0xff] }
 0x165   : > { %v1574_v51 = vadd.f32 %v1542_v61, %v1469_v25  ;;  %v1575_v59 = vadd.f32 %v1543_v62, %v1470_v26  ;;  %v1159_v52 = vadd.f32 %v1127_v9, %v1055_v36  ;;  %v1160_v54 = vadd.f32 %v1128_v11, %v1056_v37  ;;  %v4181_v25 = vld [vmem:[#allocation2 + $0x4a] sm:$0xff]  ;;  %v4183_v26 = vld [vmem:[#allocation2 + $0x52] sm:$0xff]  ;;  %v4185_v36 = vld [vmem:[#allocation12] ss:$0 sm:$0xff] }
 0x166   : > { %v1544_v53 = vmul.f32 %v4107_v24, %v4163_v46  ;;  %v1545_v5 = vmul.f32 %v4107_v24, %v4167_v49  ;;  %v1648_v6 = vmul.f32 %v4115_v30, %v4169_v58  ;;  %v1649_v61 = vmul.f32 %v4115_v30, %v4171_v60 }
 0x167   : > { %v1678_v62 = vadd.f32 %v1646_v2, %v1574_v51  ;;  %v1679_v7 = vadd.f32 %v1647_v3, %v1575_v59  ;;  %v1263_v9 = vadd.f32 %v1231_v12, %v1159_v52  ;;  %v1264_v11 = vadd.f32 %v1232_v13, %v1160_v54 }
 0x168   : > { %v1752_v37 = vmul.f32 %v4117_v31, %v4181_v25  ;;  %v1753_v42 = vmul.f32 %v4117_v31, %v4183_v26  ;;  %v763_v41 = vadd.f32 %v731_v47, %v699_v32  ;;  %v764_v2 = vadd.f32 %v732_v48, %v700_v33  ;;  %v733_v47 = vld [vmem:[%s3960_s30 + $0x40] sm:$0xff] }
 0x169   : > { %v1782_v3 = vadd.f32 %v1750_v4, %v1678_v62  ;;  %v1783_v12 = vadd.f32 %v1751_v50, %v1679_v7  ;;  %v1367_v13 = vadd.f32 %v1335_v43, %v1263_v9  ;;  %v1368_v51 = vadd.f32 %v1336_v44, %v1264_v11  ;;  %v734_v7 = vld [vmem:[%s3960_s30 + $0x48] sm:$0xff] }
 0x16a   : > { %852 = vst.msk [vmem:[#allocation2 + $0x61] sm:$0xff] %vm789_vm0, %v763_v41  ;;  %853 = vst.msk [vmem:[#allocation2 + $0x69] sm:$0xff] %vm789_vm0, %v764_v2  ;;  %v921_v59 = vmul.f32 %v4041_v16, %v1502_v55  ;;  %v922_v52 = vmul.f32 %v4041_v16, %v1503_v56  ;;  %v1025_v54 = vmul.f32 %v4046_v22, %v1606_v57 }
 0x16b   : > { %v1026_v15 = vmul.f32 %v4046_v22, %v1607_v63  ;;  %v1821_v17 = vadd.f32 %v4185_v36, %v1782_v3  ;;  %v1822_v32 = vadd.f32 %v4185_v36, %v1783_v12  ;;  %v1471_v33 = vadd.f32 %v1439_v38, %v1367_v13 }
 0x16c   : > { %v1472_v4 = vadd.f32 %v1440_v45, %v1368_v51  ;;  %v1057_v50 = vadd.f32 %v1025_v54, %v921_v59  ;;  %v1129_v43 = vmul.f32 %v4052_v29, %v4141_v0  ;;  %v1130_v55 = vmul.f32 %v4052_v29, %v4143_v1 }
 0x16d   : > { %v1058_v41 = vadd.f32 %v1026_v15, %v922_v52  ;;  %v1853_v56 = vpack.c.bf16 %v1822_v32, %v1821_v17  ;;  %v1576_v44 = vadd.f32 %v1544_v53, %v1471_v33  ;;  %v1233_v63 = vmul.f32 %v4086_v14, %v4163_v46 }
 0x16e   : > { %v1577_v57 = vadd.f32 %v1545_v5, %v1472_v4  ;;  %v1161_v48 = vadd.f32 %v1129_v43, %v1057_v50  ;;  %v1234_v38 = vmul.f32 %v4086_v14, %v4167_v49  ;;  %v1337_v45 = vmul.f32 %v4103_v21, %v4169_v58 }
 0x16f   : > { %v1162_v62 = vadd.f32 %v1130_v55, %v1058_v41  ;;  %2955 = vmatprep.mubr.msk.bf16.mxu0 %vm789_vm0, %v1853_v56  ;;  %v1680_v0 = vadd.f32 %v1648_v6, %v1576_v44  ;;  %v1338_v53 = vmul.f32 %v4103_v21, %v4171_v60  ;;  %v1441_v5 = vmul.f32 %v4105_v23, %v4181_v25 }
 0x170   : > { %v1681_v1 = vadd.f32 %v1649_v61, %v1577_v57  ;;  %v1265_v9 = vadd.f32 %v1233_v63, %v1161_v48  ;;  %v1442_v2 = vmul.f32 %v4105_v23, %v4183_v26  ;;  %v765_v3 = vadd.f32 %v733_v47, %v701_v34 }
 0x171   : > { %v1266_v11 = vadd.f32 %v1234_v38, %v1162_v62  ;;  %v1784_v12 = vadd.f32 %v1752_v37, %v1680_v0  ;;  %v4224_v51 = vld [vmem:[#allocation2 + $0x60] sm:$0xff]  ;;  %v4226_v6 = vld [vmem:[#allocation2 + $0x68] sm:$0xff]  ;;  %v766_v61 = vadd.f32 %v734_v7, %v702_v35  ;;  %v923_v59 = vmul.f32 %v4041_v16, %v4163_v46 }
 0x172   : > { %v1785_v13 = vadd.f32 %v1753_v42, %v1681_v1  ;;  %v1369_v52 = vadd.f32 %v1337_v45, %v1265_v9  ;;  %v1546_v15 = vmul.f32 %v4107_v24, %v4224_v51  ;;  %v1547_v18 = vmul.f32 %v4107_v24, %v4226_v6  ;;  %v1610_v34 = vld [vmem:[#allocation2 + $0x61] sm:$0xff]  ;;  %v4236_v42 = vld [vmem:[#allocation2 + $0x69] sm:$0xff]  ;;  %854 = vst.msk [vmem:[#allocation2 + $0x79] sm:$0xff] %vm789_vm0, %v765_v3 }
 0x173   : > { %v1370_v54 = vadd.f32 %v1338_v53, %v1266_v11  ;;  %v1823_v37 = vadd.f32 %v4185_v36, %v1784_v12  ;;  %v1650_v35 = vmul.f32 %v4115_v30, %v1610_v34  ;;  %v1651_v46 = vmul.f32 %v4115_v30, %v4236_v42  ;;  %v1714_v17 = vld [vmem:[#allocation2 + $0x62] sm:$0xff]  ;;  %v4244_v32 = vld [vmem:[#allocation2 + $0x6a] sm:$0xff]  ;;  %855 = vst.msk [vmem:[#allocation2 + $0x81] sm:$0xff] %vm789_vm0, %v766_v61 }
 0x174   : > { %v1824_v19 = vadd.f32 %v4185_v36, %v1785_v13  ;;  %v1473_v33 = vadd.f32 %v1441_v5, %v1369_v52  ;;  %v1754_v50 = vmul.f32 %v4117_v31, %v1714_v17  ;;  %v1755_v41 = vmul.f32 %v4117_v31, %v4244_v32  ;;  %v735_v11 = vld [vmem:[%s3960_s30 + $0x50] sm:$0xff]  ;;  %v736_v52 = vld [vmem:[%s3960_s30 + $0x58] sm:$0xff] }
 0x175   : > { %v1474_v4 = vadd.f32 %v1442_v2, %v1370_v54  ;;  %v924_v55 = vmul.f32 %v4041_v16, %v4167_v49  ;;  %v1027_v56 = vmul.f32 %v4046_v22, %v4169_v58  ;;  %v1028_v44 = vmul.f32 %v4046_v22, %v4171_v60 }
 0x176   : > { %v1854_v43 = vpack.c.bf16 %v1824_v19, %v1823_v37  ;;  %v1578_v57 = vadd.f32 %v1546_v15, %v1473_v33  ;;  %v1131_v47 = vmul.f32 %v4052_v29, %v4181_v25  ;;  %v1132_v48 = vmul.f32 %v4052_v29, %v4183_v26 }
 0x177   : > { %v1579_v63 = vadd.f32 %v1547_v18, %v1474_v4  ;;  %v1059_v62 = vadd.f32 %v1027_v56, %v923_v59  ;;  %v1060_v38 = vadd.f32 %v1028_v44, %v924_v55  ;;  %v1235_v49 = vmul.f32 %v4086_v14, %v4224_v51 }
 0x178   : > { %2956 = vmatmul.mubr.msk.bf16.vlgmr.msra.gmra.mrb[0].mxu0 %vm789_vm0, %v1854_v43  ;;  %v1236_v58 = vmul.f32 %v4086_v14, %v4226_v6  ;;  %v1682_v60 = vadd.f32 %v1650_v35, %v1578_v57  ;;  %v1339_v7 = vmul.f32 %v4103_v21, %v1610_v34  ;;  %v1340_v25 = vmul.f32 %v4103_v21, %v4236_v42 }
 0x179   : > { %v1683_v45 = vadd.f32 %v1651_v46, %v1579_v63  ;;  %v1163_v26 = vadd.f32 %v1131_v47, %v1059_v62  ;;  %v1164_v0 = vadd.f32 %v1132_v48, %v1060_v38  ;;  %v1443_v1 = vmul.f32 %v4105_v23, %v1714_v17  ;;  %v1508_v5 = vld [vmem:[#allocation2 + $0x78] sm:$0xff] }
 0x17a   : > { %v1444_v53 = vmul.f32 %v4105_v23, %v4244_v32  ;;  %v1612_v9 = vld [vmem:[#allocation2 + $0x79] sm:$0xff]  ;;  %v1786_v2 = vadd.f32 %v1754_v50, %v1682_v60  ;;  %v1548_v13 = vmul.f32 %v4107_v24, %v1508_v5  ;;  %v1613_v61 = vld [vmem:[#allocation2 + $0x81] sm:$0xff]  ;;  %v767_v55 = vadd.f32 %v735_v11, %v703_v39 }
 0x17b   : > { %v1787_v3 = vadd.f32 %v1755_v41, %v1683_v45  ;;  %v1509_v12 = vld [vmem:[#allocation2 + $0x80] sm:$0xff]  ;;  %v1652_v59 = vmul.f32 %v4115_v30, %v1612_v9  ;;  %v1267_v54 = vadd.f32 %v1235_v49, %v1163_v26  ;;  %v1268_v15 = vadd.f32 %v1236_v58, %v1164_v0 }
 0x17c   : > { %v1549_v18 = vmul.f32 %v4107_v24, %v1509_v12  ;;  %v1653_v37 = vmul.f32 %v4115_v30, %v1613_v61  ;;  %v4277_v19 = vld [vmem:[#allocation2 + $0x7a] sm:$0xff]  ;;  %v4279_v35 = vld [vmem:[#allocation2 + $0x82] sm:$0xff]  ;;  %v1825_v46 = vadd.f32 %v4185_v36, %v1786_v2  ;;  %v768_v56 = vadd.f32 %v736_v52, %v704_v40  ;;  %856 = vst.msk [vmem:[#allocation2 + $0x91] sm:$0xff] %vm789_vm0, %v767_v55 }
 0x17d   : > { %v1826_v33 = vadd.f32 %v4185_v36, %v1787_v3  ;;  %v1756_v4 = vmul.f32 %v4117_v31, %v4277_v19  ;;  %v1757_v50 = vmul.f32 %v4117_v31, %v4279_v35  ;;  %v1371_v41 = vadd.f32 %v1339_v7, %v1267_v54 }
 0x17e   : > { %v1372_v43 = vadd.f32 %v1340_v25, %v1268_v15  ;;  %v925_v57 = vmul.f32 %v4041_v16, %v4224_v51  ;;  %v926_v63 = vmul.f32 %v4041_v16, %v4226_v6  ;;  %v1029_v47 = vmul.f32 %v4046_v22, %v1610_v34  ;;  %857 = vst.msk [vmem:[#allocation2 + $0x99] sm:$0xff] %vm789_vm0, %v768_v56 }
 0x17f   : > { %v1855_v44 = vpack.c.bf16 %v1826_v33, %v1825_v46  ;;  %v1475_v48 = vadd.f32 %v1443_v1, %v1371_v41  ;;  %v1030_v27 = vmul.f32 %v4046_v22, %v4236_v42  ;;  %v1133_v28 = vmul.f32 %v4052_v29, %v1714_v17 }
 0x180   : > { %v1476_v62 = vadd.f32 %v1444_v53, %v1372_v43  ;;  %v1061_v39 = vadd.f32 %v1029_v47, %v925_v57  ;;  %v1134_v40 = vmul.f32 %v4052_v29, %v4244_v32  ;;  %v1237_v51 = vmul.f32 %v4086_v14, %v1508_v5 }
 0x181   : > { %2959 = vmatprep.mubr.msk.bf16.mxu0 %vm789_vm0, %v1855_v44  ;;  %v1238_v6 = vmul.f32 %v4086_v14, %v1509_v12  ;;  %v1580_v34 = vadd.f32 %v1548_v13, %v1475_v48  ;;  %v1062_v49 = vadd.f32 %v1030_v27, %v926_v63  ;;  %v1341_v58 = vmul.f32 %v4103_v21, %v1612_v9  ;;  %v737_v27 = vld [vmem:[%s3960_s30 + $0x60] sm:$0xff] }
 0x182   : > { %v1581_v38 = vadd.f32 %v1549_v18, %v1476_v62  ;;  %v1165_v60 = vadd.f32 %v1133_v28, %v1061_v39  ;;  %v1342_v42 = vmul.f32 %v4103_v21, %v1613_v61  ;;  %v1445_v17 = vmul.f32 %v4105_v23, %v4277_v19  ;;  %v738_v28 = vld [vmem:[%s3960_s30 + $0x68] sm:$0xff] }
 0x183   : > { %v1446_v45 = vmul.f32 %v4105_v23, %v4279_v35  ;;  %v1684_v7 = vadd.f32 %v1652_v59, %v1580_v34  ;;  %v1166_v25 = vadd.f32 %v1134_v40, %v1062_v49  ;;  %v5071_v26 = vunpack.c.l.bf16 %v4101_v20  ;;  %v1510_v18 = vld [vmem:[#allocation2 + $0x90] sm:$0xff] }
 0x184   : > { %v1685_v32 = vadd.f32 %v1653_v37, %v1581_v38  ;;  %v1269_v1 = vadd.f32 %v1237_v51, %v1165_v60  ;;  %v5072_v53 = vunpack.c.h.bf16 %v4101_v20  ;;  %v927_v2 = vmul.f32 %v4041_v16, %v1508_v5 }
 0x185   : > { %v634_v0 = vmul.f32 %v5071_v26, %v4034_v8  ;;  %v928_v3 = vmul.f32 %v4041_v16, %v1509_v12  ;;  %v1788_v13 = vadd.f32 %v1756_v4, %v1684_v7  ;;  %v1270_v54 = vadd.f32 %v1238_v6, %v1166_v25  ;;  %v1511_v12 = vld [vmem:[#allocation2 + $0x98] sm:$0xff] }
 0x186   : > { %v635_v11 = vmul.f32 %v5072_v53, %v4034_v8  ;;  %v1789_v52 = vadd.f32 %v1757_v50, %v1685_v32  ;;  %v1373_v15 = vadd.f32 %v1341_v58, %v1269_v1  ;;  %v1031_v46 = vmul.f32 %v4046_v22, %v1612_v9  ;;  %v1614_v50 = vld [vmem:[#allocation2 + $0x91] sm:$0xff]  ;;  %v1615_v43 = vld [vmem:[#allocation2 + $0x99] sm:$0xff] }
 0x187   : > { %v673_v59 = vadd.f32 %v4036_v10, %v634_v0  ;;  %v1032_v33 = vmul.f32 %v4046_v22, %v1613_v61  ;;  %v1827_v20 = vadd.f32 %v4185_v36, %v1788_v13  ;;  %v1374_v5 = vadd.f32 %v1342_v42, %v1270_v54  ;;  %v1718_v61 = vld [vmem:[#allocation2 + $0x92] sm:$0xff]  ;;  %v4330_v57 = vld [vmem:[#allocation2 + $0x9a] sm:$0xff]  ;;  %v2927_v0 = vld [vmem:[%s3946_s1 + $0x38] sm:$0xff]  }
 0x188   : > { %v674_v37 = vadd.f32 %v4036_v10, %v635_v11  ;;  %v1828_v41 = vadd.f32 %v4185_v36, %v1789_v52  ;;  %v1550_v4 = vmul.f32 %v4107_v24, %v1510_v18  ;;  %v1477_v55 = vadd.f32 %v1445_v17, %v1373_v15 }
 0x189   : > { %v1551_v56 = vmul.f32 %v4107_v24, %v1511_v12  ;;  %v1654_v44 = vmul.f32 %v4115_v30, %v1614_v50  ;;  %v1655_v9 = vmul.f32 %v4115_v30, %v1615_v43  ;;  %v1478_v47 = vadd.f32 %v1446_v45, %v1374_v5 }
 0x18a   : > { %v1856_v63 = vpack.c.bf16 %v1828_v41, %v1827_v20  ;;  %v1758_v48 = vmul.f32 %v4117_v31, %v1718_v61  ;;  %v1759_v62 = vmul.f32 %v4117_v31, %v4330_v57  ;;  %v1582_v39 = vadd.f32 %v1550_v4, %v1477_v55 }
 0x18b   : > { %v705_v40 = vmax.f32 %v673_v59, 0.0  ;;  %v706_v51 = vmax.f32 %v674_v37, 0.0  ;;  %v1063_v6 = vadd.f32 %v1031_v46, %v927_v2  ;;  %v1583_v34 = vadd.f32 %v1551_v56, %v1478_v47  ;;  %v2928_v56 = vld [vmem:[%s3946_s1 + $0x40] sm:$0xff]  }
 0x18c   : > { %2960 = vmatmul.mubr.msk.bf16.gmra.mrb[4].mxu0 %vm789_vm0, %v1856_v63  ;;  %v1064_v38 = vadd.f32 %v1032_v33, %v928_v3  ;;  %v1135_v49 = vmul.f32 %v4052_v29, %v4277_v19  ;;  %v1136_v58 = vmul.f32 %v4052_v29, %v4279_v35  ;;  %v1686_v60 = vadd.f32 %v1654_v44, %v1582_v39  ;;  %v4362_v44 = vld [vmem:[%s3946_s1 + $0x48] sm:$0xff]  }
 0x18d   : > { %v769_v42 = vadd.f32 %v737_v27, %v705_v40  ;;  %v770_v17 = vadd.f32 %v738_v28, %v706_v51  ;;  %v1239_v45 = vmul.f32 %v4086_v14, %v1510_v18  ;;  %v1687_v7 = vadd.f32 %v1655_v9, %v1583_v34  ;;  %v740_v27 = vld [vmem:[%s3960_s30 + $0x78] sm:$0xff] }
 0x18e   : > { %v1167_v32 = vadd.f32 %v1135_v49, %v1063_v6  ;;  %v1168_v25 = vadd.f32 %v1136_v58, %v1064_v38  ;;  %v1240_v26 = vmul.f32 %v4086_v14, %v1511_v12  ;;  %v1790_v1 = vadd.f32 %v1758_v48, %v1686_v60 }
 0x18f   : > { %858 = vst.msk [vmem:[#allocation2 + $0xa9] sm:$0xff] %vm789_vm0, %v769_v42  ;;  %859 = vst.msk [vmem:[#allocation2 + $0xb1] sm:$0xff] %vm789_vm0, %v770_v17  ;;  %v1343_v19 = vmul.f32 %v4103_v21, %v1614_v50  ;;  %v1344_v35 = vmul.f32 %v4103_v21, %v1615_v43  ;;  %v1447_v53 = vmul.f32 %v4105_v23, %v1718_v61  ;;  %v2887_v54 = vunpack.c.l.bf16 %v2927_v0 }
 0x190   : > { %v1791_v11 = vadd.f32 %v1759_v62, %v1687_v7  ;;  %v1271_v2 = vadd.f32 %v1239_v45, %v1167_v32  ;;  %v1272_v3 = vadd.f32 %v1240_v26, %v1168_v25  ;;  %v1448_v13 = vmul.f32 %v4105_v23, %v4330_v57  ;;  %v739_v62 = vld [vmem:[%s3960_s30 + $0x70] sm:$0xff] }
 0x191   : > { %v1829_v52 = vadd.f32 %v4185_v36, %v1790_v1  ;;  %v2888_v59 = vunpack.c.h.bf16 %v2927_v0  ;;  %v929_v15 = vmul.f32 %v4041_v16, %v1510_v18  ;;  %v930_v20 = vmul.f32 %v4041_v16, %v1511_v12 }
 0x192   : > { %v1830_v37 = vadd.f32 %v4185_v36, %v1791_v11  ;;  %v1375_v46 = vadd.f32 %v1343_v19, %v1271_v2  ;;  %v1376_v33 = vadd.f32 %v1344_v35, %v1272_v3  ;;  %v636_v41 = vmul.f32 %v2887_v54, %v4034_v8 }
 0x193   : > { %v637_v5 = vmul.f32 %v2888_v59, %v4034_v8  ;;  %v1033_v4 = vmul.f32 %v4046_v22, %v1614_v50  ;;  %v1034_v55 = vmul.f32 %v4046_v22, %v1615_v43  ;;  %v1137_v47 = vmul.f32 %v4052_v29, %v1718_v61 }
 0x194   : > { %v1857_v18 = vpack.c.bf16 %v1830_v37, %v1829_v52  ;;  %v1479_v9 = vadd.f32 %v1447_v53, %v1375_v46  ;;  %v1480_v63 = vadd.f32 %v1448_v13, %v1376_v33  ;;  %v675_v48 = vadd.f32 %v4036_v10, %v636_v41 }
 0x195   : > { %v676_v12 = vadd.f32 %v4036_v10, %v637_v5  ;;  %v1065_v28 = vadd.f32 %v1033_v4, %v929_v15  ;;  %v1066_v39 = vadd.f32 %v1034_v55, %v930_v20  ;;  %v1138_v51 = vmul.f32 %v4052_v29, %v4330_v57 }
 0x196   : > { %2963 = vmatprep.mubr.msk.bf16.mxu0 %vm789_vm0, %v1857_v18  ;;  %v1512_v50 = vld [vmem:[#allocation2 + $0xa8] sm:$0xff]  ;;  %v1513_v43 = vld [vmem:[#allocation2 + $0xb0] sm:$0xff]  ;;  %v2891_v6 = vunpack.c.l.bf16 %v2928_v56  ;;  %v2892_v34 = vunpack.c.h.bf16 %v2928_v56  ;;  %v2895_v61 = vunpack.c.l.bf16 %v4362_v44  ;;  %v707_v45 = vmax.f32 %v675_v48, 0.0 }
 0x197   : > { %v1616_v40 = vld [vmem:[#allocation2 + $0xa9] sm:$0xff]  ;;  %v1552_v38 = vmul.f32 %v4107_v24, %v1512_v50  ;;  %v1553_v49 = vmul.f32 %v4107_v24, %v1513_v43  ;;  %v1617_v58 = vld [vmem:[#allocation2 + $0xb1] sm:$0xff]  ;;  %v708_v25 = vmax.f32 %v676_v12, 0.0  ;;  %v1169_v19 = vadd.f32 %v1137_v47, %v1065_v28  ;;  %v742_v28 = vld [vmem:[%s3960_s30 + $0x88] sm:$0xff] }
 0x198   : > { %v1656_v60 = vmul.f32 %v4115_v30, %v1616_v40  ;;  %v1720_v42 = vld [vmem:[#allocation2 + $0xaa] sm:$0xff]  ;;  %v1721_v17 = vld [vmem:[#allocation2 + $0xb2] sm:$0xff]  ;;  %v1657_v7 = vmul.f32 %v4115_v30, %v1617_v58  ;;  %v771_v1 = vadd.f32 %v739_v62, %v707_v45  ;;  %v1170_v53 = vadd.f32 %v1138_v51, %v1066_v39 }
 0x199   : > { %v1760_v32 = vmul.f32 %v4117_v31, %v1720_v42  ;;  %v1761_v57 = vmul.f32 %v4117_v31, %v1721_v17  ;;  %v1584_v26 = vadd.f32 %v1552_v38, %v1479_v9  ;;  %v1585_v0 = vadd.f32 %v1553_v49, %v1480_v63 }
 0x19a   : > { %v772_v35 = vadd.f32 %v740_v27, %v708_v25  ;;  %v1241_v11 = vmul.f32 %v4086_v14, %v1512_v50  ;;  %v1242_v2 = vmul.f32 %v4086_v14, %v1513_v43  ;;  %860 = vst.msk [vmem:[#allocation2 + $0xc1] sm:$0xff] %vm789_vm0, %v771_v1  ;;  %v1345_v52 = vmul.f32 %v4103_v21, %v1616_v40  ;;  %v741_v27 = vld [vmem:[%s3960_s30 + $0x80] sm:$0xff] }
 0x19b   : > { %v1688_v3 = vadd.f32 %v1656_v60, %v1584_v26  ;;  %v1689_v13 = vadd.f32 %v1657_v7, %v1585_v0  ;;  %v1346_v54 = vmul.f32 %v4103_v21, %v1617_v58  ;;  %v1449_v37 = vmul.f32 %v4105_v23, %v1720_v42 }
 0x19c   : > { %861 = vst.msk [vmem:[#allocation2 + $0xc9] sm:$0xff] %vm789_vm0, %v772_v35  ;;  %v1273_v59 = vadd.f32 %v1241_v11, %v1169_v19  ;;  %v1274_v15 = vadd.f32 %v1242_v2, %v1170_v53  ;;  %v1450_v46 = vmul.f32 %v4105_v23, %v1721_v17  ;;  %v638_v41 = vmul.f32 %v2891_v6, %v4034_v8 }
 0x19d   : > { %v1792_v33 = vadd.f32 %v1760_v32, %v1688_v3  ;;  %v1793_v20 = vadd.f32 %v1761_v57, %v1689_v13  ;;  %v639_v5 = vmul.f32 %v2892_v34, %v4034_v8  ;;  %v931_v56 = vmul.f32 %v4041_v16, %v1512_v50 }
 0x19e   : > { %v1377_v4 = vadd.f32 %v1345_v52, %v1273_v59  ;;  %v1378_v55 = vadd.f32 %v1346_v54, %v1274_v15  ;;  %v932_v18 = vmul.f32 %v4041_v16, %v1513_v43  ;;  %v677_v47 = vadd.f32 %v4036_v10, %v638_v41 }
 0x19f   : > { %v1831_v9 = vadd.f32 %v4185_v36, %v1792_v33  ;;  %v1832_v63 = vadd.f32 %v4185_v36, %v1793_v20  ;;  %v678_v48 = vadd.f32 %v4036_v10, %v639_v5  ;;  %v1035_v39 = vmul.f32 %v4046_v22, %v1616_v40 }
 0x1a0   : > { %v1481_v12 = vadd.f32 %v1449_v37, %v1377_v4  ;;  %v1482_v62 = vadd.f32 %v1450_v46, %v1378_v55  ;;  %v1036_v51 = vmul.f32 %v4046_v22, %v1617_v58  ;;  %v709_v50 = vmax.f32 %v677_v47, 0.0 }
 0x1a1   : > { %v1858_v6 = vpack.c.bf16 %v1832_v63, %v1831_v9  ;;  %v710_v34 = vmax.f32 %v678_v48, 0.0  ;;  %v1139_v43 = vmul.f32 %v4052_v29, %v1720_v42  ;;  %v1514_v38 = vld [vmem:[#allocation2 + $0xc0] sm:$0xff]  ;;  %v1067_v60 = vadd.f32 %v1035_v39, %v931_v56 }
 0x1a2   : > { %v1618_v49 = vld [vmem:[#allocation2 + $0xc1] sm:$0xff]  ;;  %v1068_v45 = vadd.f32 %v1036_v51, %v932_v18  ;;  %v1140_v7 = vmul.f32 %v4052_v29, %v1721_v17  ;;  %v2896_v32 = vunpack.c.h.bf16 %v4362_v44  ;;  %v1554_v40 = vmul.f32 %v4107_v24, %v1514_v38  ;;  %v744_v44 = vld [vmem:[%s3960_s30 + $0x98] sm:$0xff] }
 0x1a3   : > { %2964 = vmatmul.mubr.msk.bf16.gmra.mrb[8].mxu0 %vm789_vm0, %v1858_v6  ;;  %v1515_v57 = vld [vmem:[#allocation2 + $0xc8] sm:$0xff]  ;;  %v1658_v58 = vmul.f32 %v4115_v30, %v1618_v49  ;;  %v773_v0 = vadd.f32 %v741_v27, %v709_v50  ;;  %v774_v42 = vadd.f32 %v742_v28, %v710_v34  ;;  %v1171_v53 = vadd.f32 %v1139_v43, %v1067_v60 }
 0x1a4   : > { %v1619_v25 = vld [vmem:[#allocation2 + $0xc9] sm:$0xff]  ;;  %v1555_v1 = vmul.f32 %v4107_v24, %v1515_v57  ;;  %v1586_v11 = vadd.f32 %v1554_v40, %v1481_v12  ;;  %v1172_v3 = vadd.f32 %v1140_v7, %v1068_v45  ;;  %v1243_v13 = vmul.f32 %v4086_v14, %v1514_v38 }
 0x1a5   : > { %v4405_v26 = vld [vmem:[#allocation2 + $0xc2] sm:$0xff]  ;;  %v1659_v19 = vmul.f32 %v4115_v30, %v1619_v25  ;;  %v1723_v35 = vld [vmem:[#allocation2 + $0xca] sm:$0xff]  ;;  %862 = vst.msk [vmem:[#allocation2 + $0xd9] sm:$0xff] %vm789_vm0, %v773_v0  ;;  %863 = vst.msk [vmem:[#allocation2 + $0xe1] sm:$0xff] %vm789_vm0, %v774_v42  ;;  %v1244_v54 = vmul.f32 %v4086_v14, %v1515_v57  ;;  %v1347_v59 = vmul.f32 %v4103_v21, %v1618_v49 }
 0x1a6   : > { %v1762_v17 = vmul.f32 %v4117_v31, %v4405_v26  ;;  %v1763_v2 = vmul.f32 %v4117_v31, %v1723_v35  ;;  %v1587_v52 = vadd.f32 %v1555_v1, %v1482_v62  ;;  %v1348_v15 = vmul.f32 %v4103_v21, %v1619_v25  ;;  %v743_v39 = vld [vmem:[%s3960_s30 + $0x90] sm:$0xff] }
 0x1a7   : > { %v1690_v37 = vadd.f32 %v1658_v58, %v1586_v11  ;;  %v1275_v46 = vadd.f32 %v1243_v13, %v1171_v53  ;;  %v1451_v33 = vmul.f32 %v4105_v23, %v4405_v26  ;;  %v1452_v20 = vmul.f32 %v4105_v23, %v1723_v35 }
 0x1a8   : > { %v1691_v41 = vadd.f32 %v1659_v19, %v1587_v52  ;;  %v1276_v5 = vadd.f32 %v1244_v54, %v1172_v3  ;;  %v640_v4 = vmul.f32 %v2895_v61, %v4034_v8  ;;  %v641_v55 = vmul.f32 %v2896_v32, %v4034_v8  ;;  %v2930_v3 = vld [vmem:[%s3946_s1 + $0x50] sm:$0xff]  }
 0x1a9   : > { %v1794_v56 = vadd.f32 %v1762_v17, %v1690_v37  ;;  %v1379_v18 = vadd.f32 %v1347_v59, %v1275_v46  ;;  %v933_v9 = vmul.f32 %v4041_v16, %v1514_v38  ;;  %v934_v63 = vmul.f32 %v4041_v16, %v1515_v57 }
 0x1aa   : > { %v1795_v47 = vadd.f32 %v1763_v2, %v1691_v41  ;;  %v1380_v48 = vadd.f32 %v1348_v15, %v1276_v5  ;;  %v679_v12 = vadd.f32 %v4036_v10, %v640_v4  ;;  %v680_v62 = vadd.f32 %v4036_v10, %v641_v55  ;;  %v4458_v55 = vld [vmem:[#allocation11] ss:$0 sm:$0xff] }
 0x1ab   : > { %v1833_v27 = vadd.f32 %v4185_v36, %v1794_v56  ;;  %v1483_v28 = vadd.f32 %v1451_v33, %v1379_v18  ;;  %v1037_v61 = vmul.f32 %v4046_v22, %v1618_v49  ;;  %v1038_v8 = vmul.f32 %v4046_v22, %v1619_v25 }
 0x1ac   : > { %v1834_v51 = vadd.f32 %v4185_v36, %v1795_v47  ;;  %v1484_v6 = vadd.f32 %v1452_v20, %v1380_v48  ;;  %v1516_v50 = vld [vmem:[#allocation2 + $0xd8] sm:$0xff]  ;;  %v1517_v16 = vld [vmem:[#allocation2 + $0xe0] sm:$0xff]  ;;  %v711_v43 = vmax.f32 %v679_v12, 0.0  ;;  %v712_v38 = vmax.f32 %v680_v62, 0.0 }
 0x1ad   : > { %v1620_v34 = vld [vmem:[#allocation2 + $0xd9] sm:$0xff]  ;;  %v1556_v60 = vmul.f32 %v4107_v24, %v1516_v50  ;;  %v1557_v10 = vmul.f32 %v4107_v24, %v1517_v16  ;;  %v1621_v45 = vld [vmem:[#allocation2 + $0xe1] sm:$0xff]  ;;  %v1069_v22 = vadd.f32 %v1037_v61, %v933_v9  ;;  %v1070_v17 = vadd.f32 %v1038_v8, %v934_v63  ;;  %v4463_v63 = vld [vmem:[#allocation6] ss:$0 sm:$0xff] }
 0x1ae   : > { %v1660_v7 = vmul.f32 %v4115_v30, %v1620_v34  ;;  %v1724_v32 = vld [vmem:[#allocation2 + $0xda] sm:$0xff]  ;;  %v4438_v49 = vld [vmem:[#allocation2 + $0xe2] sm:$0xff]  ;;  %v1859_v57 = vpack.c.bf16 %v1834_v51, %v1833_v27  ;;  %v1661_v40 = vmul.f32 %v4115_v30, %v1621_v45  ;;  %v775_v1 = vadd.f32 %v743_v39, %v711_v43  ;;  %v4471_v61 = vld [vmem:[#allocation8] ss:$0 sm:$0xff] }
 0x1af   : > { %v1764_v25 = vmul.f32 %v4117_v31, %v1724_v32  ;;  %v1765_v58 = vmul.f32 %v4117_v31, %v4438_v49  ;;  %v1588_v0 = vadd.f32 %v1556_v60, %v1483_v28  ;;  %v1589_v42 = vadd.f32 %v1557_v10, %v1484_v6  ;;  %v4468_v28 = vld [vmem:[#allocation11 + $0x1] ss:$0 sm:$0xff]  ;;  %v746_v6 = vld [vmem:[%s3960_s30 + $0xa8] sm:$0xff]  ;;  %v4477_v43 = vld [vmem:[#allocation11 + $0x2] ss:$0 sm:$0xff] }
 0x1b0   : > { %v776_v19 = vadd.f32 %v744_v44, %v712_v38  ;;  %2967 = vmatprep.mubr.msk.bf16.mxu0 %vm789_vm0, %v1859_v57  ;;  %v1141_v53 = vmul.f32 %v4052_v29, %v4405_v26  ;;  %v1142_v11 = vmul.f32 %v4052_v29, %v1723_v35  ;;  %v1245_v2 = vmul.f32 %v4086_v14, %v1516_v50  ;;  %v745_v51 = vld [vmem:[%s3960_s30 + $0xa0] sm:$0xff] }
 0x1b1   : > { %v1692_v13 = vadd.f32 %v1660_v7, %v1588_v0  ;;  %v1693_v52 = vadd.f32 %v1661_v40, %v1589_v42  ;;  %864 = vst.msk [vmem:[#allocation2 + $0xf1] sm:$0xff] %vm789_vm0, %v775_v1  ;;  %v1246_v54 = vmul.f32 %v4086_v14, %v1517_v16  ;;  %v1349_v59 = vmul.f32 %v4103_v21, %v1620_v34 }
 0x1b2   : > { %865 = vst.msk [vmem:[#allocation2 + $0xf9] sm:$0xff] %vm789_vm0, %v776_v19  ;;  %v1173_v15 = vadd.f32 %v1141_v53, %v1069_v22  ;;  %v1174_v37 = vadd.f32 %v1142_v11, %v1070_v17  ;;  %v1350_v46 = vmul.f32 %v4103_v21, %v1621_v45  ;;  %v1453_v26 = vmul.f32 %v4105_v23, %v1724_v32 }
 0x1b3   : > { %v1796_v29 = vadd.f32 %v1764_v25, %v1692_v13  ;;  %v1797_v35 = vadd.f32 %v1765_v58, %v1693_v52  ;;  %v1454_v33 = vmul.f32 %v4105_v23, %v4438_v49  ;;  %v2899_v20 = vunpack.c.l.bf16 %v2930_v3 }
 0x1b4   : > { %v1277_v41 = vadd.f32 %v1245_v2, %v1173_v15  ;;  %v1278_v5 = vadd.f32 %v1246_v54, %v1174_v37  ;;  %v2900_v4 = vunpack.c.h.bf16 %v2930_v3  ;;  %v935_v56 = vmul.f32 %v4458_v55, %v1516_v50  ;;  %v2931_v15 = vld [vmem:[%s3946_s1 + $0x58] sm:$0xff]  }
 0x1b5   : > { %v1835_v18 = vadd.f32 %v4185_v36, %v1796_v29  ;;  %v1836_v9 = vadd.f32 %v4185_v36, %v1797_v35  ;;  %v642_v47 = vmul.f32 %v4463_v63, %v2899_v20  ;;  %v936_v48 = vmul.f32 %v4458_v55, %v1517_v16 }
 0x1b6   : > { %v1381_v12 = vadd.f32 %v1349_v59, %v1277_v41  ;;  %v1382_v62 = vadd.f32 %v1350_v46, %v1278_v5  ;;  %v643_v27 = vmul.f32 %v4463_v63, %v2900_v4  ;;  %v1039_v39 = vmul.f32 %v4468_v28, %v1620_v34  ;;  %v4500_v41 = vld [vmem:[#allocation11 + $0x5] ss:$0 sm:$0xff] }
 0x1b7   : > { %v1860_v44 = vpack.c.bf16 %v1836_v9, %v1835_v18  ;;  %v681_v8 = vadd.f32 %v4471_v61, %v642_v47  ;;  %v1040_v50 = vmul.f32 %v4468_v28, %v1621_v45  ;;  %v1143_v16 = vmul.f32 %v4477_v43, %v1724_v32 }
 0x1b8   : > { %v1485_v38 = vadd.f32 %v1453_v26, %v1381_v12  ;;  %v1486_v60 = vadd.f32 %v1454_v33, %v1382_v62  ;;  %v1518_v10 = vld [vmem:[#allocation2 + $0xf0] sm:$0xff]  ;;  %v682_v34 = vadd.f32 %v4471_v61, %v643_v27  ;;  %v1071_v57 = vadd.f32 %v1039_v39, %v935_v56 }
 0x1b9   : > { %v1519_v7 = vld [vmem:[#allocation2 + $0xf8] sm:$0xff]  ;;  %2968 = vmatmul.mubr.msk.bf16.gmra.mrb[12].mxu0 %vm789_vm0, %v1860_v44  ;;  %v1558_v40 = vmul.f32 %v4107_v24, %v1518_v10  ;;  %v713_v42 = vmax.f32 %v681_v8, 0.0  ;;  %v1072_v13 = vadd.f32 %v1040_v50, %v936_v48  ;;  %v1247_v59 = vmul.f32 %v4086_v14, %v1518_v10 }
 0x1ba   : > { %v1622_v22 = vld [vmem:[#allocation2 + $0xf1] sm:$0xff]  ;;  %v1559_v25 = vmul.f32 %v4107_v24, %v1519_v7  ;;  %v1623_v58 = vld [vmem:[#allocation2 + $0xf9] sm:$0xff]  ;;  %v714_v53 = vmax.f32 %v682_v34, 0.0  ;;  %v1144_v24 = vmul.f32 %v4477_v43, %v4438_v49  ;;  %v1175_v54 = vadd.f32 %v1143_v16, %v1071_v57 }
 0x1bb   : > { %v1662_v45 = vmul.f32 %v4115_v30, %v1622_v22  ;;  %v1726_v0 = vld [vmem:[#allocation2 + $0xf2] sm:$0xff]  ;;  %v1727_v32 = vld [vmem:[#allocation2 + $0xfa] sm:$0xff]  ;;  %v1663_v1 = vmul.f32 %v4115_v30, %v1623_v58  ;;  %v1590_v11 = vadd.f32 %v1558_v40, %v1485_v38  ;;  %v777_v3 = vadd.f32 %v745_v51, %v713_v42 }
 0x1bc   : > { %v1766_v19 = vmul.f32 %v4117_v31, %v1726_v0  ;;  %v1767_v17 = vmul.f32 %v4117_v31, %v1727_v32  ;;  %v1591_v2 = vadd.f32 %v1559_v25, %v1486_v60  ;;  %v778_v52 = vadd.f32 %v746_v6, %v714_v53  ;;  %v4493_v30 = vld [vmem:[#allocation11 + $0x3] ss:$0 sm:$0xff]  ;;  %v747_v6 = vld [vmem:[%s3960_s30 + $0xb0] sm:$0xff]  ;;  %v4518_v25 = vld [vmem:[#allocation11 + $0x6] ss:$0 sm:$0xff] }
 0x1bd   : > { %v1694_v37 = vadd.f32 %v1662_v45, %v1590_v11  ;;  %866 = vst.msk [vmem:[#allocation2 + $0x109] sm:$0xff] %vm789_vm0, %v777_v3  ;;  %v1248_v31 = vmul.f32 %v4493_v30, %v1519_v7  ;;  %v1351_v26 = vmul.f32 %v4103_v21, %v1622_v22  ;;  %v1176_v29 = vadd.f32 %v1144_v24, %v1072_v13 }
 0x1be   : > { %v1695_v46 = vadd.f32 %v1663_v1, %v1591_v2  ;;  %867 = vst.msk [vmem:[#allocation2 + $0x111] sm:$0xff] %vm789_vm0, %v778_v52  ;;  %v1279_v35 = vadd.f32 %v1247_v59, %v1175_v54  ;;  %v1352_v49 = vmul.f32 %v4103_v21, %v1623_v58  ;;  %v1455_v33 = vmul.f32 %v4105_v23, %v1726_v0  ;;  %v4526_v2 = vld [vmem:[#allocation11 + $0x8] ss:$0 sm:$0xff] }
 0x1bf   : > { %v1798_v14 = vadd.f32 %v1766_v19, %v1694_v37  ;;  %v1456_v5 = vmul.f32 %v4500_v41, %v1727_v32  ;;  %v2903_v4 = vunpack.c.l.bf16 %v2931_v15  ;;  %v1280_v56 = vadd.f32 %v1248_v31, %v1176_v29 }
 0x1c0   : > { %v1799_v20 = vadd.f32 %v1767_v17, %v1695_v46  ;;  %v1383_v18 = vadd.f32 %v1351_v26, %v1279_v35  ;;  %v2904_v9 = vunpack.c.h.bf16 %v2931_v15  ;;  %v937_v47 = vmul.f32 %v4458_v55, %v1518_v10  ;;  %v2932_v26 = vld [vmem:[%s3946_s1 + $0x60] sm:$0xff]  }
 0x1c1   : > { %v1837_v48 = vadd.f32 %v4185_v36, %v1798_v14  ;;  %v644_v21 = vmul.f32 %v4463_v63, %v2903_v4  ;;  %v938_v23 = vmul.f32 %v4458_v55, %v1519_v7  ;;  %v1384_v62 = vadd.f32 %v1352_v49, %v1280_v56  ;;  %v748_v7 = vld [vmem:[%s3960_s30 + $0xb8] sm:$0xff]  ;;  %v4534_v49 = vld [vmem:[#allocation11 + $0x4] ss:$0 sm:$0xff] }
 0x1c2   : > { %v1838_v12 = vadd.f32 %v4185_v36, %v1799_v20  ;;  %v1487_v27 = vadd.f32 %v1455_v33, %v1383_v18  ;;  %v645_v39 = vmul.f32 %v4463_v63, %v2904_v9  ;;  %v1041_v44 = vmul.f32 %v4468_v28, %v1622_v22 }
 0x1c3   : > { %v683_v51 = vadd.f32 %v4471_v61, %v644_v21  ;;  %v1042_v50 = vmul.f32 %v4468_v28, %v1623_v58  ;;  %v1145_v16 = vmul.f32 %v4477_v43, %v1726_v0  ;;  %v1488_v38 = vadd.f32 %v1456_v5, %v1384_v62  ;;  %v4521_v58 = vld [vmem:[#allocation11 + $0x7] ss:$0 sm:$0xff] }
 0x1c4   : > { %v1861_v8 = vpack.c.bf16 %v1838_v12, %v1837_v48  ;;  %v1520_v60 = vld [vmem:[#allocation2 + $0x108] sm:$0xff]  ;;  %v684_v34 = vadd.f32 %v4471_v61, %v645_v39  ;;  %v1073_v57 = vadd.f32 %v1041_v44, %v937_v47  ;;  %v1146_v40 = vmul.f32 %v4477_v43, %v1727_v32 }
 0x1c5   : > { %v1624_v10 = vld [vmem:[#allocation2 + $0x109] sm:$0xff]  ;;  %v1560_v45 = vmul.f32 %v4518_v25, %v1520_v60  ;;  %v1625_v42 = vld [vmem:[#allocation2 + $0x111] sm:$0xff]  ;;  %v715_v19 = vmax.f32 %v683_v51, 0.0  ;;  %v1074_v17 = vadd.f32 %v1042_v50, %v938_v23  ;;  %v1249_v31 = vmul.f32 %v4493_v30, %v1520_v60 }
 0x1c6   : > { %2971 = vmatprep.mubr.msk.bf16.mxu1 %vm789_vm0, %v1861_v8  ;;  %v1521_v22 = vld [vmem:[#allocation2 + $0x110] sm:$0xff]  ;;  %v1664_v0 = vmul.f32 %v4521_v58, %v1624_v10  ;;  %v1665_v32 = vmul.f32 %v4521_v58, %v1625_v42  ;;  %v716_v13 = vmax.f32 %v684_v34, 0.0  ;;  %v1177_v59 = vadd.f32 %v1145_v16, %v1073_v57 }
 0x1c7   : > { %v1728_v1 = vld [vmem:[#allocation2 + $0x10a] sm:$0xff]  ;;  %v1561_v53 = vmul.f32 %v4518_v25, %v1521_v22  ;;  %v1729_v11 = vld [vmem:[#allocation2 + $0x112] sm:$0xff]  ;;  %v1592_v52 = vadd.f32 %v1560_v45, %v1487_v27  ;;  %v779_v54 = vadd.f32 %v747_v6, %v715_v19  ;;  %v1178_v46 = vadd.f32 %v1146_v40, %v1074_v17 }
 0x1c8   : > { %v1768_v3 = vmul.f32 %v4526_v2, %v1728_v1  ;;  %v1769_v24 = vmul.f32 %v4526_v2, %v1729_v11  ;;  %v780_v37 = vadd.f32 %v748_v7, %v716_v13  ;;  %v1250_v35 = vmul.f32 %v4493_v30, %v1521_v22  ;;  %v749_v7 = vld [vmem:[%s3960_s30 + $0xc0] sm:$0xff] }
 0x1c9   : > { %v1593_v15 = vadd.f32 %v1561_v53, %v1488_v38  ;;  %v1696_v29 = vadd.f32 %v1664_v0, %v1592_v52  ;;  %868 = vst.msk [vmem:[#allocation2 + $0x121] sm:$0xff] %vm789_vm0, %v779_v54  ;;  %v1353_v33 = vmul.f32 %v4534_v49, %v1624_v10  ;;  %v1354_v14 = vmul.f32 %v4534_v49, %v1625_v42  ;;  %v750_v0 = vld [vmem:[%s3960_s30 + $0xc8] sm:$0xff] }
 0x1ca   : > { %869 = vst.msk [vmem:[#allocation2 + $0x129] sm:$0xff] %vm789_vm0, %v780_v37  ;;  %v1281_v5 = vadd.f32 %v1249_v31, %v1177_v59  ;;  %v1457_v4 = vmul.f32 %v4500_v41, %v1728_v1  ;;  %v1458_v56 = vmul.f32 %v4500_v41, %v1729_v11  ;;  %v1282_v9 = vadd.f32 %v1250_v35, %v1178_v46 }
 0x1cb   : > { %v1697_v20 = vadd.f32 %v1665_v32, %v1593_v15  ;;  %v1800_v18 = vadd.f32 %v1768_v3, %v1696_v29  ;;  %v2907_v47 = vunpack.c.l.bf16 %v2932_v26  ;;  %v2908_v48 = vunpack.c.h.bf16 %v2932_v26 }
 0x1cc   : > { %v1385_v21 = vadd.f32 %v1353_v33, %v1281_v5  ;;  %v939_v23 = vmul.f32 %v4458_v55, %v1520_v60  ;;  %v940_v62 = vmul.f32 %v4458_v55, %v1521_v22  ;;  %v1386_v39 = vadd.f32 %v1354_v14, %v1282_v9  ;;  %v2933_v14 = vld [vmem:[%s3946_s1 + $0x68] sm:$0xff]  }
 0x1cd   : > { %v1801_v12 = vadd.f32 %v1769_v24, %v1697_v20  ;;  %v1839_v27 = vadd.f32 %v4185_v36, %v1800_v18  ;;  %v646_v44 = vmul.f32 %v4463_v63, %v2907_v47  ;;  %v647_v8 = vmul.f32 %v4463_v63, %v2908_v48 }
 0x1ce   : > { %v1489_v6 = vadd.f32 %v1457_v4, %v1385_v21  ;;  %v1043_v50 = vmul.f32 %v4468_v28, %v1624_v10  ;;  %v1044_v16 = vmul.f32 %v4468_v28, %v1625_v42  ;;  %v1490_v38 = vadd.f32 %v1458_v56, %v1386_v39 }
 0x1cf   : > { %v1840_v51 = vadd.f32 %v4185_v36, %v1801_v12  ;;  %v685_v60 = vadd.f32 %v4471_v61, %v646_v44  ;;  %v686_v34 = vadd.f32 %v4471_v61, %v647_v8  ;;  %v1147_v57 = vmul.f32 %v4477_v43, %v1728_v1 }
 0x1d0   : > { %v1522_v22 = vld [vmem:[#allocation2 + $0x120] sm:$0xff]  ;;  %v1075_v19 = vadd.f32 %v1043_v50, %v939_v23  ;;  %v1076_v17 = vadd.f32 %v1044_v16, %v940_v62  ;;  %v1148_v36 = vmul.f32 %v4477_v43, %v1729_v11  ;;  %v2911_v21 = vunpack.c.l.bf16 %v2933_v14 }
 0x1d1   : > { %v1862_v40 = vpack.c.bf16 %v1840_v51, %v1839_v27  ;;  %v1626_v45 = vld [vmem:[#allocation2 + $0x121] sm:$0xff]  ;;  %v1562_v10 = vmul.f32 %v4518_v25, %v1522_v22  ;;  %v1627_v42 = vld [vmem:[#allocation2 + $0x129] sm:$0xff]  ;;  %v717_v13 = vmax.f32 %v685_v60, 0.0  ;;  %v718_v52 = vmax.f32 %v686_v34, 0.0  ;;  %v4573_v51 = vld [vmem:[#allocation12] ss:$0 sm:$0xff] }
 0x1d2   : > { %v1523_v53 = vld [vmem:[#allocation2 + $0x128] sm:$0xff]  ;;  %v1666_v32 = vmul.f32 %v4521_v58, %v1626_v45  ;;  %v1667_v24 = vmul.f32 %v4521_v58, %v1627_v42  ;;  %v1179_v11 = vadd.f32 %v1147_v57, %v1075_v19  ;;  %v1180_v29 = vadd.f32 %v1148_v36, %v1076_v17  ;;  %v2934_v60 = vld [vmem:[%s3946_s1 + $0x70] sm:$0xff]  }
 0x1d3   : > { %v1730_v3 = vld [vmem:[#allocation2 + $0x122] sm:$0xff]  ;;  %2972 = vmatmul.mubr.msk.bf16.vlgmr.msra.gmra.mrb[0].mxu1 %vm789_vm0, %v1862_v40  ;;  %v1563_v1 = vmul.f32 %v4518_v25, %v1523_v53  ;;  %v1731_v54 = vld [vmem:[#allocation2 + $0x12a] sm:$0xff]  ;;  %v1594_v15 = vadd.f32 %v1562_v10, %v1489_v6  ;;  %v781_v46 = vadd.f32 %v749_v7, %v717_v13  ;;  %v782_v31 = vadd.f32 %v750_v0, %v718_v52 }
 0x1d4   : > { %v1770_v59 = vmul.f32 %v4526_v2, %v1730_v3  ;;  %v1771_v37 = vmul.f32 %v4526_v2, %v1731_v54  ;;  %v1251_v35 = vmul.f32 %v4493_v30, %v1522_v22  ;;  %v1252_v33 = vmul.f32 %v4493_v30, %v1523_v53  ;;  %v751_v19 = vld [vmem:[%s3960_s30 + $0xd0] sm:$0xff]  ;;  %v752_v17 = vld [vmem:[%s3960_s30 + $0xd8] sm:$0xff] }
 0x1d5   : > { %v1595_v26 = vadd.f32 %v1563_v1, %v1490_v38  ;;  %v1698_v20 = vadd.f32 %v1666_v32, %v1594_v15  ;;  %870 = vst.msk [vmem:[#allocation2 + $0x139] sm:$0xff] %vm789_vm0, %v781_v46  ;;  %871 = vst.msk [vmem:[#allocation2 + $0x141] sm:$0xff] %vm789_vm0, %v782_v31  ;;  %v1355_v5 = vmul.f32 %v4534_v49, %v1626_v45  ;;  %v2912_v23 = vunpack.c.h.bf16 %v2933_v14 }
 0x1d6   : > { %v1356_v4 = vmul.f32 %v4534_v49, %v1627_v42  ;;  %v1459_v56 = vmul.f32 %v4500_v41, %v1730_v3  ;;  %v1283_v9 = vadd.f32 %v1251_v35, %v1179_v11  ;;  %v1284_v47 = vadd.f32 %v1252_v33, %v1180_v29 }
 0x1d7   : > { %v1699_v18 = vadd.f32 %v1667_v24, %v1595_v26  ;;  %v1460_v48 = vmul.f32 %v4500_v41, %v1731_v54  ;;  %v1802_v12 = vadd.f32 %v1770_v59, %v1698_v20  ;;  %v941_v62 = vmul.f32 %v4458_v55, %v1522_v22 }
 0x1d8   : > { %v1387_v39 = vadd.f32 %v1355_v5, %v1283_v9  ;;  %v1388_v44 = vadd.f32 %v1356_v4, %v1284_v47  ;;  %v942_v8 = vmul.f32 %v4458_v55, %v1523_v53  ;;  %v648_v50 = vmul.f32 %v4463_v63, %v2911_v21 }
 0x1d9   : > { %v1803_v27 = vadd.f32 %v1771_v37, %v1699_v18  ;;  %v1841_v6 = vadd.f32 %v4573_v51, %v1802_v12  ;;  %v649_v16 = vmul.f32 %v4463_v63, %v2912_v23  ;;  %v1045_v38 = vmul.f32 %v4468_v28, %v1626_v45 }
 0x1da   : > { %v1491_v7 = vadd.f32 %v1459_v56, %v1387_v39  ;;  %v1492_v57 = vadd.f32 %v1460_v48, %v1388_v44  ;;  %v1046_v40 = vmul.f32 %v4468_v28, %v1627_v42  ;;  %v687_v22 = vadd.f32 %v4471_v61, %v648_v50 }
 0x1db   : > { %v1842_v34 = vadd.f32 %v4573_v51, %v1803_v27  ;;  %v688_v0 = vadd.f32 %v4471_v61, %v649_v16  ;;  %v1077_v36 = vadd.f32 %v1045_v38, %v941_v62  ;;  %v1149_v53 = vmul.f32 %v4477_v43, %v1730_v3 }
 0x1dc   : > { %v1524_v32 = vld [vmem:[#allocation2 + $0x138] sm:$0xff]  ;;  %v1525_v13 = vld [vmem:[#allocation2 + $0x140] sm:$0xff]  ;;  %v1078_v52 = vadd.f32 %v1046_v40, %v942_v8  ;;  %v1150_v1 = vmul.f32 %v4477_v43, %v1731_v54  ;;  %v2915_v24 = vunpack.c.l.bf16 %v2934_v60  ;;  %v719_v31 = vmax.f32 %v687_v22, 0.0 }
 0x1dd   : > { %v1863_v10 = vpack.c.bf16 %v1842_v34, %v1841_v6  ;;  %v1628_v45 = vld [vmem:[#allocation2 + $0x139] sm:$0xff]  ;;  %v1564_v59 = vmul.f32 %v4518_v25, %v1524_v32  ;;  %v1565_v42 = vmul.f32 %v4518_v25, %v1525_v13  ;;  %v1629_v11 = vld [vmem:[#allocation2 + $0x141] sm:$0xff]  ;;  %v720_v54 = vmax.f32 %v688_v0, 0.0 }
 0x1de   : > { %v1668_v15 = vmul.f32 %v4521_v58, %v1628_v45  ;;  %v1732_v37 = vld [vmem:[#allocation2 + $0x13a] sm:$0xff]  ;;  %v1733_v46 = vld [vmem:[#allocation2 + $0x142] sm:$0xff]  ;;  %v1669_v3 = vmul.f32 %v4521_v58, %v1629_v11  ;;  %v783_v14 = vadd.f32 %v751_v19, %v719_v31  ;;  %v1181_v20 = vadd.f32 %v1149_v53, %v1077_v36 }
 0x1df   : > { %2975 = vmatprep.mubr.msk.bf16.mxu1 %vm789_vm0, %v1863_v10  ;;  %v1772_v26 = vmul.f32 %v4526_v2, %v1732_v37  ;;  %v1773_v29 = vmul.f32 %v4526_v2, %v1733_v46  ;;  %v1596_v35 = vadd.f32 %v1564_v59, %v1491_v7  ;;  %v1597_v33 = vadd.f32 %v1565_v42, %v1492_v57  ;;  %v2935_v0 = vld [vmem:[%s3946_s1 + $0x78] sm:$0xff]   ;;  %v754_v59 = vld [vmem:[%s3960_s30 + $0xe8] sm:$0xff] }
 0x1e0   : > { %v784_v5 = vadd.f32 %v752_v17, %v720_v54  ;;  %v1182_v4 = vadd.f32 %v1150_v1, %v1078_v52  ;;  %v1253_v56 = vmul.f32 %v4493_v30, %v1524_v32  ;;  %v1254_v18 = vmul.f32 %v4493_v30, %v1525_v13  ;;  %872 = vst.msk [vmem:[#allocation2 + $0x151] sm:$0xff] %vm789_vm0, %v783_v14  ;;  %v753_v17 = vld [vmem:[%s3960_s30 + $0xe0] sm:$0xff] }
 0x1e1   : > { %v1700_v9 = vadd.f32 %v1668_v15, %v1596_v35  ;;  %v1701_v47 = vadd.f32 %v1669_v3, %v1597_v33  ;;  %v1357_v48 = vmul.f32 %v4534_v49, %v1628_v45  ;;  %v1358_v12 = vmul.f32 %v4534_v49, %v1629_v11 }
 0x1e2   : > { %873 = vst.msk [vmem:[#allocation2 + $0x159] sm:$0xff] %vm789_vm0, %v784_v5  ;;  %v1285_v21 = vadd.f32 %v1253_v56, %v1181_v20  ;;  %v1286_v23 = vadd.f32 %v1254_v18, %v1182_v4  ;;  %v1461_v62 = vmul.f32 %v4500_v41, %v1732_v37  ;;  %v1462_v27 = vmul.f32 %v4500_v41, %v1733_v46 }
 0x1e3   : > { %v1804_v39 = vadd.f32 %v1772_v26, %v1700_v9  ;;  %v1805_v44 = vadd.f32 %v1773_v29, %v1701_v47  ;;  %v2916_v8 = vunpack.c.h.bf16 %v2934_v60  ;;  %v650_v6 = vmul.f32 %v4463_v63, %v2915_v24 }
 0x1e4   : > { %v1389_v50 = vadd.f32 %v1357_v48, %v1285_v21  ;;  %v1390_v16 = vadd.f32 %v1358_v12, %v1286_v23  ;;  %v943_v38 = vmul.f32 %v4458_v55, %v1524_v32  ;;  %v944_v34 = vmul.f32 %v4458_v55, %v1525_v13 }
 0x1e5   : > { %v1843_v7 = vadd.f32 %v4573_v51, %v1804_v39  ;;  %v1844_v57 = vadd.f32 %v4573_v51, %v1805_v44  ;;  %v651_v40 = vmul.f32 %v4463_v63, %v2916_v8  ;;  %v689_v22 = vadd.f32 %v4471_v61, %v650_v6 }
 0x1e6   : > { %v1493_v19 = vadd.f32 %v1461_v62, %v1389_v50  ;;  %v1494_v60 = vadd.f32 %v1462_v27, %v1390_v16  ;;  %v1047_v36 = vmul.f32 %v4468_v28, %v1628_v45  ;;  %v1048_v53 = vmul.f32 %v4468_v28, %v1629_v11 }
 0x1e7   : > { %v1864_v10 = vpack.c.bf16 %v1844_v57, %v1843_v7  ;;  %v690_v32 = vadd.f32 %v4471_v61, %v651_v40  ;;  %v721_v13 = vmax.f32 %v689_v22, 0.0  ;;  %v1151_v52 = vmul.f32 %v4477_v43, %v1732_v37  ;;  %v1526_v1 = vld [vmem:[#allocation2 + $0x150] sm:$0xff] }
 0x1e8   : > { %v1630_v24 = vld [vmem:[#allocation2 + $0x151] sm:$0xff]  ;;  %v1079_v42 = vadd.f32 %v1047_v36, %v943_v38  ;;  %v1080_v15 = vadd.f32 %v1048_v53, %v944_v34  ;;  %v1152_v31 = vmul.f32 %v4477_v43, %v1733_v46  ;;  %v2919_v3 = vunpack.c.l.bf16 %v2935_v0 }
 0x1e9   : > { %2976 = vmatmul.mubr.msk.bf16.gmra.mrb[4].mxu1 %vm789_vm0, %v1864_v10  ;;  %v1527_v26 = vld [vmem:[#allocation2 + $0x158] sm:$0xff]  ;;  %v1566_v45 = vmul.f32 %v4518_v25, %v1526_v1  ;;  %v1670_v29 = vmul.f32 %v4521_v58, %v1630_v24  ;;  %v722_v35 = vmax.f32 %v690_v32, 0.0  ;;  %v785_v33 = vadd.f32 %v753_v17, %v721_v13 }
 0x1ea   : > { %v1631_v11 = vld [vmem:[#allocation2 + $0x159] sm:$0xff]  ;;  %v1567_v37 = vmul.f32 %v4518_v25, %v1527_v26  ;;  %v1183_v46 = vadd.f32 %v1151_v52, %v1079_v42  ;;  %v1184_v9 = vadd.f32 %v1152_v31, %v1080_v15  ;;  %v1255_v48 = vmul.f32 %v4493_v30, %v1526_v1  ;;  %v755_v15 = vld [vmem:[%s3960_s30 + $0xf0] sm:$0xff]  ;;  %v756_v31 = vld [vmem:[%s3960_s30 + $0xf8] sm:$0xff] }
 0x1eb   : > { %v1734_v54 = vld [vmem:[#allocation2 + $0x152] sm:$0xff]  ;;  %v1671_v14 = vmul.f32 %v4521_v58, %v1631_v11  ;;  %v1735_v20 = vld [vmem:[#allocation2 + $0x15a] sm:$0xff]  ;;  %v1598_v4 = vadd.f32 %v1566_v45, %v1493_v19  ;;  %v786_v18 = vadd.f32 %v754_v59, %v722_v35  ;;  %874 = vst.msk [vmem:[#allocation2 + $0x169] sm:$0xff] %vm789_vm0, %v785_v33  ;;  %v1256_v12 = vmul.f32 %v4493_v30, %v1527_v26 }
 0x1ec   : > { %v1774_v5 = vmul.f32 %v4526_v2, %v1734_v54  ;;  %v1775_v56 = vmul.f32 %v4526_v2, %v1735_v20  ;;  %v1599_v47 = vadd.f32 %v1567_v37, %v1494_v60  ;;  %v1359_v21 = vmul.f32 %v4534_v49, %v1630_v24 }
 0x1ed   : > { %v1702_v23 = vadd.f32 %v1670_v29, %v1598_v4  ;;  %875 = vst.msk [vmem:[#allocation2 + $0x171] sm:$0xff] %vm789_vm0, %v786_v18  ;;  %v1360_v62 = vmul.f32 %v4534_v49, %v1631_v11  ;;  %v1463_v27 = vmul.f32 %v4500_v41, %v1734_v54  ;;  %v1464_v39 = vmul.f32 %v4500_v41, %v1735_v20 }
 0x1ee   : > { %v1703_v44 = vadd.f32 %v1671_v14, %v1599_v47  ;;  %v1287_v8 = vadd.f32 %v1255_v48, %v1183_v46  ;;  %v1288_v6 = vadd.f32 %v1256_v12, %v1184_v9  ;;  %v2920_v50 = vunpack.c.h.bf16 %v2935_v0 }
 0x1ef   : > { %v1806_v16 = vadd.f32 %v1774_v5, %v1702_v23  ;;  %v652_v38 = vmul.f32 %v4463_v63, %v2919_v3  ;;  %v945_v34 = vmul.f32 %v4458_v55, %v1526_v1  ;;  %v946_v7 = vmul.f32 %v4458_v55, %v1527_v26 }
 0x1f0   : > { %v1807_v57 = vadd.f32 %v1775_v56, %v1703_v44  ;;  %v1391_v40 = vadd.f32 %v1359_v21, %v1287_v8  ;;  %v1392_v22 = vadd.f32 %v1360_v62, %v1288_v6  ;;  %v653_v19 = vmul.f32 %v4463_v63, %v2920_v50 }
 0x1f1   : > { %v1845_v60 = vadd.f32 %v4573_v51, %v1806_v16  ;;  %v691_v17 = vadd.f32 %v4471_v61, %v652_v38  ;;  %v1049_v0 = vmul.f32 %v4468_v28, %v1630_v24  ;;  %v1050_v36 = vmul.f32 %v4468_v28, %v1631_v11 }
 0x1f2   : > { %v1846_v53 = vadd.f32 %v4573_v51, %v1807_v57  ;;  %v1495_v10 = vadd.f32 %v1463_v27, %v1391_v40  ;;  %v1496_v32 = vadd.f32 %v1464_v39, %v1392_v22  ;;  %v1528_v13 = vld [vmem:[#allocation2 + $0x168] sm:$0xff]  ;;  %v692_v1 = vadd.f32 %v4471_v61, %v653_v19 }
 0x1f3   : > { %v1632_v52 = vld [vmem:[#allocation2 + $0x169] sm:$0xff]  ;;  %v1568_v59 = vmul.f32 %v4518_v25, %v1528_v13  ;;  %v723_v42 = vmax.f32 %v691_v17, 0.0  ;;  %v1081_v3 = vadd.f32 %v1049_v0, %v945_v34  ;;  %v1082_v35 = vadd.f32 %v1050_v36, %v946_v7 }
 0x1f4   : > { %v1672_v63 = vmul.f32 %v4521_v58, %v1632_v52  ;;  %v1865_v26 = vpack.c.bf16 %v1846_v53, %v1845_v60  ;;  %v1529_v24 = vld [vmem:[#allocation2 + $0x170] sm:$0xff]  ;;  %v724_v29 = vmax.f32 %v692_v1, 0.0  ;;  %v1153_v33 = vmul.f32 %v4477_v43, %v1734_v54 }
 0x1f5   : > { %v1633_v45 = vld [vmem:[#allocation2 + $0x171] sm:$0xff]  ;;  %v1569_v37 = vmul.f32 %v4518_v25, %v1529_v24  ;;  %v1600_v14 = vadd.f32 %v1568_v59, %v1495_v10  ;;  %v787_v56 = vadd.f32 %v755_v15, %v723_v42  ;;  %v1154_v9 = vmul.f32 %v4477_v43, %v1735_v20 }
 0x1f6   : > { %v1736_v11 = vld [vmem:[#allocation2 + $0x16a] sm:$0xff]  ;;  %v1673_v61 = vmul.f32 %v4521_v58, %v1633_v45  ;;  %v1737_v5 = vld [vmem:[#allocation2 + $0x172] sm:$0xff]  ;;  %2979 = vmatprep.mubr.msk.bf16.mxu1 %vm789_vm0, %v1865_v26  ;;  %v788_v18 = vadd.f32 %v756_v31, %v724_v29  ;;  %v1185_v12 = vadd.f32 %v1153_v33, %v1081_v3  ;;  %v1257_v54 = vmul.f32 %v4493_v30, %v1528_v13 }
 0x1f7   : > { %v1776_v46 = vmul.f32 %v4526_v2, %v1736_v11  ;;  %v1777_v4 = vmul.f32 %v4526_v2, %v1737_v5  ;;  %v1601_v47 = vadd.f32 %v1569_v37, %v1496_v32  ;;  %v1704_v48 = vadd.f32 %v1672_v63, %v1600_v14  ;;  %876 = vst.msk [vmem:[#allocation2 + $0x181] sm:$0xff] %vm789_vm0, %v787_v56  ;;  %v1532_v14 = vld [vmem:[#allocation2 + $0x198] sm:$0xff] }
 0x1f8   : > { %877 = vst.msk [vmem:[#allocation2 + $0x189] sm:$0xff] %vm789_vm0, %v788_v18  ;;  %v1186_v21 = vadd.f32 %v1154_v9, %v1082_v35  ;;  %v1258_v23 = vmul.f32 %v4493_v30, %v1529_v24  ;;  %v1361_v62 = vmul.f32 %v4534_v49, %v1632_v52  ;;  %v1362_v27 = vmul.f32 %v4534_v49, %v1633_v45 }
 0x1f9   : > { %v1705_v39 = vadd.f32 %v1673_v61, %v1601_v47  ;;  %v1808_v44 = vadd.f32 %v1776_v46, %v1704_v48  ;;  %v1289_v8 = vadd.f32 %v1257_v54, %v1185_v12  ;;  %v1465_v20 = vmul.f32 %v4500_v41, %v1736_v11  ;;  %v1636_v48 = vld [vmem:[#allocation2 + $0x199] sm:$0xff] }
 0x1fa   : > { %v1290_v6 = vadd.f32 %v1258_v23, %v1186_v21  ;;  %v1466_v50 = vmul.f32 %v4500_v41, %v1737_v5  ;;  %v947_v16 = vmul.f32 %v4458_v55, %v1528_v13  ;;  %v948_v38 = vmul.f32 %v4458_v55, %v1529_v24  ;;  %v1637_v21 = vld [vmem:[#allocation2 + $0x1a1] sm:$0xff] }
 0x1fb   : > { %v1809_v34 = vadd.f32 %v1777_v4, %v1705_v39  ;;  %v1847_v7 = vadd.f32 %v4573_v51, %v1808_v44  ;;  %v1393_v57 = vadd.f32 %v1361_v62, %v1289_v8  ;;  %v1051_v40 = vmul.f32 %v4468_v28, %v1632_v52  ;;  %v1533_v4 = vld [vmem:[#allocation2 + $0x1a0] sm:$0xff] }
 0x1fc   : > { %v1394_v22 = vadd.f32 %v1362_v27, %v1290_v6  ;;  %v1052_v19 = vmul.f32 %v4468_v28, %v1633_v45  ;;  %v1155_v60 = vmul.f32 %v4477_v43, %v1736_v11  ;;  %v1156_v17 = vmul.f32 %v4477_v43, %v1737_v5  ;;  %v1740_v39 = vld [vmem:[#allocation2 + $0x19a] sm:$0xff]  ;;  %v1741_v8 = vld [vmem:[#allocation2 + $0x1a2] sm:$0xff] }
 0x1fd   : > { %v1848_v0 = vadd.f32 %v4573_v51, %v1809_v34  ;;  %v1083_v36 = vadd.f32 %v1051_v40, %v947_v16  ;;  %v1497_v53 = vadd.f32 %v1465_v20, %v1393_v57  ;;  %v1572_v54 = vmul.f32 %v4518_v25, %v1532_v14 }
 0x1fe   : > { %v1498_v10 = vadd.f32 %v1466_v50, %v1394_v22  ;;  %v1084_v32 = vadd.f32 %v1052_v19, %v948_v38  ;;  %v1530_v13 = vld [vmem:[#allocation2 + $0x180] sm:$0xff]  ;;  %v1573_v27 = vmul.f32 %v4518_v25, %v1533_v4  ;;  %v1676_v44 = vmul.f32 %v4521_v58, %v1636_v48 }
 0x1ff   : > { %v1866_v55 = vpack.c.bf16 %v1848_v0, %v1847_v7  ;;  %v1531_v1 = vld [vmem:[#allocation2 + $0x188] sm:$0xff]  ;;  %v1187_v63 = vadd.f32 %v1155_v60, %v1083_v36  ;;  %v1570_v52 = vmul.f32 %v4518_v25, %v1530_v13  ;;  %v1259_v11 = vmul.f32 %v4493_v30, %v1530_v13 }
 0x200   : > { %v1634_v59 = vld [vmem:[#allocation2 + $0x181] sm:$0xff]  ;;  %v1571_v42 = vmul.f32 %v4518_v25, %v1531_v1  ;;  %v1635_v28 = vld [vmem:[#allocation2 + $0x189] sm:$0xff]  ;;  %v1188_v3 = vadd.f32 %v1156_v17, %v1084_v32  ;;  %v1260_v33 = vmul.f32 %v4493_v30, %v1531_v1  ;;  %v1677_v50 = vmul.f32 %v4521_v58, %v1637_v21 }
 0x201   : > { %v1674_v15 = vmul.f32 %v4521_v58, %v1634_v59  ;;  %v1738_v31 = vld [vmem:[#allocation2 + $0x182] sm:$0xff]  ;;  %v1739_v43 = vld [vmem:[#allocation2 + $0x18a] sm:$0xff]  ;;  %2980 = vmatmul.mubr.msk.bf16.gmra.mrb[8].mxu1 %vm789_vm0, %v1866_v55  ;;  %v1675_v26 = vmul.f32 %v4521_v58, %v1635_v28  ;;  %v1602_v29 = vadd.f32 %v1570_v52, %v1497_v53  ;;  %v1363_v37 = vmul.f32 %v4534_v49, %v1634_v59 }
 0x202   : > { %v1778_v24 = vmul.f32 %v4526_v2, %v1738_v31  ;;  %v1779_v45 = vmul.f32 %v4526_v2, %v1739_v43  ;;  %v1603_v35 = vadd.f32 %v1571_v42, %v1498_v10  ;;  %v1291_v61 = vadd.f32 %v1259_v11, %v1187_v63  ;;  %v4695_v58 = vld [vmem:[#allocation15] ss:$0 sm:$0xff] }
 0x203   : > { %v1364_v5 = vmul.f32 %v4534_v49, %v1635_v28  ;;  %v1467_v46 = vmul.f32 %v4500_v41, %v1738_v31  ;;  %v1706_v56 = vadd.f32 %v1674_v15, %v1602_v29  ;;  %v1292_v9 = vadd.f32 %v1260_v33, %v1188_v3 }
 0x204   : > { %v1707_v18 = vadd.f32 %v1675_v26, %v1603_v35  ;;  %v1468_v47 = vmul.f32 %v4500_v41, %v1739_v43  ;;  %v1395_v12 = vadd.f32 %v1363_v37, %v1291_v61  ;;  %v1780_v38 = vmul.f32 %v4526_v2, %v1740_v39 }
 0x205   : > { %v1810_v30 = vadd.f32 %v1778_v24, %v1706_v56  ;;  %v1396_v62 = vadd.f32 %v1364_v5, %v1292_v9  ;;  %v1781_v57 = vmul.f32 %v4526_v2, %v1741_v8  ;;  %v4698_v2 = vld [vmem:[#allocation17] ss:$0 sm:$0xff] }
 0x206   : > { %v1811_v23 = vadd.f32 %v1779_v45, %v1707_v18  ;;  %v1499_v49 = vadd.f32 %v1467_v46, %v1395_v12 }
 0x207   : > { %v1849_v20 = vadd.f32 %v4573_v51, %v1810_v30  ;;  %v1500_v41 = vadd.f32 %v1468_v47, %v1396_v62 }
 0x208   : > { %v1850_v6 = vadd.f32 %v4573_v51, %v1811_v23  ;;  %v1604_v16 = vadd.f32 %v1572_v54, %v1499_v49 }
 0x209   : > { %v1605_v7 = vadd.f32 %v1573_v27, %v1500_v41 }
 0x20a   : > { %v1867_v34 = vpack.c.bf16 %v1850_v6, %v1849_v20  ;;  %v1708_v25 = vadd.f32 %v1676_v44, %v1604_v16 }
 0x20b   : > { %v1709_v40 = vadd.f32 %v1677_v50, %v1605_v7 }
 0x20c   : > { %2983 = vmatprep.mubr.msk.bf16.mxu1 %vm789_vm0, %v1867_v34  ;;  %v1812_v22 = vadd.f32 %v1780_v38, %v1708_v25 }
 0x20d   : > { %v1813_v19 = vadd.f32 %v1781_v57, %v1709_v40 }
 0x20e   : > { %v1851_v60 = vadd.f32 %v4573_v51, %v1812_v22 }
 0x20f   : > { %v1852_v17 = vadd.f32 %v4573_v51, %v1813_v19 }
 0x211   : > { %v1868_v0 = vpack.c.bf16 %v1852_v17, %v1851_v60 }
 0x213   : > { %2984 = vmatmul.mubr.msk.bf16.gmra.mrb[12].mxu1 %vm789_vm0, %v1868_v0 }
 0x24b   : > { %v2957_v36 = vpop.f32.mrb[0].mxu0 }
 0x24c   : > { %v1972_v53 = vadd.f32 %v2957_v36, %v4695_v58  ;;  %v1963_v10 = vpop.f32.mrb[1].mxu0 }
 0x24d   : > { %v1964_v32 = vadd.f32 %v4695_v58, %v1963_v10  ;;  %v2958_v55 = vpop.f32.mrb[2].mxu0 }
 0x24e   : > { %v2826_v13 = vpack.c.bf16 %v1972_v53, %v1972_v53  ;;  %v1975_v1 = vadd.f32 %v2958_v55, %v4695_v58  ;;  %v1966_v51 = vpop.f32.mrb[3].mxu0  ;;  %v2260_v59 = vsub.f32 %v1972_v53, %v4698_v2 }
 0x24f   : > { %v2824_v63 = vpack.c.bf16 %v1964_v32, %v1964_v32  ;;  %v2258_v52 = vsub.f32 %v1964_v32, %v4698_v2  ;;  %v1967_v42 = vadd.f32 %v4695_v58, %v1966_v51 }
 0x250   : > { %2221 = vst.msk [vmem:[%s4707_s26 + $0x8] sm:$0xf] %vm2218_vm3, %v2826_v13  ;;  %v2827_v28 = vpack.c.bf16 %v1975_v1, %v1975_v1  ;;  %v2261_v31 = vsub.f32 %v1975_v1, %v4698_v2  ;;  %v2363_v26 = vmul.f32 %v2260_v59, %v2260_v59  ;;  %v2293_v35 = vsel %vm789_vm0, %v2260_v59, 0.0 }
 0x251   : > { %2219 = vst.msk [vmem:[%s4707_s26] sm:$0xf] %vm2218_vm3, %v2824_v63  ;;  %v2361_v15 = vmul.f32 %v2258_v52, %v2258_v52  ;;  %v2825_v43 = vpack.c.bf16 %v1967_v42, %v1967_v42  ;;  %v2259_v3 = vsub.f32 %v1967_v42, %v4698_v2  ;;  %v2290_v24 = vsel %vm789_vm0, %v2258_v52, 0.0 }
 0x252   : > { %2222 = vst.msk [vmem:[%s4707_s26 + $0xc] sm:$0xf] %vm2218_vm3, %v2827_v28  ;;  %v2364_v37 = vmul.f32 %v2261_v31, %v2261_v31  ;;  %v2396_v46 = vsel %vm789_vm0, %v2363_v26, 0.0  ;;  %v2295_v4 = vsel %vm789_vm0, %v2261_v31, 0.0 }
 0x253   : > { %2220 = vst.msk [vmem:[%s4707_s26 + $0x4] sm:$0xf] %vm2218_vm3, %v2825_v43  ;;  %v2291_v45 = vsel %vm789_vm0, %v2259_v3, 0.0  ;;  %v2362_v11 = vmul.f32 %v2259_v3, %v2259_v3  ;;  %v2393_v33 = vsel %vm789_vm0, %v2361_v15, 0.0 }
 0x254   : > { %v2292_v29 = vadd.f32 %v2291_v45, %v2290_v24  ;;  %v2398_v9 = vsel %vm789_vm0, %v2364_v37, 0.0 }
 0x255   : > { %v2394_v14 = vsel %vm789_vm0, %v2362_v11, 0.0 }
 0x256   : > { %v2294_v61 = vadd.f32 %v2293_v35, %v2292_v29  ;;  %v2395_v5 = vadd.f32 %v2394_v14, %v2393_v33 }
 0x258   : > { %v2397_v56 = vadd.f32 %v2396_v46, %v2395_v5  ;;  %v2296_v18 = vadd.f32 %v2295_v4, %v2294_v61 }
 0x25a   : > { %v2399_v47 = vadd.f32 %v2398_v9, %v2397_v56 }
 0x25f   : > { %v2961_v48 = vpop.f32.mrb[4].mxu0 }
 0x260   : > { %v1988_v12 = vadd.f32 %v2961_v48, %v4695_v58  ;;  %v1979_v54 = vpop.f32.mrb[5].mxu0 }
 0x261   : > { %v1980_v21 = vadd.f32 %v4695_v58, %v1979_v54  ;;  %v2962_v30 = vpop.f32.mrb[6].mxu0 }
 0x262   : > { %v2830_v23 = vpack.c.bf16 %v1988_v12, %v1988_v12  ;;  %v1991_v62 = vadd.f32 %v2962_v30, %v4695_v58  ;;  %v1982_v27 = vpop.f32.mrb[7].mxu0  ;;  %v2264_v39 = vsub.f32 %v1988_v12, %v4698_v2 }
 0x263   : > { %v2828_v49 = vpack.c.bf16 %v1980_v21, %v1980_v21  ;;  %v2262_v44 = vsub.f32 %v1980_v21, %v4698_v2  ;;  %v1983_v8 = vadd.f32 %v4695_v58, %v1982_v27 }
 0x264   : > { %2225 = vst.msk [vmem:[%s4707_s26 + $0x18] sm:$0xf] %vm2218_vm3, %v2830_v23  ;;  %v2831_v20 = vpack.c.bf16 %v1991_v62, %v1991_v62  ;;  %v2265_v6 = vsub.f32 %v1991_v62, %v4698_v2  ;;  %v2367_v7 = vmul.f32 %v2264_v39, %v2264_v39  ;;  %v2301_v60 = vsel %vm789_vm0, %v2264_v39, 0.0 }
 0x265   : > { %2223 = vst.msk [vmem:[%s4707_s26 + $0x10] sm:$0xf] %vm2218_vm3, %v2828_v49  ;;  %v2297_v41 = vsel %vm789_vm0, %v2262_v44, 0.0  ;;  %v2365_v50 = vmul.f32 %v2262_v44, %v2262_v44  ;;  %v2829_v16 = vpack.c.bf16 %v1983_v8, %v1983_v8  ;;  %v2263_v38 = vsub.f32 %v1983_v8, %v4698_v2 }
 0x266   : > { %v2298_v34 = vadd.f32 %v2297_v41, %v2296_v18  ;;  %2226 = vst.msk [vmem:[%s4707_s26 + $0x1c] sm:$0xf] %vm2218_vm3, %v2831_v20  ;;  %v2368_v17 = vmul.f32 %v2265_v6, %v2265_v6  ;;  %v2404_v10 = vsel %vm789_vm0, %v2367_v7, 0.0  ;;  %v2303_v32 = vsel %vm789_vm0, %v2265_v6, 0.0 }
 0x267   : > { %v2400_v57 = vsel %vm789_vm0, %v2365_v50, 0.0  ;;  %2224 = vst.msk [vmem:[%s4707_s26 + $0x14] sm:$0xf] %vm2218_vm3, %v2829_v16  ;;  %v2299_v25 = vsel %vm789_vm0, %v2263_v38, 0.0  ;;  %v2366_v40 = vmul.f32 %v2263_v38, %v2263_v38 }
 0x268   : > { %v2401_v22 = vadd.f32 %v2400_v57, %v2399_v47  ;;  %v2300_v19 = vadd.f32 %v2299_v25, %v2298_v34  ;;  %v2406_v1 = vsel %vm789_vm0, %v2368_v17, 0.0 }
 0x269   : > { %v2402_v0 = vsel %vm789_vm0, %v2366_v40, 0.0 }
 0x26a   : > { %v2302_v36 = vadd.f32 %v2301_v60, %v2300_v19  ;;  %v2403_v53 = vadd.f32 %v2402_v0, %v2401_v22 }
 0x26c   : > { %v2405_v55 = vadd.f32 %v2404_v10, %v2403_v53  ;;  %v2304_v13 = vadd.f32 %v2303_v32, %v2302_v36 }
 0x26e   : > { %v2407_v51 = vadd.f32 %v2406_v1, %v2405_v55 }
 0x276   : > { %v2965_v59 = vpop.f32.mrb[8].mxu0 }
 0x277   : > { %v2004_v63 = vadd.f32 %v2965_v59, %v4695_v58  ;;  %v1995_v52 = vpop.f32.mrb[9].mxu0 }
 0x278   : > { %v1996_v42 = vadd.f32 %v4695_v58, %v1995_v52  ;;  %v2966_v28 = vpop.f32.mrb[10].mxu0 }
 0x279   : > { %v2834_v15 = vpack.c.bf16 %v2004_v63, %v2004_v63  ;;  %v2007_v31 = vadd.f32 %v2966_v28, %v4695_v58  ;;  %v1998_v43 = vpop.f32.mrb[11].mxu0  ;;  %v2268_v3 = vsub.f32 %v2004_v63, %v4698_v2 }
 0x27a   : > { %v2832_v26 = vpack.c.bf16 %v1996_v42, %v1996_v42  ;;  %v2266_v24 = vsub.f32 %v1996_v42, %v4698_v2  ;;  %v1999_v45 = vadd.f32 %v4695_v58, %v1998_v43 }
 0x27b   : > { %2229 = vst.msk [vmem:[%s4707_s26 + $0x28] sm:$0xf] %vm2218_vm3, %v2834_v15  ;;  %v2835_v11 = vpack.c.bf16 %v2007_v31, %v2007_v31  ;;  %v2269_v29 = vsub.f32 %v2007_v31, %v4698_v2  ;;  %v2371_v5 = vmul.f32 %v2268_v3, %v2268_v3  ;;  %v2309_v47 = vsel %vm789_vm0, %v2268_v3, 0.0 }
 0x27c   : > { %2227 = vst.msk [vmem:[%s4707_s26 + $0x20] sm:$0xf] %vm2218_vm3, %v2832_v26  ;;  %v2305_v35 = vsel %vm789_vm0, %v2266_v24, 0.0  ;;  %v2369_v33 = vmul.f32 %v2266_v24, %v2266_v24  ;;  %v2833_v37 = vpack.c.bf16 %v1999_v45, %v1999_v45  ;;  %v2267_v14 = vsub.f32 %v1999_v45, %v4698_v2 }
 0x27d   : > { %v2306_v61 = vadd.f32 %v2305_v35, %v2304_v13  ;;  %2230 = vst.msk [vmem:[%s4707_s26 + $0x2c] sm:$0xf] %vm2218_vm3, %v2835_v11  ;;  %v2372_v48 = vmul.f32 %v2269_v29, %v2269_v29  ;;  %v2412_v30 = vsel %vm789_vm0, %v2371_v5, 0.0  ;;  %v2311_v23 = vsel %vm789_vm0, %v2269_v29, 0.0 }
 0x27e   : > { %v2408_v46 = vsel %vm789_vm0, %v2369_v33, 0.0  ;;  %2228 = vst.msk [vmem:[%s4707_s26 + $0x24] sm:$0xf] %vm2218_vm3, %v2833_v37  ;;  %v2307_v4 = vsel %vm789_vm0, %v2267_v14, 0.0  ;;  %v2370_v56 = vmul.f32 %v2267_v14, %v2267_v14 }
 0x27f   : > { %v2409_v18 = vadd.f32 %v2408_v46, %v2407_v51  ;;  %v2308_v9 = vadd.f32 %v2307_v4, %v2306_v61  ;;  %v2414_v39 = vsel %vm789_vm0, %v2372_v48, 0.0 }
 0x280   : > { %v2410_v12 = vsel %vm789_vm0, %v2370_v56, 0.0 }
 0x281   : > { %v2310_v54 = vadd.f32 %v2309_v47, %v2308_v9  ;;  %v2411_v21 = vadd.f32 %v2410_v12, %v2409_v18 }
 0x283   : > { %v2413_v62 = vadd.f32 %v2412_v30, %v2411_v21  ;;  %v2312_v27 = vadd.f32 %v2311_v23, %v2310_v54 }
 0x285   : > { %v2415_v49 = vadd.f32 %v2414_v39, %v2413_v62 }
 0x28c   : > { %v2969_v44 = vpop.f32.mrb[12].mxu0 }
 0x28d   : > { %v2020_v8 = vadd.f32 %v2969_v44, %v4695_v58  ;;  %v2011_v20 = vpop.f32.mrb[13].mxu0 }
 0x28e   : > { %v2012_v6 = vadd.f32 %v4695_v58, %v2011_v20  ;;  %v2970_v41 = vpop.f32.mrb[14].mxu0 }
 0x28f   : > { %v2838_v50 = vpack.c.bf16 %v2020_v8, %v2020_v8  ;;  %v2023_v16 = vadd.f32 %v2970_v41, %v4695_v58  ;;  %v2014_v38 = vpop.f32.mrb[15].mxu0  ;;  %v2272_v34 = vsub.f32 %v2020_v8, %v4698_v2 }
 0x290   : > { %v2836_v7 = vpack.c.bf16 %v2012_v6, %v2012_v6  ;;  %v2270_v57 = vsub.f32 %v2012_v6, %v4698_v2  ;;  %v2015_v25 = vadd.f32 %v4695_v58, %v2014_v38 }
 0x291   : > { %2233 = vst.msk [vmem:[%s4707_s26 + $0x38] sm:$0xf] %vm2218_vm3, %v2838_v50  ;;  %v2839_v40 = vpack.c.bf16 %v2023_v16, %v2023_v16  ;;  %v2273_v22 = vsub.f32 %v2023_v16, %v4698_v2  ;;  %v2375_v53 = vmul.f32 %v2272_v34, %v2272_v34  ;;  %v2317_v51 = vsel %vm789_vm0, %v2272_v34, 0.0 }
 0x292   : > { %2231 = vst.msk [vmem:[%s4707_s26 + $0x30] sm:$0xf] %vm2218_vm3, %v2836_v7  ;;  %v2313_v19 = vsel %vm789_vm0, %v2270_v57, 0.0  ;;  %v2373_v60 = vmul.f32 %v2270_v57, %v2270_v57  ;;  %v2837_v17 = vpack.c.bf16 %v2015_v25, %v2015_v25  ;;  %v2271_v0 = vsub.f32 %v2015_v25, %v4698_v2 }
 0x293   : > { %v2314_v36 = vadd.f32 %v2313_v19, %v2312_v27  ;;  %2234 = vst.msk [vmem:[%s4707_s26 + $0x3c] sm:$0xf] %vm2218_vm3, %v2839_v40  ;;  %v2376_v59 = vmul.f32 %v2273_v22, %v2273_v22  ;;  %v2420_v28 = vsel %vm789_vm0, %v2375_v53, 0.0  ;;  %v2319_v15 = vsel %vm789_vm0, %v2273_v22, 0.0 }
 0x294   : > { %v2416_v10 = vsel %vm789_vm0, %v2373_v60, 0.0  ;;  %2232 = vst.msk [vmem:[%s4707_s26 + $0x34] sm:$0xf] %vm2218_vm3, %v2837_v17  ;;  %v2315_v32 = vsel %vm789_vm0, %v2271_v0, 0.0  ;;  %v2374_v55 = vmul.f32 %v2271_v0, %v2271_v0 }
 0x295   : > { %v2417_v13 = vadd.f32 %v2416_v10, %v2415_v49  ;;  %v2316_v1 = vadd.f32 %v2315_v32, %v2314_v36  ;;  %v2422_v3 = vsel %vm789_vm0, %v2376_v59, 0.0 }
 0x296   : > { %v2418_v63 = vsel %vm789_vm0, %v2374_v55, 0.0 }
 0x297   : > { %v2318_v52 = vadd.f32 %v2317_v51, %v2316_v1  ;;  %v2419_v42 = vadd.f32 %v2418_v63, %v2417_v13 }
 0x299   : > { %v2421_v31 = vadd.f32 %v2420_v28, %v2419_v42  ;;  %v2320_v43 = vadd.f32 %v2319_v15, %v2318_v52 }
 0x29b   : > { %v2423_v26 = vadd.f32 %v2422_v3, %v2421_v31 }
 0x2a6   : > { %v2973_v24 = vpop.f32.mrb[0].mxu1 }
 0x2a7   : > { %v2036_v45 = vadd.f32 %v2973_v24, %v4695_v58  ;;  %v2027_v11 = vpop.f32.mrb[1].mxu1 }
 0x2a8   : > { %v2028_v29 = vadd.f32 %v4695_v58, %v2027_v11  ;;  %v2974_v35 = vpop.f32.mrb[2].mxu1 }
 0x2a9   : > { %v2842_v33 = vpack.c.bf16 %v2036_v45, %v2036_v45  ;;  %v2039_v37 = vadd.f32 %v2974_v35, %v4695_v58  ;;  %v2030_v14 = vpop.f32.mrb[3].mxu1  ;;  %v2276_v61 = vsub.f32 %v2036_v45, %v4698_v2 }
 0x2aa   : > { %v2840_v5 = vpack.c.bf16 %v2028_v29, %v2028_v29  ;;  %v2274_v46 = vsub.f32 %v2028_v29, %v4698_v2  ;;  %v2031_v4 = vadd.f32 %v4695_v58, %v2030_v14 }
 0x2ab   : > { %2237 = vst.msk [vmem:[%s4707_s26 + $0x48] sm:$0xf] %vm2218_vm3, %v2842_v33  ;;  %v2843_v56 = vpack.c.bf16 %v2039_v37, %v2039_v37  ;;  %v2277_v18 = vsub.f32 %v2039_v37, %v4698_v2  ;;  %v2379_v21 = vmul.f32 %v2276_v61, %v2276_v61  ;;  %v2325_v49 = vsel %vm789_vm0, %v2276_v61, 0.0 }
 0x2ac   : > { %2235 = vst.msk [vmem:[%s4707_s26 + $0x40] sm:$0xf] %vm2218_vm3, %v2840_v5  ;;  %v2321_v9 = vsel %vm789_vm0, %v2274_v46, 0.0  ;;  %v2377_v47 = vmul.f32 %v2274_v46, %v2274_v46  ;;  %v2841_v48 = vpack.c.bf16 %v2031_v4, %v2031_v4  ;;  %v2275_v12 = vsub.f32 %v2031_v4, %v4698_v2 }
 0x2ad   : > { %v2322_v54 = vadd.f32 %v2321_v9, %v2320_v43  ;;  %2238 = vst.msk [vmem:[%s4707_s26 + $0x4c] sm:$0xf] %vm2218_vm3, %v2843_v56  ;;  %v2380_v44 = vmul.f32 %v2277_v18, %v2277_v18  ;;  %v2428_v41 = vsel %vm789_vm0, %v2379_v21, 0.0  ;;  %v2327_v50 = vsel %vm789_vm0, %v2277_v18, 0.0 }
 0x2ae   : > { %v2424_v30 = vsel %vm789_vm0, %v2377_v47, 0.0  ;;  %2236 = vst.msk [vmem:[%s4707_s26 + $0x44] sm:$0xf] %vm2218_vm3, %v2841_v48  ;;  %v2323_v23 = vsel %vm789_vm0, %v2275_v12, 0.0  ;;  %v2378_v62 = vmul.f32 %v2275_v12, %v2275_v12 }
 0x2af   : > { %v2425_v27 = vadd.f32 %v2424_v30, %v2423_v26  ;;  %v2324_v39 = vadd.f32 %v2323_v23, %v2322_v54  ;;  %v2430_v34 = vsel %vm789_vm0, %v2380_v44, 0.0 }
 0x2b0   : > { %v2426_v8 = vsel %vm789_vm0, %v2378_v62, 0.0 }
 0x2b1   : > { %v2326_v20 = vadd.f32 %v2325_v49, %v2324_v39  ;;  %v2427_v6 = vadd.f32 %v2426_v8, %v2425_v27 }
 0x2b3   : > { %v2429_v16 = vadd.f32 %v2428_v41, %v2427_v6  ;;  %v2328_v38 = vadd.f32 %v2327_v50, %v2326_v20 }
 0x2b5   : > { %v2431_v7 = vadd.f32 %v2430_v34, %v2429_v16 }
 0x2bc   : > { %v2977_v57 = vpop.f32.mrb[4].mxu1 }
 0x2bd   : > { %v2052_v25 = vadd.f32 %v2977_v57, %v4695_v58  ;;  %v2043_v40 = vpop.f32.mrb[5].mxu1 }
 0x2be   : > { %v2044_v22 = vadd.f32 %v4695_v58, %v2043_v40  ;;  %v2978_v19 = vpop.f32.mrb[6].mxu1 }
 0x2bf   : > { %v2846_v60 = vpack.c.bf16 %v2052_v25, %v2052_v25  ;;  %v2055_v17 = vadd.f32 %v2978_v19, %v4695_v58  ;;  %v2046_v0 = vpop.f32.mrb[7].mxu1  ;;  %v2280_v36 = vsub.f32 %v2052_v25, %v4698_v2 }
 0x2c0   : > { %v2844_v53 = vpack.c.bf16 %v2044_v22, %v2044_v22  ;;  %v2278_v10 = vsub.f32 %v2044_v22, %v4698_v2  ;;  %v2047_v32 = vadd.f32 %v4695_v58, %v2046_v0 }
 0x2c1   : > { %2241 = vst.msk [vmem:[%s4707_s26 + $0x58] sm:$0xf] %vm2218_vm3, %v2846_v60  ;;  %v2847_v55 = vpack.c.bf16 %v2055_v17, %v2055_v17  ;;  %v2281_v13 = vsub.f32 %v2055_v17, %v4698_v2  ;;  %v2383_v42 = vmul.f32 %v2280_v36, %v2280_v36  ;;  %v2333_v26 = vsel %vm789_vm0, %v2280_v36, 0.0 }
 0x2c2   : > { %2239 = vst.msk [vmem:[%s4707_s26 + $0x50] sm:$0xf] %vm2218_vm3, %v2844_v53  ;;  %v2329_v1 = vsel %vm789_vm0, %v2278_v10, 0.0  ;;  %v2381_v51 = vmul.f32 %v2278_v10, %v2278_v10  ;;  %v2845_v59 = vpack.c.bf16 %v2047_v32, %v2047_v32  ;;  %v2279_v63 = vsub.f32 %v2047_v32, %v4698_v2 }
 0x2c3   : > { %v2330_v52 = vadd.f32 %v2329_v1, %v2328_v38  ;;  %2242 = vst.msk [vmem:[%s4707_s26 + $0x5c] sm:$0xf] %vm2218_vm3, %v2847_v55  ;;  %v2384_v24 = vmul.f32 %v2281_v13, %v2281_v13  ;;  %v2436_v35 = vsel %vm789_vm0, %v2383_v42, 0.0  ;;  %v2335_v33 = vsel %vm789_vm0, %v2281_v13, 0.0 }
 0x2c4   : > { %v2432_v28 = vsel %vm789_vm0, %v2381_v51, 0.0  ;;  %2240 = vst.msk [vmem:[%s4707_s26 + $0x54] sm:$0xf] %vm2218_vm3, %v2845_v59  ;;  %v2331_v15 = vsel %vm789_vm0, %v2279_v63, 0.0  ;;  %v2382_v31 = vmul.f32 %v2279_v63, %v2279_v63 }
 0x2c5   : > { %v2433_v43 = vadd.f32 %v2432_v28, %v2431_v7  ;;  %v2332_v3 = vadd.f32 %v2331_v15, %v2330_v52  ;;  %v2438_v61 = vsel %vm789_vm0, %v2384_v24, 0.0 }
 0x2c6   : > { %v2434_v45 = vsel %vm789_vm0, %v2382_v31, 0.0 }
 0x2c7   : > { %v2334_v11 = vadd.f32 %v2333_v26, %v2332_v3  ;;  %v2435_v29 = vadd.f32 %v2434_v45, %v2433_v43 }
 0x2c9   : > { %v2437_v37 = vadd.f32 %v2436_v35, %v2435_v29  ;;  %v2336_v14 = vadd.f32 %v2335_v33, %v2334_v11 }
 0x2cb   : > { %v2439_v5 = vadd.f32 %v2438_v61, %v2437_v37 }
 0x2d4   : > { %v2981_v46 = vpop.f32.mrb[8].mxu1 }
 0x2d5   : > { %v2068_v4 = vadd.f32 %v2981_v46, %v4695_v58  ;;  %v2059_v56 = vpop.f32.mrb[9].mxu1 }
 0x2d6   : > { %v2060_v18 = vadd.f32 %v4695_v58, %v2059_v56  ;;  %v2982_v9 = vpop.f32.mrb[10].mxu1 }
 0x2d7   : > { %v2850_v47 = vpack.c.bf16 %v2068_v4, %v2068_v4  ;;  %v2071_v48 = vadd.f32 %v2982_v9, %v4695_v58  ;;  %v2062_v12 = vpop.f32.mrb[11].mxu1  ;;  %v2284_v54 = vsub.f32 %v2068_v4, %v4698_v2 }
 0x2d8   : > { %v2848_v21 = vpack.c.bf16 %v2060_v18, %v2060_v18  ;;  %v2282_v30 = vsub.f32 %v2060_v18, %v4698_v2  ;;  %v2063_v23 = vadd.f32 %v4695_v58, %v2062_v12 }
 0x2d9   : > { %2245 = vst.msk [vmem:[%s4707_s26 + $0x68] sm:$0xf] %vm2218_vm3, %v2850_v47  ;;  %v2851_v62 = vpack.c.bf16 %v2071_v48, %v2071_v48  ;;  %v2285_v27 = vsub.f32 %v2071_v48, %v4698_v2  ;;  %v2387_v6 = vmul.f32 %v2284_v54, %v2284_v54  ;;  %v2341_v7 = vsel %vm789_vm0, %v2284_v54, 0.0 }
 0x2da   : > { %2243 = vst.msk [vmem:[%s4707_s26 + $0x60] sm:$0xf] %vm2218_vm3, %v2848_v21  ;;  %v2337_v39 = vsel %vm789_vm0, %v2282_v30, 0.0  ;;  %v2385_v49 = vmul.f32 %v2282_v30, %v2282_v30  ;;  %v2849_v44 = vpack.c.bf16 %v2063_v23, %v2063_v23  ;;  %v2283_v8 = vsub.f32 %v2063_v23, %v4698_v2 }
 0x2db   : > { %v2338_v20 = vadd.f32 %v2337_v39, %v2336_v14  ;;  %2246 = vst.msk [vmem:[%s4707_s26 + $0x6c] sm:$0xf] %vm2218_vm3, %v2851_v62  ;;  %v2388_v57 = vmul.f32 %v2285_v27, %v2285_v27  ;;  %v2444_v19 = vsel %vm789_vm0, %v2387_v6, 0.0  ;;  %v2343_v60 = vsel %vm789_vm0, %v2285_v27, 0.0 }
 0x2dc   : > { %v2440_v41 = vsel %vm789_vm0, %v2385_v49, 0.0  ;;  %2244 = vst.msk [vmem:[%s4707_s26 + $0x64] sm:$0xf] %vm2218_vm3, %v2849_v44  ;;  %v2339_v50 = vsel %vm789_vm0, %v2283_v8, 0.0  ;;  %v2386_v16 = vmul.f32 %v2283_v8, %v2283_v8 }
 0x2dd   : > { %v2441_v38 = vadd.f32 %v2440_v41, %v2439_v5  ;;  %v2340_v34 = vadd.f32 %v2339_v50, %v2338_v20  ;;  %v2446_v36 = vsel %vm789_vm0, %v2388_v57, 0.0 }
 0x2de   : > { %v2442_v25 = vsel %vm789_vm0, %v2386_v16, 0.0 }
 0x2df   : > { %v2342_v40 = vadd.f32 %v2341_v7, %v2340_v34  ;;  %v2443_v22 = vadd.f32 %v2442_v25, %v2441_v38 }
 0x2e1   : > { %v2445_v17 = vadd.f32 %v2444_v19, %v2443_v22  ;;  %v2344_v0 = vadd.f32 %v2343_v60, %v2342_v40 }
 0x2e3   : > { %v2447_v53 = vadd.f32 %v2446_v36, %v2445_v17 }
 0x2e6   : > { %v2985_v10 = vpop.f32.mrb[12].mxu1 }
 0x2e7   : > { %v2084_v32 = vadd.f32 %v2985_v10, %v4695_v58  ;;  %v2075_v55 = vpop.f32.mrb[13].mxu1 }
 0x2e8   : > { %v2076_v13 = vadd.f32 %v4695_v58, %v2075_v55  ;;  %v2986_v1 = vpop.f32.mrb[14].mxu1 }
 0x2e9   : > { %v2854_v51 = vpack.c.bf16 %v2084_v32, %v2084_v32  ;;  %v2087_v59 = vadd.f32 %v2986_v1, %v4695_v58  ;;  %v2078_v63 = vpop.f32.mrb[15].mxu1  ;;  %v2288_v52 = vsub.f32 %v2084_v32, %v4698_v2 }
 0x2ea   : > { %v2852_v42 = vpack.c.bf16 %v2076_v13, %v2076_v13  ;;  %v2286_v28 = vsub.f32 %v2076_v13, %v4698_v2  ;;  %v2079_v15 = vadd.f32 %v4695_v58, %v2078_v63 }
 0x2eb   : > { %2249 = vst.msk [vmem:[%s4707_s26 + $0x78] sm:$0xf] %vm2218_vm3, %v2854_v51  ;;  %v2855_v31 = vpack.c.bf16 %v2087_v59, %v2087_v59  ;;  %v2289_v43 = vsub.f32 %v2087_v59, %v4698_v2  ;;  %v2391_v11 = vmul.f32 %v2288_v52, %v2288_v52 }
 0x2ec   : > { %2247 = vst.msk [vmem:[%s4707_s26 + $0x70] sm:$0xf] %vm2218_vm3, %v2852_v42  ;;  %v2345_v3 = vsel %vm789_vm0, %v2286_v28, 0.0  ;;  %v2389_v58 = vmul.f32 %v2286_v28, %v2286_v28  ;;  %v2853_v26 = vpack.c.bf16 %v2079_v15, %v2079_v15  ;;  %v2287_v24 = vsub.f32 %v2079_v15, %v4698_v2 }
 0x2ed   : > { %v2346_v45 = vadd.f32 %v2345_v3, %v2344_v0  ;;  %2250 = vst.msk [vmem:[%s4707_s26 + $0x7c] sm:$0xf] %vm2218_vm3, %v2855_v31 }
 0x2ee   : > { %v2448_v29 = vsel %vm789_vm0, %v2389_v58, 0.0  ;;  %2248 = vst.msk [vmem:[%s4707_s26 + $0x74] sm:$0xf] %vm2218_vm3, %v2853_v26  ;;  %v2347_v35 = vsel %vm789_vm0, %v2287_v24, 0.0  ;;  %v2390_v33 = vmul.f32 %v2287_v24, %v2287_v24 }
 0x2ef   : > { %v2449_v37 = vadd.f32 %v2448_v29, %v2447_v53  ;;  %v2348_v14 = vadd.f32 %v2347_v35, %v2346_v45 }
 0x2f0   : > { %3413 = shalt.err (!%p3410_p0)
}
 0x2f1   : > { %s3414_s27 = scalar_lea.hbm %s4885_s21, 2048  ;;  %s3418_s7 = scalar_lea.hbm %s5028_s9, 4096 }
 0x2f2   : > { %p3415_p4 = scmp.ne.s32.totalorder %s4885_s21, %s3414_s27  ;;  %p3419_p3 = scmp.lt.u32.totalorder %s4885_s21, %s5028_s9 }
 0x2f3   : > { %p3420_p2 = scmp.lt.u32.totalorder %s3418_s7, %s3414_s27  ;;  %p3422_p7 = scmp.lt.u32.totalorder %s3414_s27, %s4885_s21 }
 0x2f4   : > { %p3416_p13 = pnand %p3415_p4, %p5073_p11 }
 0x2f5   : > { %p3421_p6 = por %p3420_p2, %p3419_p3 }
 0x2f6   : > { %p3417_p1 = pneg %p3416_p13 }
 0x2f7   : > { %p3423_p5 = por %p3422_p7, %p3421_p6 }
 0x2f9   : > { %p3424_p9 = pnand %p3423_p5, %p3417_p1 }
 0x2fb   : > { %3427 = shalt.err (!%p3424_p9)
}
 0x2fc   : > { %s3565_s26 = smov 64   ;;  %s3566_s28 = smov 4   ;;  %v2349_v2 = vsel %vm789_vm0, %v2288_v52, 0.0  ;;  %v2392_v61 = vmul.f32 %v2289_v43, %v2289_v43  ;;  %v2450_v5 = vsel %vm789_vm0, %v2390_v33, 0.0  ;;  %v2452_v56 = vsel %vm789_vm0, %v2391_v11, 0.0 }
 0x2fd   : > { %3023 = dma.vmem_to_hbm [thread:$0]  (%p5073_p11), %s4887_s4, 2048, %s4885_s21, %s2464_s2, %s3565_s26, %s3565_s26, %s3566_s28   ;;  %v2350_v46 = vadd.f32 %v2349_v2, %v2348_v14  ;;  %v2451_v4 = vadd.f32 %v2450_v5, %v2449_v37  ;;  %v2351_v18 = vsel %vm789_vm0, %v2289_v43, 0.0  ;;  %vm2359_vm4 = vcmask 24576  }
 0x2fe   : > { %v2454_v48 = vsel %vm789_vm0, %v2392_v61, 0.0  ;;  %s2818_s4 = sshll.u32 %s3650_s23, 4  ;;  %s543_s5 = scalar_lea.vmem [#allocation19], %s3940_s29 }
 0x2ff   : > { %v2352_v9 = vadd.f32 %v2351_v18, %v2350_v46  ;;  %v2453_v47 = vadd.f32 %v2452_v56, %v2451_v4  ;;  %s2501_s25 = sshll.u32 %s543_s5, 4  ;;  %s549_s21 = scalar_lea.vmem [#allocation21], %s3940_s29  ;;  %s4938_s25 = int_to_ptr.vmem [resolvable:$true] %s2501_s25 }
 0x300   : > { %s2514_s2 = sshll.u32 %s549_s21, 4  ;;  %s4936_s8 = scalar_lea.hbm %s5029_s10, %s2818_s4  ;;  %s4946_s2 = int_to_ptr.vmem [resolvable:$true] %s2514_s2 }
 0x301   : > { %v2353_v12 = vrot.slane %v2352_v9, 4  ;;  %v2455_v54 = vadd.f32 %v2454_v48, %v2453_v47  ;;  %s5074_s0 = sld [smem:[#allocation38_spill]]  ;;  %s4950_s7 = scalar_lea.sflag [#allocation20], %s474_s6 }
 0x302   : > { %s3428_s24 = scalar_lea.vmem %s4938_s25, 16  ;;  %s3567_s30 = smov [#allocation19]  }
 0x303   : > { %v2354_v21 = vadd.f32 %v2353_v12, %v2352_v9  ;;  %v2456_v30 = vrot.slane %v2455_v54, 4  ;;  %p3429_p10 = scmp.ne.s32.totalorder %s4938_s25, %s3428_s24  ;;  %s3432_s26 = sshll.u32 %s3567_s30, 4  ;;  %s3433_s26 = int_to_ptr.vmem [resolvable:$false] %s3432_s26 }
 0x304   : > { %s3434_s28 = scalar_lea.vmem %s3433_s26, 32  ;;  %p3435_p0 = scmp.lt.s32.totalorder %s4938_s25, %s3433_s26 }
 0x305   : > { %v2355_v23 = vrot.slane %v2354_v21, 2  ;;  %v2457_v62 = vadd.f32 %v2456_v30, %v2455_v54  ;;  %p3430_p8 = pnand %p3429_p10, %p5073_p11  ;;  %p3436_p4 = scmp.lt.s32.totalorder %s3434_s28, %s3428_s24 }
 0x307   : > { %v2356_v27 = vadd.f32 %v2355_v23, %v2354_v21  ;;  %v2458_v39 = vrot.slane %v2457_v62, 2  ;;  %s4944_s1 = scalar_lea.hbm %s5074_s0, %s2818_s4  ;;  %p3431_p12 = pneg %p3430_p8 }
 0x308   : > { %p3437_p13 = por %p3436_p4, %p3435_p0 }
 0x309   : > { %v2357_v49 = vrot.slane %v2356_v27, 1  ;;  %v2459_v44 = vadd.f32 %v2458_v39, %v2457_v62 }
 0x30a   : > { %p3438_p1 = pnand %p3437_p13, %p3431_p12 }
 0x30b   : > { %v2460_v8 = vrot.slane %v2459_v44, 1  ;;  %v2358_v20 = vadd.f32 %v2357_v49, %v2356_v27 }
 0x30d   : > { %2360 = vst.msk [vmem:[%s543_s5] sm:$0x1] %vm2359_vm4, %v2358_v20  ;;  %v2461_v6 = vadd.f32 %v2460_v8, %v2459_v44 }
 0x30e   : > { %3441 = shalt.err (!%p3438_p1)
}
 0x30f   : > { %s3442_s23 = scalar_lea.hbm %s4936_s8, 16  ;;  %s3446_s5 = scalar_lea.hbm %s5029_s10, 32 }
 0x310   : > { %p3443_p3 = scmp.ne.s32.totalorder %s4936_s8, %s3442_s23  ;;  %p3447_p7 = scmp.lt.u32.totalorder %s4936_s8, %s5029_s10 }
 0x311   : > { %p3448_p5 = scmp.lt.u32.totalorder %s3446_s5, %s3442_s23  ;;  %p3450_p10 = scmp.lt.u32.totalorder %s3442_s23, %s4936_s8 }
 0x312   : > { %p3444_p2 = pnand %p3443_p3, %p5073_p11 }
 0x313   : > { %p3449_p9 = por %p3448_p5, %p3447_p7 }
 0x314   : > { %p3445_p6 = pneg %p3444_p2 }
 0x315   : > { %p3451_p8 = por %p3450_p10, %p3449_p9 }
 0x317   : > { %p3452_p12 = pnand %p3451_p8, %p3445_p6 }
 0x319   : > { %3455 = shalt.err (!%p3452_p12)
}
 0x31a   : > { %3024 = dma.vmem_to_hbm [thread:$0]  (%p5073_p11), %s4938_s25, 16, %s4936_s8, %s4950_s7   ;;  %2462 = vst.msk [vmem:[%s549_s21] sm:$0x1] %vm2359_vm4, %v2461_v6 }
 0x31b   : > { %s3456_s15 = scalar_lea.vmem %s4946_s2, 16  ;;  %s3568_s27 = smov [#allocation21]  }
 0x31c   : > { %p3457_p0 = scmp.ne.s32.totalorder %s4946_s2, %s3456_s15  ;;  %s3460_s24 = sshll.u32 %s3568_s27, 4  ;;  %s3461_s24 = int_to_ptr.vmem [resolvable:$false] %s3460_s24 }
 0x31d   : > { %s3462_s30 = scalar_lea.vmem %s3461_s24, 32  ;;  %p3463_p1 = scmp.lt.s32.totalorder %s4946_s2, %s3461_s24 }
 0x31e   : > { %p3458_p4 = pnand %p3457_p0, %p5073_p11  ;;  %p3464_p3 = scmp.lt.s32.totalorder %s3462_s30, %s3456_s15 }
 0x320   : > { %p3459_p13 = pneg %p3458_p4  ;;  %p3465_p2 = por %p3464_p3, %p3463_p1 }
 0x322   : > { %p3466_p6 = pnand %p3465_p2, %p3459_p13 }
 0x324   : > { %3469 = shalt.err (!%p3466_p6)
}
 0x325   : > { %s3470_s29 = scalar_lea.hbm %s4944_s1, 16  ;;  %s3474_s8 = scalar_lea.hbm %s5074_s0, 32 }
 0x326   : > { %p3471_p7 = scmp.ne.s32.totalorder %s4944_s1, %s3470_s29  ;;  %p3475_p10 = scmp.lt.u32.totalorder %s4944_s1, %s5074_s0 }
 0x327   : > { %p3476_p8 = scmp.lt.u32.totalorder %s3474_s8, %s3470_s29  ;;  %p3478_p0 = scmp.lt.u32.totalorder %s3470_s29, %s4944_s1 }
 0x328   : > { %p3472_p5 = pnand %p3471_p7, %p5073_p11 }
 0x329   : > { %p3477_p12 = por %p3476_p8, %p3475_p10 }
 0x32a   : > { %p3473_p9 = pneg %p3472_p5 }
 0x32b   : > { %p3479_p4 = por %p3478_p0, %p3477_p12 }
 0x32d   : > { %p3480_p13 = pnand %p3479_p4, %p3473_p9 }
 0x32f   : > { %3483 = shalt.err (!%p3480_p13)
}
 0x330   : > { %3025 = dma.vmem_to_hbm [thread:$0]  (%p5073_p11), %s4946_s2, 16, %s4944_s1, %s4950_s7  }
 0x331 PF: > { %s2526_s23 = sand.u32 1, %s3534_s17   ;;  %p5075_p1 = scmp.ne.s32.totalorder %s5058_s12, 0 }
 0x332   : > { %p5076_p3 = scmp.ge.s32.totalorder %s3546_s20, 2  ;;  %s2527_s6 = scalar_lea.sflag [#allocation5], %s2526_s23 }
 0x334   : > { %p3059_p2 = pnand %p5076_p3, %p5075_p1 }
 0x336   : > { %3525 = dma.done.wait (!%p3059_p2), %s2527_s6, 2048  }
 0x337   : > { %3527 = vsyncadd (!%p3059_p2), %s2527_s6, 4294965248  ;;  %s5077_s4 = sadd.s32 4294967294, %s3546_s20  }
 0x338   : > { %s2535_s5 = sand.u32 1, %s5077_s4  }
 0x339   : > { %s2536_s13 = scalar_lea.sflag [#allocation20], %s2535_s5 }
 0x33a   : > { %3529 = dma.done.wait (!%p3059_p2), %s2536_s13, 32  }
 0x33b   : > { %3531 = vsyncadd (!%p3059_p2), %s2536_s13, 4294967264  ;;  %p34_p11 = scmp.ge.s32.totalorder %s3826_s16, 4   ;;  %s5078_s17 = smov %s3538_s18 }
 0x33c   : > { %s5079_s18 = smov %s3542_s19  ;;  %s5080_s19 = smov %s3838_s11 }
 0x33d   : > { %s5081_s20 = smov %s3826_s16  ;;  %36 = sbr.rel (!%p34_p11) target bundleno = 22 (0x16), region = 184 }
 0x344   :  { %2548 = vsyncpa [#allocation4], 1 }
 0x345   :  { %2550 = vsyncpa [#allocation4 + $0x1], 1 }
 0x346   :  { %2551 = vsyncpa [#allocation7], 1 }
 0x347   :  { %2552 = vsyncpa [#allocation10], 1 }
 0x348   :  { %2554 = vsyncpa [#allocation10 + $0x1], 1 }
 0x349   :  { %2555 = vsyncpa [#allocation13], 1 }
 0x34a   :  { %2556 = vsyncpa [#allocation16], 1 }
 0x34b   :  { %2557 = vsyncpa [#allocation5], 1 }
 0x34c   :  { %2559 = vsyncpa [#allocation5 + $0x1], 1 }
 0x34d   :  { %2560 = vsyncpa [#allocation20], 1 }
 0x34e   :  { %2562 = vsyncpa [#allocation20 + $0x1], 1 }

</bundles_post_ra>
